<compile_context>
chip_gen: v7x
topology: tpu7x:2x2x1
jax: 0.10.0
libtpu: 0.0.40
codegen_flags: <defaults>
</compile_context>

<pallas_src>
import functools
import math

import jax
import jax.numpy as jnp
from jax.experimental import pallas as pl
from jax.experimental.pallas import tpu as pltpu


def _round_up(x, m):
    return (x + m - 1) // m * m


def _pick_batch_block(N, H, W):
    """Images per grid step: target ~512 output rows of work per step, but keep
    >= 2 grid steps so both TensorCores get work under 'parallel' semantics."""
    # TODO(synk): for batch-1 inference, split H across the grid (2-row halo)
    # instead, so the second TensorCore of a v7x chip is not idle.
    target = max(1, 512 // max(1, H * W))
    bt = 1
    for d in range(1, N + 1):
        if N % d == 0 and d <= target:
            bt = d
    if N >= 2 and N // bt < 2:
        for d in range(bt, 0, -1):
            if N % d == 0 and N // d >= 2:
                bt = d
                break
    return bt


def _pick_row_chunk(H, W):
    """Output rows per matmul chunk: keep M = Hc*W <= ~128 so the (M, Cp) f32
    accumulator stays register-resident instead of spilling to VMEM."""
    hc = 1
    for d in range(1, H + 1):
        if H % d == 0 and d * W <= 128:
            hc = d
    return hc


# ----------------------------- Pallas kernel -------------------------------

def _fused_block_kernel(x_ref, w1_ref, w2_ref, s1_ref, b1_ref, s2_ref, b2_ref,
                        out_ref, xpad_ref, mid_ref, *, Bt, H, W, C, Cp, Hc):
    """Fused conv3x3+bn1+relu -> conv3x3+bn2+residual+relu for Bt images.

    x_ref   : (Bt, H, W, C)       bf16  unpadded-channel NHWC input block
    w*_ref  : (3, 3, Cp, Cp)      bf16  HWIO weights (MTL scaling folded, padded)
    s*/b*   : (1, Cp)             f32   folded BN scale / bias (padded with 0)
    out_ref : (Bt, H, W, C)       bf16  unpadded-channel NHWC output block
    xpad_ref, mid_ref : (Bt, H+2, W+2, Cp) bf16 VMEM halo scratch.
    """
    nchunks = H // Hc
    s1, b1 = s1_ref[...], b1_ref[...]
    s2, b2 = s2_ref[...], b2_ref[...]

    # Hoisted zero strips for the 1-pixel halo ring (reused for every image).
    zrow = jnp.zeros((1, W + 2, Cp), jnp.bfloat16)
    zcol = jnp.zeros((H, 1, Cp), jnp.bfloat16)

    def conv_chunk(src_ref, w_ref, b, h0):
        # 3x3 conv for output rows [h0, h0+Hc): 9 MXU matmuls on *ref* slices
        # of the halo scratch (no whole-buffer load, no value-slice copies).
        # Accumulator initialized from the first tap's dot; dots chained.
        acc = None
        for kh in range(3):
            for kw in range(3):
                patch = src_ref[b, pl.ds(h0 + kh, Hc), kw:kw + W, :]
                d = jnp.dot(patch.reshape(Hc * W, Cp), w_ref[kh, kw],
                            preferred_element_type=jnp.float32)
                acc = d if acc is None else acc + d
        return acc                                        # (Hc*W, Cp) f32

    for b in range(Bt):
        # ---- intermediate halo scratch: zero ONLY the 1-pixel ring ---------
        # (its interior is fully overwritten by the conv1 chunk stores, and the
        #  padded output channels are exactly zero since their BN scale/bias=0)
        mid_ref[b, 0:1, :, :] = zrow
        mid_ref[b, H + 1:H + 2, :, :] = zrow
        mid_ref[b, 1:H + 1, 0:1, :] = zcol
        mid_ref[b, 1:H + 1, W + 1:W + 2, :] = zcol

        # ---- input halo scratch --------------------------------------------
        if Cp > C:
            # Input arrives with its real C channels only (no padded HBM DMA).
            # The channel-pad lanes [C, Cp) must be zero and are never written
            # elsewhere, so clear this (VMEM-only) buffer and drop the real
            # channels into the interior with a single lane-0 masked store.
            xpad_ref[b, :, :, :] = jnp.zeros((H + 2, W + 2, Cp), jnp.bfloat16)
            xpad_ref[b, 1:H + 1, 1:W + 1, 0:C] = x_ref[b, :, :, :]
        else:
            # Channel-padded end-to-end pipeline: ring-only zeroing.
            xpad_ref[b, 0:1, :, :] = zrow
            xpad_ref[b, H + 1:H + 2, :, :] = zrow
            xpad_ref[b, 1:H + 1, 0:1, :] = zcol
            xpad_ref[b, 1:H + 1, W + 1:W + 2, :] = zcol
            xpad_ref[b, 1:H + 1, 1:W + 1, :] = x_ref[b, :, :, :]

        # ---- conv1 -> bn1 -> relu (row-chunked; intermediate stays in VMEM) -
        def conv1_body(ci, carry):
            h0 = pl.multiple_of(ci * Hc, Hc)
            y = conv_chunk(xpad_ref, w1_ref, b, h0)
            y = jnp.maximum(y * s1 + b1, 0.0)             # pad out-chans stay 0
            mid_ref[b, pl.ds(h0 + 1, Hc), 1:W + 1, :] = (
                y.astype(jnp.bfloat16).reshape(Hc, W, Cp))
            return carry
        jax.lax.fori_loop(0, nchunks, conv1_body, None, unroll=True)

        # ---- conv2 -> bn2 -> +residual -> relu ------------------------------
        def conv2_body(ci, carry):
            h0 = pl.multiple_of(ci * Hc, Hc)
            y = conv_chunk(mid_ref, w2_ref, b, h0)
            y = (y * s2 + b2).reshape(Hc, W, Cp)[:, :, :C]
            res = x_ref[b, pl.ds(h0, Hc), :, :].astype(jnp.float32)
            y = jnp.maximum(y + res, 0.0)
            out_ref[b, pl.ds(h0, Hc), :, :] = y.astype(out_ref.dtype)
            return carry
        jax.lax.fori_loop(0, nchunks, conv2_body, None, unroll=True)


# ------------------------------ JAX wrapper ---------------------------------

def _vmem_limit_bytes(Bt, H, W, C, Cp):
    blk_in = Bt * H * W * C * 2                 # bf16 input block
    blk_out = Bt * H * W * C * 2                # bf16 output block
    wts = 9 * Cp * Cp * 2                       # one bf16 weight tensor
    sb = 4 * Cp * 4                             # BN scale/bias
    halo = Bt * (H + 2) * (W + 2) * Cp * 2      # one bf16 halo scratch
    need = 2 * (blk_in + blk_out) + 2 * 2 * wts + 2 * sb + 2 * halo
    need = int(need * 1.25) + (2 << 20)         # compiler-temporary headroom
    # Cap well below v7x's 64 MiB physical VMEM per TensorCore.
    return max(16 << 20, min(need, 48 << 20))


def _fold_bn(gamma, beta, mean, var, cp, eps=1e-5):
    scale = gamma / jnp.sqrt(var + eps)
    bias = beta - mean * scale
    scale = jnp.pad(scale, (0, cp - scale.shape[0]))
    bias = jnp.pad(bias, (0, cp - bias.shape[0]))
    return (scale.reshape(1, cp).astype(jnp.float32),
            bias.reshape(1, cp).astype(jnp.float32))


def _prep_weight(w_oihw, mtl_w, mtl, cp):
    if mtl:
        w_oihw = w_oihw * mtl_w                   # Conv2dMtl weight scaling
    cout, cin = w_oihw.shape[0], w_oihw.shape[1]
    w = jnp.transpose(w_oihw, (2, 3, 1, 0))       # OIHW -> HWIO
    w = jnp.pad(w, ((0, 0), (0, 0), (0, cp - cin), (0, cp - cout)))
    return w.astype(jnp.bfloat16)


def basic_block_mtl_forward(x_nchw, params):
    """BasicBlockMTL.forward (stride=1, downsample=None, inplanes == planes)."""
    N, C, H, W = x_nchw.shape
    planes = params["w1"].shape[0]
    assert params["w1"].shape[1] == C and planes == C, (
        "residual path requires inplanes == planes (downsample=None)")

    Cp = _round_up(C, 128)
    Bt = _pick_batch_block(N, H, W)
    Hc = _pick_row_chunk(H, W)

    # NCHW f32 -> NHWC bf16 (single fused transpose+convert).  In a full
    # ResNet-12 stack keep activations NHWC bf16 end-to-end so this vanishes.
    x = jnp.transpose(x_nchw, (0, 2, 3, 1)).astype(jnp.bfloat16)

    w1 = _prep_weight(params["w1"], params["mtl_w1"], params["MTL"], Cp)
    w2 = _prep_weight(params["w2"], params["mtl_w2"], params["MTL"], Cp)
    s1, b1 = _fold_bn(params["bn1_gamma"], params["bn1_beta"],
                      params["bn1_mean"], params["bn1_var"], Cp)
    s2, b2 = _fold_bn(params["bn2_gamma"], params["bn2_beta"],
                      params["bn2_mean"], params["bn2_var"], Cp)

    kern = functools.partial(_fused_block_kernel,
                             Bt=Bt, H=H, W=W, C=C, Cp=Cp, Hc=Hc)
    const4 = lambda n: (0, 0, 0, 0)
    const2 = lambda n: (0, 0)

    out = pl.pallas_call(
        kern,
        out_shape=jax.ShapeDtypeStruct((N, H, W, C), jnp.bfloat16),
        grid_spec=pltpu.PrefetchScalarGridSpec(
            num_scalar_prefetch=0,
            grid=(N // Bt,),
            in_specs=[
                pl.BlockSpec((Bt, H, W, C), lambda n: (n, 0, 0, 0)),   # x
                pl.BlockSpec((3, 3, Cp, Cp), const4),                  # w1
                pl.BlockSpec((3, 3, Cp, Cp), const4),                  # w2
                pl.BlockSpec((1, Cp), const2),                         # bn1 scale
                pl.BlockSpec((1, Cp), const2),                         # bn1 bias
                pl.BlockSpec((1, Cp), const2),                         # bn2 scale
                pl.BlockSpec((1, Cp), const2),                         # bn2 bias
            ],
            out_specs=pl.BlockSpec((Bt, H, W, C), lambda n: (n, 0, 0, 0)),
            scratch_shapes=[
                pltpu.VMEM((Bt, H + 2, W + 2, Cp), jnp.bfloat16),  # padded input
                pltpu.VMEM((Bt, H + 2, W + 2, Cp), jnp.bfloat16),  # padded mid act
            ],
        ),
        compiler_params=pltpu.CompilerParams(
            dimension_semantics=("parallel",),
            vmem_limit_bytes=_vmem_limit_bytes(Bt, H, W, C, Cp),
        ),
    )(x, w1, w2, s1, b1, s2, b2)

    return jnp.transpose(out, (0, 3, 1, 2)).astype(jnp.float32)   # NHWC -> NCHW


# ------------------------- params / reference / test ------------------------

def init_params(key, inplanes, planes, MTL=False):
    """Deterministic parameter init mirroring _ConvNdMtl.reset_parameters / BN."""
    ks = jax.random.split(key, 10)
    stdv1 = 1.0 / math.sqrt(inplanes * 3 * 3)
    stdv2 = 1.0 / math.sqrt(planes * 3 * 3)
    return dict(
        MTL=MTL,
        w1=jax.random.uniform(ks[0], (planes, inplanes, 3, 3), jnp.float32,
                              -stdv1, stdv1),
        mtl_w1=jnp.ones((planes, inplanes, 1, 1), jnp.float32),
        w2=jax.random.uniform(ks[1], (planes, planes, 3, 3), jnp.float32,
                              -stdv2, stdv2),
        mtl_w2=jnp.ones((planes, planes, 1, 1), jnp.float32),
        bn1_gamma=jax.random.uniform(ks[2], (planes,), jnp.float32, 0.5, 1.5),
        bn1_beta=jax.random.uniform(ks[3], (planes,), jnp.float32, -0.1, 0.1),
        bn1_mean=jax.random.uniform(ks[4], (planes,), jnp.float32, -0.1, 0.1),
        bn1_var=jax.random.uniform(ks[5], (planes,), jnp.float32, 0.5, 1.5),
        bn2_gamma=jax.random.uniform(ks[6], (planes,), jnp.float32, 0.5, 1.5),
        bn2_beta=jax.random.uniform(ks[7], (planes,), jnp.float32, -0.1, 0.1),
        bn2_mean=jax.random.uniform(ks[8], (planes,), jnp.float32, -0.1, 0.1),
        bn2_var=jax.random.uniform(ks[9], (planes,), jnp.float32, 0.5, 1.5),
    )


def _reference_forward(x_nchw, params, eps=1e-5):
    """Pure-JAX (XLA) reference of BasicBlockMTL.forward for validation."""
    w1, w2 = params["w1"], params["w2"]
    if params["MTL"]:
        w1 = w1 * params["mtl_w1"]
        w2 = w2 * params["mtl_w2"]

    def conv(x, w):
        return jax.lax.conv_general_dilated(
            x, w, window_strides=(1, 1), padding=((1, 1), (1, 1)),
            dimension_numbers=("NCHW", "OIHW", "NCHW"),
            precision=jax.lax.Precision.HIGHEST)

    def bn(x, g, b, m, v):
        sh = (1, -1, 1, 1)
        return ((x - m.reshape(sh)) / jnp.sqrt(v.reshape(sh) + eps)
                * g.reshape(sh) + b.reshape(sh))

    out = jax.nn.relu(bn(conv(x_nchw, w1), params["bn1_gamma"],
                         params["bn1_beta"], params["bn1_mean"],
                         params["bn1_var"]))
    out = bn(conv(out, w2), params["bn2_gamma"], params["bn2_beta"],
             params["bn2_mean"], params["bn2_var"])
    return jax.nn.relu(out + x_nchw)


if __name__ == "__main__":
    key = jax.random.PRNGKey(0)
    kx, kp = jax.random.split(key)

    N, C, H, W = 2, 8, 16, 16     # inplanes = planes = 8, stride = 1
    planes = 8

    x = jax.random.normal(kx, (N, C, H, W), jnp.float32)
    params = init_params(kp, C, planes, MTL=False)

    out = jax.block_until_ready(basic_block_mtl_forward(x, params))

    assert out.shape == (N, planes, H, W), out.shape
    assert bool(jnp.all(out >= 0.0))            # final ReLU
    assert bool(jnp.all(jnp.isfinite(out)))

    ref = jax.block_until_ready(_reference_forward(x, params))
    max_err = float(jnp.max(jnp.abs(out - ref)))
    # bf16 weights/activations (including the bf16 output block) vs an f32
    # HIGHEST-precision reference -> a few percent absolute/relative error.
    assert bool(jnp.allclose(out, ref, atol=7.5e-2, rtol=5e-2)), max_err

    print("KERNEL_OK")
</pallas_src>

<mosaic_0001>
module attributes {stable_mosaic.version = 11 : i64} {
  func.func @_fused_block_kernel(%arg0: i32, %arg1: memref<1x16x16x8xbf16, #tpu.memory_space<vmem>>, %arg2: memref<3x3x128x128xbf16, #tpu.memory_space<vmem>>, %arg3: memref<3x3x128x128xbf16, #tpu.memory_space<vmem>>, %arg4: memref<1x128xf32, #tpu.memory_space<vmem>>, %arg5: memref<1x128xf32, #tpu.memory_space<vmem>>, %arg6: memref<1x128xf32, #tpu.memory_space<vmem>>, %arg7: memref<1x128xf32, #tpu.memory_space<vmem>>, %arg8: memref<1x16x16x8xbf16, #tpu.memory_space<vmem>>, %arg9: memref<1x18x18x128xbf16, #tpu.memory_space<vmem>>, %arg10: memref<1x18x18x128xbf16, #tpu.memory_space<vmem>>) attributes {dimension_semantics = [#tpu.dimension_semantics<parallel>], iteration_bounds = array<i64: 2>, scalar_prefetch = 0 : i64, scratch_operands = 2 : i64, tpu.core_type = #tpu.core_type<tc>, window_params = [{transform_indices = @transform_0, window_bounds = array<i64: 1, 16, 16, 8>}, {pipeline_mode = #tpu.pipeline_mode<synchronous>, transform_indices = @transform_1, window_bounds = array<i64: 3, 3, 128, 128>}, {pipeline_mode = #tpu.pipeline_mode<synchronous>, transform_indices = @transform_2, window_bounds = array<i64: 3, 3, 128, 128>}, {pipeline_mode = #tpu.pipeline_mode<synchronous>, transform_indices = @transform_3, window_bounds = array<i64: 1, 128>}, {pipeline_mode = #tpu.pipeline_mode<synchronous>, transform_indices = @transform_4, window_bounds = array<i64: 1, 128>}, {pipeline_mode = #tpu.pipeline_mode<synchronous>, transform_indices = @transform_5, window_bounds = array<i64: 1, 128>}, {pipeline_mode = #tpu.pipeline_mode<synchronous>, transform_indices = @transform_6, window_bounds = array<i64: 1, 128>}, {transform_indices = @transform_7, window_bounds = array<i64: 1, 16, 16, 8>}]} {
    %c0 = arith.constant 0 : index
    %c0_0 = arith.constant 0 : index
    %0 = vector.load %arg4[%c0, %c0_0] : memref<1x128xf32, #tpu.memory_space<vmem>>, vector<1x128xf32>
    %c0_1 = arith.constant 0 : index
    %c0_2 = arith.constant 0 : index
    %1 = vector.load %arg5[%c0_1, %c0_2] : memref<1x128xf32, #tpu.memory_space<vmem>>, vector<1x128xf32>
    %c0_3 = arith.constant 0 : index
    %c0_4 = arith.constant 0 : index
    %2 = vector.load %arg6[%c0_3, %c0_4] : memref<1x128xf32, #tpu.memory_space<vmem>>, vector<1x128xf32>
    %c0_5 = arith.constant 0 : index
    %c0_6 = arith.constant 0 : index
    %3 = vector.load %arg7[%c0_5, %c0_6] : memref<1x128xf32, #tpu.memory_space<vmem>>, vector<1x128xf32>
    %cst = arith.constant 0.000000e+00 : bf16
    %4 = vector.broadcast %cst : bf16 to vector<1x18x128xbf16>
    %cst_7 = arith.constant 0.000000e+00 : bf16
    %5 = vector.broadcast %cst_7 : bf16 to vector<16x1x128xbf16>
    %c0_8 = arith.constant 0 : index
    %c0_9 = arith.constant 0 : index
    %c0_10 = arith.constant 0 : index
    %c0_11 = arith.constant 0 : index
    %6 = vector.load %arg10[%c0_8, %c0_9, %c0_10, %c0_11] : memref<1x18x18x128xbf16, #tpu.memory_space<vmem>>, vector<1x1x18x128xbf16>
    %7 = vector.shape_cast %6 : vector<1x1x18x128xbf16> to vector<1x18x128xbf16>
    %8 = vector.shape_cast %4 : vector<1x18x128xbf16> to vector<1x1x18x128xbf16>
    tpu.vector_store %arg10[%c0_8, %c0_9, %c0_10, %c0_11], %8 {strides = array<i32>} : memref<1x18x18x128xbf16, #tpu.memory_space<vmem>>, vector<1x1x18x128xbf16>,
    %c0_12 = arith.constant 0 : index
    %c17 = arith.constant 17 : index
    %c0_13 = arith.constant 0 : index
    %c0_14 = arith.constant 0 : index
    %9 = vector.load %arg10[%c0_12, %c17, %c0_13, %c0_14] : memref<1x18x18x128xbf16, #tpu.memory_space<vmem>>, vector<1x1x18x128xbf16>
    %10 = vector.shape_cast %9 : vector<1x1x18x128xbf16> to vector<1x18x128xbf16>
    %11 = vector.shape_cast %4 : vector<1x18x128xbf16> to vector<1x1x18x128xbf16>
    tpu.vector_store %arg10[%c0_12, %c17, %c0_13, %c0_14], %11 {strides = array<i32>} : memref<1x18x18x128xbf16, #tpu.memory_space<vmem>>, vector<1x1x18x128xbf16>,
    %c0_15 = arith.constant 0 : index
    %c1 = arith.constant 1 : index
    %c0_16 = arith.constant 0 : index
    %c0_17 = arith.constant 0 : index
    %12 = vector.load %arg10[%c0_15, %c1, %c0_16, %c0_17] : memref<1x18x18x128xbf16, #tpu.memory_space<vmem>>, vector<1x16x1x128xbf16>
    %13 = vector.shape_cast %12 : vector<1x16x1x128xbf16> to vector<16x1x128xbf16>
    %14 = vector.shape_cast %5 : vector<16x1x128xbf16> to vector<1x16x1x128xbf16>
    tpu.vector_store %arg10[%c0_15, %c1, %c0_16, %c0_17], %14 {strides = array<i32>} : memref<1x18x18x128xbf16, #tpu.memory_space<vmem>>, vector<1x16x1x128xbf16>,
    %c0_18 = arith.constant 0 : index
    %c1_19 = arith.constant 1 : index
    %c17_20 = arith.constant 17 : index
    %c0_21 = arith.constant 0 : index
    %15 = vector.load %arg10[%c0_18, %c1_19, %c17_20, %c0_21] : memref<1x18x18x128xbf16, #tpu.memory_space<vmem>>, vector<1x16x1x128xbf16>
    %16 = vector.shape_cast %15 : vector<1x16x1x128xbf16> to vector<16x1x128xbf16>
    %17 = vector.shape_cast %5 : vector<16x1x128xbf16> to vector<1x16x1x128xbf16>
    tpu.vector_store %arg10[%c0_18, %c1_19, %c17_20, %c0_21], %17 {strides = array<i32>} : memref<1x18x18x128xbf16, #tpu.memory_space<vmem>>, vector<1x16x1x128xbf16>,
    %cst_22 = arith.constant 0.000000e+00 : bf16
    %18 = vector.broadcast %cst_22 : bf16 to vector<18x18x128xbf16>
    %c0_23 = arith.constant 0 : index
    %c0_24 = arith.constant 0 : index
    %c0_25 = arith.constant 0 : index
    %c0_26 = arith.constant 0 : index
    %19 = vector.load %arg9[%c0_23, %c0_24, %c0_25, %c0_26] : memref<1x18x18x128xbf16, #tpu.memory_space<vmem>>, vector<1x18x18x128xbf16>
    %20 = vector.shape_cast %19 : vector<1x18x18x128xbf16> to vector<18x18x128xbf16>
    %21 = vector.shape_cast %18 : vector<18x18x128xbf16> to vector<1x18x18x128xbf16>
    tpu.vector_store %arg9[%c0_23, %c0_24, %c0_25, %c0_26], %21 {strides = array<i32>} : memref<1x18x18x128xbf16, #tpu.memory_space<vmem>>, vector<1x18x18x128xbf16>,
    %c0_27 = arith.constant 0 : index
    %c0_28 = arith.constant 0 : index
    %c0_29 = arith.constant 0 : index
    %c0_30 = arith.constant 0 : index
    %22 = vector.load %arg1[%c0_27, %c0_28, %c0_29, %c0_30] : memref<1x16x16x8xbf16, #tpu.memory_space<vmem>>, vector<1x16x16x8xbf16>
    %23 = vector.shape_cast %22 : vector<1x16x16x8xbf16> to vector<16x16x8xbf16>
    %c0_31 = arith.constant 0 : index
    %c1_32 = arith.constant 1 : index
    %c1_33 = arith.constant 1 : index
    %c0_34 = arith.constant 0 : index
    %24 = vector.load %arg9[%c0_31, %c1_32, %c1_33, %c0_34] : memref<1x18x18x128xbf16, #tpu.memory_space<vmem>>, vector<1x16x16x8xbf16>
    %25 = vector.shape_cast %24 : vector<1x16x16x8xbf16> to vector<16x16x8xbf16>
    %26 = vector.shape_cast %23 : vector<16x16x8xbf16> to vector<1x16x16x8xbf16>
    tpu.vector_store %arg9[%c0_31, %c1_32, %c1_33, %c0_34], %26 {strides = array<i32>} : memref<1x18x18x128xbf16, #tpu.memory_space<vmem>>, vector<1x16x16x8xbf16>,
    %c0_i32 = arith.constant 0 : i32
    %c8_i32 = arith.constant 8 : i32
    %27 = arith.muli %c0_i32, %c8_i32 : i32
    %28 = tpu.assume_multiple %27, 8 : i32
    %c0_i32_35 = arith.constant 0 : i32
    %29 = arith.addi %28, %c0_i32_35 : i32
    %c0_36 = arith.constant 0 : index
    %30 = arith.index_cast %29 : i32 to index
    %c0_37 = arith.constant 0 : index
    %c0_38 = arith.constant 0 : index
    %31 = vector.load %arg9[%c0_36, %30, %c0_37, %c0_38] : memref<1x18x18x128xbf16, #tpu.memory_space<vmem>>, vector<1x8x16x128xbf16>
    %32 = vector.shape_cast %31 : vector<1x8x16x128xbf16> to vector<8x16x128xbf16>
    %33 = vector.shape_cast %32 : vector<8x16x128xbf16> to vector<128x128xbf16>
    %c0_39 = arith.constant 0 : index
    %c0_40 = arith.constant 0 : index
    %c0_41 = arith.constant 0 : index
    %c0_42 = arith.constant 0 : index
    %34 = vector.load %arg2[%c0_39, %c0_40, %c0_41, %c0_42] : memref<3x3x128x128xbf16, #tpu.memory_space<vmem>>, vector<1x1x128x128xbf16>
    %35 = vector.shape_cast %34 : vector<1x1x128x128xbf16> to vector<128x128xbf16>
    %cst_43 = arith.constant dense<0.000000e+00> : vector<128x128xf32>
    %36 = tpu.matmul %33, %35, %cst_43 {dimension_numbers = #tpu.dot_dimension_numbers<[1], [0], [0], [1], [0, 0, 1, 1], [], []>} : vector<128x128xbf16>, vector<128x128xbf16>, vector<128x128xf32> -> vector<128x128xf32>
    %c0_i32_44 = arith.constant 0 : i32
    %37 = arith.addi %28, %c0_i32_44 : i32
    %c0_45 = arith.constant 0 : index
    %38 = arith.index_cast %37 : i32 to index
    %c1_46 = arith.constant 1 : index
    %c0_47 = arith.constant 0 : index
    %39 = vector.load %arg9[%c0_45, %38, %c1_46, %c0_47] : memref<1x18x18x128xbf16, #tpu.memory_space<vmem>>, vector<1x8x16x128xbf16>
    %40 = vector.shape_cast %39 : vector<1x8x16x128xbf16> to vector<8x16x128xbf16>
    %41 = vector.shape_cast %40 : vector<8x16x128xbf16> to vector<128x128xbf16>
    %c0_48 = arith.constant 0 : index
    %c1_49 = arith.constant 1 : index
    %c0_50 = arith.constant 0 : index
    %c0_51 = arith.constant 0 : index
    %42 = vector.load %arg2[%c0_48, %c1_49, %c0_50, %c0_51] : memref<3x3x128x128xbf16, #tpu.memory_space<vmem>>, vector<1x1x128x128xbf16>
    %43 = vector.shape_cast %42 : vector<1x1x128x128xbf16> to vector<128x128xbf16>
    %cst_52 = arith.constant dense<0.000000e+00> : vector<128x128xf32>
    %44 = tpu.matmul %41, %43, %cst_52 {dimension_numbers = #tpu.dot_dimension_numbers<[1], [0], [0], [1], [0, 0, 1, 1], [], []>} : vector<128x128xbf16>, vector<128x128xbf16>, vector<128x128xf32> -> vector<128x128xf32>
    %45 = arith.addf %36, %44 : vector<128x128xf32>
    %c0_i32_53 = arith.constant 0 : i32
    %46 = arith.addi %28, %c0_i32_53 : i32
    %c0_54 = arith.constant 0 : index
    %47 = arith.index_cast %46 : i32 to index
    %c2 = arith.constant 2 : index
    %c0_55 = arith.constant 0 : index
    %48 = vector.load %arg9[%c0_54, %47, %c2, %c0_55] : memref<1x18x18x128xbf16, #tpu.memory_space<vmem>>, vector<1x8x16x128xbf16>
    %49 = vector.shape_cast %48 : vector<1x8x16x128xbf16> to vector<8x16x128xbf16>
    %50 = vector.shape_cast %49 : vector<8x16x128xbf16> to vector<128x128xbf16>
    %c0_56 = arith.constant 0 : index
    %c2_57 = arith.constant 2 : index
    %c0_58 = arith.constant 0 : index
    %c0_59 = arith.constant 0 : index
    %51 = vector.load %arg2[%c0_56, %c2_57, %c0_58, %c0_59] : memref<3x3x128x128xbf16, #tpu.memory_space<vmem>>, vector<1x1x128x128xbf16>
    %52 = vector.shape_cast %51 : vector<1x1x128x128xbf16> to vector<128x128xbf16>
    %cst_60 = arith.constant dense<0.000000e+00> : vector<128x128xf32>
    %53 = tpu.matmul %50, %52, %cst_60 {dimension_numbers = #tpu.dot_dimension_numbers<[1], [0], [0], [1], [0, 0, 1, 1], [], []>} : vector<128x128xbf16>, vector<128x128xbf16>, vector<128x128xf32> -> vector<128x128xf32>
    %54 = arith.addf %45, %53 : vector<128x128xf32>
    %c1_i32 = arith.constant 1 : i32
    %55 = arith.addi %28, %c1_i32 : i32
    %c0_61 = arith.constant 0 : index
    %56 = arith.index_cast %55 : i32 to index
    %c0_62 = arith.constant 0 : index
    %c0_63 = arith.constant 0 : index
    %57 = vector.load %arg9[%c0_61, %56, %c0_62, %c0_63] : memref<1x18x18x128xbf16, #tpu.memory_space<vmem>>, vector<1x8x16x128xbf16>
    %58 = vector.shape_cast %57 : vector<1x8x16x128xbf16> to vector<8x16x128xbf16>
    %59 = vector.shape_cast %58 : vector<8x16x128xbf16> to vector<128x128xbf16>
    %c1_64 = arith.constant 1 : index
    %c0_65 = arith.constant 0 : index
    %c0_66 = arith.constant 0 : index
    %c0_67 = arith.constant 0 : index
    %60 = vector.load %arg2[%c1_64, %c0_65, %c0_66, %c0_67] : memref<3x3x128x128xbf16, #tpu.memory_space<vmem>>, vector<1x1x128x128xbf16>
    %61 = vector.shape_cast %60 : vector<1x1x128x128xbf16> to vector<128x128xbf16>
    %cst_68 = arith.constant dense<0.000000e+00> : vector<128x128xf32>
    %62 = tpu.matmul %59, %61, %cst_68 {dimension_numbers = #tpu.dot_dimension_numbers<[1], [0], [0], [1], [0, 0, 1, 1], [], []>} : vector<128x128xbf16>, vector<128x128xbf16>, vector<128x128xf32> -> vector<128x128xf32>
    %63 = arith.addf %54, %62 : vector<128x128xf32>
    %c1_i32_69 = arith.constant 1 : i32
    %64 = arith.addi %28, %c1_i32_69 : i32
    %c0_70 = arith.constant 0 : index
    %65 = arith.index_cast %64 : i32 to index
    %c1_71 = arith.constant 1 : index
    %c0_72 = arith.constant 0 : index
    %66 = vector.load %arg9[%c0_70, %65, %c1_71, %c0_72] : memref<1x18x18x128xbf16, #tpu.memory_space<vmem>>, vector<1x8x16x128xbf16>
    %67 = vector.shape_cast %66 : vector<1x8x16x128xbf16> to vector<8x16x128xbf16>
    %68 = vector.shape_cast %67 : vector<8x16x128xbf16> to vector<128x128xbf16>
    %c1_73 = arith.constant 1 : index
    %c1_74 = arith.constant 1 : index
    %c0_75 = arith.constant 0 : index
    %c0_76 = arith.constant 0 : index
    %69 = vector.load %arg2[%c1_73, %c1_74, %c0_75, %c0_76] : memref<3x3x128x128xbf16, #tpu.memory_space<vmem>>, vector<1x1x128x128xbf16>
    %70 = vector.shape_cast %69 : vector<1x1x128x128xbf16> to vector<128x128xbf16>
    %cst_77 = arith.constant dense<0.000000e+00> : vector<128x128xf32>
    %71 = tpu.matmul %68, %70, %cst_77 {dimension_numbers = #tpu.dot_dimension_numbers<[1], [0], [0], [1], [0, 0, 1, 1], [], []>} : vector<128x128xbf16>, vector<128x128xbf16>, vector<128x128xf32> -> vector<128x128xf32>
    %72 = arith.addf %63, %71 : vector<128x128xf32>
    %c1_i32_78 = arith.constant 1 : i32
    %73 = arith.addi %28, %c1_i32_78 : i32
    %c0_79 = arith.constant 0 : index
    %74 = arith.index_cast %73 : i32 to index
    %c2_80 = arith.constant 2 : index
    %c0_81 = arith.constant 0 : index
    %75 = vector.load %arg9[%c0_79, %74, %c2_80, %c0_81] : memref<1x18x18x128xbf16, #tpu.memory_space<vmem>>, vector<1x8x16x128xbf16>
    %76 = vector.shape_cast %75 : vector<1x8x16x128xbf16> to vector<8x16x128xbf16>
    %77 = vector.shape_cast %76 : vector<8x16x128xbf16> to vector<128x128xbf16>
    %c1_82 = arith.constant 1 : index
    %c2_83 = arith.constant 2 : index
    %c0_84 = arith.constant 0 : index
    %c0_85 = arith.constant 0 : index
    %78 = vector.load %arg2[%c1_82, %c2_83, %c0_84, %c0_85] : memref<3x3x128x128xbf16, #tpu.memory_space<vmem>>, vector<1x1x128x128xbf16>
    %79 = vector.shape_cast %78 : vector<1x1x128x128xbf16> to vector<128x128xbf16>
    %cst_86 = arith.constant dense<0.000000e+00> : vector<128x128xf32>
    %80 = tpu.matmul %77, %79, %cst_86 {dimension_numbers = #tpu.dot_dimension_numbers<[1], [0], [0], [1], [0, 0, 1, 1], [], []>} : vector<128x128xbf16>, vector<128x128xbf16>, vector<128x128xf32> -> vector<128x128xf32>
    %81 = arith.addf %72, %80 : vector<128x128xf32>
    %c2_i32 = arith.constant 2 : i32
    %82 = arith.addi %28, %c2_i32 : i32
    %c0_87 = arith.constant 0 : index
    %83 = arith.index_cast %82 : i32 to index
    %c0_88 = arith.constant 0 : index
    %c0_89 = arith.constant 0 : index
    %84 = vector.load %arg9[%c0_87, %83, %c0_88, %c0_89] : memref<1x18x18x128xbf16, #tpu.memory_space<vmem>>, vector<1x8x16x128xbf16>
    %85 = vector.shape_cast %84 : vector<1x8x16x128xbf16> to vector<8x16x128xbf16>
    %86 = vector.shape_cast %85 : vector<8x16x128xbf16> to vector<128x128xbf16>
    %c2_90 = arith.constant 2 : index
    %c0_91 = arith.constant 0 : index
    %c0_92 = arith.constant 0 : index
    %c0_93 = arith.constant 0 : index
    %87 = vector.load %arg2[%c2_90, %c0_91, %c0_92, %c0_93] : memref<3x3x128x128xbf16, #tpu.memory_space<vmem>>, vector<1x1x128x128xbf16>
    %88 = vector.shape_cast %87 : vector<1x1x128x128xbf16> to vector<128x128xbf16>
    %cst_94 = arith.constant dense<0.000000e+00> : vector<128x128xf32>
    %89 = tpu.matmul %86, %88, %cst_94 {dimension_numbers = #tpu.dot_dimension_numbers<[1], [0], [0], [1], [0, 0, 1, 1], [], []>} : vector<128x128xbf16>, vector<128x128xbf16>, vector<128x128xf32> -> vector<128x128xf32>
    %90 = arith.addf %81, %89 : vector<128x128xf32>
    %c2_i32_95 = arith.constant 2 : i32
    %91 = arith.addi %28, %c2_i32_95 : i32
    %c0_96 = arith.constant 0 : index
    %92 = arith.index_cast %91 : i32 to index
    %c1_97 = arith.constant 1 : index
    %c0_98 = arith.constant 0 : index
    %93 = vector.load %arg9[%c0_96, %92, %c1_97, %c0_98] : memref<1x18x18x128xbf16, #tpu.memory_space<vmem>>, vector<1x8x16x128xbf16>
    %94 = vector.shape_cast %93 : vector<1x8x16x128xbf16> to vector<8x16x128xbf16>
    %95 = vector.shape_cast %94 : vector<8x16x128xbf16> to vector<128x128xbf16>
    %c2_99 = arith.constant 2 : index
    %c1_100 = arith.constant 1 : index
    %c0_101 = arith.constant 0 : index
    %c0_102 = arith.constant 0 : index
    %96 = vector.load %arg2[%c2_99, %c1_100, %c0_101, %c0_102] : memref<3x3x128x128xbf16, #tpu.memory_space<vmem>>, vector<1x1x128x128xbf16>
    %97 = vector.shape_cast %96 : vector<1x1x128x128xbf16> to vector<128x128xbf16>
    %cst_103 = arith.constant dense<0.000000e+00> : vector<128x128xf32>
    %98 = tpu.matmul %95, %97, %cst_103 {dimension_numbers = #tpu.dot_dimension_numbers<[1], [0], [0], [1], [0, 0, 1, 1], [], []>} : vector<128x128xbf16>, vector<128x128xbf16>, vector<128x128xf32> -> vector<128x128xf32>
    %99 = arith.addf %90, %98 : vector<128x128xf32>
    %c2_i32_104 = arith.constant 2 : i32
    %100 = arith.addi %28, %c2_i32_104 : i32
    %c0_105 = arith.constant 0 : index
    %101 = arith.index_cast %100 : i32 to index
    %c2_106 = arith.constant 2 : index
    %c0_107 = arith.constant 0 : index
    %102 = vector.load %arg9[%c0_105, %101, %c2_106, %c0_107] : memref<1x18x18x128xbf16, #tpu.memory_space<vmem>>, vector<1x8x16x128xbf16>
    %103 = vector.shape_cast %102 : vector<1x8x16x128xbf16> to vector<8x16x128xbf16>
    %104 = vector.shape_cast %103 : vector<8x16x128xbf16> to vector<128x128xbf16>
    %c2_108 = arith.constant 2 : index
    %c2_109 = arith.constant 2 : index
    %c0_110 = arith.constant 0 : index
    %c0_111 = arith.constant 0 : index
    %105 = vector.load %arg2[%c2_108, %c2_109, %c0_110, %c0_111] : memref<3x3x128x128xbf16, #tpu.memory_space<vmem>>, vector<1x1x128x128xbf16>
    %106 = vector.shape_cast %105 : vector<1x1x128x128xbf16> to vector<128x128xbf16>
    %cst_112 = arith.constant dense<0.000000e+00> : vector<128x128xf32>
    %107 = tpu.matmul %104, %106, %cst_112 {dimension_numbers = #tpu.dot_dimension_numbers<[1], [0], [0], [1], [0, 0, 1, 1], [], []>} : vector<128x128xbf16>, vector<128x128xbf16>, vector<128x128xf32> -> vector<128x128xf32>
    %108 = arith.addf %99, %107 : vector<128x128xf32>
    %109 = vector.broadcast %0 : vector<1x128xf32> to vector<128x128xf32>
    %110 = arith.mulf %108, %109 : vector<128x128xf32>
    %111 = vector.broadcast %1 : vector<1x128xf32> to vector<128x128xf32>
    %112 = arith.addf %110, %111 : vector<128x128xf32>
    %cst_113 = arith.constant 0.000000e+00 : f32
    %113 = vector.broadcast %cst_113 : f32 to vector<128x128xf32>
    %114 = arith.maximumf %112, %113 : vector<128x128xf32>
    %115 = arith.truncf %114 : vector<128x128xf32> to vector<128x128xbf16>
    %116 = vector.shape_cast %115 : vector<128x128xbf16> to vector<8x16x128xbf16>
    %c1_i32_114 = arith.constant 1 : i32
    %117 = arith.addi %28, %c1_i32_114 : i32
    %c0_115 = arith.constant 0 : index
    %118 = arith.index_cast %117 : i32 to index
    %c1_116 = arith.constant 1 : index
    %c0_117 = arith.constant 0 : index
    %119 = vector.load %arg10[%c0_115, %118, %c1_116, %c0_117] : memref<1x18x18x128xbf16, #tpu.memory_space<vmem>>, vector<1x8x16x128xbf16>
    %120 = vector.shape_cast %119 : vector<1x8x16x128xbf16> to vector<8x16x128xbf16>
    %121 = vector.shape_cast %116 : vector<8x16x128xbf16> to vector<1x8x16x128xbf16>
    tpu.vector_store %arg10[%c0_115, %118, %c1_116, %c0_117], %121 {strides = array<i32>} : memref<1x18x18x128xbf16, #tpu.memory_space<vmem>>, vector<1x8x16x128xbf16>,
    %c1_i32_118 = arith.constant 1 : i32
    %c8_i32_119 = arith.constant 8 : i32
    %122 = arith.muli %c1_i32_118, %c8_i32_119 : i32
    %123 = tpu.assume_multiple %122, 8 : i32
    %c0_i32_120 = arith.constant 0 : i32
    %124 = arith.addi %123, %c0_i32_120 : i32
    %c0_121 = arith.constant 0 : index
    %125 = arith.index_cast %124 : i32 to index
    %c0_122 = arith.constant 0 : index
    %c0_123 = arith.constant 0 : index
    %126 = vector.load %arg9[%c0_121, %125, %c0_122, %c0_123] : memref<1x18x18x128xbf16, #tpu.memory_space<vmem>>, vector<1x8x16x128xbf16>
    %127 = vector.shape_cast %126 : vector<1x8x16x128xbf16> to vector<8x16x128xbf16>
    %128 = vector.shape_cast %127 : vector<8x16x128xbf16> to vector<128x128xbf16>
    %c0_124 = arith.constant 0 : index
    %c0_125 = arith.constant 0 : index
    %c0_126 = arith.constant 0 : index
    %c0_127 = arith.constant 0 : index
    %129 = vector.load %arg2[%c0_124, %c0_125, %c0_126, %c0_127] : memref<3x3x128x128xbf16, #tpu.memory_space<vmem>>, vector<1x1x128x128xbf16>
    %130 = vector.shape_cast %129 : vector<1x1x128x128xbf16> to vector<128x128xbf16>
    %cst_128 = arith.constant dense<0.000000e+00> : vector<128x128xf32>
    %131 = tpu.matmul %128, %130, %cst_128 {dimension_numbers = #tpu.dot_dimension_numbers<[1], [0], [0], [1], [0, 0, 1, 1], [], []>} : vector<128x128xbf16>, vector<128x128xbf16>, vector<128x128xf32> -> vector<128x128xf32>
    %c0_i32_129 = arith.constant 0 : i32
    %132 = arith.addi %123, %c0_i32_129 : i32
    %c0_130 = arith.constant 0 : index
    %133 = arith.index_cast %132 : i32 to index
    %c1_131 = arith.constant 1 : index
    %c0_132 = arith.constant 0 : index
    %134 = vector.load %arg9[%c0_130, %133, %c1_131, %c0_132] : memref<1x18x18x128xbf16, #tpu.memory_space<vmem>>, vector<1x8x16x128xbf16>
    %135 = vector.shape_cast %134 : vector<1x8x16x128xbf16> to vector<8x16x128xbf16>
    %136 = vector.shape_cast %135 : vector<8x16x128xbf16> to vector<128x128xbf16>
    %c0_133 = arith.constant 0 : index
    %c1_134 = arith.constant 1 : index
    %c0_135 = arith.constant 0 : index
    %c0_136 = arith.constant 0 : index
    %137 = vector.load %arg2[%c0_133, %c1_134, %c0_135, %c0_136] : memref<3x3x128x128xbf16, #tpu.memory_space<vmem>>, vector<1x1x128x128xbf16>
    %138 = vector.shape_cast %137 : vector<1x1x128x128xbf16> to vector<128x128xbf16>
    %cst_137 = arith.constant dense<0.000000e+00> : vector<128x128xf32>
    %139 = tpu.matmul %136, %138, %cst_137 {dimension_numbers = #tpu.dot_dimension_numbers<[1], [0], [0], [1], [0, 0, 1, 1], [], []>} : vector<128x128xbf16>, vector<128x128xbf16>, vector<128x128xf32> -> vector<128x128xf32>
    %140 = arith.addf %131, %139 : vector<128x128xf32>
    %c0_i32_138 = arith.constant 0 : i32
    %141 = arith.addi %123, %c0_i32_138 : i32
    %c0_139 = arith.constant 0 : index
    %142 = arith.index_cast %141 : i32 to index
    %c2_140 = arith.constant 2 : index
    %c0_141 = arith.constant 0 : index
    %143 = vector.load %arg9[%c0_139, %142, %c2_140, %c0_141] : memref<1x18x18x128xbf16, #tpu.memory_space<vmem>>, vector<1x8x16x128xbf16>
    %144 = vector.shape_cast %143 : vector<1x8x16x128xbf16> to vector<8x16x128xbf16>
    %145 = vector.shape_cast %144 : vector<8x16x128xbf16> to vector<128x128xbf16>
    %c0_142 = arith.constant 0 : index
    %c2_143 = arith.constant 2 : index
    %c0_144 = arith.constant 0 : index
    %c0_145 = arith.constant 0 : index
    %146 = vector.load %arg2[%c0_142, %c2_143, %c0_144, %c0_145] : memref<3x3x128x128xbf16, #tpu.memory_space<vmem>>, vector<1x1x128x128xbf16>
    %147 = vector.shape_cast %146 : vector<1x1x128x128xbf16> to vector<128x128xbf16>
    %cst_146 = arith.constant dense<0.000000e+00> : vector<128x128xf32>
    %148 = tpu.matmul %145, %147, %cst_146 {dimension_numbers = #tpu.dot_dimension_numbers<[1], [0], [0], [1], [0, 0, 1, 1], [], []>} : vector<128x128xbf16>, vector<128x128xbf16>, vector<128x128xf32> -> vector<128x128xf32>
    %149 = arith.addf %140, %148 : vector<128x128xf32>
    %c1_i32_147 = arith.constant 1 : i32
    %150 = arith.addi %123, %c1_i32_147 : i32
    %c0_148 = arith.constant 0 : index
    %151 = arith.index_cast %150 : i32 to index
    %c0_149 = arith.constant 0 : index
    %c0_150 = arith.constant 0 : index
    %152 = vector.load %arg9[%c0_148, %151, %c0_149, %c0_150] : memref<1x18x18x128xbf16, #tpu.memory_space<vmem>>, vector<1x8x16x128xbf16>
    %153 = vector.shape_cast %152 : vector<1x8x16x128xbf16> to vector<8x16x128xbf16>
    %154 = vector.shape_cast %153 : vector<8x16x128xbf16> to vector<128x128xbf16>
    %c1_151 = arith.constant 1 : index
    %c0_152 = arith.constant 0 : index
    %c0_153 = arith.constant 0 : index
    %c0_154 = arith.constant 0 : index
    %155 = vector.load %arg2[%c1_151, %c0_152, %c0_153, %c0_154] : memref<3x3x128x128xbf16, #tpu.memory_space<vmem>>, vector<1x1x128x128xbf16>
    %156 = vector.shape_cast %155 : vector<1x1x128x128xbf16> to vector<128x128xbf16>
    %cst_155 = arith.constant dense<0.000000e+00> : vector<128x128xf32>
    %157 = tpu.matmul %154, %156, %cst_155 {dimension_numbers = #tpu.dot_dimension_numbers<[1], [0], [0], [1], [0, 0, 1, 1], [], []>} : vector<128x128xbf16>, vector<128x128xbf16>, vector<128x128xf32> -> vector<128x128xf32>
    %158 = arith.addf %149, %157 : vector<128x128xf32>
    %c1_i32_156 = arith.constant 1 : i32
    %159 = arith.addi %123, %c1_i32_156 : i32
    %c0_157 = arith.constant 0 : index
    %160 = arith.index_cast %159 : i32 to index
    %c1_158 = arith.constant 1 : index
    %c0_159 = arith.constant 0 : index
    %161 = vector.load %arg9[%c0_157, %160, %c1_158, %c0_159] : memref<1x18x18x128xbf16, #tpu.memory_space<vmem>>, vector<1x8x16x128xbf16>
    %162 = vector.shape_cast %161 : vector<1x8x16x128xbf16> to vector<8x16x128xbf16>
    %163 = vector.shape_cast %162 : vector<8x16x128xbf16> to vector<128x128xbf16>
    %c1_160 = arith.constant 1 : index
    %c1_161 = arith.constant 1 : index
    %c0_162 = arith.constant 0 : index
    %c0_163 = arith.constant 0 : index
    %164 = vector.load %arg2[%c1_160, %c1_161, %c0_162, %c0_163] : memref<3x3x128x128xbf16, #tpu.memory_space<vmem>>, vector<1x1x128x128xbf16>
    %165 = vector.shape_cast %164 : vector<1x1x128x128xbf16> to vector<128x128xbf16>
    %cst_164 = arith.constant dense<0.000000e+00> : vector<128x128xf32>
    %166 = tpu.matmul %163, %165, %cst_164 {dimension_numbers = #tpu.dot_dimension_numbers<[1], [0], [0], [1], [0, 0, 1, 1], [], []>} : vector<128x128xbf16>, vector<128x128xbf16>, vector<128x128xf32> -> vector<128x128xf32>
    %167 = arith.addf %158, %166 : vector<128x128xf32>
    %c1_i32_165 = arith.constant 1 : i32
    %168 = arith.addi %123, %c1_i32_165 : i32
    %c0_166 = arith.constant 0 : index
    %169 = arith.index_cast %168 : i32 to index
    %c2_167 = arith.constant 2 : index
    %c0_168 = arith.constant 0 : index
    %170 = vector.load %arg9[%c0_166, %169, %c2_167, %c0_168] : memref<1x18x18x128xbf16, #tpu.memory_space<vmem>>, vector<1x8x16x128xbf16>
    %171 = vector.shape_cast %170 : vector<1x8x16x128xbf16> to vector<8x16x128xbf16>
    %172 = vector.shape_cast %171 : vector<8x16x128xbf16> to vector<128x128xbf16>
    %c1_169 = arith.constant 1 : index
    %c2_170 = arith.constant 2 : index
    %c0_171 = arith.constant 0 : index
    %c0_172 = arith.constant 0 : index
    %173 = vector.load %arg2[%c1_169, %c2_170, %c0_171, %c0_172] : memref<3x3x128x128xbf16, #tpu.memory_space<vmem>>, vector<1x1x128x128xbf16>
    %174 = vector.shape_cast %173 : vector<1x1x128x128xbf16> to vector<128x128xbf16>
    %cst_173 = arith.constant dense<0.000000e+00> : vector<128x128xf32>
    %175 = tpu.matmul %172, %174, %cst_173 {dimension_numbers = #tpu.dot_dimension_numbers<[1], [0], [0], [1], [0, 0, 1, 1], [], []>} : vector<128x128xbf16>, vector<128x128xbf16>, vector<128x128xf32> -> vector<128x128xf32>
    %176 = arith.addf %167, %175 : vector<128x128xf32>
    %c2_i32_174 = arith.constant 2 : i32
    %177 = arith.addi %123, %c2_i32_174 : i32
    %c0_175 = arith.constant 0 : index
    %178 = arith.index_cast %177 : i32 to index
    %c0_176 = arith.constant 0 : index
    %c0_177 = arith.constant 0 : index
    %179 = vector.load %arg9[%c0_175, %178, %c0_176, %c0_177] : memref<1x18x18x128xbf16, #tpu.memory_space<vmem>>, vector<1x8x16x128xbf16>
    %180 = vector.shape_cast %179 : vector<1x8x16x128xbf16> to vector<8x16x128xbf16>
    %181 = vector.shape_cast %180 : vector<8x16x128xbf16> to vector<128x128xbf16>
    %c2_178 = arith.constant 2 : index
    %c0_179 = arith.constant 0 : index
    %c0_180 = arith.constant 0 : index
    %c0_181 = arith.constant 0 : index
    %182 = vector.load %arg2[%c2_178, %c0_179, %c0_180, %c0_181] : memref<3x3x128x128xbf16, #tpu.memory_space<vmem>>, vector<1x1x128x128xbf16>
    %183 = vector.shape_cast %182 : vector<1x1x128x128xbf16> to vector<128x128xbf16>
    %cst_182 = arith.constant dense<0.000000e+00> : vector<128x128xf32>
    %184 = tpu.matmul %181, %183, %cst_182 {dimension_numbers = #tpu.dot_dimension_numbers<[1], [0], [0], [1], [0, 0, 1, 1], [], []>} : vector<128x128xbf16>, vector<128x128xbf16>, vector<128x128xf32> -> vector<128x128xf32>
    %185 = arith.addf %176, %184 : vector<128x128xf32>
    %c2_i32_183 = arith.constant 2 : i32
    %186 = arith.addi %123, %c2_i32_183 : i32
    %c0_184 = arith.constant 0 : index
    %187 = arith.index_cast %186 : i32 to index
    %c1_185 = arith.constant 1 : index
    %c0_186 = arith.constant 0 : index
    %188 = vector.load %arg9[%c0_184, %187, %c1_185, %c0_186] : memref<1x18x18x128xbf16, #tpu.memory_space<vmem>>, vector<1x8x16x128xbf16>
    %189 = vector.shape_cast %188 : vector<1x8x16x128xbf16> to vector<8x16x128xbf16>
    %190 = vector.shape_cast %189 : vector<8x16x128xbf16> to vector<128x128xbf16>
    %c2_187 = arith.constant 2 : index
    %c1_188 = arith.constant 1 : index
    %c0_189 = arith.constant 0 : index
    %c0_190 = arith.constant 0 : index
    %191 = vector.load %arg2[%c2_187, %c1_188, %c0_189, %c0_190] : memref<3x3x128x128xbf16, #tpu.memory_space<vmem>>, vector<1x1x128x128xbf16>
    %192 = vector.shape_cast %191 : vector<1x1x128x128xbf16> to vector<128x128xbf16>
    %cst_191 = arith.constant dense<0.000000e+00> : vector<128x128xf32>
    %193 = tpu.matmul %190, %192, %cst_191 {dimension_numbers = #tpu.dot_dimension_numbers<[1], [0], [0], [1], [0, 0, 1, 1], [], []>} : vector<128x128xbf16>, vector<128x128xbf16>, vector<128x128xf32> -> vector<128x128xf32>
    %194 = arith.addf %185, %193 : vector<128x128xf32>
    %c2_i32_192 = arith.constant 2 : i32
    %195 = arith.addi %123, %c2_i32_192 : i32
    %c0_193 = arith.constant 0 : index
    %196 = arith.index_cast %195 : i32 to index
    %c2_194 = arith.constant 2 : index
    %c0_195 = arith.constant 0 : index
    %197 = vector.load %arg9[%c0_193, %196, %c2_194, %c0_195] : memref<1x18x18x128xbf16, #tpu.memory_space<vmem>>, vector<1x8x16x128xbf16>
    %198 = vector.shape_cast %197 : vector<1x8x16x128xbf16> to vector<8x16x128xbf16>
    %199 = vector.shape_cast %198 : vector<8x16x128xbf16> to vector<128x128xbf16>
    %c2_196 = arith.constant 2 : index
    %c2_197 = arith.constant 2 : index
    %c0_198 = arith.constant 0 : index
    %c0_199 = arith.constant 0 : index
    %200 = vector.load %arg2[%c2_196, %c2_197, %c0_198, %c0_199] : memref<3x3x128x128xbf16, #tpu.memory_space<vmem>>, vector<1x1x128x128xbf16>
    %201 = vector.shape_cast %200 : vector<1x1x128x128xbf16> to vector<128x128xbf16>
    %cst_200 = arith.constant dense<0.000000e+00> : vector<128x128xf32>
    %202 = tpu.matmul %199, %201, %cst_200 {dimension_numbers = #tpu.dot_dimension_numbers<[1], [0], [0], [1], [0, 0, 1, 1], [], []>} : vector<128x128xbf16>, vector<128x128xbf16>, vector<128x128xf32> -> vector<128x128xf32>
    %203 = arith.addf %194, %202 : vector<128x128xf32>
    %204 = vector.broadcast %0 : vector<1x128xf32> to vector<128x128xf32>
    %205 = arith.mulf %203, %204 : vector<128x128xf32>
    %206 = vector.broadcast %1 : vector<1x128xf32> to vector<128x128xf32>
    %207 = arith.addf %205, %206 : vector<128x128xf32>
    %cst_201 = arith.constant 0.000000e+00 : f32
    %208 = vector.broadcast %cst_201 : f32 to vector<128x128xf32>
    %209 = arith.maximumf %207, %208 : vector<128x128xf32>
    %210 = arith.truncf %209 : vector<128x128xf32> to vector<128x128xbf16>
    %211 = vector.shape_cast %210 : vector<128x128xbf16> to vector<8x16x128xbf16>
    %c1_i32_202 = arith.constant 1 : i32
    %212 = arith.addi %123, %c1_i32_202 : i32
    %c0_203 = arith.constant 0 : index
    %213 = arith.index_cast %212 : i32 to index
    %c1_204 = arith.constant 1 : index
    %c0_205 = arith.constant 0 : index
    %214 = vector.load %arg10[%c0_203, %213, %c1_204, %c0_205] : memref<1x18x18x128xbf16, #tpu.memory_space<vmem>>, vector<1x8x16x128xbf16>
    %215 = vector.shape_cast %214 : vector<1x8x16x128xbf16> to vector<8x16x128xbf16>
    %216 = vector.shape_cast %211 : vector<8x16x128xbf16> to vector<1x8x16x128xbf16>
    tpu.vector_store %arg10[%c0_203, %213, %c1_204, %c0_205], %216 {strides = array<i32>} : memref<1x18x18x128xbf16, #tpu.memory_space<vmem>>, vector<1x8x16x128xbf16>,
    %c2_i32_206 = arith.constant 2 : i32
    %c0_i32_207 = arith.constant 0 : i32
    %c8_i32_208 = arith.constant 8 : i32
    %217 = arith.muli %c0_i32_207, %c8_i32_208 : i32
    %218 = tpu.assume_multiple %217, 8 : i32
    %c0_i32_209 = arith.constant 0 : i32
    %219 = arith.addi %218, %c0_i32_209 : i32
    %c0_210 = arith.constant 0 : index
    %220 = arith.index_cast %219 : i32 to index
    %c0_211 = arith.constant 0 : index
    %c0_212 = arith.constant 0 : index
    %221 = vector.load %arg10[%c0_210, %220, %c0_211, %c0_212] : memref<1x18x18x128xbf16, #tpu.memory_space<vmem>>, vector<1x8x16x128xbf16>
    %222 = vector.shape_cast %221 : vector<1x8x16x128xbf16> to vector<8x16x128xbf16>
    %223 = vector.shape_cast %222 : vector<8x16x128xbf16> to vector<128x128xbf16>
    %c0_213 = arith.constant 0 : index
    %c0_214 = arith.constant 0 : index
    %c0_215 = arith.constant 0 : index
    %c0_216 = arith.constant 0 : index
    %224 = vector.load %arg3[%c0_213, %c0_214, %c0_215, %c0_216] : memref<3x3x128x128xbf16, #tpu.memory_space<vmem>>, vector<1x1x128x128xbf16>
    %225 = vector.shape_cast %224 : vector<1x1x128x128xbf16> to vector<128x128xbf16>
    %cst_217 = arith.constant dense<0.000000e+00> : vector<128x128xf32>
    %226 = tpu.matmul %223, %225, %cst_217 {dimension_numbers = #tpu.dot_dimension_numbers<[1], [0], [0], [1], [0, 0, 1, 1], [], []>} : vector<128x128xbf16>, vector<128x128xbf16>, vector<128x128xf32> -> vector<128x128xf32>
    %c0_i32_218 = arith.constant 0 : i32
    %227 = arith.addi %218, %c0_i32_218 : i32
    %c0_219 = arith.constant 0 : index
    %228 = arith.index_cast %227 : i32 to index
    %c1_220 = arith.constant 1 : index
    %c0_221 = arith.constant 0 : index
    %229 = vector.load %arg10[%c0_219, %228, %c1_220, %c0_221] : memref<1x18x18x128xbf16, #tpu.memory_space<vmem>>, vector<1x8x16x128xbf16>
    %230 = vector.shape_cast %229 : vector<1x8x16x128xbf16> to vector<8x16x128xbf16>
    %231 = vector.shape_cast %230 : vector<8x16x128xbf16> to vector<128x128xbf16>
    %c0_222 = arith.constant 0 : index
    %c1_223 = arith.constant 1 : index
    %c0_224 = arith.constant 0 : index
    %c0_225 = arith.constant 0 : index
    %232 = vector.load %arg3[%c0_222, %c1_223, %c0_224, %c0_225] : memref<3x3x128x128xbf16, #tpu.memory_space<vmem>>, vector<1x1x128x128xbf16>
    %233 = vector.shape_cast %232 : vector<1x1x128x128xbf16> to vector<128x128xbf16>
    %cst_226 = arith.constant dense<0.000000e+00> : vector<128x128xf32>
    %234 = tpu.matmul %231, %233, %cst_226 {dimension_numbers = #tpu.dot_dimension_numbers<[1], [0], [0], [1], [0, 0, 1, 1], [], []>} : vector<128x128xbf16>, vector<128x128xbf16>, vector<128x128xf32> -> vector<128x128xf32>
    %235 = arith.addf %226, %234 : vector<128x128xf32>
    %c0_i32_227 = arith.constant 0 : i32
    %236 = arith.addi %218, %c0_i32_227 : i32
    %c0_228 = arith.constant 0 : index
    %237 = arith.index_cast %236 : i32 to index
    %c2_229 = arith.constant 2 : index
    %c0_230 = arith.constant 0 : index
    %238 = vector.load %arg10[%c0_228, %237, %c2_229, %c0_230] : memref<1x18x18x128xbf16, #tpu.memory_space<vmem>>, vector<1x8x16x128xbf16>
    %239 = vector.shape_cast %238 : vector<1x8x16x128xbf16> to vector<8x16x128xbf16>
    %240 = vector.shape_cast %239 : vector<8x16x128xbf16> to vector<128x128xbf16>
    %c0_231 = arith.constant 0 : index
    %c2_232 = arith.constant 2 : index
    %c0_233 = arith.constant 0 : index
    %c0_234 = arith.constant 0 : index
    %241 = vector.load %arg3[%c0_231, %c2_232, %c0_233, %c0_234] : memref<3x3x128x128xbf16, #tpu.memory_space<vmem>>, vector<1x1x128x128xbf16>
    %242 = vector.shape_cast %241 : vector<1x1x128x128xbf16> to vector<128x128xbf16>
    %cst_235 = arith.constant dense<0.000000e+00> : vector<128x128xf32>
    %243 = tpu.matmul %240, %242, %cst_235 {dimension_numbers = #tpu.dot_dimension_numbers<[1], [0], [0], [1], [0, 0, 1, 1], [], []>} : vector<128x128xbf16>, vector<128x128xbf16>, vector<128x128xf32> -> vector<128x128xf32>
    %244 = arith.addf %235, %243 : vector<128x128xf32>
    %c1_i32_236 = arith.constant 1 : i32
    %245 = arith.addi %218, %c1_i32_236 : i32
    %c0_237 = arith.constant 0 : index
    %246 = arith.index_cast %245 : i32 to index
    %c0_238 = arith.constant 0 : index
    %c0_239 = arith.constant 0 : index
    %247 = vector.load %arg10[%c0_237, %246, %c0_238, %c0_239] : memref<1x18x18x128xbf16, #tpu.memory_space<vmem>>, vector<1x8x16x128xbf16>
    %248 = vector.shape_cast %247 : vector<1x8x16x128xbf16> to vector<8x16x128xbf16>
    %249 = vector.shape_cast %248 : vector<8x16x128xbf16> to vector<128x128xbf16>
    %c1_240 = arith.constant 1 : index
    %c0_241 = arith.constant 0 : index
    %c0_242 = arith.constant 0 : index
    %c0_243 = arith.constant 0 : index
    %250 = vector.load %arg3[%c1_240, %c0_241, %c0_242, %c0_243] : memref<3x3x128x128xbf16, #tpu.memory_space<vmem>>, vector<1x1x128x128xbf16>
    %251 = vector.shape_cast %250 : vector<1x1x128x128xbf16> to vector<128x128xbf16>
    %cst_244 = arith.constant dense<0.000000e+00> : vector<128x128xf32>
    %252 = tpu.matmul %249, %251, %cst_244 {dimension_numbers = #tpu.dot_dimension_numbers<[1], [0], [0], [1], [0, 0, 1, 1], [], []>} : vector<128x128xbf16>, vector<128x128xbf16>, vector<128x128xf32> -> vector<128x128xf32>
    %253 = arith.addf %244, %252 : vector<128x128xf32>
    %c1_i32_245 = arith.constant 1 : i32
    %254 = arith.addi %218, %c1_i32_245 : i32
    %c0_246 = arith.constant 0 : index
    %255 = arith.index_cast %254 : i32 to index
    %c1_247 = arith.constant 1 : index
    %c0_248 = arith.constant 0 : index
    %256 = vector.load %arg10[%c0_246, %255, %c1_247, %c0_248] : memref<1x18x18x128xbf16, #tpu.memory_space<vmem>>, vector<1x8x16x128xbf16>
    %257 = vector.shape_cast %256 : vector<1x8x16x128xbf16> to vector<8x16x128xbf16>
    %258 = vector.shape_cast %257 : vector<8x16x128xbf16> to vector<128x128xbf16>
    %c1_249 = arith.constant 1 : index
    %c1_250 = arith.constant 1 : index
    %c0_251 = arith.constant 0 : index
    %c0_252 = arith.constant 0 : index
    %259 = vector.load %arg3[%c1_249, %c1_250, %c0_251, %c0_252] : memref<3x3x128x128xbf16, #tpu.memory_space<vmem>>, vector<1x1x128x128xbf16>
    %260 = vector.shape_cast %259 : vector<1x1x128x128xbf16> to vector<128x128xbf16>
    %cst_253 = arith.constant dense<0.000000e+00> : vector<128x128xf32>
    %261 = tpu.matmul %258, %260, %cst_253 {dimension_numbers = #tpu.dot_dimension_numbers<[1], [0], [0], [1], [0, 0, 1, 1], [], []>} : vector<128x128xbf16>, vector<128x128xbf16>, vector<128x128xf32> -> vector<128x128xf32>
    %262 = arith.addf %253, %261 : vector<128x128xf32>
    %c1_i32_254 = arith.constant 1 : i32
    %263 = arith.addi %218, %c1_i32_254 : i32
    %c0_255 = arith.constant 0 : index
    %264 = arith.index_cast %263 : i32 to index
    %c2_256 = arith.constant 2 : index
    %c0_257 = arith.constant 0 : index
    %265 = vector.load %arg10[%c0_255, %264, %c2_256, %c0_257] : memref<1x18x18x128xbf16, #tpu.memory_space<vmem>>, vector<1x8x16x128xbf16>
    %266 = vector.shape_cast %265 : vector<1x8x16x128xbf16> to vector<8x16x128xbf16>
    %267 = vector.shape_cast %266 : vector<8x16x128xbf16> to vector<128x128xbf16>
    %c1_258 = arith.constant 1 : index
    %c2_259 = arith.constant 2 : index
    %c0_260 = arith.constant 0 : index
    %c0_261 = arith.constant 0 : index
    %268 = vector.load %arg3[%c1_258, %c2_259, %c0_260, %c0_261] : memref<3x3x128x128xbf16, #tpu.memory_space<vmem>>, vector<1x1x128x128xbf16>
    %269 = vector.shape_cast %268 : vector<1x1x128x128xbf16> to vector<128x128xbf16>
    %cst_262 = arith.constant dense<0.000000e+00> : vector<128x128xf32>
    %270 = tpu.matmul %267, %269, %cst_262 {dimension_numbers = #tpu.dot_dimension_numbers<[1], [0], [0], [1], [0, 0, 1, 1], [], []>} : vector<128x128xbf16>, vector<128x128xbf16>, vector<128x128xf32> -> vector<128x128xf32>
    %271 = arith.addf %262, %270 : vector<128x128xf32>
    %c2_i32_263 = arith.constant 2 : i32
    %272 = arith.addi %218, %c2_i32_263 : i32
    %c0_264 = arith.constant 0 : index
    %273 = arith.index_cast %272 : i32 to index
    %c0_265 = arith.constant 0 : index
    %c0_266 = arith.constant 0 : index
    %274 = vector.load %arg10[%c0_264, %273, %c0_265, %c0_266] : memref<1x18x18x128xbf16, #tpu.memory_space<vmem>>, vector<1x8x16x128xbf16>
    %275 = vector.shape_cast %274 : vector<1x8x16x128xbf16> to vector<8x16x128xbf16>
    %276 = vector.shape_cast %275 : vector<8x16x128xbf16> to vector<128x128xbf16>
    %c2_267 = arith.constant 2 : index
    %c0_268 = arith.constant 0 : index
    %c0_269 = arith.constant 0 : index
    %c0_270 = arith.constant 0 : index
    %277 = vector.load %arg3[%c2_267, %c0_268, %c0_269, %c0_270] : memref<3x3x128x128xbf16, #tpu.memory_space<vmem>>, vector<1x1x128x128xbf16>
    %278 = vector.shape_cast %277 : vector<1x1x128x128xbf16> to vector<128x128xbf16>
    %cst_271 = arith.constant dense<0.000000e+00> : vector<128x128xf32>
    %279 = tpu.matmul %276, %278, %cst_271 {dimension_numbers = #tpu.dot_dimension_numbers<[1], [0], [0], [1], [0, 0, 1, 1], [], []>} : vector<128x128xbf16>, vector<128x128xbf16>, vector<128x128xf32> -> vector<128x128xf32>
    %280 = arith.addf %271, %279 : vector<128x128xf32>
    %c2_i32_272 = arith.constant 2 : i32
    %281 = arith.addi %218, %c2_i32_272 : i32
    %c0_273 = arith.constant 0 : index
    %282 = arith.index_cast %281 : i32 to index
    %c1_274 = arith.constant 1 : index
    %c0_275 = arith.constant 0 : index
    %283 = vector.load %arg10[%c0_273, %282, %c1_274, %c0_275] : memref<1x18x18x128xbf16, #tpu.memory_space<vmem>>, vector<1x8x16x128xbf16>
    %284 = vector.shape_cast %283 : vector<1x8x16x128xbf16> to vector<8x16x128xbf16>
    %285 = vector.shape_cast %284 : vector<8x16x128xbf16> to vector<128x128xbf16>
    %c2_276 = arith.constant 2 : index
    %c1_277 = arith.constant 1 : index
    %c0_278 = arith.constant 0 : index
    %c0_279 = arith.constant 0 : index
    %286 = vector.load %arg3[%c2_276, %c1_277, %c0_278, %c0_279] : memref<3x3x128x128xbf16, #tpu.memory_space<vmem>>, vector<1x1x128x128xbf16>
    %287 = vector.shape_cast %286 : vector<1x1x128x128xbf16> to vector<128x128xbf16>
    %cst_280 = arith.constant dense<0.000000e+00> : vector<128x128xf32>
    %288 = tpu.matmul %285, %287, %cst_280 {dimension_numbers = #tpu.dot_dimension_numbers<[1], [0], [0], [1], [0, 0, 1, 1], [], []>} : vector<128x128xbf16>, vector<128x128xbf16>, vector<128x128xf32> -> vector<128x128xf32>
    %289 = arith.addf %280, %288 : vector<128x128xf32>
    %c2_i32_281 = arith.constant 2 : i32
    %290 = arith.addi %218, %c2_i32_281 : i32
    %c0_282 = arith.constant 0 : index
    %291 = arith.index_cast %290 : i32 to index
    %c2_283 = arith.constant 2 : index
    %c0_284 = arith.constant 0 : index
    %292 = vector.load %arg10[%c0_282, %291, %c2_283, %c0_284] : memref<1x18x18x128xbf16, #tpu.memory_space<vmem>>, vector<1x8x16x128xbf16>
    %293 = vector.shape_cast %292 : vector<1x8x16x128xbf16> to vector<8x16x128xbf16>
    %294 = vector.shape_cast %293 : vector<8x16x128xbf16> to vector<128x128xbf16>
    %c2_285 = arith.constant 2 : index
    %c2_286 = arith.constant 2 : index
    %c0_287 = arith.constant 0 : index
    %c0_288 = arith.constant 0 : index
    %295 = vector.load %arg3[%c2_285, %c2_286, %c0_287, %c0_288] : memref<3x3x128x128xbf16, #tpu.memory_space<vmem>>, vector<1x1x128x128xbf16>
    %296 = vector.shape_cast %295 : vector<1x1x128x128xbf16> to vector<128x128xbf16>
    %cst_289 = arith.constant dense<0.000000e+00> : vector<128x128xf32>
    %297 = tpu.matmul %294, %296, %cst_289 {dimension_numbers = #tpu.dot_dimension_numbers<[1], [0], [0], [1], [0, 0, 1, 1], [], []>} : vector<128x128xbf16>, vector<128x128xbf16>, vector<128x128xf32> -> vector<128x128xf32>
    %298 = arith.addf %289, %297 : vector<128x128xf32>
    %299 = vector.broadcast %2 : vector<1x128xf32> to vector<128x128xf32>
    %300 = arith.mulf %298, %299 : vector<128x128xf32>
    %301 = vector.broadcast %3 : vector<1x128xf32> to vector<128x128xf32>
    %302 = arith.addf %300, %301 : vector<128x128xf32>
    %303 = vector.shape_cast %302 : vector<128x128xf32> to vector<8x16x128xf32>
    %304 = vector.extract_strided_slice %303 {offsets = [0, 0, 0], sizes = [8, 16, 8], strides = [1, 1, 1]} : vector<8x16x128xf32> to vector<8x16x8xf32>
    %c0_290 = arith.constant 0 : index
    %305 = arith.index_cast %218 : i32 to index
    %c0_291 = arith.constant 0 : index
    %c0_292 = arith.constant 0 : index
    %306 = vector.load %arg1[%c0_290, %305, %c0_291, %c0_292] : memref<1x16x16x8xbf16, #tpu.memory_space<vmem>>, vector<1x8x16x8xbf16>
    %307 = vector.shape_cast %306 : vector<1x8x16x8xbf16> to vector<8x16x8xbf16>
    %308 = arith.extf %307 : vector<8x16x8xbf16> to vector<8x16x8xf32>
    %309 = arith.addf %304, %308 : vector<8x16x8xf32>
    %cst_293 = arith.constant 0.000000e+00 : f32
    %310 = vector.broadcast %cst_293 : f32 to vector<8x16x8xf32>
    %311 = arith.maximumf %309, %310 : vector<8x16x8xf32>
    %312 = arith.truncf %311 : vector<8x16x8xf32> to vector<8x16x8xbf16>
    %c0_294 = arith.constant 0 : index
    %313 = arith.index_cast %218 : i32 to index
    %c0_295 = arith.constant 0 : index
    %c0_296 = arith.constant 0 : index
    %314 = vector.load %arg8[%c0_294, %313, %c0_295, %c0_296] : memref<1x16x16x8xbf16, #tpu.memory_space<vmem>>, vector<1x8x16x8xbf16>
    %315 = vector.shape_cast %314 : vector<1x8x16x8xbf16> to vector<8x16x8xbf16>
    %316 = vector.shape_cast %312 : vector<8x16x8xbf16> to vector<1x8x16x8xbf16>
    tpu.vector_store %arg8[%c0_294, %313, %c0_295, %c0_296], %316 {strides = array<i32>} : memref<1x16x16x8xbf16, #tpu.memory_space<vmem>>, vector<1x8x16x8xbf16>,
    %c1_i32_297 = arith.constant 1 : i32
    %c8_i32_298 = arith.constant 8 : i32
    %317 = arith.muli %c1_i32_297, %c8_i32_298 : i32
    %318 = tpu.assume_multiple %317, 8 : i32
    %c0_i32_299 = arith.constant 0 : i32
    %319 = arith.addi %318, %c0_i32_299 : i32
    %c0_300 = arith.constant 0 : index
    %320 = arith.index_cast %319 : i32 to index
    %c0_301 = arith.constant 0 : index
    %c0_302 = arith.constant 0 : index
    %321 = vector.load %arg10[%c0_300, %320, %c0_301, %c0_302] : memref<1x18x18x128xbf16, #tpu.memory_space<vmem>>, vector<1x8x16x128xbf16>
    %322 = vector.shape_cast %321 : vector<1x8x16x128xbf16> to vector<8x16x128xbf16>
    %323 = vector.shape_cast %322 : vector<8x16x128xbf16> to vector<128x128xbf16>
    %c0_303 = arith.constant 0 : index
    %c0_304 = arith.constant 0 : index
    %c0_305 = arith.constant 0 : index
    %c0_306 = arith.constant 0 : index
    %324 = vector.load %arg3[%c0_303, %c0_304, %c0_305, %c0_306] : memref<3x3x128x128xbf16, #tpu.memory_space<vmem>>, vector<1x1x128x128xbf16>
    %325 = vector.shape_cast %324 : vector<1x1x128x128xbf16> to vector<128x128xbf16>
    %cst_307 = arith.constant dense<0.000000e+00> : vector<128x128xf32>
    %326 = tpu.matmul %323, %325, %cst_307 {dimension_numbers = #tpu.dot_dimension_numbers<[1], [0], [0], [1], [0, 0, 1, 1], [], []>} : vector<128x128xbf16>, vector<128x128xbf16>, vector<128x128xf32> -> vector<128x128xf32>
    %c0_i32_308 = arith.constant 0 : i32
    %327 = arith.addi %318, %c0_i32_308 : i32
    %c0_309 = arith.constant 0 : index
    %328 = arith.index_cast %327 : i32 to index
    %c1_310 = arith.constant 1 : index
    %c0_311 = arith.constant 0 : index
    %329 = vector.load %arg10[%c0_309, %328, %c1_310, %c0_311] : memref<1x18x18x128xbf16, #tpu.memory_space<vmem>>, vector<1x8x16x128xbf16>
    %330 = vector.shape_cast %329 : vector<1x8x16x128xbf16> to vector<8x16x128xbf16>
    %331 = vector.shape_cast %330 : vector<8x16x128xbf16> to vector<128x128xbf16>
    %c0_312 = arith.constant 0 : index
    %c1_313 = arith.constant 1 : index
    %c0_314 = arith.constant 0 : index
    %c0_315 = arith.constant 0 : index
    %332 = vector.load %arg3[%c0_312, %c1_313, %c0_314, %c0_315] : memref<3x3x128x128xbf16, #tpu.memory_space<vmem>>, vector<1x1x128x128xbf16>
    %333 = vector.shape_cast %332 : vector<1x1x128x128xbf16> to vector<128x128xbf16>
    %cst_316 = arith.constant dense<0.000000e+00> : vector<128x128xf32>
    %334 = tpu.matmul %331, %333, %cst_316 {dimension_numbers = #tpu.dot_dimension_numbers<[1], [0], [0], [1], [0, 0, 1, 1], [], []>} : vector<128x128xbf16>, vector<128x128xbf16>, vector<128x128xf32> -> vector<128x128xf32>
    %335 = arith.addf %326, %334 : vector<128x128xf32>
    %c0_i32_317 = arith.constant 0 : i32
    %336 = arith.addi %318, %c0_i32_317 : i32
    %c0_318 = arith.constant 0 : index
    %337 = arith.index_cast %336 : i32 to index
    %c2_319 = arith.constant 2 : index
    %c0_320 = arith.constant 0 : index
    %338 = vector.load %arg10[%c0_318, %337, %c2_319, %c0_320] : memref<1x18x18x128xbf16, #tpu.memory_space<vmem>>, vector<1x8x16x128xbf16>
    %339 = vector.shape_cast %338 : vector<1x8x16x128xbf16> to vector<8x16x128xbf16>
    %340 = vector.shape_cast %339 : vector<8x16x128xbf16> to vector<128x128xbf16>
    %c0_321 = arith.constant 0 : index
    %c2_322 = arith.constant 2 : index
    %c0_323 = arith.constant 0 : index
    %c0_324 = arith.constant 0 : index
    %341 = vector.load %arg3[%c0_321, %c2_322, %c0_323, %c0_324] : memref<3x3x128x128xbf16, #tpu.memory_space<vmem>>, vector<1x1x128x128xbf16>
    %342 = vector.shape_cast %341 : vector<1x1x128x128xbf16> to vector<128x128xbf16>
    %cst_325 = arith.constant dense<0.000000e+00> : vector<128x128xf32>
    %343 = tpu.matmul %340, %342, %cst_325 {dimension_numbers = #tpu.dot_dimension_numbers<[1], [0], [0], [1], [0, 0, 1, 1], [], []>} : vector<128x128xbf16>, vector<128x128xbf16>, vector<128x128xf32> -> vector<128x128xf32>
    %344 = arith.addf %335, %343 : vector<128x128xf32>
    %c1_i32_326 = arith.constant 1 : i32
    %345 = arith.addi %318, %c1_i32_326 : i32
    %c0_327 = arith.constant 0 : index
    %346 = arith.index_cast %345 : i32 to index
    %c0_328 = arith.constant 0 : index
    %c0_329 = arith.constant 0 : index
    %347 = vector.load %arg10[%c0_327, %346, %c0_328, %c0_329] : memref<1x18x18x128xbf16, #tpu.memory_space<vmem>>, vector<1x8x16x128xbf16>
    %348 = vector.shape_cast %347 : vector<1x8x16x128xbf16> to vector<8x16x128xbf16>
    %349 = vector.shape_cast %348 : vector<8x16x128xbf16> to vector<128x128xbf16>
    %c1_330 = arith.constant 1 : index
    %c0_331 = arith.constant 0 : index
    %c0_332 = arith.constant 0 : index
    %c0_333 = arith.constant 0 : index
    %350 = vector.load %arg3[%c1_330, %c0_331, %c0_332, %c0_333] : memref<3x3x128x128xbf16, #tpu.memory_space<vmem>>, vector<1x1x128x128xbf16>
    %351 = vector.shape_cast %350 : vector<1x1x128x128xbf16> to vector<128x128xbf16>
    %cst_334 = arith.constant dense<0.000000e+00> : vector<128x128xf32>
    %352 = tpu.matmul %349, %351, %cst_334 {dimension_numbers = #tpu.dot_dimension_numbers<[1], [0], [0], [1], [0, 0, 1, 1], [], []>} : vector<128x128xbf16>, vector<128x128xbf16>, vector<128x128xf32> -> vector<128x128xf32>
    %353 = arith.addf %344, %352 : vector<128x128xf32>
    %c1_i32_335 = arith.constant 1 : i32
    %354 = arith.addi %318, %c1_i32_335 : i32
    %c0_336 = arith.constant 0 : index
    %355 = arith.index_cast %354 : i32 to index
    %c1_337 = arith.constant 1 : index
    %c0_338 = arith.constant 0 : index
    %356 = vector.load %arg10[%c0_336, %355, %c1_337, %c0_338] : memref<1x18x18x128xbf16, #tpu.memory_space<vmem>>, vector<1x8x16x128xbf16>
    %357 = vector.shape_cast %356 : vector<1x8x16x128xbf16> to vector<8x16x128xbf16>
    %358 = vector.shape_cast %357 : vector<8x16x128xbf16> to vector<128x128xbf16>
    %c1_339 = arith.constant 1 : index
    %c1_340 = arith.constant 1 : index
    %c0_341 = arith.constant 0 : index
    %c0_342 = arith.constant 0 : index
    %359 = vector.load %arg3[%c1_339, %c1_340, %c0_341, %c0_342] : memref<3x3x128x128xbf16, #tpu.memory_space<vmem>>, vector<1x1x128x128xbf16>
    %360 = vector.shape_cast %359 : vector<1x1x128x128xbf16> to vector<128x128xbf16>
    %cst_343 = arith.constant dense<0.000000e+00> : vector<128x128xf32>
    %361 = tpu.matmul %358, %360, %cst_343 {dimension_numbers = #tpu.dot_dimension_numbers<[1], [0], [0], [1], [0, 0, 1, 1], [], []>} : vector<128x128xbf16>, vector<128x128xbf16>, vector<128x128xf32> -> vector<128x128xf32>
    %362 = arith.addf %353, %361 : vector<128x128xf32>
    %c1_i32_344 = arith.constant 1 : i32
    %363 = arith.addi %318, %c1_i32_344 : i32
    %c0_345 = arith.constant 0 : index
    %364 = arith.index_cast %363 : i32 to index
    %c2_346 = arith.constant 2 : index
    %c0_347 = arith.constant 0 : index
    %365 = vector.load %arg10[%c0_345, %364, %c2_346, %c0_347] : memref<1x18x18x128xbf16, #tpu.memory_space<vmem>>, vector<1x8x16x128xbf16>
    %366 = vector.shape_cast %365 : vector<1x8x16x128xbf16> to vector<8x16x128xbf16>
    %367 = vector.shape_cast %366 : vector<8x16x128xbf16> to vector<128x128xbf16>
    %c1_348 = arith.constant 1 : index
    %c2_349 = arith.constant 2 : index
    %c0_350 = arith.constant 0 : index
    %c0_351 = arith.constant 0 : index
    %368 = vector.load %arg3[%c1_348, %c2_349, %c0_350, %c0_351] : memref<3x3x128x128xbf16, #tpu.memory_space<vmem>>, vector<1x1x128x128xbf16>
    %369 = vector.shape_cast %368 : vector<1x1x128x128xbf16> to vector<128x128xbf16>
    %cst_352 = arith.constant dense<0.000000e+00> : vector<128x128xf32>
    %370 = tpu.matmul %367, %369, %cst_352 {dimension_numbers = #tpu.dot_dimension_numbers<[1], [0], [0], [1], [0, 0, 1, 1], [], []>} : vector<128x128xbf16>, vector<128x128xbf16>, vector<128x128xf32> -> vector<128x128xf32>
    %371 = arith.addf %362, %370 : vector<128x128xf32>
    %c2_i32_353 = arith.constant 2 : i32
    %372 = arith.addi %318, %c2_i32_353 : i32
    %c0_354 = arith.constant 0 : index
    %373 = arith.index_cast %372 : i32 to index
    %c0_355 = arith.constant 0 : index
    %c0_356 = arith.constant 0 : index
    %374 = vector.load %arg10[%c0_354, %373, %c0_355, %c0_356] : memref<1x18x18x128xbf16, #tpu.memory_space<vmem>>, vector<1x8x16x128xbf16>
    %375 = vector.shape_cast %374 : vector<1x8x16x128xbf16> to vector<8x16x128xbf16>
    %376 = vector.shape_cast %375 : vector<8x16x128xbf16> to vector<128x128xbf16>
    %c2_357 = arith.constant 2 : index
    %c0_358 = arith.constant 0 : index
    %c0_359 = arith.constant 0 : index
    %c0_360 = arith.constant 0 : index
    %377 = vector.load %arg3[%c2_357, %c0_358, %c0_359, %c0_360] : memref<3x3x128x128xbf16, #tpu.memory_space<vmem>>, vector<1x1x128x128xbf16>
    %378 = vector.shape_cast %377 : vector<1x1x128x128xbf16> to vector<128x128xbf16>
    %cst_361 = arith.constant dense<0.000000e+00> : vector<128x128xf32>
    %379 = tpu.matmul %376, %378, %cst_361 {dimension_numbers = #tpu.dot_dimension_numbers<[1], [0], [0], [1], [0, 0, 1, 1], [], []>} : vector<128x128xbf16>, vector<128x128xbf16>, vector<128x128xf32> -> vector<128x128xf32>
    %380 = arith.addf %371, %379 : vector<128x128xf32>
    %c2_i32_362 = arith.constant 2 : i32
    %381 = arith.addi %318, %c2_i32_362 : i32
    %c0_363 = arith.constant 0 : index
    %382 = arith.index_cast %381 : i32 to index
    %c1_364 = arith.constant 1 : index
    %c0_365 = arith.constant 0 : index
    %383 = vector.load %arg10[%c0_363, %382, %c1_364, %c0_365] : memref<1x18x18x128xbf16, #tpu.memory_space<vmem>>, vector<1x8x16x128xbf16>
    %384 = vector.shape_cast %383 : vector<1x8x16x128xbf16> to vector<8x16x128xbf16>
    %385 = vector.shape_cast %384 : vector<8x16x128xbf16> to vector<128x128xbf16>
    %c2_366 = arith.constant 2 : index
    %c1_367 = arith.constant 1 : index
    %c0_368 = arith.constant 0 : index
    %c0_369 = arith.constant 0 : index
    %386 = vector.load %arg3[%c2_366, %c1_367, %c0_368, %c0_369] : memref<3x3x128x128xbf16, #tpu.memory_space<vmem>>, vector<1x1x128x128xbf16>
    %387 = vector.shape_cast %386 : vector<1x1x128x128xbf16> to vector<128x128xbf16>
    %cst_370 = arith.constant dense<0.000000e+00> : vector<128x128xf32>
    %388 = tpu.matmul %385, %387, %cst_370 {dimension_numbers = #tpu.dot_dimension_numbers<[1], [0], [0], [1], [0, 0, 1, 1], [], []>} : vector<128x128xbf16>, vector<128x128xbf16>, vector<128x128xf32> -> vector<128x128xf32>
    %389 = arith.addf %380, %388 : vector<128x128xf32>
    %c2_i32_371 = arith.constant 2 : i32
    %390 = arith.addi %318, %c2_i32_371 : i32
    %c0_372 = arith.constant 0 : index
    %391 = arith.index_cast %390 : i32 to index
    %c2_373 = arith.constant 2 : index
    %c0_374 = arith.constant 0 : index
    %392 = vector.load %arg10[%c0_372, %391, %c2_373, %c0_374] : memref<1x18x18x128xbf16, #tpu.memory_space<vmem>>, vector<1x8x16x128xbf16>
    %393 = vector.shape_cast %392 : vector<1x8x16x128xbf16> to vector<8x16x128xbf16>
    %394 = vector.shape_cast %393 : vector<8x16x128xbf16> to vector<128x128xbf16>
    %c2_375 = arith.constant 2 : index
    %c2_376 = arith.constant 2 : index
    %c0_377 = arith.constant 0 : index
    %c0_378 = arith.constant 0 : index
    %395 = vector.load %arg3[%c2_375, %c2_376, %c0_377, %c0_378] : memref<3x3x128x128xbf16, #tpu.memory_space<vmem>>, vector<1x1x128x128xbf16>
    %396 = vector.shape_cast %395 : vector<1x1x128x128xbf16> to vector<128x128xbf16>
    %cst_379 = arith.constant dense<0.000000e+00> : vector<128x128xf32>
    %397 = tpu.matmul %394, %396, %cst_379 {dimension_numbers = #tpu.dot_dimension_numbers<[1], [0], [0], [1], [0, 0, 1, 1], [], []>} : vector<128x128xbf16>, vector<128x128xbf16>, vector<128x128xf32> -> vector<128x128xf32>
    %398 = arith.addf %389, %397 : vector<128x128xf32>
    %399 = vector.broadcast %2 : vector<1x128xf32> to vector<128x128xf32>
    %400 = arith.mulf %398, %399 : vector<128x128xf32>
    %401 = vector.broadcast %3 : vector<1x128xf32> to vector<128x128xf32>
    %402 = arith.addf %400, %401 : vector<128x128xf32>
    %403 = vector.shape_cast %402 : vector<128x128xf32> to vector<8x16x128xf32>
    %404 = vector.extract_strided_slice %403 {offsets = [0, 0, 0], sizes = [8, 16, 8], strides = [1, 1, 1]} : vector<8x16x128xf32> to vector<8x16x8xf32>
    %c0_380 = arith.constant 0 : index
    %405 = arith.index_cast %318 : i32 to index
    %c0_381 = arith.constant 0 : index
    %c0_382 = arith.constant 0 : index
    %406 = vector.load %arg1[%c0_380, %405, %c0_381, %c0_382] : memref<1x16x16x8xbf16, #tpu.memory_space<vmem>>, vector<1x8x16x8xbf16>
    %407 = vector.shape_cast %406 : vector<1x8x16x8xbf16> to vector<8x16x8xbf16>
    %408 = arith.extf %407 : vector<8x16x8xbf16> to vector<8x16x8xf32>
    %409 = arith.addf %404, %408 : vector<8x16x8xf32>
    %cst_383 = arith.constant 0.000000e+00 : f32
    %410 = vector.broadcast %cst_383 : f32 to vector<8x16x8xf32>
    %411 = arith.maximumf %409, %410 : vector<8x16x8xf32>
    %412 = arith.truncf %411 : vector<8x16x8xf32> to vector<8x16x8xbf16>
    %c0_384 = arith.constant 0 : index
    %413 = arith.index_cast %318 : i32 to index
    %c0_385 = arith.constant 0 : index
    %c0_386 = arith.constant 0 : index
    %414 = vector.load %arg8[%c0_384, %413, %c0_385, %c0_386] : memref<1x16x16x8xbf16, #tpu.memory_space<vmem>>, vector<1x8x16x8xbf16>
    %415 = vector.shape_cast %414 : vector<1x8x16x8xbf16> to vector<8x16x8xbf16>
    %416 = vector.shape_cast %412 : vector<8x16x8xbf16> to vector<1x8x16x8xbf16>
    tpu.vector_store %arg8[%c0_384, %413, %c0_385, %c0_386], %416 {strides = array<i32>} : memref<1x16x16x8xbf16, #tpu.memory_space<vmem>>, vector<1x8x16x8xbf16>,
    %c2_i32_387 = arith.constant 2 : i32
    return
  }
  func.func @transform_0(%arg0: i32) -> (i32, i32, i32, i32) {
    %c0_i32 = arith.constant 0 : i32
    %c0_i32_0 = arith.constant 0 : i32
    %c0_i32_1 = arith.constant 0 : i32
    %c0_i32_2 = arith.constant 0 : i32
    return %arg0, %c0_i32, %c0_i32_0, %c0_i32_1 : i32, i32, i32, i32
  }
  func.func @transform_1(%arg0: i32) -> (i32, i32, i32, i32) {
    %c0_i32 = arith.constant 0 : i32
    %c0_i32_0 = arith.constant 0 : i32
    %c0_i32_1 = arith.constant 0 : i32
    %c0_i32_2 = arith.constant 0 : i32
    %c0_i32_3 = arith.constant 0 : i32
    return %c0_i32, %c0_i32_0, %c0_i32_1, %c0_i32_2 : i32, i32, i32, i32
  }
  func.func @transform_2(%arg0: i32) -> (i32, i32, i32, i32) {
    %c0_i32 = arith.constant 0 : i32
    %c0_i32_0 = arith.constant 0 : i32
    %c0_i32_1 = arith.constant 0 : i32
    %c0_i32_2 = arith.constant 0 : i32
    %c0_i32_3 = arith.constant 0 : i32
    return %c0_i32, %c0_i32_0, %c0_i32_1, %c0_i32_2 : i32, i32, i32, i32
  }
  func.func @transform_3(%arg0: i32) -> (i32, i32) {
    %c0_i32 = arith.constant 0 : i32
    %c0_i32_0 = arith.constant 0 : i32
    %c0_i32_1 = arith.constant 0 : i32
    return %c0_i32, %c0_i32_0 : i32, i32
  }
  func.func @transform_4(%arg0: i32) -> (i32, i32) {
    %c0_i32 = arith.constant 0 : i32
    %c0_i32_0 = arith.constant 0 : i32
    %c0_i32_1 = arith.constant 0 : i32
    return %c0_i32, %c0_i32_0 : i32, i32
  }
  func.func @transform_5(%arg0: i32) -> (i32, i32) {
    %c0_i32 = arith.constant 0 : i32
    %c0_i32_0 = arith.constant 0 : i32
    %c0_i32_1 = arith.constant 0 : i32
    return %c0_i32, %c0_i32_0 : i32, i32
  }
  func.func @transform_6(%arg0: i32) -> (i32, i32) {
    %c0_i32 = arith.constant 0 : i32
    %c0_i32_0 = arith.constant 0 : i32
    %c0_i32_1 = arith.constant 0 : i32
    return %c0_i32, %c0_i32_0 : i32, i32
  }
  func.func @transform_7(%arg0: i32) -> (i32, i32, i32, i32) {
    %c0_i32 = arith.constant 0 : i32
    %c0_i32_0 = arith.constant 0 : i32
    %c0_i32_1 = arith.constant 0 : i32
    %c0_i32_2 = arith.constant 0 : i32
    return %arg0, %c0_i32, %c0_i32_0, %c0_i32_1 : i32, i32, i32, i32
  }
}

</mosaic_0001>

<bundles_post_ra>
// kernel: tpu_custom_call.1
= control target key start
LH: loop header
LB: loop body
LE: loop exit
PB: predicated region body
PF: predicated region fallthrough
CT: control target
= control target key end

     0   :  { %12 = vsyncpa [#allocation5], 0  ;;  %s20737_s0 = inlined_call_operand.vmem [shape: bf16[2,16,16,8], index: 0, kind: input, shape index: {}]   ;;  %s20738_s1 = inlined_call_operand.hbm [shape: bf16[3,3,128,128], index: 1, kind: input, shape index: {}]   ;;  %s20739_s2 = inlined_call_operand.hbm [shape: bf16[3,3,128,128], index: 2, kind: input, shape index: {}]   ;;  %s20740_s3 = inlined_call_operand.vmem [shape: f32[1,128], index: 3, kind: input, shape index: {}]   ;;  %s20741_s4 = inlined_call_operand.vmem [shape: f32[1,128], index: 4, kind: input, shape index: {}]   ;;  %s20742_s5 = inlined_call_operand.vmem [shape: f32[1,128], index: 5, kind: input, shape index: {}]   ;;  %s20743_s6 = inlined_call_operand.vmem [shape: f32[1,128], index: 6, kind: input, shape index: {}]   ;;  %s20744_s7 = inlined_call_operand.vmem [shape: bf16[2,16,16,8], index: 7, kind: output, shape index: {}]  }
   0x1   :  { %13 = vsyncpa [#allocation7], 0  ;;  %s17157_s24 = smov 0  }
   0x2 LB: > { %s17163_s25 = sadd.s32 4294967295, %s17110_s24   ;;  %p13440_p0 = scmp.ge.s32.totalorder %s17110_s24, 1  ;;  %s17110_s24 = sphi %s17157_s24, %s19_s24  }
   0x3   : > { %p202_p1 = scmp.lt.s32.totalorder %s17110_s24, 3  ;;  %s17112_s26 = smov [#allocation4]  }
   0x4   : > { %s214_s27 = sshll.u32 %s17112_s26, 4  ;;  %p20745_p3 = scmp.eq.s32.totalorder %s17163_s25, 0  ;;  %s215_s27 = int_to_ptr.vmem [resolvable:$true] %s214_s27 }
   0x5   : > { %p17167_p2 = pnand %p13440_p0, %p202_p1  ;;  %s17113_s29 = smov [#allocation6]  }
   0x6   : > { %s227_s30 = sshll.u32 %s17113_s29, 4  ;;  %s17040_s11 = scalar_lea.hbm %s20738_s1, 9216  ;;  %s17180_s30 = int_to_ptr.vmem [resolvable:$true] %s227_s30 }
   0x7   : > { %s20778_s28 = scalar_select %p17167_p2, 1, 0 }
   0x8   : > { %p16618_p4 = pneg %p17167_p2  ;;  %p17041_p6 = scmp.ne.s32.totalorder %s20738_s1, %s17040_s11 }
   0x9   : > { %p17047_p10 = scmp.lt.u32.totalorder %s17040_s11, %s20738_s1 }
   0xa   : > { %p17176_p5 = pnand %p20745_p3, %p16618_p4 }
   0xc   : > { %p17042_p7 = pneg %p17176_p5 }
   0xe   : > { %p17043_p8 = pnand %p17042_p7, %p17041_p6 }
  0x10   : > { %p17044_p9 = pneg %p17043_p8 }
  0x12   : > { %p17049_p11 = pnand %p17047_p10, %p17044_p9 }
  0x14   : > { %17052 = shalt.err (!%p17049_p11)
}
  0x15   : > { %s17053_s16 = scalar_lea.vmem %s215_s27, 9216  ;;  %p17061_p1 = scmp.lt.s32.totalorder %s215_s27, %s215_s27 }
  0x16   : > { %p17054_p12 = scmp.ne.s32.totalorder %s215_s27, %s17053_s16  ;;  %p17062_p4 = scmp.lt.s32.totalorder %s17053_s16, %s17053_s16 }
  0x18   : > { %p17056_p13 = pnand %p17054_p12, %p17042_p7  ;;  %p17063_p3 = por %p17062_p4, %p17061_p1 }
  0x1a   : > { %p17057_p0 = pneg %p17056_p13 }
  0x1c   : > { %p17064_p2 = pnand %p17063_p3, %p17057_p0 }
  0x1e   : > { %17067 = shalt.err (!%p17064_p2)
}
  0x1f   : > { %s17114_s17 = smov 64   ;;  %s17115_s18 = smov 4  }
  0x20   : > { %16621 = dma.hbm_to_vmem [thread:$0]  (!%p17176_p5), %s20738_s1, 9216, %s215_s27, [#allocation5], %s17114_s17, %s17114_s17, %s17115_s18  }
  0x21   : > { %s17068_s23 = scalar_lea.hbm %s20739_s2, 9216 }
  0x22   : > { %p17069_p6 = scmp.ne.s32.totalorder %s20739_s2, %s17068_s23  ;;  %p17075_p8 = scmp.lt.u32.totalorder %s17068_s23, %s20739_s2 }
  0x24   : > { %p17071_p2 = pnand %p17069_p6, %p17042_p7 }
  0x26   : > { %p17072_p3 = pneg %p17071_p2 }
  0x28   : > { %p17077_p9 = pnand %p17075_p8, %p17072_p3 }
  0x2a   : > { %17080 = shalt.err (!%p17077_p9)
}
  0x2b   : > { %s17081_s27 = scalar_lea.vmem %s17180_s30, 9216  ;;  %p17089_p13 = scmp.lt.s32.totalorder %s17180_s30, %s17180_s30 }
  0x2c   : > { %p17082_p10 = scmp.ne.s32.totalorder %s17180_s30, %s17081_s27  ;;  %p17090_p0 = scmp.lt.s32.totalorder %s17081_s27, %s17081_s27 }
  0x2e   : > { %p17084_p11 = pnand %p17082_p10, %p17042_p7  ;;  %p17091_p1 = por %p17090_p0, %p17089_p13 }
  0x30   : > { %p17085_p12 = pneg %p17084_p11 }
  0x32   : > { %p17092_p4 = pnand %p17091_p1, %p17085_p12 }
  0x34   : > { %17095 = shalt.err (!%p17092_p4)
}
  0x35   : > { %16624 = dma.hbm_to_vmem [thread:$0]  (!%p17176_p5), %s20739_s2, 9216, %s17180_s30, [#allocation7], %s17114_s17, %s17114_s17, %s17115_s18  }
  0x36   : > { %p20780_p6 = scmp.ne.s32.totalorder %s20778_s28, 0 }
  0x38   : > { %263 = sbr.rel (%p20780_p6) target bundleno = 1320 (0x528), region = 48 }
  0x3f   : > { %p20781_p2 = scmp.eq.s32.totalorder %s17163_s25, 0 }
  0x41   : > { %17101 = dma.done.wait (%p20781_p2), [#allocation5], 9216   ;;  %p20782_p7 = pmov %p20781_p2 }
  0x42   : > { %p20783_p3 = pmov %p20781_p2 }
  0x43   : > { %17103 = vsyncadd (%p20782_p7), [#allocation5], 4294958080 }
  0x44   : > { %17105 = dma.done.wait (%p20783_p3), [#allocation7], 9216   ;;  %p20784_p8 = pmov %p20781_p2 }
  0x45   : > { %v17116_v0 = vmov 0   ;;  %v16642_v1 = vld [vmem:[#allocation4 + $0x40] sm:$0xff]   ;;  %v16644_v3 = vld [vmem:[#allocation4 + $0x48] sm:$0xff]   ;;  %p299_p5 = scmp.lt.s32.totalorder %s17163_s25, 1  ;;  %v16646_v5 = vld [vmem:[#allocation4 + $0x50] sm:$0xff]   ;;  %vm832_vm5 = vcmask 60416  }
  0x46   : > { %17107 = vsyncadd (%p20784_p8), [#allocation7], 4294958080  ;;  %423 = vst [vmem:[#allocation2] sm:$0xf] %v17116_v0  ;;  %v16643_v2 = vld [vmem:[#allocation4 + $0x40] sm:$0xff]   ;;  %14946 = vmatprep.subr.bf16.mxu0 %v16642_v1  ;;  %v16645_v4 = vld [vmem:[#allocation4 + $0x48] sm:$0xff]  }
  0x47   : > { %424 = vst [vmem:[#allocation2 + $0x4] sm:$0xf] %v17116_v0  ;;  %425 = vst [vmem:[#allocation2 + $0x8] sm:$0x1] %v17116_v0  ;;  %15234 = vmatprep.subr.bf16.mxu1 %v16643_v2  ;;  %14947 = vmatpush3.bf16.msra.mxu0 %v16642_v1  ;;  %v16647_v6 = vld [vmem:[#allocation4 + $0x50] sm:$0xff]   ;;  %s20898_s25 = smov (!%p299_p5, %s17163_s25), 1 }
  0x48   : > { %314 = vst [vmem:[#allocation3] sm:$0xf] %v17116_v0  ;;  %315 = vst [vmem:[#allocation3 + $0x4] sm:$0xf] %v17116_v0  ;;  %15235 = vmatpush3.bf16.msra.mxu1 %v16643_v2  ;;  %14948 = vmatprep.subr.bf16.mxu0 %v16644_v3  ;;  %v16648_v7 = vld [vmem:[#allocation4 + $0x58] sm:$0xff]   ;;  %s14225_s28 = sshll.u32 %s20898_s25, 7 }
  0x49   : > { %316 = vst [vmem:[#allocation3 + $0x8] sm:$0x1] %v17116_v0  ;;  %318 = vst [vmem:[#allocation3 + $0xcc] sm:$0xf] %v17116_v0  ;;  %15236 = vmatprep.subr.bf16.mxu1 %v16645_v4  ;;  %vm992_vm0 = vsmask.f32 3328  ;;  %s17249_s13 = scalar_lea.vmem %s20737_s0, %s14225_s28  ;;  %s20600_s26 = scalar_lea.vmem %s20744_s7, %s14225_s28 }
  0x4a   : > { %319 = vst [vmem:[#allocation3 + $0xd0] sm:$0xf] %v17116_v0  ;;  %320 = vst [vmem:[#allocation3 + $0xd4] sm:$0x1] %v17116_v0  ;;  %vm993_vm1 = vsmask.f32 7440 }
  0x4b   : > { %426 = vst [vmem:[#allocation2 + $0xc] sm:$0xf] %v17116_v0  ;;  %427 = vst [vmem:[#allocation2 + $0x10] sm:$0xf] %v17116_v0  ;;  %14949 = vmatpush3.bf16.msra.mxu0 %v16644_v3  ;;  %v16649_v8 = vld [vmem:[#allocation4 + $0x58] sm:$0xff]   ;;  %v16650_v9 = vld [vmem:[#allocation4 + $0x60] sm:$0xff]  }
  0x4c   : > { %428 = vst [vmem:[#allocation2 + $0x14] sm:$0x1] %v17116_v0  ;;  %429 = vst [vmem:[#allocation2 + $0x18] sm:$0xf] %v17116_v0  ;;  %15237 = vmatpush3.bf16.msra.mxu1 %v16645_v4  ;;  %14950 = vmatprep.subr.bf16.mxu0 %v16646_v5  ;;  %vm373_vm2 = vsmask.f32 7938 }
  0x4d   : > { %430 = vst [vmem:[#allocation2 + $0x1c] sm:$0xf] %v17116_v0  ;;  %431 = vst [vmem:[#allocation2 + $0x20] sm:$0x1] %v17116_v0  ;;  %15238 = vmatprep.subr.bf16.mxu1 %v16647_v6  ;;  %vm323_vm3 = vsmask.f32 256 }
  0x4e   : > { %432 = vst [vmem:[#allocation2 + $0x24] sm:$0xf] %v17116_v0  ;;  %433 = vst [vmem:[#allocation2 + $0x28] sm:$0xf] %v17116_v0  ;;  %vm509_vm4 = vsmask.f32 4368 }
  0x4f   : > { %434 = vst [vmem:[#allocation2 + $0x2c] sm:$0x1] %v17116_v0  ;;  %435 = vst [vmem:[#allocation2 + $0x30] sm:$0xf] %v17116_v0  ;;  %14951 = vmatpush3.bf16.msra.mxu0 %v16646_v5  ;;  %v16651_v10 = vld [vmem:[#allocation4 + $0x60] sm:$0xff]   ;;  %v16652_v11 = vld [vmem:[#allocation4 + $0x68] sm:$0xff]  }
  0x50   : > { %436 = vst [vmem:[#allocation2 + $0x34] sm:$0xf] %v17116_v0  ;;  %437 = vst [vmem:[#allocation2 + $0x38] sm:$0x1] %v17116_v0  ;;  %15239 = vmatpush3.bf16.msra.mxu1 %v16647_v6  ;;  %14952 = vmatprep.subr.bf16.mxu0 %v16648_v7  ;;  %v16653_v12 = vld [vmem:[#allocation4 + $0x68] sm:$0xff]   ;;  %vm839_vm6 = vcmask 57344  }
  0x51   : > { %438 = vst [vmem:[#allocation2 + $0x3c] sm:$0xf] %v17116_v0  ;;  %439 = vst [vmem:[#allocation2 + $0x40] sm:$0xf] %v17116_v0  ;;  %15240 = vmatprep.subr.bf16.mxu1 %v16649_v8  ;;  %v952_v13 = vld [vmem:[#allocation2] sm:$0xf] }
  0x52   : > { %440 = vst [vmem:[#allocation2 + $0x44] sm:$0x1] %v17116_v0  ;;  %441 = vst [vmem:[#allocation2 + $0x48] sm:$0xf] %v17116_v0  ;;  %v953_v14 = vld [vmem:[#allocation2 + $0x4] sm:$0xf] }
  0x53   : > { %442 = vst [vmem:[#allocation2 + $0x4c] sm:$0xf] %v17116_v0  ;;  %443 = vst [vmem:[#allocation2 + $0x50] sm:$0x1] %v17116_v0  ;;  %14953 = vmatpush3.bf16.msra.mxu0 %v16648_v7  ;;  %v984_v15 = vld [vmem:[#allocation2 + $0x8] sm:$0x1] }
  0x54   : > { %444 = vst [vmem:[#allocation2 + $0x54] sm:$0xf] %v17116_v0  ;;  %445 = vst [vmem:[#allocation2 + $0x58] sm:$0xf] %v17116_v0  ;;  %15241 = vmatpush3.bf16.msra.mxu1 %v16649_v8  ;;  %14954 = vmatprep.subr.bf16.mxu0 %v16650_v9  ;;  %v996_v16 = vshrl.u32 %v952_v13, 16  ;;  %v999_v17 = vshll.u32 %v952_v13, 16 }
  0x55   : > { %446 = vst [vmem:[#allocation2 + $0x5c] sm:$0x1] %v17116_v0  ;;  %447 = vst [vmem:[#allocation2 + $0x60] sm:$0xf] %v17116_v0  ;;  %15242 = vmatprep.subr.bf16.mxu1 %v16651_v10  ;;  %v1005_v18 = vshll.u32 %v953_v14, 16  ;;  %v1009_v19 = vshrl.u32 %v953_v14, 16 }
  0x56   : > { %448 = vst [vmem:[#allocation2 + $0x64] sm:$0xf] %v17116_v0  ;;  %449 = vst [vmem:[#allocation2 + $0x68] sm:$0x1] %v17116_v0  ;;  %v491_v20 = vld [vmem:[%s17249_s13 + $0x38] sm:$0xf] }
  0x57   : > { %450 = vst [vmem:[#allocation2 + $0x6c] sm:$0xf] %v17116_v0  ;;  %451 = vst [vmem:[#allocation2 + $0x70] sm:$0xf] %v17116_v0  ;;  %v1015_v21 = vshll.u32 %v984_v15, 16  ;;  %v631_v23 = vshrl.u32 %v491_v20, 16  ;;  %14955 = vmatpush3.bf16.msra.mxu0 %v16650_v9 }
  0x58   : > { %452 = vst [vmem:[#allocation2 + $0x74] sm:$0x1] %v17116_v0  ;;  %453 = vst [vmem:[#allocation2 + $0x78] sm:$0xf] %v17116_v0  ;;  %v492_v22 = vld [vmem:[%s17249_s13 + $0x3c] sm:$0xf]  ;;  %15243 = vmatpush3.bf16.msra.mxu1 %v16651_v10  ;;  %14956 = vmatprep.subr.bf16.mxu0 %v16652_v11 }
  0x59   : > { %454 = vst [vmem:[#allocation2 + $0x7c] sm:$0xf] %v17116_v0  ;;  %455 = vst [vmem:[#allocation2 + $0x80] sm:$0x1] %v17116_v0  ;;  %v634_v24 = vshll.u32 %v491_v20, 16  ;;  %v20785_v25 = vmov 0  ;;  %15244 = vmatprep.subr.bf16.mxu1 %v16653_v12 }
  0x5a   : > { %456 = vst [vmem:[#allocation2 + $0x84] sm:$0xf] %v17116_v0  ;;  %457 = vst [vmem:[#allocation2 + $0x88] sm:$0xf] %v17116_v0  ;;  %v998_v26 = vrot.slane %v996_v16, 4  ;;  %v1001_v27 = vrot.slane %v999_v17, 5 }
  0x5b   : > { %458 = vst [vmem:[#allocation2 + $0x8c] sm:$0x1] %v17116_v0  ;;  %459 = vst [vmem:[#allocation2 + $0x90] sm:$0xf] %v17116_v0  ;;  %v1007_v28 = vrot.slane %v1005_v18, 5  ;;  %v1011_v29 = vrot.slane %v1009_v19, 4  ;;  %14957 = vmatpush3.bf16.msra.mxu0 %v16652_v11 }
  0x5c   : > { %460 = vst [vmem:[#allocation2 + $0x94] sm:$0xf] %v17116_v0  ;;  %461 = vst [vmem:[#allocation2 + $0x98] sm:$0x1] %v17116_v0  ;;  %v16654_v30 = vld [vmem:[#allocation4 + $0x70] sm:$0xff]   ;;  %v633_v31 = vrot.slane %v631_v23, 7  ;;  %v1002_v37 = vor.u32 %v1001_v27, %v998_v26  ;;  %15245 = vmatpush3.bf16.msra.mxu1 %v16653_v12 }
  0x5d   : > { %462 = vst [vmem:[#allocation2 + $0x9c] sm:$0xf] %v17116_v0  ;;  %463 = vst [vmem:[#allocation2 + $0xa0] sm:$0xf] %v17116_v0  ;;  %v639_v32 = vshrl.u32 %v492_v22, 16  ;;  %v642_v33 = vshll.u32 %v492_v22, 16  ;;  %v1012_v38 = vor.u32 %v1011_v29, %v1007_v28  ;;  %14958 = vmatprep.subr.bf16.mxu0 %v16654_v30 }
  0x5e   : > { %464 = vst [vmem:[#allocation2 + $0xa4] sm:$0x1] %v17116_v0  ;;  %465 = vst [vmem:[#allocation2 + $0xa8] sm:$0xf] %v17116_v0  ;;  %v20788_v34 = vmov 0  ;;  %v16655_v36 = vld [vmem:[#allocation4 + $0x70] sm:$0xff]   ;;  %v636_v44 = vor.u32 %v634_v24, %v633_v31 }
  0x5f   : > { %466 = vst [vmem:[#allocation2 + $0xac] sm:$0xf] %v17116_v0  ;;  %467 = vst [vmem:[#allocation2 + $0xb0] sm:$0x1] %v17116_v0  ;;  %v886_v35 = vld [vmem:[#allocation2 + $0x60] sm:$0xf]  ;;  %15246 = vmatprep.subr.bf16.mxu1 %v16655_v36  ;;  %14959 = vmatpush3.bf16.msra.mxu0 %v16654_v30 }
  0x60   : > { %468 = vst [vmem:[#allocation2 + $0xb4] sm:$0xf] %v17116_v0  ;;  %469 = vst [vmem:[#allocation2 + $0xb8] sm:$0xf] %v17116_v0  ;;  %v1017_v39 = vrot.slane %v1015_v21, 5  ;;  %v16656_v42 = vld [vmem:[#allocation4 + $0x78] sm:$0xff]   ;;  %15247 = vmatpush3.bf16.msra.mxu1 %v16655_v36 }
  0x61   : > { %470 = vst [vmem:[#allocation2 + $0xbc] sm:$0x1] %v17116_v0  ;;  %471 = vst [vmem:[#allocation2 + $0xc0] sm:$0xf] %v17116_v0  ;;  %v477_v40 = vld [vmem:[%s17249_s13] sm:$0xf]  ;;  %14960 = vmatprep.subr.bf16.mxu0 %v16656_v42 }
  0x62   : > { %472 = vst [vmem:[#allocation2 + $0xc4] sm:$0xf] %v17116_v0  ;;  %473 = vst [vmem:[#allocation2 + $0xc8] sm:$0x1] %v17116_v0  ;;  %v478_v41 = vld [vmem:[%s17249_s13 + $0x4] sm:$0xf] }
  0x63   : > { %474 = vst [vmem:[#allocation2 + $0xcc] sm:$0xf] %v17116_v0  ;;  %475 = vst [vmem:[#allocation2 + $0xd0] sm:$0xf] %v17116_v0  ;;  %v20791_v43 = vmov 0  ;;  %v637_v45 = vrot.slane %v633_v31, 4  ;;  %14961 = vmatpush3.bf16.msra.mxu0 %v16656_v42 }
  0x64   : > { %476 = vst [vmem:[#allocation2 + $0xd4] sm:$0x1] %v17116_v0  ;;  %vm17255_vm7 = vmor %vm992_vm0, %vm993_vm1  ;;  %v641_v46 = vrot.slane %v639_v32, 7  ;;  %v890_v47 = vld [vmem:[#allocation2 + $0x68] sm:$0x1]  ;;  %v512_v48 = vshrl.u32 %v477_v40, 16 }
  0x65   : > { %v20786_v25 = vsel %vm17255_vm7, 4294967295, %v20785_v25  ;;  %vm17261_vm8 = vmand %vm832_vm5, %vm373_vm2  ;;  %v16657_v49 = vld [vmem:[#allocation4 + $0x78] sm:$0xff]   ;;  %v1003_v50 = vrot.slane %v1002_v37, 4  ;;  %v1013_v51 = vrot.slane %v1012_v38, 4  ;;  %v20794_v52 = vmov 0  ;;  %v17294_v12 = vld [vmem:[#allocation4] sm:$0xff]  }
  0x66   : > { %20787 = vst [vmem:[#allocation10_spill] sm:$0xff] %v20786_v25  ;;  %v20789_v34 = vsel %vm17261_vm8, 4294967295, %v20788_v34  ;;  %vm17269_vm9 = vmor %vm323_vm3, %vm509_vm4  ;;  %v515_v53 = vshll.u32 %v477_v40, 16  ;;  %v520_v54 = vshrl.u32 %v478_v41, 16  ;;  %v644_v55 = vor.u32 %v642_v33, %v641_v46  ;;  %v493_v59 = vld [vmem:[%s17249_s13 + $0x40] sm:$0xf]  ;;  %15248 = vmatprep.subr.bf16.mxu1 %v16657_v49  ;;  %14978 = vmatprep.subr.bf16.mxu0 %v17294_v12 }
  0x67   : > { %20790 = vst [vmem:[#allocation11_spill] sm:$0xff] %v20789_v34  ;;  %v20792_v43 = vsel %vm17269_vm9, 4294967295, %v20791_v43  ;;  %vm17275_vm10 = vmand %vm839_vm6, %vm323_vm3  ;;  %v646_v56 = vrot.slane %v641_v46, 4  ;;  %v887_v57 = vsel %vm17261_vm8, %v636_v44, %v886_v35  ;;  %v514_v58 = vrot.slane %v512_v48, 7  ;;  %v834_v0 = vld [vmem:[#allocation2 + $0xc] sm:$0xf]  ;;  %15249 = vmatpush3.bf16.msra.mxu1 %v16657_v49 }
  0x68   : > { %20793 = vst [vmem:[#allocation12_spill] sm:$0xff] %v20792_v43  ;;  %v20795_v52 = vsel %vm17275_vm10, 4294967295, %v20794_v52  ;;  %v1008_v60 = vsel %vm17255_vm7, %v1003_v50, %v1007_v28  ;;  %v1018_v61 = vsel %vm17255_vm7, %v1013_v51, %v1017_v39  ;;  %888 = vst [vmem:[#allocation2 + $0x60] sm:$0xf] %v887_v57  ;;  %v522_v62 = vrot.slane %v520_v54, 7  ;;  %v17300_v20 = vld [vmem:[#allocation4] sm:$0xff]  }
  0x69   : > { %20796 = vst [vmem:[#allocation13_spill] sm:$0xff] %v20795_v52  ;;  %v523_v63 = vshll.u32 %v478_v41, 16  ;;  %v494_v1 = vld [vmem:[%s17249_s13 + $0x44] sm:$0xf]  ;;  %v13451_v2 = vcombine.low %v1008_v60, %v1018_v61  ;;  %v645_v3 = vsel %vm17269_vm9, %v637_v45, %v644_v55  ;;  %v891_v4 = vsel %vm17275_vm10, %v646_v56, %v890_v47  ;;  %v841_v6 = vld [vmem:[#allocation2 + $0x14] sm:$0x1]  ;;  %15266 = vmatprep.subr.bf16.mxu1 %v17300_v20 }
  0x6a   : > { %v517_v5 = vor.u32 %v515_v53, %v514_v58  ;;  %889 = vst.msk [vmem:[#allocation2 + $0x64] sm:$0xf] %vm832_vm5, %v645_v3  ;;  %892 = vst [vmem:[#allocation2 + $0x68] sm:$0x1] %v891_v4  ;;  %v518_v7 = vrot.slane %v514_v58, 4  ;;  %v527_v9 = vrot.slane %v522_v62, 4 }
  0x6b   : > { %v525_v8 = vor.u32 %v523_v63, %v522_v62  ;;  %v648_v10 = vshrl.u32 %v493_v59, 16  ;;  %v651_v13 = vshll.u32 %v493_v59, 16  ;;  %v656_v14 = vshrl.u32 %v494_v1, 16  ;;  %v893_v16 = vld [vmem:[#allocation2 + $0x6c] sm:$0xf]  ;;  %14962 = vmatprep.mubr.bf16.mxu0 %v13451_v2 }
  0x6c   : > { %v835_v11 = vsel %vm17261_vm8, %v517_v5, %v834_v0  ;;  %v659_v15 = vshll.u32 %v494_v1, 16  ;;  %v842_v18 = vsel %vm17275_vm10, %v527_v9, %v841_v6  ;;  %v479_v22 = vld [vmem:[%s17249_s13 + $0x8] sm:$0xf]  ;;  %v480_v23 = vld [vmem:[%s17249_s13 + $0xc] sm:$0xf]  ;;  %vm1598_vm11 = vcmask 1042432  }
  0x6d   : > { %v526_v17 = vsel %vm17269_vm9, %v518_v7, %v525_v8  ;;  %836 = vst [vmem:[#allocation2 + $0xc] sm:$0xf] %v835_v11  ;;  %v650_v19 = vrot.slane %v648_v10, 7  ;;  %843 = vst [vmem:[#allocation2 + $0x14] sm:$0x1] %v842_v18  ;;  %v658_v21 = vrot.slane %v656_v14, 7 }
  0x6e   : > { %838 = vst.msk [vmem:[#allocation2 + $0x10] sm:$0xf] %vm832_vm5, %v526_v17  ;;  %v897_v27 = vld [vmem:[#allocation2 + $0x74] sm:$0x1]  ;;  %v529_v28 = vshrl.u32 %v479_v22, 16  ;;  %v537_v32 = vshrl.u32 %v480_v23, 16 }
  0x6f   : > { %v653_v24 = vor.u32 %v651_v13, %v650_v19  ;;  %v654_v26 = vrot.slane %v650_v19, 4  ;;  %v4138_v29 = vld [vmem:[#allocation2 + $0x60] sm:$0xf]  ;;  %v661_v30 = vor.u32 %v659_v15, %v658_v21  ;;  %v663_v31 = vrot.slane %v658_v21, 4 }
  0x70   : > { %v540_v33 = vshll.u32 %v480_v23, 16  ;;  %v4179_v35 = vshrl.u32 %v4138_v29, 16  ;;  %v4182_v36 = vshll.u32 %v4138_v29, 16  ;;  %v531_v38 = vrot.slane %v529_v28, 7 }
  0x71   : > { %v894_v37 = vsel %vm17261_vm8, %v653_v24, %v893_v16  ;;  %v4139_v39 = vld [vmem:[#allocation2 + $0x64] sm:$0xf]  ;;  %v4170_v40 = vld [vmem:[#allocation2 + $0x68] sm:$0x1]  ;;  %v662_v41 = vsel %vm17269_vm9, %v654_v26, %v661_v30  ;;  %v898_v42 = vsel %vm17275_vm10, %v663_v31, %v897_v27  ;;  %v17313_v44 = vrot.slane %v537_v32, 7 }
  0x72   : > { %895 = vst [vmem:[#allocation2 + $0x6c] sm:$0xf] %v894_v37  ;;  %v4181_v45 = vrot.slane %v4179_v35, 4  ;;  %v4184_v46 = vrot.slane %v4182_v36, 5  ;;  %v4188_v47 = vshll.u32 %v4139_v39, 16  ;;  %v4192_v48 = vshrl.u32 %v4139_v39, 16 }
  0x73   : > { %896 = vst.msk [vmem:[#allocation2 + $0x70] sm:$0xf] %vm832_vm5, %v662_v41  ;;  %899 = vst [vmem:[#allocation2 + $0x74] sm:$0x1] %v898_v42  ;;  %v4198_v49 = vshll.u32 %v4170_v40, 16  ;;  %v532_v51 = vshll.u32 %v479_v22, 16  ;;  %v542_v59 = vor.u32 %v540_v33, %v17313_v44 }
  0x74   : > { %v954_v50 = vld [vmem:[#allocation2 + $0xc] sm:$0xf]  ;;  %v535_v53 = vrot.slane %v531_v38, 4  ;;  %v4185_v54 = vor.u32 %v4184_v46, %v4181_v45  ;;  %v4190_v55 = vrot.slane %v4188_v47, 5  ;;  %v4194_v56 = vrot.slane %v4192_v48, 4 }
  0x75   : > { %v955_v57 = vld [vmem:[#allocation2 + $0x10] sm:$0xf]  ;;  %v985_v58 = vld [vmem:[#allocation2 + $0x14] sm:$0x1]  ;;  %v4200_v60 = vrot.slane %v4198_v49, 5  ;;  %v1020_v61 = vshrl.u32 %v954_v50, 16  ;;  %v534_v7 = vor.u32 %v532_v51, %v531_v38 }
  0x76   : > { %v1023_v62 = vshll.u32 %v954_v50, 16  ;;  %v1029_v63 = vshll.u32 %v955_v57, 16  ;;  %v4186_v0 = vrot.slane %v4185_v54, 4  ;;  %v4195_v1 = vor.u32 %v4194_v56, %v4190_v55  ;;  %v844_v26 = vld [vmem:[#allocation2 + $0x18] sm:$0xf] }
  0x77   : > { %v1033_v2 = vshrl.u32 %v955_v57, 16  ;;  %v1039_v3 = vshll.u32 %v985_v58, 16  ;;  %v1022_v4 = vrot.slane %v1020_v61, 4  ;;  %v543_v19 = vsel %vm17269_vm9, %v535_v53, %v542_v59  ;;  %v848_v27 = vld [vmem:[#allocation2 + $0x20] sm:$0x1]  ;;  %v16660_v51 = vld [vmem:[#allocation4 + $0x8] sm:$0xff]  }
  0x78   : > { %v1025_v5 = vrot.slane %v1023_v62, 5  ;;  %v1031_v6 = vrot.slane %v1029_v63, 5  ;;  %v4191_v8 = vsel %vm17255_vm7, %v4186_v0, %v4190_v55  ;;  %v4196_v9 = vrot.slane %v4195_v1, 4  ;;  %847 = vst.msk [vmem:[#allocation2 + $0x1c] sm:$0xf] %vm832_vm5, %v543_v19  ;;  %v16661_v61 = vld [vmem:[#allocation4 + $0x8] sm:$0xff]  }
  0x79   : > { %v1035_v10 = vrot.slane %v1033_v2, 4  ;;  %v1041_v11 = vrot.slane %v1039_v3, 5  ;;  %v4140_v13 = vld [vmem:[#allocation2 + $0x6c] sm:$0xf]  ;;  %v495_v32 = vld [vmem:[%s17249_s13 + $0x48] sm:$0xf]  ;;  %v845_v47 = vsel %vm17261_vm8, %v534_v7, %v844_v26 }
  0x7a   : > { %v1026_v14 = vor.u32 %v1025_v5, %v1022_v4  ;;  %v4141_v15 = vld [vmem:[#allocation2 + $0x70] sm:$0xf]  ;;  %v4171_v16 = vld [vmem:[#allocation2 + $0x74] sm:$0x1]  ;;  %v4203_v17 = vshrl.u32 %v4140_v13, 16  ;;  %v4206_v18 = vshll.u32 %v4140_v13, 16  ;;  %v4201_v21 = vsel %vm17255_vm7, %v4196_v9, %v4200_v60 }
  0x7b   : > { %v1036_v22 = vor.u32 %v1035_v10, %v1031_v6  ;;  %v4212_v23 = vshll.u32 %v4141_v15, 16  ;;  %v4216_v24 = vshrl.u32 %v4141_v15, 16  ;;  %v13637_v28 = vcombine.low %v4191_v8, %v4201_v21  ;;  %v496_v38 = vld [vmem:[%s17249_s13 + $0x4c] sm:$0xf]  ;;  %v481_v48 = vld [vmem:[%s17249_s13 + $0x10] sm:$0xf] }
  0x7c   : > { %v1027_v29 = vrot.slane %v1026_v14, 4  ;;  %v4205_v30 = vrot.slane %v4203_v17, 4  ;;  %v4208_v31 = vrot.slane %v4206_v18, 5  ;;  %v4222_v37 = vshll.u32 %v4171_v16, 16  ;;  %846 = vst [vmem:[#allocation2 + $0x18] sm:$0xf] %v845_v47 }
  0x7d   : > { %v1037_v33 = vrot.slane %v1036_v22, 4  ;;  %v4214_v35 = vrot.slane %v4212_v23, 5  ;;  %v4218_v36 = vrot.slane %v4216_v24, 4  ;;  %15250 = vmatprep.mubr.bf16.mxu1 %v13637_v28  ;;  %v544_v41 = vrot.slane %v17313_v44, 4  ;;  %v900_v58 = vld [vmem:[#allocation2 + $0x78] sm:$0xf] }
  0x7e   : > { %v1032_v39 = vsel %vm17255_vm7, %v1027_v29, %v1031_v6  ;;  %v4209_v40 = vor.u32 %v4208_v31, %v4205_v30  ;;  %v4224_v46 = vrot.slane %v4222_v37, 5  ;;  %v665_v54 = vshrl.u32 %v495_v32, 16  ;;  %v482_v59 = vld [vmem:[%s17249_s13 + $0x14] sm:$0xf]  ;;  %v904_v0 = vld [vmem:[#allocation2 + $0x80] sm:$0x1] }
  0x7f   : > { %v1042_v42 = vsel %vm17255_vm7, %v1037_v33, %v1041_v11  ;;  %v4219_v45 = vor.u32 %v4218_v36, %v4214_v35  ;;  %v849_v53 = vsel %vm17275_vm10, %v544_v41, %v848_v27  ;;  %v668_v44 = vshll.u32 %v495_v32, 16  ;;  %v957_v62 = vld [vmem:[#allocation2 + $0x1c] sm:$0xf]  ;;  %v851_v7 = vld [vmem:[#allocation2 + $0x24] sm:$0xf]  ;;  %v16664_v37 = vld [vmem:[#allocation4 + $0x18] sm:$0xff]  }
  0x80   : > { %v13452_v49 = vcombine.low %v1032_v39, %v1042_v42  ;;  %v4210_v50 = vrot.slane %v4209_v40, 4  ;;  %850 = vst [vmem:[#allocation2 + $0x20] sm:$0x1] %v849_v53  ;;  %v673_v56 = vshrl.u32 %v496_v38, 16  ;;  %v676_v57 = vshll.u32 %v496_v38, 16  ;;  %v16662_v8 = vld [vmem:[#allocation4 + $0x10] sm:$0xff]  }
  0x81   : > { %v4220_v55 = vrot.slane %v4219_v45, 4  ;;  %v667_v63 = vrot.slane %v665_v54, 7  ;;  %v546_v1 = vshrl.u32 %v481_v48, 16  ;;  %v549_v2 = vshll.u32 %v481_v48, 16  ;;  %v497_v22 = vld [vmem:[%s17249_s13 + $0x50] sm:$0xf] }
  0x82   : > { %14963 = vmatmul.mubr.bf16.vlgmr.msra.gmra.mrb[0].mxu0 %v13452_v49  ;;  %v4215_v60 = vsel %vm17255_vm7, %v4210_v50, %v4214_v35  ;;  %v1053_v4 = vshll.u32 %v957_v62, 16  ;;  %v1057_v5 = vshrl.u32 %v957_v62, 16  ;;  %v675_v6 = vrot.slane %v673_v56, 7  ;;  %v855_v29 = vld [vmem:[#allocation2 + $0x2c] sm:$0x1]  ;;  %v16663_v31 = vld [vmem:[#allocation4 + $0x10] sm:$0xff]  }
  0x83   : > { %v4225_v3 = vsel %vm17255_vm7, %v4220_v55, %v4224_v46  ;;  %14979 = vmatpush3.bf16.msra.mxu0 %v17294_v12  ;;  %v670_v10 = vor.u32 %v668_v44, %v667_v63  ;;  %v671_v11 = vrot.slane %v667_v63, 4  ;;  %v548_v13 = vrot.slane %v546_v1, 7  ;;  %v956_v23 = vld [vmem:[#allocation2 + $0x18] sm:$0xf]  ;;  %v498_v30 = vld [vmem:[%s17249_s13 + $0x54] sm:$0xf] }
  0x84   : > { %v13638_v9 = vcombine.low %v4215_v60, %v4225_v3  ;;  %14980 = vmatprep.subr.bf16.mxu0 %v16660_v51  ;;  %v17342_v14 = vrot.slane %v1053_v4, 5  ;;  %v1059_v15 = vrot.slane %v1057_v5, 4  ;;  %v678_v16 = vor.u32 %v676_v57, %v675_v6  ;;  %v17358_v42 = vld [vmem:[%s17249_s13 + $0x18] sm:$0xf]  ;;  %v17361_v54 = vld [vmem:[%s17249_s13 + $0x1c] sm:$0xf] }
  0x85   : > { %v680_v17 = vrot.slane %v675_v6, 4  ;;  %v901_v12 = vsel %vm17261_vm8, %v670_v10, %v900_v58  ;;  %v551_v18 = vor.u32 %v549_v2, %v548_v13  ;;  %v552_v19 = vrot.slane %v548_v13, 4  ;;  %v907_v57 = vld [vmem:[#allocation2 + $0x84] sm:$0xf]  ;;  %v16665_v58 = vld [vmem:[#allocation4 + $0x18] sm:$0xff]   ;;  %v16666_v60 = vld [vmem:[#allocation4 + $0x20] sm:$0xff]  }
  0x86   : > { %15251 = vmatmul.mubr.bf16.vlgmr.msra.gmra.mrb[0].mxu1 %v13638_v9  ;;  %v554_v21 = vshrl.u32 %v482_v59, 16  ;;  %v1060_v24 = vor.u32 %v1059_v15, %v17342_v14  ;;  %v679_v26 = vsel %vm17269_vm9, %v671_v11, %v678_v16  ;;  %902 = vst [vmem:[#allocation2 + $0x78] sm:$0xf] %v901_v12  ;;  %v557_v28 = vshll.u32 %v482_v59, 16  ;;  %v17028_v34 = vld [vmem:[#allocation2 + $0x6c] sm:$0xf] }
  0x87   : > { %15267 = vmatpush3.bf16.msra.mxu1 %v17300_v20  ;;  %14981 = vmatpush3.bf16.msra.mxu0 %v16660_v51  ;;  %v905_v27 = vsel %vm17275_vm10, %v680_v17, %v904_v0  ;;  %v986_v32 = vld [vmem:[#allocation2 + $0x20] sm:$0x1]  ;;  %v1044_v33 = vshrl.u32 %v956_v23, 16  ;;  %v1047_v20 = vshll.u32 %v956_v23, 16  ;;  %903 = vst.msk [vmem:[#allocation2 + $0x7c] sm:$0xf] %vm832_vm5, %v679_v26  ;;  %v852_v36 = vsel %vm17261_vm8, %v551_v18, %v851_v7 }
  0x88   : > { %15268 = vmatprep.subr.bf16.mxu1 %v16661_v61  ;;  %906 = vst [vmem:[#allocation2 + $0x80] sm:$0x1] %v905_v27  ;;  %v556_v35 = vrot.slane %v554_v21, 7  ;;  %14982 = vmatprep.subr.bf16.mxu0 %v16662_v8  ;;  %v1061_v38 = vrot.slane %v1060_v24, 4  ;;  %v1063_v39 = vshll.u32 %v986_v32, 16  ;;  %v682_v40 = vshrl.u32 %v497_v22, 16 }
  0x89   : > { %853 = vst [vmem:[#allocation2 + $0x24] sm:$0xf] %v852_v36  ;;  %v685_v41 = vshll.u32 %v497_v22, 16  ;;  %v1046_v45 = vrot.slane %v1044_v33, 4  ;;  %v1049_v46 = vrot.slane %v1047_v20, 5  ;;  %v690_v51 = vshrl.u32 %v498_v30, 16 }
  0x8a   : > { %v559_v47 = vor.u32 %v557_v28, %v556_v35  ;;  %v561_v48 = vrot.slane %v556_v35, 4  ;;  %v1065_v49 = vrot.slane %v1063_v39, 5  ;;  %v684_v50 = vrot.slane %v682_v40, 7  ;;  %v16667_v18 = vld [vmem:[#allocation4 + $0x20] sm:$0xff]   ;;  %v16668_v24 = vld [vmem:[#allocation4 + $0x28] sm:$0xff]   ;;  %v16670_v35 = vld [vmem:[#allocation4 + $0x30] sm:$0xff]  }
  0x8b   : > { %15269 = vmatpush3.bf16.msra.mxu1 %v16661_v61  ;;  %v693_v53 = vshll.u32 %v498_v30, 16  ;;  %14983 = vmatpush3.bf16.msra.mxu0 %v16662_v8  ;;  %v1050_v55 = vor.u32 %v1049_v46, %v1046_v45  ;;  %v563_v59 = vshrl.u32 %v17358_v42, 16  ;;  %v692_v0 = vrot.slane %v690_v51, 7  ;;  %v16669_v30 = vld [vmem:[#allocation4 + $0x28] sm:$0xff]   ;;  %v911_v20 = vld [vmem:[#allocation2 + $0x8c] sm:$0x1] }
  0x8c   : > { %v560_v44 = vsel %vm17269_vm9, %v552_v19, %v559_v47  ;;  %v856_v56 = vsel %vm17275_vm10, %v561_v48, %v855_v29  ;;  %15270 = vmatprep.subr.bf16.mxu1 %v16663_v31  ;;  %14984 = vmatprep.subr.bf16.mxu0 %v16664_v37  ;;  %v1066_v61 = vsel %vm17255_vm7, %v1061_v38, %v1065_v49  ;;  %v688_v63 = vrot.slane %v684_v50, 4 }
  0x8d   : > { %854 = vst.msk [vmem:[#allocation2 + $0x28] sm:$0xf] %vm832_vm5, %v560_v44  ;;  %857 = vst [vmem:[#allocation2 + $0x2c] sm:$0x1] %v856_v56  ;;  %v687_v62 = vor.u32 %v685_v41, %v684_v50  ;;  %v1051_v1 = vrot.slane %v1050_v55, 4  ;;  %v17371_v3 = vrot.slane %v563_v59, 7  ;;  %v695_v10 = vor.u32 %v693_v53, %v692_v0 }
  0x8e   : > { %v4142_v2 = vld [vmem:[#allocation2 + $0x78] sm:$0xf]  ;;  %v566_v4 = vshll.u32 %v17358_v42, 16  ;;  %v571_v5 = vshrl.u32 %v17361_v54, 16  ;;  %v4143_v6 = vld [vmem:[#allocation2 + $0x7c] sm:$0xf] }
  0x8f   : > { %v4172_v7 = vld [vmem:[#allocation2 + $0x80] sm:$0x1]  ;;  %v4227_v8 = vshrl.u32 %v4142_v2, 16  ;;  %v4230_v9 = vshll.u32 %v4142_v2, 16  ;;  %v908_v11 = vsel %vm17261_vm8, %v687_v62, %v907_v57  ;;  %15271 = vmatpush3.bf16.msra.mxu1 %v16663_v31  ;;  %14985 = vmatpush3.bf16.msra.mxu0 %v16664_v37  ;;  %v1056_v13 = vsel %vm17255_vm7, %v1051_v1, %v17342_v14  ;;  %v858_v53 = vld [vmem:[#allocation2 + $0x30] sm:$0xf] }
  0x90   : > { %v4236_v15 = vshll.u32 %v4143_v6, 16  ;;  %v4240_v16 = vshrl.u32 %v4143_v6, 16  ;;  %v4246_v17 = vshll.u32 %v4172_v7, 16  ;;  %v958_v12 = vld [vmem:[#allocation2 + $0x24] sm:$0xf]  ;;  %15272 = vmatprep.subr.bf16.mxu1 %v16665_v58  ;;  %14986 = vmatprep.subr.bf16.mxu0 %v16666_v60  ;;  %v13453_v19 = vcombine.low %v1056_v13, %v1066_v61  ;;  %v16672_v2 = vld [vmem:[#allocation4 + $0x38] sm:$0xff]  }
  0x91   : > { %909 = vst [vmem:[#allocation2 + $0x84] sm:$0xf] %v908_v11  ;;  %v4229_v21 = vrot.slane %v4227_v8, 4  ;;  %v4232_v22 = vrot.slane %v4230_v9, 5  ;;  %v1068_v23 = vshrl.u32 %v958_v12, 16  ;;  %v1071_v29 = vshll.u32 %v958_v12, 16 }
  0x92   : > { %v4238_v26 = vrot.slane %v4236_v15, 5  ;;  %v4242_v27 = vrot.slane %v4240_v16, 4  ;;  %v4248_v28 = vrot.slane %v4246_v17, 5  ;;  %14966 = vmatprep.mubr.bf16.mxu0 %v13453_v19  ;;  %v696_v32 = vsel %vm17269_vm9, %v688_v63, %v695_v10  ;;  %v862_v55 = vld [vmem:[#allocation2 + $0x38] sm:$0x1] }
  0x93   : > { %v4233_v14 = vor.u32 %v4232_v22, %v4229_v21  ;;  %v1070_v31 = vrot.slane %v1068_v23, 4  ;;  %v697_v33 = vrot.slane %v692_v0, 4  ;;  %15273 = vmatpush3.bf16.msra.mxu1 %v16665_v58  ;;  %v1073_v39 = vrot.slane %v1071_v29, 5  ;;  %910 = vst.msk [vmem:[#allocation2 + $0x88] sm:$0xf] %vm832_vm5, %v696_v32  ;;  %14987 = vmatpush3.bf16.msra.mxu0 %v16666_v60  ;;  %v16671_v60 = vld [vmem:[#allocation4 + $0x30] sm:$0xff]  }
  0x94   : > { %v4243_v36 = vor.u32 %v4242_v27, %v4238_v26  ;;  %v17382_v37 = vld [vmem:[#allocation2 + $0x28] sm:$0xf]  ;;  %v987_v38 = vld [vmem:[#allocation2 + $0x2c] sm:$0x1]  ;;  %v568_v40 = vor.u32 %v566_v4, %v17371_v3  ;;  %v569_v41 = vrot.slane %v17371_v3, 4  ;;  %15274 = vmatprep.subr.bf16.mxu1 %v16667_v18  ;;  %14988 = vmatprep.subr.bf16.mxu0 %v16668_v24  ;;  %v573_v51 = vrot.slane %v571_v5, 7 }
  0x95   : > { %v4234_v42 = vrot.slane %v4233_v14, 4  ;;  %v1077_v45 = vshll.u32 %v17382_v37, 16  ;;  %v1081_v46 = vshrl.u32 %v17382_v37, 16  ;;  %v1087_v47 = vshll.u32 %v987_v38, 16  ;;  %v499_v1 = vld [vmem:[%s17249_s13 + $0x58] sm:$0xf] }
  0x96   : > { %v4244_v48 = vrot.slane %v4243_v36, 4  ;;  %v1074_v49 = vor.u32 %v1073_v39, %v1070_v31  ;;  %v912_v50 = vsel %vm17275_vm10, %v697_v33, %v911_v20  ;;  %v574_v5 = vshll.u32 %v17361_v54, 16  ;;  %v500_v7 = vld [vmem:[%s17249_s13 + $0x5c] sm:$0xf]  ;;  %v914_v22 = vld [vmem:[#allocation2 + $0x90] sm:$0xf] }
  0x97   : > { %v4239_v44 = vsel %vm17255_vm7, %v4234_v42, %v4238_v26  ;;  %v1079_v56 = vrot.slane %v1077_v45, 5  ;;  %v1083_v57 = vrot.slane %v1081_v46, 4  ;;  %v1089_v58 = vrot.slane %v1087_v47, 5  ;;  %913 = vst [vmem:[#allocation2 + $0x8c] sm:$0x1] %v912_v50  ;;  %15275 = vmatpush3.bf16.msra.mxu1 %v16667_v18  ;;  %14989 = vmatpush3.bf16.msra.mxu0 %v16668_v24  ;;  %v16673_v23 = vld [vmem:[#allocation4 + $0x38] sm:$0xff]  }
  0x98   : > { %v17393_v59 = vld [vmem:[#allocation2 + $0x84] sm:$0xf]  ;;  %v4249_v61 = vsel %vm17255_vm7, %v4244_v48, %v4248_v28  ;;  %v1075_v62 = vrot.slane %v1074_v49, 4  ;;  %15276 = vmatprep.subr.bf16.mxu1 %v16669_v30  ;;  %v578_v6 = vrot.slane %v573_v51, 4  ;;  %14990 = vmatprep.subr.bf16.mxu0 %v16670_v35  ;;  %v859_v11 = vsel %vm17261_vm8, %v568_v40, %v858_v53  ;;  %v485_v29 = vld [vmem:[%s17249_s13 + $0x20] sm:$0xf] }
  0x99   : > { %v4251_v63 = vshrl.u32 %v17393_v59, 16  ;;  %v4254_v0 = vshll.u32 %v17393_v59, 16  ;;  %v13639_v3 = vcombine.low %v4239_v44, %v4249_v61  ;;  %v1084_v4 = vor.u32 %v1083_v57, %v1079_v56  ;;  %860 = vst [vmem:[#allocation2 + $0x30] sm:$0xf] %v859_v11  ;;  %v17418_v20 = vld [vmem:[#allocation4 + $0x80] sm:$0xff]  }
  0x9a   : > { %v1080_v8 = vsel %vm17255_vm7, %v1075_v62, %v1079_v56  ;;  %v17406_v15 = vld [vmem:[#allocation2 + $0x88] sm:$0xf]  ;;  %v576_v16 = vor.u32 %v574_v5, %v573_v51  ;;  %v863_v54 = vsel %vm17275_vm10, %v578_v6, %v862_v55  ;;  %v699_v17 = vshrl.u32 %v499_v1, 16  ;;  %v486_v40 = vld [vmem:[%s17249_s13 + $0x24] sm:$0xf]  ;;  %v17423_v48 = vld [vmem:[#allocation4 + $0x80] sm:$0xff]  }
  0x9b   : > { %v4253_v9 = vrot.slane %v4251_v63, 4  ;;  %v4256_v10 = vrot.slane %v4254_v0, 5  ;;  %15254 = vmatprep.mubr.bf16.mxu1 %v13639_v3  ;;  %v1085_v13 = vrot.slane %v1084_v4, 4  ;;  %15277 = vmatpush3.bf16.msra.mxu1 %v16669_v30  ;;  %v4260_v18 = vshll.u32 %v17406_v15, 16  ;;  %864 = vst [vmem:[#allocation2 + $0x38] sm:$0x1] %v863_v54 }
  0x9c   : > { %v4264_v19 = vshrl.u32 %v17406_v15, 16  ;;  %v702_v21 = vshll.u32 %v499_v1, 16  ;;  %15278 = vmatprep.subr.bf16.mxu1 %v16671_v60  ;;  %14991 = vmatpush3.bf16.msra.mxu0 %v16670_v35  ;;  %v577_v26 = vsel %vm17269_vm9, %v569_v41, %v576_v16  ;;  %v701_v27 = vrot.slane %v699_v17, 7  ;;  %v918_v46 = vld [vmem:[#allocation2 + $0x98] sm:$0x1] }
  0x9d   : > { %v4257_v12 = vor.u32 %v4256_v10, %v4253_v9  ;;  %v1090_v24 = vsel %vm17255_vm7, %v1085_v13, %v1089_v58  ;;  %v707_v28 = vshrl.u32 %v500_v7, 16  ;;  %14992 = vmatprep.subr.bf16.mxu0 %v16672_v2  ;;  %v4262_v32 = vrot.slane %v4260_v18, 5  ;;  %861 = vst.msk [vmem:[#allocation2 + $0x34] sm:$0xf] %vm832_vm5, %v577_v26  ;;  %v865_v5 = vld [vmem:[#allocation2 + $0x3c] sm:$0xf] }
  0x9e   : > { %v13454_v30 = vcombine.low %v1080_v8, %v1090_v24  ;;  %v4173_v14 = vld [vmem:[#allocation2 + $0x8c] sm:$0x1]  ;;  %v4266_v33 = vrot.slane %v4264_v19, 4  ;;  %v704_v36 = vor.u32 %v702_v21, %v701_v27  ;;  %v705_v38 = vrot.slane %v701_v27, 4  ;;  %v501_v6 = vld [vmem:[%s17249_s13 + $0x60] sm:$0xf] }
  0x9f   : > { %v4258_v31 = vrot.slane %v4257_v12, 4  ;;  %v4270_v35 = vshll.u32 %v4173_v14, 16  ;;  %v709_v39 = vrot.slane %v707_v28, 7  ;;  %15279 = vmatpush3.bf16.msra.mxu1 %v16671_v60  ;;  %v710_v45 = vshll.u32 %v500_v7, 16  ;;  %v502_v12 = vld [vmem:[%s17249_s13 + $0x64] sm:$0xf] }
  0xa0   : > { %14967 = vmatmul.mubr.bf16.gmra.mrb[4].mxu0 %v13454_v30  ;;  %v4267_v42 = vor.u32 %v4266_v33, %v4262_v32  ;;  %v580_v47 = vshrl.u32 %v485_v29, 16  ;;  %15280 = vmatprep.subr.bf16.mxu1 %v16673_v23  ;;  %v915_v51 = vsel %vm17261_vm8, %v704_v36, %v914_v22  ;;  %v583_v53 = vshll.u32 %v485_v29, 16  ;;  %v17427_v44 = vld [vmem:[#allocation2 + $0x30] sm:$0xf]  ;;  %v869_v21 = vld [vmem:[#allocation2 + $0x44] sm:$0x1] }
  0xa1   : > { %v4263_v41 = vsel %vm17255_vm7, %v4258_v31, %v4262_v32  ;;  %v4272_v49 = vrot.slane %v4270_v35, 5  ;;  %v714_v50 = vrot.slane %v709_v39, 4  ;;  %14993 = vmatpush3.bf16.msra.mxu0 %v16672_v2  ;;  %v712_v56 = vor.u32 %v710_v45, %v709_v39  ;;  %916 = vst [vmem:[#allocation2 + $0x90] sm:$0xf] %v915_v51  ;;  %v921_v29 = vld [vmem:[#allocation2 + $0x9c] sm:$0xf] }
  0xa2   : > { %v4268_v55 = vrot.slane %v4267_v42, 4  ;;  %v582_v57 = vrot.slane %v580_v47, 7  ;;  %v588_v58 = vshrl.u32 %v486_v40, 16  ;;  %15010 = vmatprep.subr.bf16.mxu0 %v17418_v20  ;;  %v17430_v60 = vld [vmem:[#allocation2 + $0x38] sm:$0x1]  ;;  %v1092_v61 = vshrl.u32 %v17427_v44, 16 }
  0xa3   : > { %v1095_v62 = vshll.u32 %v17427_v44, 16  ;;  %v919_v63 = vsel %vm17275_vm10, %v714_v50, %v918_v46  ;;  %v591_v0 = vshll.u32 %v486_v40, 16  ;;  %15281 = vmatpush3.bf16.msra.mxu1 %v16673_v23  ;;  %v1111_v2 = vshll.u32 %v17430_v60, 16  ;;  %v487_v40 = vld [vmem:[%s17249_s13 + $0x28] sm:$0xf] }
  0xa4   : > { %v4273_v1 = vsel %vm17255_vm7, %v4268_v55, %v4272_v49  ;;  %v713_v3 = vsel %vm17269_vm9, %v705_v38, %v712_v56  ;;  %920 = vst [vmem:[#allocation2 + $0x98] sm:$0x1] %v919_v63  ;;  %v585_v4 = vor.u32 %v583_v53, %v582_v57  ;;  %15298 = vmatprep.subr.bf16.mxu1 %v17423_v48  ;;  %v17443_v8 = vld [vmem:[#allocation2 + $0x34] sm:$0xf]  ;;  %v1094_v9 = vrot.slane %v1092_v61, 4 }
  0xa5   : > { %v13640_v7 = vcombine.low %v4263_v41, %v4273_v1  ;;  %v1097_v10 = vrot.slane %v1095_v62, 5  ;;  %917 = vst.msk [vmem:[#allocation2 + $0x94] sm:$0xf] %vm832_vm5, %v713_v3  ;;  %v586_v11 = vrot.slane %v582_v57, 4  ;;  %v1101_v13 = vshll.u32 %v17443_v8, 16 }
  0xa6   : > { %v1105_v16 = vshrl.u32 %v17443_v8, 16  ;;  %v1113_v54 = vrot.slane %v1111_v2, 5  ;;  %v590_v17 = vrot.slane %v588_v58, 7  ;;  %v866_v19 = vsel %vm17261_vm8, %v585_v4, %v865_v5  ;;  %v925_v1 = vld [vmem:[#allocation2 + $0xa4] sm:$0x1] }
  0xa7   : > { %15255 = vmatmul.mubr.bf16.gmra.mrb[4].mxu1 %v13640_v7  ;;  %v1098_v18 = vor.u32 %v1097_v10, %v1094_v9  ;;  %v716_v22 = vshrl.u32 %v501_v6, 16  ;;  %v719_v23 = vshll.u32 %v501_v6, 16  ;;  %v1103_v24 = vrot.slane %v1101_v13, 5  ;;  %867 = vst [vmem:[#allocation2 + $0x3c] sm:$0xf] %v866_v19 }
  0xa8   : > { %v1107_v26 = vrot.slane %v1105_v16, 4  ;;  %v593_v27 = vor.u32 %v591_v0, %v590_v17  ;;  %v595_v28 = vrot.slane %v590_v17, 4  ;;  %v17451_v14 = vld [vmem:[#allocation2 + $0x90] sm:$0xf]  ;;  %v724_v32 = vshrl.u32 %v502_v12, 16 }
  0xa9   : > { %v1099_v30 = vrot.slane %v1098_v18, 4  ;;  %v718_v31 = vrot.slane %v716_v22, 7  ;;  %v727_v33 = vshll.u32 %v502_v12, 16  ;;  %v4275_v36 = vshrl.u32 %v17451_v14, 16  ;;  %v488_v9 = vld [vmem:[%s17249_s13 + $0x2c] sm:$0xf] }
  0xaa   : > { %v1108_v35 = vor.u32 %v1107_v26, %v1103_v24  ;;  %v4278_v38 = vshll.u32 %v17451_v14, 16  ;;  %v594_v39 = vsel %vm17269_vm9, %v586_v11, %v593_v27  ;;  %v870_v45 = vsel %vm17275_vm10, %v595_v28, %v869_v21  ;;  %v872_v26 = vld [vmem:[#allocation2 + $0x48] sm:$0xf]  ;;  %v17690_v25 = vld [vmem:[#allocation2 + $0x30] sm:$0xe] }
  0xab   : > { %v1104_v41 = vsel %vm17255_vm7, %v1099_v30, %v1103_v24  ;;  %v17460_v42 = vld [vmem:[#allocation2 + $0x98] sm:$0x1]  ;;  %868 = vst.msk [vmem:[#allocation2 + $0x40] sm:$0xf] %vm832_vm5, %v594_v39  ;;  %v721_v46 = vor.u32 %v719_v23, %v718_v31  ;;  %v722_v47 = vrot.slane %v718_v31, 4  ;;  %v4277_v51 = vrot.slane %v4275_v36, 4 }
  0xac   : > { %v1109_v49 = vrot.slane %v1108_v35, 4  ;;  %v17465_v50 = vld [vmem:[#allocation2 + $0x94] sm:$0xf]  ;;  %v4280_v53 = vrot.slane %v4278_v38, 5  ;;  %v4294_v55 = vshll.u32 %v17460_v42, 16  ;;  %v726_v58 = vrot.slane %v724_v32, 7 }
  0xad   : > { %871 = vst [vmem:[#allocation2 + $0x44] sm:$0x1] %v870_v45  ;;  %v4284_v56 = vshll.u32 %v17465_v50, 16  ;;  %v4288_v57 = vshrl.u32 %v17465_v50, 16  ;;  %v922_v61 = vsel %vm17261_vm8, %v721_v46, %v921_v29  ;;  %v597_v2 = vshrl.u32 %v487_v40, 16  ;;  %20805 = vst [vmem:[#allocation22_spill] sm:$0xff] %v17690_v25 }
  0xae   : > { %v1114_v62 = vsel %vm17255_vm7, %v1109_v49, %v1113_v54  ;;  %v4281_v63 = vor.u32 %v4280_v53, %v4277_v51  ;;  %v4296_v0 = vrot.slane %v4294_v55, 5  ;;  %923 = vst [vmem:[#allocation2 + $0x9c] sm:$0xf] %v922_v61  ;;  %v17474_v6 = vld [vmem:[#allocation2 + $0x3c] sm:$0xf]  ;;  %v729_v7 = vor.u32 %v727_v33, %v726_v58 }
  0xaf   : > { %v13455_v3 = vcombine.low %v1104_v41, %v1114_v62  ;;  %v4286_v4 = vrot.slane %v4284_v56, 5  ;;  %v4290_v5 = vrot.slane %v4288_v57, 4  ;;  %v1116_v11 = vshrl.u32 %v17474_v6, 16  ;;  %v503_v32 = vld [vmem:[%s17249_s13 + $0x68] sm:$0xf] }
  0xb0   : > { %v4282_v10 = vrot.slane %v4281_v63, 4  ;;  %v1119_v13 = vshll.u32 %v17474_v6, 16  ;;  %v731_v16 = vrot.slane %v726_v58, 4  ;;  %v730_v17 = vsel %vm17269_vm9, %v722_v47, %v729_v7  ;;  %v504_v47 = vld [vmem:[%s17249_s13 + $0x6c] sm:$0xf] }
  0xb1   : > { %14970 = vmatprep.mubr.bf16.mxu0 %v13455_v3  ;;  %v4291_v54 = vor.u32 %v4290_v5, %v4286_v4  ;;  %v599_v12 = vrot.slane %v597_v2, 7  ;;  %v600_v18 = vshll.u32 %v487_v40, 16  ;;  %v1118_v22 = vrot.slane %v1116_v11, 4  ;;  %924 = vst.msk [vmem:[#allocation2 + $0xa0] sm:$0xf] %vm832_vm5, %v730_v17 }
  0xb2   : > { %v4287_v19 = vsel %vm17255_vm7, %v4282_v10, %v4286_v4  ;;  %v17483_v21 = vld [vmem:[#allocation2 + $0x40] sm:$0xf]  ;;  %v1121_v23 = vrot.slane %v1119_v13, 5  ;;  %v926_v24 = vsel %vm17275_vm10, %v731_v16, %v925_v1  ;;  %v605_v38 = vshrl.u32 %v488_v9, 16  ;;  %v876_v62 = vld [vmem:[#allocation2 + $0x50] sm:$0x1] }
  0xb3   : > { %v4292_v27 = vrot.slane %v4291_v54, 4  ;;  %v1125_v29 = vshll.u32 %v17483_v21, 16  ;;  %v1129_v30 = vshrl.u32 %v17483_v21, 16  ;;  %927 = vst [vmem:[#allocation2 + $0xa4] sm:$0x1] %v926_v24  ;;  %v602_v31 = vor.u32 %v600_v18, %v599_v12 }
  0xb4   : > { %v17488_v28 = vld [vmem:[#allocation2 + $0x44] sm:$0x1]  ;;  %v1122_v33 = vor.u32 %v1121_v23, %v1118_v22  ;;  %v603_v36 = vrot.slane %v599_v12, 4  ;;  %v608_v46 = vshll.u32 %v488_v9, 16  ;;  %v607_v58 = vrot.slane %v605_v38, 7 }
  0xb5   : > { %v1135_v35 = vshll.u32 %v17488_v28, 16  ;;  %v4297_v39 = vsel %vm17255_vm7, %v4292_v27, %v4296_v0  ;;  %v1127_v40 = vrot.slane %v1125_v29, 5  ;;  %v1131_v41 = vrot.slane %v1129_v30, 4  ;;  %v17496_v45 = vld [vmem:[#allocation2 + $0x9c] sm:$0xf] }
  0xb6   : > { %v13641_v49 = vcombine.low %v4287_v19, %v4297_v39  ;;  %v1123_v51 = vrot.slane %v1122_v33, 4  ;;  %v4299_v55 = vshrl.u32 %v17496_v45, 16  ;;  %v4302_v57 = vshll.u32 %v17496_v45, 16  ;;  %v489_v10 = vld [vmem:[%s17249_s13 + $0x30] sm:$0xf] }
  0xb7   : > { %v1137_v53 = vrot.slane %v1135_v35, 5  ;;  %v1132_v56 = vor.u32 %v1131_v41, %v1127_v40  ;;  %v873_v61 = vsel %vm17261_vm8, %v602_v31, %v872_v26  ;;  %v733_v1 = vshrl.u32 %v503_v32, 16  ;;  %v928_v12 = vld [vmem:[#allocation2 + $0xa8] sm:$0xf]  ;;  %v490_v18 = vld [vmem:[%s17249_s13 + $0x34] sm:$0xf] }
  0xb8   : > { %15258 = vmatprep.mubr.bf16.mxu1 %v13641_v49  ;;  %v1128_v63 = vsel %vm17255_vm7, %v1123_v51, %v1127_v40  ;;  %v4301_v0 = vrot.slane %v4299_v55, 4  ;;  %874 = vst [vmem:[#allocation2 + $0x48] sm:$0xf] %v873_v61  ;;  %v736_v2 = vshll.u32 %v503_v32, 16  ;;  %v17505_v4 = vld [vmem:[#allocation2 + $0xa0] sm:$0xf]  ;;  %v610_v7 = vor.u32 %v608_v46, %v607_v58 }
  0xb9   : > { %v1133_v3 = vrot.slane %v1132_v56, 4  ;;  %v4304_v5 = vrot.slane %v4302_v57, 5  ;;  %v612_v9 = vrot.slane %v607_v58, 4  ;;  %v4308_v13 = vshll.u32 %v17505_v4, 16  ;;  %v932_v41 = vld [vmem:[#allocation2 + $0xb0] sm:$0x1] }
  0xba   : > { %v17508_v11 = vld [vmem:[#allocation2 + $0xa4] sm:$0x1]  ;;  %v4312_v16 = vshrl.u32 %v17505_v4, 16  ;;  %v735_v54 = vrot.slane %v733_v1, 7  ;;  %v741_v17 = vshrl.u32 %v504_v47, 16  ;;  %v611_v24 = vsel %vm17269_vm9, %v603_v36, %v610_v7 }
  0xbb   : > { %v1138_v19 = vsel %vm17255_vm7, %v1133_v3, %v1137_v53  ;;  %v4305_v22 = vor.u32 %v4304_v5, %v4301_v0  ;;  %v4318_v23 = vshll.u32 %v17508_v11, 16  ;;  %v4310_v27 = vrot.slane %v4308_v13, 5  ;;  %875 = vst.msk [vmem:[#allocation2 + $0x4c] sm:$0xf] %vm832_vm5, %v611_v24 }
  0xbc   : > { %v13456_v26 = vcombine.low %v1128_v63, %v1138_v19  ;;  %v4314_v29 = vrot.slane %v4312_v16, 4  ;;  %v877_v30 = vsel %vm17275_vm10, %v612_v9, %v876_v62  ;;  %v738_v33 = vor.u32 %v736_v2, %v735_v54  ;;  %v505_v62 = vld [vmem:[%s17249_s13 + $0x70] sm:$0xf] }
  0xbd   : > { %v4306_v31 = vrot.slane %v4305_v22, 4  ;;  %v4320_v32 = vrot.slane %v4318_v23, 5  ;;  %878 = vst [vmem:[#allocation2 + $0x50] sm:$0x1] %v877_v30  ;;  %v739_v35 = vrot.slane %v735_v54, 4  ;;  %v743_v39 = vrot.slane %v741_v17, 7 }
  0xbe   : > { %14971 = vmatmul.mubr.bf16.gmra.mrb[8].mxu0 %v13456_v26  ;;  %v4315_v38 = vor.u32 %v4314_v29, %v4310_v27  ;;  %v744_v40 = vshll.u32 %v504_v47, 16  ;;  %v614_v36 = vshrl.u32 %v489_v10, 16  ;;  %v929_v51 = vsel %vm17261_vm8, %v738_v33, %v928_v12  ;;  %v879_v47 = vld [vmem:[#allocation2 + $0x54] sm:$0xf] }
  0xbf   : > { %v4311_v46 = vsel %vm17255_vm7, %v4306_v31, %v4310_v27  ;;  %v17523_v49 = vld [vmem:[#allocation2 + $0x48] sm:$0xf]  ;;  %v617_v53 = vshll.u32 %v489_v10, 16  ;;  %v622_v55 = vshrl.u32 %v490_v18, 16  ;;  %930 = vst [vmem:[#allocation2 + $0xa8] sm:$0xf] %v929_v51 }
  0xc0   : > { %v4316_v56 = vrot.slane %v4315_v38, 4  ;;  %v1140_v57 = vshrl.u32 %v17523_v49, 16  ;;  %v1143_v58 = vshll.u32 %v17523_v49, 16  ;;  %v746_v61 = vor.u32 %v744_v40, %v743_v39  ;;  %v883_v10 = vld [vmem:[#allocation2 + $0x5c] sm:$0x1] }
  0xc1   : > { %v748_v63 = vrot.slane %v743_v39, 4  ;;  %v616_v0 = vrot.slane %v614_v36, 7  ;;  %v624_v1 = vrot.slane %v622_v55, 7  ;;  %v625_v2 = vshll.u32 %v490_v18, 16  ;;  %v506_v26 = vld [vmem:[%s17249_s13 + $0x74] sm:$0xf] }
  0xc2   : > { %v4321_v3 = vsel %vm17255_vm7, %v4316_v56, %v4320_v32  ;;  %v1142_v5 = vrot.slane %v1140_v57, 4  ;;  %v1145_v7 = vrot.slane %v1143_v58, 5  ;;  %v747_v9 = vsel %vm17269_vm9, %v739_v35, %v746_v61  ;;  %v17534_v16 = vld [vmem:[#allocation2 + $0x4c] sm:$0xf]  ;;  %v935_v39 = vld [vmem:[#allocation2 + $0xb4] sm:$0xf] }
  0xc3   : > { %v13642_v13 = vcombine.low %v4311_v46, %v4321_v3  ;;  %931 = vst.msk [vmem:[#allocation2 + $0xac] sm:$0xf] %vm832_vm5, %v747_v9  ;;  %v933_v54 = vsel %vm17275_vm10, %v748_v63, %v932_v41  ;;  %v619_v17 = vor.u32 %v617_v53, %v616_v0  ;;  %v620_v12 = vrot.slane %v616_v0, 4 }
  0xc4   : > { %v17539_v18 = vld [vmem:[#allocation2 + $0x50] sm:$0x1]  ;;  %v1146_v19 = vor.u32 %v1145_v7, %v1142_v5  ;;  %v1149_v22 = vshll.u32 %v17534_v16, 16  ;;  %v1153_v23 = vshrl.u32 %v17534_v16, 16  ;;  %934 = vst [vmem:[#allocation2 + $0xb0] sm:$0x1] %v933_v54  ;;  %v627_v24 = vor.u32 %v625_v2, %v624_v1 }
  0xc5   : > { %15259 = vmatmul.mubr.bf16.gmra.mrb[8].mxu1 %v13642_v13  ;;  %v1159_v27 = vshll.u32 %v17539_v18, 16  ;;  %v629_v29 = vrot.slane %v624_v1, 4  ;;  %v880_v30 = vsel %vm17261_vm8, %v619_v17, %v879_v47  ;;  %v750_v31 = vshrl.u32 %v505_v62, 16 }
  0xc6   : > { %v1147_v32 = vrot.slane %v1146_v19, 4  ;;  %v1151_v33 = vrot.slane %v1149_v22, 5  ;;  %v1155_v35 = vrot.slane %v1153_v23, 4  ;;  %v628_v38 = vsel %vm17269_vm9, %v620_v12, %v627_v24  ;;  %881 = vst [vmem:[#allocation2 + $0x54] sm:$0xf] %v880_v30 }
  0xc7   : > { %v1161_v40 = vrot.slane %v1159_v27, 5  ;;  %v17549_v41 = vld [vmem:[#allocation2 + $0xa8] sm:$0xf]  ;;  %882 = vst.msk [vmem:[#allocation2 + $0x58] sm:$0xf] %vm832_vm5, %v628_v38  ;;  %v884_v36 = vsel %vm17275_vm10, %v629_v29, %v883_v10  ;;  %v752_v46 = vrot.slane %v750_v31, 7 }
  0xc8   : > { %v753_v51 = vshll.u32 %v505_v62, 16  ;;  %v1156_v53 = vor.u32 %v1155_v35, %v1151_v33  ;;  %v4323_v55 = vshrl.u32 %v17549_v41, 16  ;;  %v4326_v56 = vshll.u32 %v17549_v41, 16  ;;  %885 = vst [vmem:[#allocation2 + $0x5c] sm:$0x1] %v884_v36 }
  0xc9   : > { %v1152_v57 = vsel %vm17255_vm7, %v1147_v32, %v1151_v33  ;;  %v758_v61 = vshrl.u32 %v506_v26, 16  ;;  %v761_v47 = vshll.u32 %v506_v26, 16  ;;  %v756_v3 = vrot.slane %v752_v46, 4  ;;  %v939_v32 = vld [vmem:[#allocation2 + $0xbc] sm:$0x1] }
  0xca   : > { %v755_v58 = vor.u32 %v753_v51, %v752_v46  ;;  %v1157_v63 = vrot.slane %v1156_v53, 4  ;;  %v17558_v0 = vld [vmem:[#allocation2 + $0xac] sm:$0xf]  ;;  %v4325_v1 = vrot.slane %v4323_v55, 4  ;;  %v4328_v2 = vrot.slane %v4326_v56, 5 }
  0xcb   : > { %v17560_v5 = vld [vmem:[#allocation2 + $0xb0] sm:$0x1]  ;;  %v4332_v62 = vshll.u32 %v17558_v0, 16  ;;  %v4336_v7 = vshrl.u32 %v17558_v0, 16  ;;  %v760_v9 = vrot.slane %v758_v61, 7  ;;  %vm1599_vm12 = vcmask 1046532  }
  0xcc   : > { %v936_v10 = vsel %vm17261_vm8, %v755_v58, %v935_v39  ;;  %v1162_v13 = vsel %vm17255_vm7, %v1157_v63, %v1161_v40  ;;  %v4329_v54 = vor.u32 %v4328_v2, %v4325_v1  ;;  %v4342_v17 = vshll.u32 %v17560_v5, 16  ;;  %vm17724_vm13 = vmor %vm1598_vm11, %vm1599_vm12 }
  0xcd   : > { %937 = vst [vmem:[#allocation2 + $0xb4] sm:$0xf] %v936_v10  ;;  %v13457_v12 = vcombine.low %v1152_v57, %v1162_v13  ;;  %v4334_v19 = vrot.slane %v4332_v62, 5  ;;  %v4338_v22 = vrot.slane %v4336_v7, 4  ;;  %v17569_v23 = vld [vmem:[#allocation2 + $0x54] sm:$0xf]  ;;  %v763_v24 = vor.u32 %v761_v47, %v760_v9 }
  0xce   : > { %v4330_v26 = vrot.slane %v4329_v54, 4  ;;  %v4344_v27 = vrot.slane %v4342_v17, 5  ;;  %v17571_v29 = vld [vmem:[#allocation2 + $0x58] sm:$0xf]  ;;  %v1164_v30 = vshrl.u32 %v17569_v23, 16  ;;  %v1167_v31 = vshll.u32 %v17569_v23, 16 }
  0xcf   : > { %14974 = vmatprep.mubr.bf16.mxu0 %v13457_v12  ;;  %v4339_v33 = vor.u32 %v4338_v22, %v4334_v19  ;;  %v17575_v35 = vld [vmem:[#allocation2 + $0x5c] sm:$0x1]  ;;  %v1173_v38 = vshll.u32 %v17571_v29, 16  ;;  %v1177_v39 = vshrl.u32 %v17571_v29, 16  ;;  %v764_v40 = vsel %vm17269_vm9, %v756_v3, %v763_v24 }
  0xd0   : > { %v4335_v36 = vsel %vm17255_vm7, %v4330_v26, %v4334_v19  ;;  %v1166_v46 = vrot.slane %v1164_v30, 4  ;;  %v1169_v51 = vrot.slane %v1167_v31, 5  ;;  %v1183_v53 = vshll.u32 %v17575_v35, 16  ;;  %938 = vst.msk [vmem:[#allocation2 + $0xb8] sm:$0xf] %vm832_vm5, %v764_v40 }
  0xd1   : > { %v4340_v55 = vrot.slane %v4339_v33, 4  ;;  %v1175_v56 = vrot.slane %v1173_v38, 5  ;;  %v1179_v57 = vrot.slane %v1177_v39, 4  ;;  %v765_v58 = vrot.slane %v760_v9, 4  ;;  %v17011_v26 = vld [vmem:[#allocation2] sm:$0xf] }
  0xd2   : > { %v1170_v61 = vor.u32 %v1169_v51, %v1166_v46  ;;  %v1185_v47 = vrot.slane %v1183_v53, 5  ;;  %v17608_v51 = vld [vmem:[#allocation2 + $0x8] sm:$0x1]  ;;  %v16678_v53 = vld [vmem:[#allocation4 + $0x90] sm:$0xff]   ;;  %v17673_v19 = vld [vmem:[#allocation2 + $0x7c] sm:$0xf] }
  0xd3   : > { %v4345_v63 = vsel %vm17255_vm7, %v4340_v55, %v4344_v27  ;;  %v1180_v1 = vor.u32 %v1179_v57, %v1175_v56  ;;  %v940_v2 = vsel %vm17275_vm10, %v765_v58, %v939_v32  ;;  %v17601_v27 = vld [vmem:[#allocation2 + $0x4] sm:$0xf]  ;;  %v17611_v55 = vld [vmem:[#allocation2 + $0x68] sm:$0x1]  ;;  %20802 = vst [vmem:[#allocation19_spill] sm:$0xff] %v17673_v19  ;;  %v4817_v25 = vrot.slane %v17505_v4, 5 }
  0xd4   : > { %v17589_v3 = vld [vmem:[#allocation2 + $0xb4] sm:$0xf]  ;;  %v13643_v62 = vcombine.low %v4335_v36, %v4345_v63  ;;  %v1171_v7 = vrot.slane %v1170_v61, 4  ;;  %941 = vst [vmem:[#allocation2 + $0xbc] sm:$0x1] %v940_v2  ;;  %v13467_v30 = vcombine.low %v17011_v26, %v17601_v27  ;;  %vm322_vm14 = vcmask 1040384  }
  0xd5   : > { %v4347_v10 = vshrl.u32 %v17589_v3, 16  ;;  %v4350_v13 = vshll.u32 %v17589_v3, 16  ;;  %v1181_v54 = vrot.slane %v1180_v1, 4  ;;  %v17615_v61 = vld [vmem:[#allocation2 + $0x14] sm:$0x1]  ;;  %vm18756_vm15 = vmand %vm322_vm14, %vm323_vm3  ;;  %vm4077_vm1 = vcmask 1043456  }
  0xd6   : > { %15262 = vmatprep.mubr.bf16.mxu1 %v13643_v62  ;;  %v1176_v9 = vsel %vm17255_vm7, %v1171_v7, %v1175_v56  ;;  %v17618_v63 = vld [vmem:[#allocation2 + $0x74] sm:$0x1]  ;;  %v17017_v2 = vld [vmem:[#allocation2 + $0xc] sm:$0xf]  ;;  %v17621_v62 = vld [vmem:[#allocation2 + $0x10] sm:$0xf] }
  0xd7   : > { %v4349_v17 = vrot.slane %v4347_v10, 4  ;;  %v4352_v12 = vrot.slane %v4350_v13, 5  ;;  %v1186_v22 = vsel %vm17255_vm7, %v1181_v54, %v1185_v47  ;;  %v17599_v24 = vld [vmem:[#allocation2 + $0xb8] sm:$0xf]  ;;  %20797 = vst [vmem:[#allocation14_spill] sm:$0xff] %v17618_v63  ;;  %v13468_v7 = vcombine.low %v17017_v2, %v17621_v62  ;;  %vm18786_vm0 = vmand %vm322_vm14, %vm373_vm2 }
  0xd8   : > { %v13458_v31 = vcombine.low %v1176_v9, %v1186_v22  ;;  %v4356_v33 = vshll.u32 %v17599_v24, 16  ;;  %v4360_v38 = vshrl.u32 %v17599_v24, 16  ;;  %v17624_v10 = vld [vmem:[#allocation2] sm:$0xe]  ;;  %v20749_v22 = vrot.slane %v17601_v27, 5  ;;  %vm18892_vm3 = vmand %vm4077_vm1, %vm373_vm2 }
  0xd9   : > { %v4353_v32 = vor.u32 %v4352_v12, %v4349_v17  ;;  %v17626_v13 = vld [vmem:[#allocation2 + $0x60] sm:$0xe]  ;;  %v16676_v12 = vld [vmem:[#allocation4 + $0x88] sm:$0xff]   ;;  %v17631_v26 = vld [vmem:[#allocation2 + $0xc] sm:$0xe] }
  0xda   : > { %14975 = vmatmul.mubr.bf16.gmra.mrb[12].mxu0 %v13458_v31  ;;  %v4358_v40 = vrot.slane %v4356_v33, 5  ;;  %v4362_v36 = vrot.slane %v4360_v38, 4  ;;  %v17635_v31 = vld [vmem:[#allocation2 + $0x64] sm:$0xf]  ;;  %v20748_v33 = vrot.slane %v17621_v62, 5 }
  0xdb   : > { %v4354_v39 = vrot.slane %v4353_v32, 4  ;;  %v17606_v46 = vld [vmem:[#allocation2 + $0xbc] sm:$0x1]  ;;  %14994 = vmatprep.mubr.bf16.mxu0 %v13467_v30  ;;  %v17633_v30 = vld [vmem:[#allocation2 + $0x6c] sm:$0xe]  ;;  %v20747_v32 = vrot.slane %v17635_v31, 5 }
  0xdc   : > { %v4363_v57 = vor.u32 %v4362_v36, %v4358_v40  ;;  %v4366_v58 = vshll.u32 %v17606_v46, 16  ;;  %20798 = vst [vmem:[#allocation15_spill] sm:$0xff] %v17633_v30  ;;  %v17639_v38 = vld [vmem:[#allocation2 + $0x18] sm:$0xe]  ;;  %v17647_v56 = vld [vmem:[#allocation2 + $0x70] sm:$0xf] }
  0xdd   : > { %v4359_v54 = vsel %vm17255_vm7, %v4354_v39, %v4358_v40  ;;  %v17020_v40 = vld [vmem:[#allocation2 + $0x60] sm:$0xf]  ;;  %v17022_v2 = vld [vmem:[#allocation2 + $0x18] sm:$0xf]  ;;  %20799 = vst [vmem:[#allocation16_spill] sm:$0xff] %v17647_v56  ;;  %v20753_v47 = vrot.slane %v17647_v56, 5  ;;  %v13654_v43 = vcombine.low %v17028_v34, %v17647_v56  ;;  %v13471_v34 = vcombine.low %v17427_v44, %v17443_v8 }
  0xde   : > { %v4364_v9 = vrot.slane %v4363_v57, 4  ;;  %v4368_v17 = vrot.slane %v4366_v58, 5  ;;  %v13653_v36 = vcombine.low %v17020_v40, %v17635_v31  ;;  %v17644_v58 = vld [vmem:[#allocation2 + $0x1c] sm:$0xf]  ;;  %v17708_v63 = vld [vmem:[#allocation2 + $0x2c] sm:$0x1] }
  0xdf   : > { %v13469_v1 = vcombine.low %v17022_v2, %v17644_v58  ;;  %v17665_v2 = vld [vmem:[#allocation2 + $0x24] sm:$0xe]  ;;  %v17678_v40 = vrot.slane %v20753_v47, 4  ;;  %v4760_v47 = vld [vmem:[#allocation2 + $0x90] sm:$0xe]  ;;  %20809 = vst [vmem:[#allocation24_spill] sm:$0xff] %v17708_v63 }
  0xe0   : > { %v4369_v39 = vsel %vm17255_vm7, %v4364_v9, %v4368_v17  ;;  %v17652_v17 = vld [vmem:[#allocation2 + $0x78] sm:$0xe]  ;;  %20801 = vst [vmem:[#allocation18_spill] sm:$0xff] %v17665_v2  ;;  %v17027_v9 = vld [vmem:[#allocation2 + $0x24] sm:$0xf]  ;;  %v13673_v30 = vrot.slane %v4760_v47, 9 }
  0xe1   : > { %v13644_v57 = vcombine.low %v4359_v54, %v4369_v39  ;;  %20800 = vst [vmem:[#allocation17_spill] sm:$0xff] %v17652_v17  ;;  %v17657_v54 = vrot.slane %v20749_v22, 4  ;;  %v17661_v39 = vrot.slane %v20747_v32, 4  ;;  %20803 = vst [vmem:[#allocation20_spill] sm:$0xff] %v17678_v40  ;;  %v17684_v22 = vld [vmem:[#allocation2 + $0x80] sm:$0x1]  ;;  %v13470_v52 = vcombine.low %v17027_v9, %v17382_v37 }
  0xe2   : > { %14995 = vmatmul.mubr.bf16.vlgmr.msra.gmra.mrb[0].mxu0 %v13468_v7  ;;  %v17680_v7 = vld [vmem:[#allocation2 + $0x20] sm:$0x1]  ;;  %20804 = vst [vmem:[#allocation21_spill] sm:$0xff] %v17684_v22  ;;  %v1579_v17 = vld [vmem:[#allocation2 + $0x3c] sm:$0xe]  ;;  %v20806_v32 = vrot.slane %v17644_v58, 5 }
  0xe3   : > { %15263 = vmatmul.mubr.bf16.gmra.mrb[12].mxu1 %v13644_v57  ;;  %15011 = vmatpush3.bf16.msra.mxu0 %v17418_v20  ;;  %v17669_v57 = vrot.slane %v20748_v33, 4  ;;  %v16680_v33 = vld [vmem:[#allocation4 + $0x98] sm:$0xff]   ;;  %v17029_v40 = vld [vmem:[#allocation2 + $0x78] sm:$0xf]  ;;  %v20807_v22 = vrot.slane %v17673_v19, 5  ;;  %v4813_v44 = vrot.slane %v17460_v42, 5 }
  0xe4   : > { %15282 = vmatprep.mubr.bf16.mxu1 %v13653_v36  ;;  %15012 = vmatprep.subr.bf16.mxu0 %v16676_v12  ;;  %v16677_v36 = vld [vmem:[#allocation4 + $0x88] sm:$0xff]   ;;  %v13655_v20 = vcombine.low %v17029_v40, %v17673_v19  ;;  %v16679_v19 = vld [vmem:[#allocation4 + $0x90] sm:$0xff]   ;;  %v1580_v40 = vld [vmem:[#allocation2 + $0x48] sm:$0xe] }
  0xe5   : > { %14998 = vmatprep.mubr.bf16.mxu0 %v13469_v1  ;;  %v17698_v1 = vrot.slane %v20806_v32, 4  ;;  %v17702_v2 = vrot.slane %v20807_v22, 4  ;;  %v4761_v9 = vld [vmem:[#allocation2 + $0x9c] sm:$0xe]  ;;  %v20810_v32 = vrot.slane %v17382_v37, 5  ;;  %v13488_v22 = vrot.slane %v1579_v17, 9 }
  0xe6   : > { %v4762_v42 = vld [vmem:[#allocation2 + $0xa8] sm:$0xe]  ;;  %v13674_v17 = vrot.slane %v4761_v9, 9  ;;  %v20814_v9 = vcombine.low %v17393_v59, %v17406_v15 }
  0xe7   : > { %15013 = vmatpush3.bf16.msra.mxu0 %v16676_v12  ;;  %20808 = vst [vmem:[#allocation23_spill] sm:$0xff] %v17702_v2  ;;  %v13472_v12 = vcombine.low %v17474_v6, %v17483_v21  ;;  %v17713_v56 = vrot.slane %v20810_v32, 4  ;;  %v4810_v2 = vrot.slane %v17465_v50, 5  ;;  %v1638_v6 = vrot.slane %v17483_v21, 5  ;;  %v16681_v63 = vld [vmem:[#allocation4 + $0x98] sm:$0xff]  }
  0xe8   : > { %15014 = vmatprep.subr.bf16.mxu0 %v16678_v53  ;;  %v4763_v32 = vld [vmem:[#allocation2 + $0xb4] sm:$0xe] }
  0xe9   : > { %20811 = vst [vmem:[#allocation25_spill] sm:$0xff] %v17713_v56  ;;  %v4812_v47 = vrot.slane %v4810_v2, 4  ;;  %v1641_v56 = vrot.slane %v17488_v28, 5  ;;  %v17746_v21 = vsel %vm17724_vm13, %v13488_v22, %v1638_v6  ;;  %v1640_v28 = vrot.slane %v1638_v6, 4 }
  0xea   : > { %14999 = vmatmul.mubr.bf16.gmra.mrb[4].mxu0 %v13470_v52  ;;  %v1645_v6 = vrot.slane %v17534_v16, 5 }
  0xeb   : > { %15283 = vmatmul.mubr.bf16.vlgmr.msra.gmra.mrb[0].mxu1 %v13654_v43  ;;  %15015 = vmatpush3.bf16.msra.mxu0 %v16678_v53  ;;  %v16682_v43 = vld [vmem:[#allocation4 + $0xa0] sm:$0xff]   ;;  %v17732_v53 = vsel %vm17724_vm13, %v13673_v30, %v4810_v2  ;;  %v17742_v30 = vsel %vm17724_vm13, %v4812_v47, %v4813_v44  ;;  %v16684_v44 = vld [vmem:[#allocation4 + $0xa8] sm:$0xff]   ;;  %v17756_v22 = vsel %vm17724_vm13, %v1640_v28, %v1641_v56  ;;  %v13675_v47 = vrot.slane %v4762_v42, 9 }
  0xec   : > { %15299 = vmatpush3.bf16.msra.mxu1 %v17423_v48  ;;  %15286 = vmatprep.mubr.bf16.mxu1 %v13655_v20  ;;  %v4820_v48 = vrot.slane %v17508_v11, 5  ;;  %v1581_v2 = vld [vmem:[#allocation2 + $0x54] sm:$0xe]  ;;  %v17752_v11 = vsel %vm17724_vm13, %v13674_v17, %v4817_v25  ;;  %v13489_v20 = vrot.slane %v1580_v40, 9  ;;  %v13496_v17 = vcombine.low %v17746_v21, %v17756_v22 }
  0xed   : > { %15300 = vmatprep.subr.bf16.mxu1 %v16677_v36  ;;  %15016 = vmatprep.subr.bf16.mxu0 %v16680_v33  ;;  %v4827_v40 = vrot.slane %v17560_v5, 5  ;;  %v1647_v42 = vrot.slane %v1645_v6, 4  ;;  %v13490_v28 = vrot.slane %v1581_v2, 9  ;;  %v16686_v2 = vld [vmem:[#allocation4 + $0xb0] sm:$0xff]  }
  0xee   : > { %15002 = vmatprep.mubr.bf16.mxu0 %v13471_v34  ;;  %v4819_v34 = vrot.slane %v4817_v25, 4 }
  0xef   : > { %15017 = vmatpush3.bf16.msra.mxu0 %v16680_v33  ;;  %v1648_v33 = vrot.slane %v17539_v18, 5  ;;  %v17772_v18 = vsel %vm17724_vm13, %v13489_v20, %v1645_v6  ;;  %v20815_v20 = vcombine.low %v17451_v14, %v17465_v50  ;;  %v4834_v6 = vrot.slane %v17606_v46, 5 }
  0xf0   : > { %15301 = vmatpush3.bf16.msra.mxu1 %v16677_v36  ;;  %15018 = vmatprep.subr.bf16.mxu0 %v16682_v43  ;;  %v17764_v25 = vsel %vm17724_vm13, %v4819_v34, %v4820_v48  ;;  %v4824_v36 = vrot.slane %v17558_v0, 5  ;;  %v1655_v34 = vrot.slane %v17575_v35, 5  ;;  %v20817_v46 = vrot.slane %v17443_v8, 5 }
  0xf1   : > { %15302 = vmatprep.subr.bf16.mxu1 %v16679_v19  ;;  %v13682_v56 = vcombine.low %v17752_v11, %v17764_v25  ;;  %v17788_v59 = vsel %vm17724_vm13, %v1647_v42, %v1648_v33 }
  0xf2   : > { %15003 = vmatmul.mubr.bf16.gmra.mrb[8].mxu0 %v13472_v12  ;;  %v17779_v48 = vsel %vm17724_vm13, %v13675_v47, %v4824_v36  ;;  %v4826_v5 = vrot.slane %v4824_v36, 4  ;;  %v1652_v12 = vrot.slane %v17571_v29, 5  ;;  %v16683_v47 = vld [vmem:[#allocation4 + $0xa0] sm:$0xff]   ;;  %v13497_v35 = vcombine.low %v17772_v18, %v17788_v59 }
  0xf3   : > { %15287 = vmatmul.mubr.bf16.gmra.mrb[4].mxu1 %v20814_v9  ;;  %15019 = vmatpush3.bf16.msra.mxu0 %v16682_v43  ;;  %v13676_v43 = vrot.slane %v4763_v32, 9  ;;  %v4831_v9 = vrot.slane %v17599_v24, 5  ;;  %v20816_v32 = vcombine.low %v17523_v49, %v17534_v16  ;;  %v17807_v33 = vrot.slane %v20817_v46, 4  ;;  %v16693_v46 = vld [vmem:[#allocation4 + $0xc8] sm:$0xff]  }
  0xf4   : > { %15303 = vmatpush3.bf16.msra.mxu1 %v16679_v19  ;;  %15290 = vmatprep.mubr.bf16.mxu1 %v20815_v20  ;;  %v17796_v14 = vsel %vm17724_vm13, %v4826_v5, %v4827_v40  ;;  %v17800_v50 = vsel %vm17724_vm13, %v13490_v28, %v1652_v12  ;;  %v1654_v19 = vrot.slane %v1652_v12, 4  ;;  %v13658_v28 = vcombine.low %v17496_v45, %v17505_v4  ;;  %v16685_v5 = vld [vmem:[#allocation4 + $0xa8] sm:$0xff]   ;;  %v16689_v12 = vld [vmem:[#allocation4 + $0xb8] sm:$0xff]  }
  0xf5   : > { %15304 = vmatprep.subr.bf16.mxu1 %v16681_v63  ;;  %15020 = vmatprep.subr.bf16.mxu0 %v16684_v44  ;;  %v13683_v36 = vcombine.low %v17779_v48, %v17796_v14  ;;  %v17813_v40 = vsel %vm17724_vm13, %v13676_v43, %v4831_v9  ;;  %v4833_v42 = vrot.slane %v4831_v9, 4  ;;  %v20818_v49 = vrot.slane %v17601_v27, 5 }
  0xf6   : > { %15006 = vmatprep.mubr.bf16.mxu0 %v20816_v32  ;;  %v20819_v16 = vrot.slane %v17624_v10, 9  ;;  %v20820_v32 = vrot.slane %v17608_v51, 5  ;;  %v17830_v9 = vsel %vm17724_vm13, %v1654_v19, %v1655_v34  ;;  %v13659_v45 = vcombine.low %v17549_v41, %v17558_v0  ;;  %v16688_v41 = vld [vmem:[#allocation4 + $0xb0] sm:$0xff]  }
  0xf7   : > { %15021 = vmatpush3.bf16.msra.mxu0 %v16684_v44  ;;  %v13498_v4 = vcombine.low %v17800_v50, %v17830_v9  ;;  %v17838_v27 = vsel %vm17724_vm13, %v4833_v42, %v4834_v6  ;;  %v20821_v10 = vcombine.low %v17569_v23, %v17571_v29  ;;  %v20822_v0 = vrot.slane %v17621_v62, 5  ;;  %v16709_v50 = vld [vmem:[#allocation2 + $0x18] sm:$0xff]   ;;  %v16710_v9 = vld [vmem:[#allocation4 + $0x100] sm:$0xff]  }
  0xf8   : > { %v1604_v20 = vsel %vm17724_vm13, %v20819_v16, %v20818_v49  ;;  %v1607_v43 = vsel %vm17724_vm13, %v17657_v54, %v20820_v32  ;;  %15305 = vmatpush3.bf16.msra.mxu1 %v16681_v63  ;;  %15022 = vmatprep.subr.bf16.mxu0 %v16686_v2  ;;  %v13684_v51 = vcombine.low %v17813_v40, %v17838_v27  ;;  %v16691_v54 = vld [vmem:[#allocation4 + $0xc0] sm:$0xff]   ;;  %v20823_v44 = vrot.slane %v17631_v26, 9 }
  0xf9   : > { %15306 = vmatprep.subr.bf16.mxu1 %v16683_v47  ;;  %v13491_v63 = vcombine.low %v1604_v20, %v1607_v43  ;;  %v20824_v6 = vrot.slane %v17615_v61, 5  ;;  %v20825_v23 = vrot.slane %v17635_v31, 5  ;;  %v20826_v29 = vrot.slane %v17626_v13, 9  ;;  %v16695_v20 = vld [vmem:[#allocation4 + $0xd0] sm:$0xff]  }
  0xfa   : > { %15007 = vmatmul.mubr.bf16.gmra.mrb[12].mxu0 %v20821_v10  ;;  %v1611_v34 = vsel %vm17724_vm13, %v20823_v44, %v20822_v0  ;;  %v20827_v26 = vrot.slane %v17611_v55, 5  ;;  %v20828_v31 = vrot.slane %v17644_v58, 5  ;;  %v20829_v13 = vrot.slane %v17639_v38, 9  ;;  %v20833_v58 = vld [vmem:[#allocation15_spill] sm:$0xff]  ;;  %v20837_v43 = vld [vmem:[#allocation20_spill] sm:$0xff] }
  0xfb   : > { %15291 = vmatmul.mubr.bf16.gmra.mrb[8].mxu1 %v13658_v28  ;;  %15023 = vmatpush3.bf16.msra.mxu0 %v16686_v2  ;;  %v1614_v19 = vsel %vm17724_vm13, %v17669_v57, %v20824_v6  ;;  %v4783_v62 = vsel %vm17724_vm13, %v20826_v29, %v20825_v23  ;;  %v13660_v57 = vcombine.low %v17589_v3, %v17599_v24  ;;  %v20830_v55 = vrot.slane %v17680_v7, 5  ;;  %v4759_v3 = vld [vmem:[#allocation2 + $0x84] sm:$0xe]  ;;  %v20835_v7 = vld [vmem:[#allocation14_spill] sm:$0xff]  ;;  %v20844_v23 = vld [vmem:[#allocation19_spill] sm:$0xff] }
  0xfc   : > { %15307 = vmatpush3.bf16.msra.mxu1 %v16683_v47  ;;  %15294 = vmatprep.mubr.bf16.mxu1 %v13659_v45  ;;  %v4786_v61 = vsel %vm17724_vm13, %v17661_v39, %v20827_v26  ;;  %v13492_v2 = vcombine.low %v1611_v34, %v1614_v19  ;;  %v16690_v47 = vld [vmem:[#allocation4 + $0xb8] sm:$0xff]   ;;  %v1618_v42 = vsel %vm17724_vm13, %v20829_v13, %v20828_v31  ;;  %v20831_v24 = vld [vmem:[#allocation16_spill] sm:$0xff]  ;;  %v20834_v49 = vrot.slane %v20833_v58, 9  ;;  %v20839_v45 = vld [vmem:[#allocation18_spill] sm:$0xff] }
  0xfd   : > { %15308 = vmatprep.subr.bf16.mxu1 %v16685_v5  ;;  %15024 = vmatprep.subr.bf16.mxu0 %v16689_v12  ;;  %v1621_v39 = vsel %vm17724_vm13, %v17698_v1, %v20830_v55  ;;  %v13677_v28 = vcombine.low %v4783_v62, %v4786_v61  ;;  %v20836_v32 = vrot.slane %v20835_v7, 5  ;;  %v20840_v10 = vrot.slane %v20839_v45, 9  ;;  %v20841_v0 = vld [vmem:[#allocation24_spill] sm:$0xff]  ;;  %v20843_v34 = vld [vmem:[#allocation25_spill] sm:$0xff]  ;;  %v16692_v19 = vld [vmem:[#allocation4 + $0xc0] sm:$0xff]  }
  0xfe   : > { %15026 = vmatprep.mubr.bf16.mxu0 %v13491_v63  ;;  %v13493_v16 = vcombine.low %v1618_v42, %v1621_v39  ;;  %v20842_v44 = vrot.slane %v20841_v0, 5  ;;  %v20846_v29 = vld [vmem:[#allocation17_spill] sm:$0xff]  ;;  %v13672_v13 = vrot.slane %v4759_v3, 9  ;;  %v20851_v42 = vrot.slane %v17406_v15, 5  ;;  %v507_v3 = vld [vmem:[%s17249_s13 + $0x78] sm:$0xf] }
  0xff   : > { %15025 = vmatpush3.bf16.msra.mxu0 %v16689_v12  ;;  %v20832_v12 = vrot.slane %v20831_v24, 5  ;;  %v4793_v1 = vsel %vm17724_vm13, %v20837_v43, %v20836_v32  ;;  %v20848_v26 = vld [vmem:[#allocation21_spill] sm:$0xff]  ;;  %v20852_v24 = vrot.slane %v17443_v8, 5  ;;  %v20855_v7 = vrot.slane %v17430_v60, 5  ;;  %v16694_v32 = vld [vmem:[#allocation4 + $0xc8] sm:$0xff]  }
 0x100   : > { %15309 = vmatpush3.bf16.msra.mxu1 %v16685_v5  ;;  %15042 = vmatprep.subr.bf16.mxu0 %v16691_v54  ;;  %v20838_v5 = vrot.slane %v17382_v37, 5  ;;  %v1628_v6 = vsel %vm17724_vm13, %v20843_v34, %v20842_v44  ;;  %v20847_v37 = vrot.slane %v20846_v29, 9  ;;  %v20849_v61 = vrot.slane %v20848_v26, 5  ;;  %v17031_v39 = vld [vmem:[#allocation2 + $0x8c] sm:$0x1] }
 0x101   : > { %15310 = vmatprep.subr.bf16.mxu1 %v16688_v41  ;;  %v4790_v38 = vsel %vm17724_vm13, %v20834_v49, %v20832_v12  ;;  %v4805_v55 = vrot.slane %v20851_v42, 4  ;;  %v20853_v12 = vld [vmem:[#allocation22_spill] sm:$0xff]  ;;  %v16697_v43 = vld [vmem:[#allocation4 + $0xd8] sm:$0xff]   ;;  %v767_v8 = vshrl.u32 %v507_v3, 16  ;;  %v20856_v60 = vmov %v20851_v42  ;;  %v942_v34 = vld [vmem:[#allocation2 + $0xc0] sm:$0xf] }
 0x102   : > { %15027 = vmatmul.mubr.bf16.vlgmr.msra.gmra.mrb[0].mxu0 %v13492_v2  ;;  %v1625_v63 = vsel %vm17724_vm13, %v20840_v10, %v20838_v5  ;;  %v20850_v2 = vld [vmem:[#allocation23_spill] sm:$0xff]  ;;  %v20854_v58 = vrot.slane %v20853_v12, 9  ;;  %v2113_v29 = vld [vmem:[#allocation2 + $0xc] sm:$0xf]  ;;  %v2115_v26 = vld [vmem:[#allocation2 + $0x14] sm:$0x1] }
 0x103   : > { %15295 = vmatmul.mubr.bf16.gmra.mrb[12].mxu1 %v13660_v57  ;;  %15043 = vmatpush3.bf16.msra.mxu0 %v16691_v54  ;;  %v20845_v54 = vrot.slane %v20844_v23, 5  ;;  %v4800_v57 = vsel %vm17724_vm13, %v20850_v2, %v20849_v61  ;;  %v13494_v31 = vcombine.low %v1625_v63, %v1628_v6  ;;  %v16699_v63 = vld [vmem:[#allocation4 + $0xe0] sm:$0xff]   ;;  %v769_v0 = vrot.slane %v767_v8, 7  ;;  %v16696_v6 = vld [vmem:[#allocation4 + $0xd0] sm:$0xff]   ;;  %v16698_v2 = vld [vmem:[#allocation4 + $0xd8] sm:$0xff]  }
 0x104   : > { %15311 = vmatpush3.bf16.msra.mxu1 %v16688_v41  ;;  %15314 = vmatprep.mubr.bf16.mxu1 %v13677_v28  ;;  %v13678_v41 = vcombine.low %v4790_v38, %v4793_v1  ;;  %v4806_v28 = vrot.slane %v17031_v39, 5  ;;  %v1632_v49 = vsel %vm17724_vm13, %v20854_v58, %v20852_v24  ;;  %v1635_v38 = vsel %vm17724_vm13, %v17807_v33, %v20855_v7  ;;  %v5290_v39 = vld [vmem:[#allocation2 + $0x6c] sm:$0xf] }
 0x105   : > { %15312 = vmatprep.subr.bf16.mxu1 %v16690_v47  ;;  %15044 = vmatprep.subr.bf16.mxu0 %v16693_v46  ;;  %v4797_v62 = vsel %vm17724_vm13, %v20847_v37, %v20845_v54  ;;  %v770_v1 = vshll.u32 %v507_v3, 16  ;;  %v13495_v10 = vcombine.low %v1632_v49, %v1635_v38  ;;  %v4804_v33 = vsel %vm17724_vm13, %v13672_v13, %v20856_v60  ;;  %v5292_v49 = vld [vmem:[#allocation2 + $0x74] sm:$0x1] }
 0x106   : > { %15030 = vmatprep.mubr.bf16.mxu0 %v13493_v16  ;;  %v508_v16 = vld [vmem:[%s17249_s13 + $0x7c] sm:$0xf]  ;;  %v773_v54 = vrot.slane %v769_v0, 4  ;;  %v2141_v61 = vshll.u32 %v2113_v29, 16  ;;  %v2157_v58 = vshll.u32 %v2115_v26, 16  ;;  %v5315_v7 = vshrl.u32 %v5290_v39, 16 }
 0x107   : > { %15045 = vmatpush3.bf16.msra.mxu0 %v16693_v46  ;;  %v13679_v46 = vcombine.low %v4797_v62, %v4800_v57  ;;  %v775_v5 = vshrl.u32 %v508_v16, 16  ;;  %v778_v45 = vshll.u32 %v508_v16, 16  ;;  %v772_v23 = vor.u32 %v770_v1, %v769_v0  ;;  %v17937_v62 = vld [vmem:[#allocation2 + $0x10] sm:$0xf]  ;;  %v17951_v1 = vld [vmem:[#allocation2 + $0x1c] sm:$0xf] }
 0x108   : > { %15313 = vmatpush3.bf16.msra.mxu1 %v16690_v47  ;;  %15046 = vmatprep.subr.bf16.mxu0 %v16695_v20  ;;  %v4807_v47 = vsel %vm17724_vm13, %v4805_v55, %v4806_v28  ;;  %v2147_v42 = vshll.u32 %v17937_v62, 16  ;;  %v2151_v55 = vshrl.u32 %v17937_v62, 16  ;;  %v5291_v28 = vld [vmem:[#allocation2 + $0x70] sm:$0xf]  ;;  %v2143_v12 = vrot.slane %v2141_v61, 5  ;;  %v16705_v26 = vld [vmem:[#allocation4 + $0xf8] sm:$0xff]  }
 0x109   : > { %15330 = vmatprep.subr.bf16.mxu1 %v16692_v19  ;;  %v17934_v44 = vrot.slane %v775_v5, 7  ;;  %v13680_v37 = vcombine.low %v4804_v33, %v4807_v47  ;;  %v943_v13 = vsel %vm17261_vm8, %v772_v23, %v942_v34  ;;  %v5318_v3 = vshll.u32 %v5290_v39, 16  ;;  %v16703_v5 = vld [vmem:[#allocation4 + $0xf0] sm:$0xff]   ;;  %v16700_v34 = vld [vmem:[#allocation4 + $0xe0] sm:$0xff]   ;;  %v2128_v57 = vld [vmem:[#allocation2 + $0x48] sm:$0xf] }
 0x10a   : > { %15031 = vmatmul.mubr.bf16.gmra.mrb[4].mxu0 %v13494_v31  ;;  %944 = vst [vmem:[#allocation2 + $0xc0] sm:$0xf] %v943_v13  ;;  %v17946_v38 = vrot.slane %v2147_v42, 5  ;;  %v5324_v16 = vshll.u32 %v5291_v28, 16  ;;  %v5328_v8 = vshrl.u32 %v5291_v28, 16  ;;  %v20859_v47 = vcombine.low %v17732_v53, %v17742_v30  ;;  %v16707_v61 = vld [vmem:[#allocation2 + $0xc] sm:$0xff]  }
 0x10b   : > { %15315 = vmatmul.mubr.bf16.vlgmr.msra.gmra.mrb[0].mxu1 %v13678_v41  ;;  %15047 = vmatpush3.bf16.msra.mxu0 %v16695_v20  ;;  %v780_v15 = vor.u32 %v778_v45, %v17934_v44  ;;  %v2138_v20 = vshrl.u32 %v2113_v29, 16  ;;  %v5320_v60 = vrot.slane %v5318_v3, 5  ;;  %v5334_v22 = vshll.u32 %v5292_v49, 16  ;;  %v17966_v53 = vld [vmem:[#allocation2 + $0x20] sm:$0x1] }
 0x10c   : > { %15331 = vmatpush3.bf16.msra.mxu1 %v16692_v19  ;;  %15318 = vmatprep.mubr.bf16.mxu1 %v13679_v46  ;;  %v16701_v19 = vld [vmem:[#allocation4 + $0xe8] sm:$0xff]   ;;  %v2153_v46 = vrot.slane %v2151_v55, 4  ;;  %v17954_v33 = vrot.slane %v5324_v16, 5  ;;  %v5330_v21 = vrot.slane %v5328_v8, 4  ;;  %v17960_v23 = vrot.slane %v2157_v58, 5  ;;  %v17991_v28 = vld [vmem:[#allocation4 + $0xf0] sm:$0xff]  }
 0x10d   : > { %15332 = vmatprep.subr.bf16.mxu1 %v16694_v32  ;;  %15048 = vmatprep.subr.bf16.mxu0 %v16697_v43  ;;  %v781_v41 = vsel %vm17269_vm9, %v773_v54, %v780_v15  ;;  %v2140_v24 = vrot.slane %v2138_v20, 4  ;;  %v2171_v15 = vshll.u32 %v17951_v1, 16  ;;  %v5293_v29 = vld [vmem:[#allocation2 + $0x78] sm:$0xf]  ;;  %v17968_v20 = vld [vmem:[#allocation2 + $0x7c] sm:$0xf] }
 0x10e   : > { %15034 = vmatprep.mubr.bf16.mxu0 %v13495_v10  ;;  %945 = vst.msk [vmem:[#allocation2 + $0xc4] sm:$0xf] %vm832_vm5, %v781_v41  ;;  %v2154_v10 = vor.u32 %v2153_v46, %v17946_v38  ;;  %v5331_v18 = vor.u32 %v5330_v21, %v17954_v33  ;;  %v17975_v59 = vrot.slane %v5334_v22, 5  ;;  %v5339_v42 = vshrl.u32 %v5293_v29, 16  ;;  %v2119_v3 = vld [vmem:[#allocation2 + $0x24] sm:$0xf] }
 0x10f   : > { %15049 = vmatpush3.bf16.msra.mxu0 %v16697_v43  ;;  %v2116_v43 = vld [vmem:[#allocation2 + $0x18] sm:$0xf]  ;;  %v2144_v45 = vor.u32 %v2143_v12, %v2140_v24  ;;  %v17979_v13 = vrot.slane %v2171_v15, 5  ;;  %v5342_v55 = vshll.u32 %v5293_v29, 16  ;;  %v5348_v39 = vshll.u32 %v17968_v20, 16 }
 0x110   : > { %15333 = vmatpush3.bf16.msra.mxu1 %v16694_v32  ;;  %15050 = vmatprep.subr.bf16.mxu0 %v16699_v63  ;;  %v5317_v32 = vrot.slane %v5315_v7, 4  ;;  %v2165_v0 = vshll.u32 %v2116_v43, 16  ;;  %v17972_v31 = vrot.slane %v2154_v10, 4  ;;  %v2181_v58 = vshll.u32 %v17966_v53, 16  ;;  %v18016_v8 = vld [vmem:[#allocation2 + $0x28] sm:$0xf] }
 0x111   : > { %15334 = vmatprep.subr.bf16.mxu1 %v16696_v6  ;;  %v17970_v41 = vrot.slane %v2144_v45, 4  ;;  %v5341_v49 = vrot.slane %v5339_v42, 4  ;;  %v5344_v25 = vrot.slane %v5342_v55, 5  ;;  %v5352_v7 = vshrl.u32 %v17968_v20, 16  ;;  %v18020_v10 = vld [vmem:[#allocation4 + $0xf8] sm:$0xff]   ;;  %v16718_v42 = vld [vmem:[#allocation4 + $0x110] sm:$0xff]  }
 0x112   : > { %15035 = vmatmul.mubr.bf16.gmra.mrb[8].mxu0 %v13496_v17  ;;  %v2162_v17 = vshrl.u32 %v2116_v43, 16  ;;  %v5321_v54 = vor.u32 %v5320_v60, %v5317_v32  ;;  %v2160_v48 = vsel %vm17255_vm7, %v17972_v31, %v17960_v23  ;;  %v18008_v14 = vrot.slane %v5331_v18, 4  ;;  %v16708_v60 = vld [vmem:[#allocation2 + $0x6c] sm:$0xff]  }
 0x113   : > { %15319 = vmatmul.mubr.bf16.gmra.mrb[4].mxu1 %v13680_v37  ;;  %15051 = vmatpush3.bf16.msra.mxu0 %v16699_v63  ;;  %v16702_v37 = vld [vmem:[#allocation4 + $0xe8] sm:$0xff]   ;;  %v2150_v11 = vsel %vm17255_vm7, %v17970_v41, %v17946_v38  ;;  %v5345_v43 = vor.u32 %v5344_v25, %v5341_v49  ;;  %v5354_v32 = vrot.slane %v5352_v7, 4  ;;  %v2186_v45 = vshrl.u32 %v2119_v3, 16  ;;  %v18104_v41 = vld [vmem:[#allocation2 + $0x94] sm:$0xf] }
 0x114   : > { %15335 = vmatpush3.bf16.msra.mxu1 %v16696_v6  ;;  %15322 = vmatprep.mubr.bf16.mxu1 %v20859_v47  ;;  %v2164_v30 = vrot.slane %v2162_v17, 4  ;;  %v2167_v6 = vrot.slane %v2165_v0, 5  ;;  %v18024_v21 = vrot.slane %v2181_v58, 5  ;;  %v2189_v22 = vshll.u32 %v2119_v3, 16  ;;  %v16713_v0 = vld [vmem:[#allocation4 + $0x108] sm:$0xff]  }
 0x115   : > { %15336 = vmatprep.subr.bf16.mxu1 %v16698_v2  ;;  %15052 = vmatprep.subr.bf16.mxu0 %v16701_v19  ;;  %v2195_v17 = vshll.u32 %v18016_v8, 16  ;;  %v2188_v15 = vrot.slane %v2186_v45, 4  ;;  %v18032_v29 = vrot.slane %v5345_v43, 4  ;;  %v5337_v55 = vsel %vm17255_vm7, %v18008_v14, %v17975_v59  ;;  %v18067_v43 = vld [vmem:[#allocation2 + $0x34] sm:$0xf] }
 0x116   : > { %15038 = vmatprep.mubr.bf16.mxu0 %v13497_v35  ;;  %v17977_v35 = vrot.slane %v5321_v54, 4  ;;  %v2168_v24 = vor.u32 %v2167_v6, %v2164_v30  ;;  %v2199_v30 = vshrl.u32 %v18016_v8, 16  ;;  %v5296_v6 = vld [vmem:[#allocation2 + $0x84] sm:$0xf]  ;;  %v16717_v45 = vld [vmem:[#allocation2 + $0x30] sm:$0xff]  }
 0x117   : > { %15053 = vmatpush3.bf16.msra.mxu0 %v16701_v19  ;;  %v2175_v19 = vshrl.u32 %v17951_v1, 16  ;;  %v5363_v25 = vshrl.u32 %v5296_v6, 16  ;;  %v5366_v7 = vshll.u32 %v5296_v6, 16 }
 0x118   : > { %15337 = vmatpush3.bf16.msra.mxu1 %v16698_v2  ;;  %15054 = vmatprep.subr.bf16.mxu0 %v16703_v5  ;;  %v17985_v2 = vld [vmem:[#allocation2 + $0x80] sm:$0x1]  ;;  %v5327_v16 = vsel %vm17255_vm7, %v17977_v35, %v17954_v33  ;;  %v18022_v47 = vrot.slane %v2168_v24, 4  ;;  %v2223_v33 = vshrl.u32 %v18067_v43, 16  ;;  %v16726_v35 = vld [vmem:[#allocation4 + $0x120] sm:$0xff]  }
 0x119   : > { %15338 = vmatprep.subr.bf16.mxu1 %v16700_v34  ;;  %v2177_v12 = vrot.slane %v2175_v19, 4  ;;  %v5358_v46 = vshll.u32 %v17985_v2, 16  ;;  %v16715_v19 = vld [vmem:[#allocation2 + $0x24] sm:$0xff]   ;;  %v5368_v3 = vrot.slane %v5366_v7, 5  ;;  %v18100_v23 = vcombine.low %v5327_v16, %v5337_v55 }
 0x11a   : > { %15039 = vmatmul.mubr.bf16.gmra.mrb[12].mxu0 %v13498_v4  ;;  %v2174_v58 = vsel %vm17255_vm7, %v18022_v47, %v17979_v13 }
 0x11b   : > { %15323 = vmatmul.mubr.bf16.gmra.mrb[8].mxu1 %v13682_v56  ;;  %15055 = vmatpush3.bf16.msra.mxu0 %v16703_v5  ;;  %v18001_v56 = vrot.slane %v5348_v39, 5  ;;  %v18018_v5 = vld [vmem:[#allocation2 + $0x2c] sm:$0x1]  ;;  %v5360_v24 = vrot.slane %v5358_v46, 5  ;;  %v5365_v46 = vrot.slane %v5363_v25, 4 }
 0x11c   : > { %15339 = vmatpush3.bf16.msra.mxu1 %v16700_v34  ;;  %15326 = vmatprep.mubr.bf16.mxu1 %v13683_v36  ;;  %v2178_v36 = vor.u32 %v2177_v12, %v17979_v13  ;;  %v2205_v18 = vshll.u32 %v18018_v5, 16  ;;  %v2201_v12 = vrot.slane %v2199_v30, 4  ;;  %v16711_v13 = vld [vmem:[#allocation2 + $0x78] sm:$0xff]  }
 0x11d   : > { %15340 = vmatprep.subr.bf16.mxu1 %v16702_v37  ;;  %15056 = vmatprep.subr.bf16.mxu0 %v16705_v26  ;;  %v5355_v54 = vor.u32 %v5354_v32, %v18001_v56  ;;  %v16716_v32 = vld [vmem:[#allocation2 + $0x84] sm:$0xff]  }
 0x11e   : > { %15058 = vmatprep.mubr.bf16.mxu0 %v16707_v61  ;;  %v18027_v34 = vrot.slane %v2178_v36, 4  ;;  %v18034_v61 = vrot.slane %v2195_v17, 5  ;;  %v2122_v36 = vld [vmem:[#allocation2 + $0x30] sm:$0xf]  ;;  %v18065_v14 = vrot.slane %v2205_v18, 5 }
 0x11f   : > { %15057 = vmatpush3.bf16.msra.mxu0 %v16705_v26  ;;  %v2191_v26 = vrot.slane %v2189_v22, 5  ;;  %v5356_v39 = vrot.slane %v5355_v54, 4  ;;  %v5299_v17 = vld [vmem:[#allocation2 + $0x90] sm:$0xf]  ;;  %v2210_v30 = vshrl.u32 %v2122_v36, 16  ;;  %v2213_v6 = vshll.u32 %v2122_v36, 16 }
 0x120   : > { %15341 = vmatpush3.bf16.msra.mxu1 %v16702_v37  ;;  %15074 = vmatprep.subr.bf16.mxu0 %v16710_v9  ;;  %v18037_v37 = vld [vmem:[#allocation2 + $0x88] sm:$0xf]  ;;  %v2184_v40 = vsel %vm17255_vm7, %v18027_v34, %v18024_v21  ;;  %v2202_v27 = vor.u32 %v2201_v12, %v18034_v61  ;;  %v18075_v34 = vld [vmem:[#allocation4 + $0x108] sm:$0xff]   ;;  %v2225_v36 = vrot.slane %v2223_v33, 4 }
 0x121   : > { %15342 = vmatprep.subr.bf16.mxu1 %v17991_v28  ;;  %v2192_v49 = vor.u32 %v2191_v26, %v2188_v15  ;;  %v5376_v59 = vshrl.u32 %v18037_v37, 16  ;;  %v5369_v15 = vor.u32 %v5368_v3, %v5365_v46  ;;  %v18102_v31 = vcombine.low %v2174_v58, %v2184_v40  ;;  %v18119_v12 = vld [vmem:[#allocation2 + $0x98] sm:$0x1]  ;;  %v16719_v46 = vld [vmem:[#allocation2 + $0x90] sm:$0xff]   ;;  %v16725_v3 = vld [vmem:[#allocation2 + $0x48] sm:$0xff]  }
 0x122   : > { %15059 = vmatmul.mubr.bf16.vlgmr.msra.gmra.mrb[0].mxu0 %v16709_v50  ;;  %v18050_v50 = vld [vmem:[#allocation2 + $0x8c] sm:$0x1]  ;;  %v18077_v54 = vrot.slane %v2202_v27, 4  ;;  %v2215_v38 = vrot.slane %v2213_v6, 5  ;;  %20861 = vst [vmem:[#allocation16_spill] sm:$0xff] %v18119_v12  ;;  %v5387_v58 = vshrl.u32 %v5299_v17, 16 }
 0x123   : > { %15327 = vmatmul.mubr.bf16.gmra.mrb[12].mxu1 %v13684_v51  ;;  %15075 = vmatpush3.bf16.msra.mxu0 %v16710_v9  ;;  %v5372_v51 = vshll.u32 %v18037_v37, 16  ;;  %v16712_v9 = vld [vmem:[#allocation4 + $0x100] sm:$0xff]   ;;  %v18071_v47 = vrot.slane %v2192_v49, 4  ;;  %v5378_v22 = vrot.slane %v5376_v59, 4  ;;  %v5382_v18 = vshll.u32 %v18050_v50, 16 }
 0x124   : > { %15343 = vmatpush3.bf16.msra.mxu1 %v17991_v28  ;;  %15346 = vmatprep.mubr.bf16.mxu1 %v16708_v60  ;;  %v5351_v28 = vsel %vm17255_vm7, %v18032_v29, %v18001_v56  ;;  %v5361_v60 = vsel %vm17255_vm7, %v5356_v39, %v5360_v24  ;;  %v16721_v56 = vld [vmem:[#allocation4 + $0x118] sm:$0xff]   ;;  %v16723_v29 = vld [vmem:[#allocation2 + $0x3c] sm:$0xff]   ;;  %v18112_v39 = vrot.slane %v5369_v15, 4  ;;  %v18114_v24 = vld [vmem:[#allocation2 + $0x38] sm:$0x1]  ;;  %v5390_v49 = vshll.u32 %v5299_v17, 16 }
 0x125   : > { %15344 = vmatprep.subr.bf16.mxu1 %v18020_v10  ;;  %15076 = vmatprep.subr.bf16.mxu0 %v16713_v0  ;;  %v18073_v21 = vrot.slane %v5372_v51, 5  ;;  %v18123_v7 = vrot.slane %v5382_v18, 5  ;;  %v5396_v40 = vshll.u32 %v18104_v41, 16  ;;  %v2125_v27 = vld [vmem:[#allocation2 + $0x3c] sm:$0xf]  ;;  %v2229_v59 = vshll.u32 %v18114_v24, 16 }
 0x126   : > { %15062 = vmatprep.mubr.bf16.mxu0 %v16715_v19  ;;  %v2212_v19 = vrot.slane %v2210_v30, 4  ;;  %v18143_v17 = vld [vmem:[#allocation4 + $0x118] sm:$0xff]   ;;  %v16724_v15 = vld [vmem:[#allocation2 + $0x9c] sm:$0xff]   ;;  %v2234_v18 = vshrl.u32 %v2125_v27, 16 }
 0x127   : > { %15077 = vmatpush3.bf16.msra.mxu0 %v16713_v0  ;;  %v18090_v0 = vcombine.low %v2150_v11, %v2160_v48  ;;  %v5379_v26 = vor.u32 %v5378_v22, %v18073_v21  ;;  %v18106_v11 = vcombine.low %v5351_v28, %v5361_v60  ;;  %v18132_v28 = vld [vmem:[#allocation2 + $0x40] sm:$0xf]  ;;  %v18140_v60 = vrot.slane %v5396_v40, 5  ;;  %v16729_v30 = vld [vmem:[#allocation4 + $0x128] sm:$0xff]  }
 0x128   : > { %15345 = vmatpush3.bf16.msra.mxu1 %v18020_v10  ;;  %15078 = vmatprep.subr.bf16.mxu0 %v16718_v42  ;;  %v2219_v10 = vshll.u32 %v18067_v43, 16  ;;  %v2216_v16 = vor.u32 %v2215_v38, %v2212_v19  ;;  %v5400_v22 = vshrl.u32 %v18104_v41, 16  ;;  %v16731_v19 = vld [vmem:[#allocation2 + $0x54] sm:$0xff]  }
 0x129   : > { %15362 = vmatprep.subr.bf16.mxu1 %v16712_v9  ;;  %v18121_v25 = vrot.slane %v5379_v26, 4  ;;  %v18146_v26 = vld [vmem:[#allocation2 + $0x44] sm:$0x1] }
 0x12a   : > { %15063 = vmatmul.mubr.bf16.gmra.mrb[4].mxu0 %v16717_v45  ;;  %v18117_v55 = vrot.slane %v2219_v10, 5  ;;  %v18138_v45 = vrot.slane %v2216_v16, 4  ;;  %20862 = vst [vmem:[#allocation15_spill] sm:$0xff] %v18146_v26  ;;  %v2237_v10 = vshll.u32 %v2125_v27, 16  ;;  %v5402_v33 = vrot.slane %v5400_v22, 4 }
 0x12b   : > { %15347 = vmatmul.mubr.bf16.vlgmr.msra.gmra.mrb[0].mxu1 %v16711_v13  ;;  %15079 = vmatpush3.bf16.msra.mxu0 %v16718_v42  ;;  %v16720_v42 = vld [vmem:[#allocation4 + $0x110] sm:$0xff]   ;;  %v5389_v13 = vrot.slane %v5387_v58, 4  ;;  %v2243_v16 = vshll.u32 %v18132_v28, 16  ;;  %v5302_v58 = vld [vmem:[#allocation2 + $0x9c] sm:$0xf]  ;;  %v2253_v63 = vshll.u32 %v18146_v26, 16 }
 0x12c   : > { %15363 = vmatpush3.bf16.msra.mxu1 %v16712_v9  ;;  %15350 = vmatprep.mubr.bf16.mxu1 %v16716_v32  ;;  %v5392_v9 = vrot.slane %v5390_v49, 5  ;;  %v2226_v6 = vor.u32 %v2225_v36, %v18117_v55  ;;  %v18155_v49 = vrot.slane %v2229_v59, 5  ;;  %v2236_v36 = vrot.slane %v2234_v18, 4  ;;  %v18158_v27 = vld [vmem:[#allocation2 + $0xa0] sm:$0xf]  ;;  %v16728_v18 = vld [vmem:[#allocation4 + $0x120] sm:$0xff]  }
 0x12d   : > { %15364 = vmatprep.subr.bf16.mxu1 %v18075_v34  ;;  %15080 = vmatprep.subr.bf16.mxu0 %v16721_v56  ;;  %v2239_v40 = vrot.slane %v2237_v10, 5  ;;  %20863 = vst [vmem:[#allocation14_spill] sm:$0xff] %v18158_v27  ;;  %v18165_v22 = vrot.slane %v2243_v16, 5  ;;  %v18168_v59 = vld [vmem:[#allocation2 + $0xa4] sm:$0x1]  ;;  %v5411_v16 = vshrl.u32 %v5302_v58, 16 }
 0x12e   : > { %15066 = vmatprep.mubr.bf16.mxu0 %v16723_v29  ;;  %v5393_v29 = vor.u32 %v5392_v9, %v5389_v13  ;;  %v5403_v9 = vor.u32 %v5402_v33, %v18140_v60  ;;  %20864 = vst [vmem:[#allocation20_spill] sm:$0xff] %v18168_v59  ;;  %v16734_v10 = vld [vmem:[#allocation4 + $0x130] sm:$0xff]   ;;  %v18170_v32 = vrot.slane %v2226_v6, 4  ;;  %v5414_v51 = vshll.u32 %v5302_v58, 16 }
 0x12f   : > { %15081 = vmatpush3.bf16.msra.mxu0 %v16721_v56  ;;  %v5406_v56 = vshll.u32 %v18119_v12, 16  ;;  %v2240_v38 = vor.u32 %v2239_v40, %v2236_v36  ;;  %v5420_v36 = vshll.u32 %v18158_v27, 16  ;;  %v18186_v40 = vrot.slane %v2253_v63, 5  ;;  %v16730_v12 = vld [vmem:[#allocation4 + $0x128] sm:$0xff]  }
 0x130   : > { %15365 = vmatpush3.bf16.msra.mxu1 %v18075_v34  ;;  %15082 = vmatprep.subr.bf16.mxu0 %v16726_v35  ;;  %v2247_v34 = vshrl.u32 %v18132_v28, 16  ;;  %v18174_v13 = vrot.slane %v5403_v9, 4  ;;  %v5413_v58 = vrot.slane %v5411_v16, 4  ;;  %v5430_v9 = vshll.u32 %v18168_v59, 16  ;;  %v18201_v16 = vld [vmem:[#allocation2 + $0x50] sm:$0x1] }
 0x131   : > { %15366 = vmatprep.subr.bf16.mxu1 %v16720_v42  ;;  %v18176_v33 = vrot.slane %v5406_v56, 5  ;;  %v18179_v6 = vrot.slane %v2240_v38, 4  ;;  %v16732_v56 = vld [vmem:[#allocation2 + $0xb4] sm:$0xff]   ;;  %v18199_v63 = vrot.slane %v5420_v36, 5  ;;  %20865 = vst [vmem:[#allocation18_spill] sm:$0xff] %v18201_v16  ;;  %v2258_v59 = vshrl.u32 %v2128_v57, 16 }
 0x132   : > { %15067 = vmatmul.mubr.bf16.gmra.mrb[8].mxu0 %v16725_v3  ;;  %v18172_v3 = vrot.slane %v5393_v29, 4  ;;  %v2249_v48 = vrot.slane %v2247_v34, 4  ;;  %v5416_v34 = vrot.slane %v5414_v51, 5  ;;  %v5305_v51 = vld [vmem:[#allocation2 + $0xa8] sm:$0xf] }
 0x133   : > { %15351 = vmatmul.mubr.bf16.gmra.mrb[4].mxu1 %v16719_v46  ;;  %15083 = vmatpush3.bf16.msra.mxu0 %v16726_v35  ;;  %v16727_v46 = vld [vmem:[#allocation2 + $0xa8] sm:$0xff]   ;;  %v16733_v35 = vld [vmem:[#allocation2 + $0x60] sm:$0xff]  }
 0x134   : > { %15367 = vmatpush3.bf16.msra.mxu1 %v16720_v42  ;;  %15354 = vmatprep.mubr.bf16.mxu1 %v16724_v15  ;;  %v2250_v29 = vor.u32 %v2249_v48, %v18165_v22  ;;  %v5424_v42 = vshrl.u32 %v18158_v27, 16  ;;  %v18184_v15 = vld [vmem:[#allocation2 + $0x4c] sm:$0xf]  ;;  %v2232_v48 = vsel %vm17255_vm7, %v18170_v32, %v18155_v49  ;;  %v5399_v38 = vsel %vm17255_vm7, %v18172_v3, %v18140_v60 }
 0x135   : > { %15368 = vmatprep.subr.bf16.mxu1 %v18143_v17  ;;  %15084 = vmatprep.subr.bf16.mxu0 %v16729_v30  ;;  %v5409_v32 = vsel %vm17255_vm7, %v18174_v13, %v18176_v33  ;;  %v18208_v27 = vld [vmem:[#allocation2 + $0xac] sm:$0xf]  ;;  %v2246_v3 = vsel %vm17255_vm7, %v18179_v6, %v18165_v22  ;;  %v2271_v36 = vshrl.u32 %v18184_v15, 16  ;;  %v5432_v33 = vrot.slane %v5430_v9, 5  ;;  %v16739_v6 = vld [vmem:[#allocation4 + $0x140] sm:$0xff]  }
 0x136   : > { %15070 = vmatprep.mubr.bf16.mxu0 %v16731_v19  ;;  %v18197_v19 = vrot.slane %v2250_v29, 4  ;;  %v5426_v49 = vrot.slane %v5424_v42, 4  ;;  %v16737_v60 = vld [vmem:[#allocation4 + $0x138] sm:$0xff]   ;;  %v2261_v29 = vshll.u32 %v2128_v57, 16  ;;  %v2260_v42 = vrot.slane %v2258_v59, 4  ;;  %v16736_v59 = vld [vmem:[#allocation4 + $0x130] sm:$0xff]  }
 0x137   : > { %15085 = vmatpush3.bf16.msra.mxu0 %v16729_v30  ;;  %v5417_v30 = vor.u32 %v5416_v34, %v5413_v58  ;;  %v2273_v57 = vrot.slane %v2271_v36, 4  ;;  %v5438_v9 = vshll.u32 %v5305_v51, 16  ;;  %v18233_v36 = vld [vmem:[#allocation2 + $0x58] sm:$0xf] }
 0x138   : > { %15369 = vmatpush3.bf16.msra.mxu1 %v18143_v17  ;;  %15086 = vmatprep.subr.bf16.mxu0 %v16734_v10  ;;  %v2267_v17 = vshll.u32 %v18184_v15, 16  ;;  %v5427_v13 = vor.u32 %v5426_v49, %v18199_v63  ;;  %v2256_v58 = vsel %vm17255_vm7, %v18197_v19, %v18186_v40  ;;  %v2263_v34 = vrot.slane %v2261_v29, 5 }
 0x139   : > { %15370 = vmatprep.subr.bf16.mxu1 %v16728_v18  ;;  %v5418_v26 = vrot.slane %v5417_v30, 4  ;;  %v2277_v30 = vshll.u32 %v18201_v16, 16  ;;  %v5435_v49 = vshrl.u32 %v5305_v51, 16  ;;  %v5444_v19 = vshll.u32 %v18208_v27, 16  ;;  %v16738_v16 = vld [vmem:[#allocation4 + $0x138] sm:$0xff]  }
 0x13a   : > { %15071 = vmatmul.mubr.bf16.gmra.mrb[12].mxu0 %v16733_v35  ;;  %v18221_v22 = vrot.slane %v2267_v17, 5  ;;  %v5428_v35 = vrot.slane %v5427_v13, 4  ;;  %v5440_v51 = vrot.slane %v5438_v9, 5  ;;  %v5448_v17 = vshrl.u32 %v18208_v27, 16  ;;  %v16735_v13 = vld [vmem:[#allocation2 + $0xc0] sm:$0xff]  }
 0x13b   : > { %15355 = vmatmul.mubr.bf16.gmra.mrb[8].mxu1 %v16727_v46  ;;  %15087 = vmatpush3.bf16.msra.mxu0 %v16734_v10  ;;  %v5423_v10 = vsel %vm17255_vm7, %v5418_v26, %v18199_v63  ;;  %v2264_v46 = vor.u32 %v2263_v34, %v2260_v42  ;;  %v5437_v29 = vrot.slane %v5435_v49, 4  ;;  %v16741_v26 = vld [vmem:[#allocation4 + $0x148] sm:$0xff]   ;;  %v20866_v63 = vsel %vm17255_vm7, %v18077_v54, %v18065_v14 }
 0x13c   : > { %15371 = vmatpush3.bf16.msra.mxu1 %v16728_v18  ;;  %15358 = vmatprep.mubr.bf16.mxu1 %v16732_v56  ;;  %v2274_v40 = vor.u32 %v2273_v57, %v18221_v22  ;;  %v2131_v18 = vld [vmem:[#allocation2 + $0x54] sm:$0xf]  ;;  %v5433_v56 = vsel %vm17255_vm7, %v5428_v35, %v5432_v33  ;;  %v20868_v42 = vsel %vm17255_vm7, %v18121_v25, %v18123_v7  ;;  %v18268_v57 = vld [vmem:[#allocation2 + $0x5c] sm:$0x1]  ;;  %v18284_v49 = vrot.slane %v5444_v19, 5 }
 0x13d   : > { %15372 = vmatprep.subr.bf16.mxu1 %v16730_v12  ;;  %15088 = vmatprep.subr.bf16.mxu0 %v16737_v60  ;;  %v20870_v14 = vsel %vm17255_vm7, %v18138_v45, %v18117_v55  ;;  %v18270_v25 = vrot.slane %v2264_v46, 4  ;;  %v2282_v7 = vshrl.u32 %v2131_v18, 16  ;;  %v5308_v35 = vld [vmem:[#allocation2 + $0xb4] sm:$0xf]  ;;  %v18276_v55 = vcombine.low %v2246_v3, %v2256_v58  ;;  %v16743_v46 = vld [vmem:[#allocation4 + $0x150] sm:$0xff]  }
 0x13e   : > { %15090 = vmatprep.mubr.bf16.mxu0 %v18090_v0  ;;  %v20867_v0 = vsel %vm17255_vm7, %v18071_v47, %v18034_v61  ;;  %v18262_v54 = vcombine.low %v20870_v14, %v2232_v48  ;;  %v18264_v61 = vcombine.low %v5399_v38, %v5409_v32  ;;  %v18266_v47 = vld [vmem:[#allocation2 + $0xb0] sm:$0x1]  ;;  %v18278_v45 = vcombine.low %v5423_v10, %v5433_v56  ;;  %v18281_v32 = vld [vmem:[#allocation2 + $0xb8] sm:$0xf] }
 0x13f   : > { %15089 = vmatpush3.bf16.msra.mxu0 %v16737_v60  ;;  %v13525_v33 = vcombine.low %v20867_v0, %v20866_v63  ;;  %v20869_v60 = vsel %vm17255_vm7, %v18112_v39, %v18073_v21  ;;  %v18272_v21 = vrot.slane %v2274_v40, 4  ;;  %v18274_v39 = vrot.slane %v2277_v30, 5  ;;  %v16742_v14 = vld [vmem:[#allocation4 + $0x148] sm:$0xff]  }
 0x140   : > { %v18255_v34 = vcombine.low %v20869_v60, %v20868_v42  ;;  %15373 = vmatpush3.bf16.msra.mxu1 %v16730_v12  ;;  %15106 = vmatprep.subr.bf16.mxu0 %v16739_v6  ;;  %v2285_v48 = vshll.u32 %v2131_v18, 16  ;;  %v2291_v38 = vshll.u32 %v18233_v36, 16  ;;  %v5441_v12 = vor.u32 %v5440_v51, %v5437_v29  ;;  %v18300_v18 = vld [vmem:[#allocation2 + $0xbc] sm:$0x1]  ;;  %v2134_v29 = vld [vmem:[#allocation2 + $0x60] sm:$0xf] }
 0x141   : > { %15374 = vmatprep.subr.bf16.mxu1 %v16736_v59  ;;  %v5450_v9 = vrot.slane %v5448_v17, 4  ;;  %v5454_v30 = vshll.u32 %v18266_v47, 16  ;;  %v2284_v3 = vrot.slane %v2282_v7, 4  ;;  %v2295_v40 = vshrl.u32 %v18233_v36, 16 }
 0x142   : > { %15091 = vmatmul.mubr.bf16.vlgmr.msra.gmra.mrb[0].mxu0 %v18102_v31  ;;  %v2287_v58 = vrot.slane %v2285_v48, 5  ;;  %v18287_v10 = vrot.slane %v2291_v38, 5  ;;  %v2270_v31 = vsel %vm17255_vm7, %v18270_v25, %v18221_v22  ;;  %v2301_v19 = vshll.u32 %v18268_v57, 16  ;;  %v18303_v22 = vld [vmem:[#allocation2 + $0x64] sm:$0xf] }
 0x143   : > { %15359 = vmatmul.mubr.bf16.gmra.mrb[12].mxu1 %v16735_v13  ;;  %15107 = vmatpush3.bf16.msra.mxu0 %v16739_v6  ;;  %v2280_v6 = vsel %vm17255_vm7, %v18272_v21, %v18274_v39  ;;  %v5459_v56 = vshrl.u32 %v5308_v35, 16  ;;  %v2297_v51 = vrot.slane %v2295_v40, 4  ;;  %v5462_v17 = vshll.u32 %v5308_v35, 16  ;;  %v18314_v35 = vld [vmem:[#allocation2 + $0x68] sm:$0x1] }
 0x144   : > { %15375 = vmatpush3.bf16.msra.mxu1 %v16736_v59  ;;  %15378 = vmatprep.mubr.bf16.mxu1 %v18100_v23  ;;  %v16740_v59 = vld [vmem:[#allocation4 + $0x140] sm:$0xff]   ;;  %v2288_v23 = vor.u32 %v2287_v58, %v2284_v3  ;;  %v5468_v13 = vshll.u32 %v18281_v32, 16  ;;  %v18305_v63 = vrot.slane %v5441_v12, 4  ;;  %v18307_v0 = vrot.slane %v2301_v19, 5  ;;  %v16745_v3 = vld [vmem:[#allocation4 + $0x158] sm:$0xff]  }
 0x145   : > { %15376 = vmatprep.subr.bf16.mxu1 %v16738_v16  ;;  %15108 = vmatprep.subr.bf16.mxu0 %v16741_v26  ;;  %v5461_v42 = vrot.slane %v5459_v56, 4  ;;  %v5472_v60 = vshrl.u32 %v18281_v32, 16  ;;  %v5451_v25 = vor.u32 %v5450_v9, %v18284_v49  ;;  %v2298_v39 = vor.u32 %v2297_v51, %v18287_v10  ;;  %v946_v51 = vld [vmem:[#allocation2 + $0xc8] sm:$0x1] }
 0x146   : > { %15094 = vmatprep.mubr.bf16.mxu0 %v13525_v33  ;;  %v18311_v21 = vrot.slane %v2288_v23, 4  ;;  %v5464_v7 = vrot.slane %v5462_v17, 5  ;;  %v18316_v33 = vrot.slane %v5468_v13, 5  ;;  %v5478_v38 = vshll.u32 %v18300_v18, 16  ;;  %v5311_v17 = vld [vmem:[#allocation2 + $0xc0] sm:$0xf] }
 0x147   : > { %15109 = vmatpush3.bf16.msra.mxu0 %v16741_v26  ;;  %v5474_v48 = vrot.slane %v5472_v60, 4  ;;  %v2306_v12 = vshrl.u32 %v2134_v29, 16  ;;  %v18319_v26 = vrot.slane %v5454_v30, 5  ;;  %v2299_v9 = vrot.slane %v2298_v39, 4  ;;  %v16744_v13 = vld [vmem:[#allocation4 + $0x150] sm:$0xff]  }
 0x148   : > { %15377 = vmatpush3.bf16.msra.mxu1 %v16738_v16  ;;  %15110 = vmatprep.subr.bf16.mxu0 %v16743_v46  ;;  %v5465_v58 = vor.u32 %v5464_v7, %v5461_v42  ;;  %v2309_v40 = vshll.u32 %v2134_v29, 16  ;;  %v13528_v19 = vcombine.low %v2270_v31, %v2280_v6  ;;  %v2315_v23 = vshll.u32 %v18303_v22, 16  ;;  %v18332_v6 = vld [vmem:[#allocation2 + $0xc4] sm:$0xf]  ;;  %v16747_v29 = vld [vmem:[#allocation4 + $0x160] sm:$0xff]  }
 0x149   : > { %15394 = vmatprep.subr.bf16.mxu1 %v16740_v59  ;;  %v5475_v56 = vor.u32 %v5474_v48, %v18316_v33  ;;  %v2308_v16 = vrot.slane %v2306_v12, 4  ;;  %v18325_v60 = vrot.slane %v5451_v25, 4  ;;  %v2294_v30 = vsel %vm17255_vm7, %v18311_v21, %v18287_v10 }
 0x14a   : > { %15095 = vmatmul.mubr.bf16.gmra.mrb[4].mxu0 %v18262_v54  ;;  %v2311_v54 = vrot.slane %v2309_v40, 5  ;;  %v2319_v31 = vshrl.u32 %v18303_v22, 16  ;;  %v2317_v42 = vrot.slane %v2315_v23, 5  ;;  %v2325_v25 = vshll.u32 %v18314_v35, 16  ;;  %v16746_v23 = vld [vmem:[#allocation4 + $0x158] sm:$0xff]  }
 0x14b   : > { %15379 = vmatmul.mubr.bf16.vlgmr.msra.gmra.mrb[0].mxu1 %v18106_v11  ;;  %15111 = vmatpush3.bf16.msra.mxu0 %v16743_v46  ;;  %v2304_v11 = vsel %vm17255_vm7, %v2299_v9, %v18307_v0  ;;  %v5480_v46 = vrot.slane %v5478_v38, 5  ;;  %v5466_v10 = vrot.slane %v5465_v58, 4  ;;  %v20871_v7 = vrot.slane %v17934_v44, 4 }
 0x14c   : > { %15395 = vmatpush3.bf16.msra.mxu1 %v16740_v59  ;;  %15382 = vmatprep.mubr.bf16.mxu1 %v18255_v34  ;;  %v2312_v21 = vor.u32 %v2311_v54, %v2308_v16  ;;  %v2321_v39 = vrot.slane %v2319_v31, 4  ;;  %v2539_v34 = vld [vmem:[#allocation2 + $0xc] sm:$0xe]  ;;  %v5476_v12 = vrot.slane %v5475_v56, 4  ;;  %v2327_v40 = vrot.slane %v2325_v25, 5 }
 0x14d   : > { %15396 = vmatprep.subr.bf16.mxu1 %v16742_v14  ;;  %15112 = vmatprep.subr.bf16.mxu0 %v16745_v3  ;;  %v947_v59 = vsel %vm17275_vm10, %v20871_v7, %v946_v51  ;;  %v5483_v0 = vshrl.u32 %v5311_v17, 16  ;;  %v5486_v38 = vshll.u32 %v5311_v17, 16  ;;  %v5447_v9 = vsel %vm17255_vm7, %v18305_v63, %v18284_v49  ;;  %v16749_v17 = vld [vmem:[#allocation4 + $0x168] sm:$0xff]  }
 0x14e   : > { %15098 = vmatprep.mubr.bf16.mxu0 %v18276_v55  ;;  %948 = vst [vmem:[#allocation2 + $0xc8] sm:$0x1] %v947_v59  ;;  %v2313_v58 = vrot.slane %v2312_v21, 4  ;;  %v2322_v16 = vor.u32 %v2321_v39, %v2317_v42  ;;  %v5492_v44 = vshll.u32 %v18332_v6, 16  ;;  %v5457_v55 = vsel %vm17255_vm7, %v18325_v60, %v18319_v26  ;;  %v5715_v39 = vld [vmem:[#allocation2 + $0x6c] sm:$0xe] }
 0x14f   : > { %15113 = vmatpush3.bf16.msra.mxu0 %v16745_v3  ;;  %v5485_v56 = vrot.slane %v5483_v0, 4  ;;  %v5488_v51 = vrot.slane %v5486_v38, 5  ;;  %v5496_v3 = vshrl.u32 %v18332_v6, 16  ;;  %v13529_v54 = vcombine.low %v2294_v30, %v2304_v11  ;;  %v2540_v7 = vld [vmem:[#allocation2 + $0x18] sm:$0xe]  ;;  %v16753_v38 = vld [vmem:[#allocation4 + $0x178] sm:$0xff]  }
 0x150   : > { %15397 = vmatpush3.bf16.msra.mxu1 %v16742_v14  ;;  %15114 = vmatprep.subr.bf16.mxu0 %v16747_v29  ;;  %v2323_v49 = vrot.slane %v2322_v16, 4  ;;  %v18354_v63 = vrot.slane %v5492_v44, 5  ;;  %v2573_v31 = vrot.slane %v17937_v62, 5  ;;  %v5471_v14 = vsel %vm17255_vm7, %v5466_v10, %v18316_v33  ;;  %v16751_v33 = vld [vmem:[#allocation4 + $0x170] sm:$0xff]   ;;  %v17033_v59 = vld [vmem:[#allocation2 + $0x70] sm:$0xf] }
 0x151   : > { %15398 = vmatprep.subr.bf16.mxu1 %v16744_v13  ;;  %v5481_v26 = vsel %vm17255_vm7, %v5476_v12, %v5480_v46  ;;  %v5498_v60 = vrot.slane %v5496_v3, 4  ;;  %v13539_v25 = vrot.slane %v2539_v34, 9  ;;  %v2318_v30 = vsel %vm17255_vm7, %v2313_v58, %v2317_v42 }
 0x152   : > { %15099 = vmatmul.mubr.bf16.gmra.mrb[8].mxu0 %v13528_v19  ;;  %v2328_v11 = vsel %vm17255_vm7, %v2323_v49, %v2327_v40  ;;  %v2575_v62 = vrot.slane %v2573_v31, 4  ;;  %v17032_v19 = vld [vmem:[#allocation2 + $0x14] sm:$0x1]  ;;  %v5489_v46 = vor.u32 %v5488_v51, %v5485_v56  ;;  %v13715_v42 = vcombine.low %v5471_v14, %v5481_v26  ;;  %v2541_v56 = vld [vmem:[#allocation2 + $0x24] sm:$0xe] }
 0x153   : > { %15383 = vmatmul.mubr.bf16.gmra.mrb[4].mxu1 %v18264_v61  ;;  %15115 = vmatpush3.bf16.msra.mxu0 %v16747_v29  ;;  %v2576_v21 = vrot.slane %v17032_v19, 5  ;;  %v5499_v10 = vor.u32 %v5498_v60, %v18354_v63  ;;  %v13714_v61 = vcombine.low %v5447_v9, %v5457_v55  ;;  %v16748_v29 = vld [vmem:[#allocation4 + $0x160] sm:$0xff]   ;;  %v5749_v34 = vrot.slane %v17033_v59, 5  ;;  %v5716_v55 = vld [vmem:[#allocation2 + $0x78] sm:$0xe] }
 0x154   : > { %15399 = vmatpush3.bf16.msra.mxu1 %v16744_v13  ;;  %15386 = vmatprep.mubr.bf16.mxu1 %v18278_v45  ;;  %v13530_v12 = vcombine.low %v2318_v30, %v2328_v11  ;;  %v13725_v13 = vrot.slane %v5715_v39, 9  ;;  %v13540_v0 = vrot.slane %v2540_v7, 9  ;;  %v16750_v45 = vld [vmem:[#allocation4 + $0x168] sm:$0xff]   ;;  %v2574_v58 = vsel %vm17724_vm13, %v13539_v25, %v2573_v31  ;;  %v17034_v49 = vld [vmem:[#allocation2 + $0x74] sm:$0x1] }
 0x155   : > { %15400 = vmatprep.subr.bf16.mxu1 %v16746_v23  ;;  %15116 = vmatprep.subr.bf16.mxu0 %v16749_v17  ;;  %v18369_v48 = vld [vmem:[#allocation2 + $0xc8] sm:$0x1]  ;;  %v2577_v9 = vsel %vm17724_vm13, %v2575_v62, %v2576_v21  ;;  %v2580_v16 = vrot.slane %v17951_v1, 5  ;;  %v2583_v44 = vrot.slane %v17966_v53, 5  ;;  %v5490_v51 = vrot.slane %v5489_v46, 4  ;;  %v16755_v21 = vld [vmem:[#allocation4 + $0x180] sm:$0xff]  }
 0x156   : > { %15102 = vmatprep.mubr.bf16.mxu0 %v13529_v54  ;;  %v5502_v40 = vshll.u32 %v18369_v48, 16  ;;  %v5500_v3 = vrot.slane %v5499_v10, 4  ;;  %v5751_v14 = vrot.slane %v5749_v34, 4  ;;  %v5756_v31 = vrot.slane %v17968_v20, 5  ;;  %v2542_v62 = vld [vmem:[#allocation2 + $0x30] sm:$0xe] }
 0x157   : > { %15117 = vmatpush3.bf16.msra.mxu0 %v16749_v17  ;;  %v5752_v17 = vrot.slane %v17034_v49, 5  ;;  %v2582_v26 = vrot.slane %v2580_v16, 4  ;;  %v2587_v60 = vrot.slane %v18016_v8, 5  ;;  %v13547_v1 = vcombine.low %v2574_v58, %v2577_v9  ;;  %v5717_v7 = vld [vmem:[#allocation2 + $0x84] sm:$0xe] }
 0x158   : > { %15401 = vmatpush3.bf16.msra.mxu1 %v16746_v23  ;;  %15118 = vmatprep.subr.bf16.mxu0 %v16751_v33  ;;  %v5504_v54 = vrot.slane %v5502_v40, 5  ;;  %v2581_v53 = vsel %vm17724_vm13, %v13540_v0, %v2580_v16  ;;  %v13541_v25 = vrot.slane %v2541_v56, 9  ;;  %v2590_v11 = vrot.slane %v18018_v5, 5  ;;  %v5718_v0 = vld [vmem:[#allocation2 + $0x90] sm:$0xe] }
 0x159   : > { %15402 = vmatprep.subr.bf16.mxu1 %v16748_v29  ;;  %v2584_v23 = vsel %vm17724_vm13, %v2582_v26, %v2583_v44  ;;  %v2589_v30 = vrot.slane %v2587_v60, 4  ;;  %v5495_v20 = vsel %vm17255_vm7, %v5490_v51, %v18354_v63  ;;  %v5750_v19 = vsel %vm17724_vm13, %v13725_v13, %v5749_v34  ;;  %v16754_v34 = vld [vmem:[#allocation4 + $0x178] sm:$0xff]  }
 0x15a   : > { %15103 = vmatmul.mubr.bf16.gmra.mrb[12].mxu0 %v13530_v12  ;;  %v5505_v8 = vsel %vm17255_vm7, %v5500_v3, %v5504_v54  ;;  %v13726_v39 = vrot.slane %v5716_v55, 9  ;;  %v5753_v5 = vsel %vm17724_vm13, %v5751_v14, %v5752_v17  ;;  %v5758_v46 = vrot.slane %v5756_v31, 4  ;;  %v2544_v3 = vld [vmem:[#allocation2 + $0x48] sm:$0xe]  ;;  %v16756_v54 = vld [vmem:[#allocation4 + $0x180] sm:$0xff]   ;;  %v20873_v14 = vld [vmem:[#allocation15_spill] sm:$0xff] }
 0x15b   : > { %15387 = vmatmul.mubr.bf16.gmra.mrb[8].mxu1 %v13714_v61  ;;  %15119 = vmatpush3.bf16.msra.mxu0 %v16751_v33  ;;  %v16752_v33 = vld [vmem:[#allocation4 + $0x170] sm:$0xff]   ;;  %v5759_v10 = vrot.slane %v17985_v2, 5  ;;  %v5763_v63 = vrot.slane %v18037_v37, 5  ;;  %v13548_v61 = vcombine.low %v2581_v53, %v2584_v23  ;;  %v13716_v59 = vcombine.low %v5495_v20, %v5505_v8  ;;  %v2543_v2 = vld [vmem:[#allocation2 + $0x3c] sm:$0xe] }
 0x15c   : > { %15403 = vmatpush3.bf16.msra.mxu1 %v16748_v29  ;;  %15390 = vmatprep.mubr.bf16.mxu1 %v13715_v42  ;;  %v13542_v29 = vrot.slane %v2542_v62, 9  ;;  %v2594_v42 = vrot.slane %v18067_v43, 5  ;;  %v2588_v12 = vsel %vm17724_vm13, %v13541_v25, %v2587_v60  ;;  %v2591_v40 = vsel %vm17724_vm13, %v2589_v30, %v2590_v11  ;;  %v16757_v43 = vld [vmem:[#allocation4 + $0x188] sm:$0xff]   ;;  %v20874_v60 = vld [vmem:[#allocation16_spill] sm:$0xff]  ;;  %v20875_v25 = vld [vmem:[#allocation14_spill] sm:$0xff] }
 0x15d   : > { %15404 = vmatprep.subr.bf16.mxu1 %v16750_v45  ;;  %15120 = vmatprep.subr.bf16.mxu0 %v16753_v38  ;;  %v2597_v13 = vrot.slane %v18114_v24, 5  ;;  %v13733_v37 = vcombine.low %v5750_v19, %v5753_v5  ;;  %v18404_v58 = vsel %vm17724_vm13, %v13726_v39, %v5756_v31  ;;  %v5765_v16 = vrot.slane %v5763_v63, 4  ;;  %v5719_v53 = vld [vmem:[#allocation2 + $0x9c] sm:$0xe]  ;;  %v18423_v62 = vld [vmem:[#allocation2 + $0xa8] sm:$0xe] }
 0x15e   : > { %15122 = vmatprep.mubr.bf16.mxu0 %v13547_v1  ;;  %v2596_v9 = vrot.slane %v2594_v42, 4  ;;  %v5766_v44 = vrot.slane %v18050_v50, 5  ;;  %v2601_v55 = vrot.slane %v18132_v28, 5  ;;  %v5760_v24 = vsel %vm17724_vm13, %v5758_v46, %v5759_v10  ;;  %v16759_v50 = vld [vmem:[#allocation4 + $0x190] sm:$0xff]   ;;  %v2545_v20 = vld [vmem:[#allocation2 + $0x54] sm:$0xe] }
 0x15f   : > { %15121 = vmatpush3.bf16.msra.mxu0 %v16753_v38  ;;  %v13727_v38 = vrot.slane %v5717_v7, 9  ;;  %v2595_v56 = vsel %vm17724_vm13, %v13542_v29, %v2594_v42  ;;  %v5770_v51 = vrot.slane %v18104_v41, 5  ;;  %v13543_v17 = vrot.slane %v2543_v2, 9  ;;  %v16758_v7 = vld [vmem:[#allocation4 + $0x188] sm:$0xff]  }
 0x160   : > { %15405 = vmatpush3.bf16.msra.mxu1 %v16750_v45  ;;  %15138 = vmatprep.subr.bf16.mxu0 %v16755_v21  ;;  %v13549_v45 = vcombine.low %v2588_v12, %v2591_v40  ;;  %v2598_v49 = vsel %vm17724_vm13, %v2596_v9, %v2597_v13  ;;  %v2603_v28 = vrot.slane %v2601_v55, 4  ;;  %v2604_v26 = vrot.slane %v20873_v14, 5  ;;  %v18435_v12 = vld [vmem:[#allocation2 + $0xb4] sm:$0xe]  ;;  %v16762_v14 = vld [vmem:[#allocation4 + $0x198] sm:$0xff]  }
 0x161   : > { %15406 = vmatprep.subr.bf16.mxu1 %v16752_v33  ;;  %v13728_v31 = vrot.slane %v5718_v0, 9  ;;  %v5773_v1 = vrot.slane %v20874_v60, 5  ;;  %v5764_v41 = vsel %vm17724_vm13, %v13727_v38, %v5763_v63  ;;  %v5767_v23 = vsel %vm17724_vm13, %v5765_v16, %v5766_v44  ;;  %v20877_v0 = vld [vmem:[#allocation20_spill] sm:$0xff]  ;;  %v16763_v9 = vld [vmem:[#allocation4 + $0x1a0] sm:$0xff]  }
 0x162   : > { %15123 = vmatmul.mubr.bf16.vlgmr.msra.gmra.mrb[0].mxu0 %v13548_v61  ;;  %v5777_v30 = vrot.slane %v20875_v25, 5  ;;  %v2608_v11 = vrot.slane %v18184_v15, 5  ;;  %v13734_v8 = vcombine.low %v18404_v58, %v5760_v24  ;;  %v13550_v19 = vcombine.low %v2595_v56, %v2598_v49  ;;  %v20876_v15 = vld [vmem:[#allocation18_spill] sm:$0xff]  ;;  %v2546_v58 = vld [vmem:[#allocation2 + $0x60] sm:$0xe] }
 0x163   : > { %15391 = vmatmul.mubr.bf16.gmra.mrb[12].mxu1 %v13716_v59  ;;  %15139 = vmatpush3.bf16.msra.mxu0 %v16755_v21  ;;  %v5772_v21 = vrot.slane %v5770_v51, 4  ;;  %v13544_v39 = vrot.slane %v2544_v3, 9  ;;  %v2602_v5 = vsel %vm17724_vm13, %v13543_v17, %v2601_v55  ;;  %v2605_v46 = vsel %vm17724_vm13, %v2603_v28, %v2604_v26 }
 0x164   : > { %15407 = vmatpush3.bf16.msra.mxu1 %v16752_v33  ;;  %15410 = vmatprep.mubr.bf16.mxu1 %v13733_v37  ;;  %v16761_v33 = vld [vmem:[#allocation4 + $0x198] sm:$0xff]   ;;  %v2610_v10 = vrot.slane %v2608_v11, 4  ;;  %v2611_v63 = vrot.slane %v20876_v15, 5  ;;  %v13735_v61 = vcombine.low %v5764_v41, %v5767_v23  ;;  %v5771_v29 = vsel %vm17724_vm13, %v13728_v31, %v5770_v51  ;;  %v16767_v41 = vld [vmem:[#allocation4 + $0x1b0] sm:$0xff]   ;;  %v16764_v23 = vld [vmem:[#allocation4 + $0x1a0] sm:$0xff]  }
 0x165   : > { %15408 = vmatprep.subr.bf16.mxu1 %v16754_v34  ;;  %15140 = vmatprep.subr.bf16.mxu0 %v16757_v43  ;;  %v5784_v42 = vrot.slane %v18208_v27, 5  ;;  %v2615_v59 = vrot.slane %v18233_v36, 5  ;;  %v13729_v40 = vrot.slane %v5719_v53, 9  ;;  %v5779_v13 = vrot.slane %v5777_v30, 4  ;;  %v16760_v36 = vld [vmem:[#allocation4 + $0x190] sm:$0xff]  }
 0x166   : > { %15126 = vmatprep.mubr.bf16.mxu0 %v13549_v45  ;;  %v5780_v2 = vrot.slane %v20877_v0, 5  ;;  %v5791_v37 = vrot.slane %v18281_v32, 5  ;;  %v13730_v27 = vrot.slane %v18423_v62, 9  ;;  %v13545_v38 = vrot.slane %v2545_v20, 9  ;;  %v16782_v0 = vld [vmem:[#allocation4 + $0x1d0] sm:$0xff]  }
 0x167   : > { %15141 = vmatpush3.bf16.msra.mxu0 %v16757_v43  ;;  %v13551_v43 = vcombine.low %v2602_v5, %v2605_v46  ;;  %v2609_v16 = vsel %vm17724_vm13, %v13544_v39, %v2608_v11  ;;  %v2612_v44 = vsel %vm17724_vm13, %v2610_v10, %v2611_v63  ;;  %v2617_v32 = vrot.slane %v2615_v59, 4  ;;  %v16769_v46 = vld [vmem:[#allocation4 + $0x1b8] sm:$0xff]   ;;  %v16771_v10 = vld [vmem:[#allocation2 + $0x18] sm:$0xff]  }
 0x168   : > { %15409 = vmatpush3.bf16.msra.mxu1 %v16754_v34  ;;  %15142 = vmatprep.subr.bf16.mxu0 %v16759_v50  ;;  %v5774_v34 = vsel %vm17724_vm13, %v5772_v21, %v5773_v1  ;;  %v2618_v55 = vrot.slane %v18268_v57, 5  ;;  %v5786_v24 = vrot.slane %v5784_v42, 4  ;;  %v5787_v45 = vrot.slane %v18266_v47, 5  ;;  %v16766_v21 = vld [vmem:[#allocation4 + $0x1a8] sm:$0xff]  }
 0x169   : > { %15426 = vmatprep.subr.bf16.mxu1 %v16756_v54  ;;  %v13731_v56 = vrot.slane %v18435_v12, 9  ;;  %v2622_v51 = vrot.slane %v18303_v22, 5  ;;  %v5778_v3 = vsel %vm17724_vm13, %v13729_v40, %v5777_v30  ;;  %v5781_v49 = vsel %vm17724_vm13, %v5779_v13, %v5780_v2  ;;  %v16765_v22 = vld [vmem:[#allocation4 + $0x1a8] sm:$0xff]   ;;  %v16779_v13 = vld [vmem:[#allocation2 + $0x30] sm:$0xff]   ;;  %v16775_v2 = vld [vmem:[#allocation2 + $0x84] sm:$0xff]  }
 0x16a   : > { %15127 = vmatmul.mubr.bf16.gmra.mrb[4].mxu0 %v13550_v19  ;;  %v5794_v57 = vrot.slane %v18300_v18, 5  ;;  %v13552_v17 = vcombine.low %v2609_v16, %v2612_v44  ;;  %v13546_v28 = vrot.slane %v2546_v58, 9  ;;  %v2625_v47 = vrot.slane %v18314_v35, 5  ;;  %v5722_v35 = vld [vmem:[#allocation2 + $0xc0] sm:$0xe]  ;;  %v16772_v12 = vld [vmem:[#allocation2 + $0x78] sm:$0xff]  }
 0x16b   : > { %15411 = vmatmul.mubr.bf16.vlgmr.msra.gmra.mrb[0].mxu1 %v13734_v8  ;;  %15143 = vmatpush3.bf16.msra.mxu0 %v16759_v50  ;;  %v5793_v50 = vrot.slane %v5791_v37, 4  ;;  %v2616_v26 = vsel %vm17724_vm13, %v13545_v38, %v2615_v59  ;;  %v2619_v31 = vsel %vm17724_vm13, %v2617_v32, %v2618_v55  ;;  %v2624_v60 = vrot.slane %v2622_v51, 4  ;;  %v16770_v59 = vld [vmem:[#allocation4 + $0x1b8] sm:$0xff]   ;;  %v16777_v40 = vld [vmem:[#allocation4 + $0x1c8] sm:$0xff]   ;;  %v16780_v58 = vld [vmem:[#allocation2 + $0x90] sm:$0xff]  }
 0x16c   : > { %15427 = vmatpush3.bf16.msra.mxu1 %v16756_v54  ;;  %15414 = vmatprep.mubr.bf16.mxu1 %v13735_v61  ;;  %v13736_v54 = vcombine.low %v5771_v29, %v5774_v34  ;;  %v5798_v1 = vrot.slane %v18332_v6, 5  ;;  %v13737_v18 = vcombine.low %v5778_v3, %v5781_v49  ;;  %v13553_v53 = vcombine.low %v2616_v26, %v2619_v31  ;;  %v16774_v61 = vld [vmem:[#allocation4 + $0x1c0] sm:$0xff]   ;;  %v16768_v29 = vld [vmem:[#allocation4 + $0x1b0] sm:$0xff]   ;;  %v18478_v38 = vld [vmem:[#allocation2 + $0x1c] sm:$0xf] }
 0x16d   : > { %15428 = vmatprep.subr.bf16.mxu1 %v16758_v7  ;;  %15144 = vmatprep.subr.bf16.mxu0 %v16761_v33  ;;  %v2623_v25 = vsel %vm17724_vm13, %v13546_v28, %v2622_v51  ;;  %v2626_v30 = vsel %vm17724_vm13, %v2624_v60, %v2625_v47  ;;  %v5785_v6 = vsel %vm17724_vm13, %v13730_v27, %v5784_v42  ;;  %v13732_v39 = vrot.slane %v5722_v35, 9  ;;  %v16781_v34 = vld [vmem:[#allocation2 + $0x3c] sm:$0xff]   ;;  %v16785_v27 = vld [vmem:[#allocation4 + $0x1d8] sm:$0xff]   ;;  %v3086_v47 = vld [vmem:[#allocation2 + $0x24] sm:$0xf] }
 0x16e   : > { %15130 = vmatprep.mubr.bf16.mxu0 %v13551_v43  ;;  %v5788_v11 = vsel %vm17724_vm13, %v5786_v24, %v5787_v45  ;;  %v5792_v62 = vsel %vm17724_vm13, %v13731_v56, %v5791_v37  ;;  %v5795_v20 = vsel %vm17724_vm13, %v5793_v50, %v5794_v57  ;;  %v13554_v8 = vcombine.low %v2623_v25, %v2626_v30  ;;  %v16776_v37 = vld [vmem:[#allocation4 + $0x1c0] sm:$0xff]   ;;  %v3083_v43 = vld [vmem:[#allocation2 + $0x18] sm:$0xf]  ;;  %v16787_v32 = vld [vmem:[#allocation2 + $0x48] sm:$0xff]  }
 0x16f   : > { %15145 = vmatpush3.bf16.msra.mxu0 %v16761_v33  ;;  %v13738_v19 = vcombine.low %v5785_v6, %v5788_v11  ;;  %v5800_v33 = vrot.slane %v5798_v1, 4  ;;  %v5801_v5 = vrot.slane %v18369_v48, 5  ;;  %v5799_v15 = vsel %vm17724_vm13, %v13732_v39, %v5798_v1  ;;  %v16773_v48 = vld [vmem:[#allocation2 + $0x24] sm:$0xff]   ;;  %v6257_v56 = vld [vmem:[#allocation2 + $0x78] sm:$0xf]  ;;  %v16783_v30 = vld [vmem:[#allocation2 + $0x9c] sm:$0xff]  }
 0x170   : > { %15429 = vmatpush3.bf16.msra.mxu1 %v16758_v7  ;;  %15146 = vmatprep.subr.bf16.mxu0 %v16763_v9  ;;  %v13739_v7 = vcombine.low %v5792_v62, %v5795_v20  ;;  %v3108_v16 = vshrl.u32 %v3083_v43, 16  ;;  %v3111_v44 = vshll.u32 %v3083_v43, 16  ;;  %v3117_v55 = vshll.u32 %v18478_v38, 16  ;;  %v18485_v49 = vld [vmem:[#allocation2 + $0x7c] sm:$0xf] }
 0x171   : > { %15430 = vmatprep.subr.bf16.mxu1 %v16760_v36  ;;  %v5802_v63 = vsel %vm17724_vm13, %v5800_v33, %v5801_v5  ;;  %v3121_v24 = vshrl.u32 %v18478_v38, 16  ;;  %v18487_v50 = vld [vmem:[#allocation2 + $0x80] sm:$0x1]  ;;  %v6282_v28 = vshrl.u32 %v6257_v56, 16  ;;  %v6285_v26 = vshll.u32 %v6257_v56, 16  ;;  %v16786_v33 = vld [vmem:[#allocation4 + $0x1d8] sm:$0xff]  }
 0x172   : > { %15131 = vmatmul.mubr.bf16.gmra.mrb[8].mxu0 %v13552_v17  ;;  %v13740_v42 = vcombine.low %v5799_v15, %v5802_v63  ;;  %v3110_v51 = vrot.slane %v3108_v16, 4  ;;  %v3113_v3 = vrot.slane %v3111_v44, 5  ;;  %v18489_v57 = vrot.slane %v3117_v55, 5  ;;  %v18495_v1 = vld [vmem:[#allocation2 + $0x28] sm:$0xf]  ;;  %v16792_v44 = vld [vmem:[#allocation4 + $0x1e0] sm:$0xff]  }
 0x173   : > { %15415 = vmatmul.mubr.bf16.gmra.mrb[4].mxu1 %v13736_v54  ;;  %15147 = vmatpush3.bf16.msra.mxu0 %v16763_v9  ;;  %v16778_v9 = vld [vmem:[#allocation4 + $0x1c8] sm:$0xff]   ;;  %v3123_v54 = vrot.slane %v3121_v24, 4  ;;  %v6291_v31 = vshll.u32 %v18485_v49, 16  ;;  %v6295_v60 = vshrl.u32 %v18485_v49, 16  ;;  %v6301_v35 = vshll.u32 %v18487_v50, 16  ;;  %v16797_v56 = vld [vmem:[#allocation2 + $0x6c] sm:$0xff]  }
 0x174   : > { %15431 = vmatpush3.bf16.msra.mxu1 %v16760_v36  ;;  %15418 = vmatprep.mubr.bf16.mxu1 %v13737_v18  ;;  %v18480_v36 = vld [vmem:[#allocation2 + $0x20] sm:$0x1]  ;;  %v16790_v18 = vld [vmem:[#allocation4 + $0x1e0] sm:$0xff]   ;;  %v3132_v25 = vshrl.u32 %v3086_v47, 16  ;;  %v6287_v11 = vrot.slane %v6285_v26, 5  ;;  %v3141_v15 = vshll.u32 %v18495_v1, 16 }
 0x175   : > { %15432 = vmatprep.subr.bf16.mxu1 %v16762_v14  ;;  %15148 = vmatprep.subr.bf16.mxu0 %v16765_v22  ;;  %v3127_v45 = vshll.u32 %v18480_v36, 16  ;;  %v6293_v62 = vrot.slane %v6291_v31, 5  ;;  %v6297_v20 = vrot.slane %v6295_v60, 4  ;;  %v6260_v63 = vld [vmem:[#allocation2 + $0x84] sm:$0xf] }
 0x176   : > { %15134 = vmatprep.mubr.bf16.mxu0 %v13553_v53  ;;  %v3124_v53 = vor.u32 %v3123_v54, %v18489_v57  ;;  %v3134_v39 = vrot.slane %v3132_v25, 4  ;;  %v6306_v16 = vshrl.u32 %v6260_v63, 16  ;;  %v6309_v24 = vshll.u32 %v6260_v63, 16  ;;  %v3089_v26 = vld [vmem:[#allocation2 + $0x30] sm:$0xf] }
 0x177   : > { %15149 = vmatpush3.bf16.msra.mxu0 %v16765_v22  ;;  %v18491_v17 = vrot.slane %v3127_v45, 5  ;;  %v3114_v22 = vor.u32 %v3113_v3, %v3110_v51 }
 0x178   : > { %15433 = vmatpush3.bf16.msra.mxu1 %v16762_v14  ;;  %15150 = vmatprep.subr.bf16.mxu0 %v16767_v41  ;;  %v16784_v14 = vld [vmem:[#allocation4 + $0x1d0] sm:$0xff]   ;;  %v6308_v54 = vrot.slane %v6306_v16, 4 }
 0x179   : > { %15434 = vmatprep.subr.bf16.mxu1 %v16764_v23  ;;  %v3115_v6 = vrot.slane %v3114_v22, 4 }
 0x17a   : > { %15135 = vmatmul.mubr.bf16.gmra.mrb[12].mxu0 %v13554_v8  ;;  %v16788_v8 = vld [vmem:[#allocation2 + $0xa8] sm:$0xff]  }
 0x17b   : > { %15419 = vmatmul.mubr.bf16.gmra.mrb[8].mxu1 %v13738_v19  ;;  %15151 = vmatpush3.bf16.msra.mxu0 %v16767_v41  ;;  %v6284_v41 = vrot.slane %v6282_v28, 4  ;;  %v16789_v19 = vld [vmem:[#allocation2 + $0x54] sm:$0xff]  }
 0x17c   : > { %15435 = vmatpush3.bf16.msra.mxu1 %v16764_v23  ;;  %15422 = vmatprep.mubr.bf16.mxu1 %v13739_v7  ;;  %v18499_v23 = vld [vmem:[#allocation2 + $0x2c] sm:$0x1]  ;;  %v3135_v7 = vshll.u32 %v3086_v47, 16 }
 0x17d   : > { %15436 = vmatprep.subr.bf16.mxu1 %v16766_v21  ;;  %15152 = vmatprep.subr.bf16.mxu0 %v16769_v46  ;;  %v6288_v5 = vor.u32 %v6287_v11, %v6284_v41  ;;  %v3156_v41 = vshrl.u32 %v3089_v26, 16  ;;  %v3159_v11 = vshll.u32 %v3089_v26, 16  ;;  %v16802_v26 = vld [vmem:[#allocation4 + $0x1f8] sm:$0xff]  }
 0x17e   : > { %15154 = vmatprep.mubr.bf16.mxu0 %v16771_v10  ;;  %v6303_v10 = vrot.slane %v6301_v35, 5  ;;  %v16791_v35 = vld [vmem:[#allocation2 + $0xb4] sm:$0xff]  }
 0x17f   : > { %15153 = vmatpush3.bf16.msra.mxu0 %v16769_v46  ;;  %v6298_v46 = vor.u32 %v6297_v20, %v6293_v62  ;;  %v16794_v20 = vld [vmem:[#allocation4 + $0x1e8] sm:$0xff]   ;;  %v3161_v63 = vrot.slane %v3159_v11, 5 }
 0x180   : > { %15437 = vmatpush3.bf16.msra.mxu1 %v16766_v21  ;;  %15170 = vmatprep.subr.bf16.mxu0 %v16774_v61  ;;  %v3125_v21 = vrot.slane %v3124_v53, 4  ;;  %v18531_v53 = vld [vmem:[#allocation2 + $0x38] sm:$0x1] }
 0x181   : > { %15438 = vmatprep.subr.bf16.mxu1 %v16768_v29 }
 0x182   : > { %15155 = vmatmul.mubr.bf16.vlgmr.msra.gmra.mrb[0].mxu0 %v16773_v48  ;;  %v3120_v48 = vsel %vm17255_vm7, %v3115_v6, %v18489_v57 }
 0x183   : > { %15423 = vmatmul.mubr.bf16.gmra.mrb[12].mxu1 %v13740_v42  ;;  %15171 = vmatpush3.bf16.msra.mxu0 %v16774_v61  ;;  %v18502_v61 = vld [vmem:[#allocation2 + $0x88] sm:$0xf]  ;;  %v3137_v42 = vrot.slane %v3135_v7, 5 }
 0x184   : > { %15439 = vmatpush3.bf16.msra.mxu1 %v16768_v29  ;;  %15442 = vmatprep.mubr.bf16.mxu1 %v16772_v12  ;;  %v16793_v29 = vld [vmem:[#allocation4 + $0x1e8] sm:$0xff]   ;;  %v3151_v12 = vshll.u32 %v18499_v23, 16  ;;  %v6315_v45 = vshll.u32 %v18502_v61, 16  ;;  %v6319_v47 = vshrl.u32 %v18502_v61, 16 }
 0x185   : > { %15440 = vmatprep.subr.bf16.mxu1 %v16770_v59  ;;  %15172 = vmatprep.subr.bf16.mxu0 %v16777_v40  ;;  %v3138_v43 = vor.u32 %v3137_v42, %v3134_v39  ;;  %v3158_v39 = vrot.slane %v3156_v41, 4 }
 0x186   : > { %15158 = vmatprep.mubr.bf16.mxu0 %v16779_v13  ;;  %v16795_v13 = vld [vmem:[#allocation2 + $0x60] sm:$0xff]   ;;  %v18521_v28 = vrot.slane %v6315_v45, 5 }
 0x187   : > { %15173 = vmatpush3.bf16.msra.mxu0 %v16777_v40  ;;  %v18509_v40 = vld [vmem:[#allocation2 + $0x8c] sm:$0x1]  ;;  %v3139_v3 = vrot.slane %v3138_v43, 4  ;;  %v18546_v43 = vld [vmem:[#allocation2 + $0x40] sm:$0xf] }
 0x188   : > { %15441 = vmatpush3.bf16.msra.mxu1 %v16770_v59  ;;  %15174 = vmatprep.subr.bf16.mxu0 %v16782_v0  ;;  %v3145_v59 = vshrl.u32 %v18495_v1, 16  ;;  %v6325_v22 = vshll.u32 %v18509_v40, 16 }
 0x189   : > { %15458 = vmatprep.subr.bf16.mxu1 %v16776_v37 }
 0x18a   : > { %15159 = vmatmul.mubr.bf16.gmra.mrb[4].mxu0 %v16781_v34  ;;  %v16798_v34 = vld [vmem:[#allocation4 + $0x1f0] sm:$0xff]   ;;  %v6327_v6 = vrot.slane %v6325_v22, 5  ;;  %v6266_v22 = vld [vmem:[#allocation2 + $0x9c] sm:$0xf] }
 0x18b   : > { %15443 = vmatmul.mubr.bf16.vlgmr.msra.gmra.mrb[0].mxu1 %v16775_v2  ;;  %15175 = vmatpush3.bf16.msra.mxu0 %v16782_v0  ;;  %v3130_v0 = vsel %vm17255_vm7, %v3125_v21, %v18491_v17  ;;  %v6289_v2 = vrot.slane %v6288_v5, 4  ;;  %v6311_v17 = vrot.slane %v6309_v24, 5  ;;  %v16800_v24 = vld [vmem:[#allocation4 + $0x1f0] sm:$0xff]  }
 0x18c   : > { %15459 = vmatpush3.bf16.msra.mxu1 %v16776_v37  ;;  %15446 = vmatprep.mubr.bf16.mxu1 %v16780_v58  ;;  %v6299_v37 = vrot.slane %v6298_v46, 4  ;;  %v3143_v58 = vrot.slane %v3141_v15, 5  ;;  %v18519_v51 = vcombine.low %v3120_v48, %v3130_v0 }
 0x18d   : > { %15460 = vmatprep.subr.bf16.mxu1 %v16778_v9  ;;  %15176 = vmatprep.subr.bf16.mxu0 %v16785_v27  ;;  %v6312_v25 = vor.u32 %v6311_v17, %v6308_v54 }
 0x18e   : > { %15162 = vmatprep.mubr.bf16.mxu0 %v16787_v32  ;;  %v6294_v32 = vsel %vm17255_vm7, %v6289_v2, %v6293_v62  ;;  %v6304_v55 = vsel %vm17255_vm7, %v6299_v37, %v6303_v10  ;;  %v6263_v62 = vld [vmem:[#allocation2 + $0x90] sm:$0xf]  ;;  %v3162_v37 = vor.u32 %v3161_v63, %v3158_v39 }
 0x18f   : > { %15177 = vmatpush3.bf16.msra.mxu0 %v16785_v27  ;;  %v3153_v27 = vrot.slane %v3151_v12, 5  ;;  %v18525_v31 = vcombine.low %v6294_v32, %v6304_v55  ;;  %v6313_v10 = vrot.slane %v6312_v25, 4  ;;  %v6330_v12 = vshrl.u32 %v6263_v62, 16  ;;  %v18560_v25 = vld [vmem:[#allocation2 + $0xa0] sm:$0xf] }
 0x190   : > { %15461 = vmatpush3.bf16.msra.mxu1 %v16778_v9  ;;  %15178 = vmatprep.subr.bf16.mxu0 %v16790_v18  ;;  %v3147_v9 = vrot.slane %v3145_v59, 4  ;;  %v3175_v59 = vshll.u32 %v18531_v53, 16  ;;  %v3163_v45 = vrot.slane %v3162_v37, 4  ;;  %v3095_v37 = vld [vmem:[#allocation2 + $0x48] sm:$0xf] }
 0x191   : > { %15462 = vmatprep.subr.bf16.mxu1 %v16784_v14  ;;  %v6318_v0 = vsel %vm17255_vm7, %v6313_v10, %v18521_v28  ;;  %v6332_v32 = vrot.slane %v6330_v12, 4  ;;  %v3193_v10 = vshrl.u32 %v18546_v43, 16 }
 0x192   : > { %15163 = vmatmul.mubr.bf16.gmra.mrb[8].mxu0 %v16789_v19  ;;  %v3148_v57 = vor.u32 %v3147_v9, %v3143_v58  ;;  %v16801_v19 = vld [vmem:[#allocation4 + $0x1f8] sm:$0xff]   ;;  %v16803_v9 = vld [vmem:[#allocation4 + $0x200] sm:$0xff]   ;;  %v3177_v16 = vrot.slane %v3175_v59, 5  ;;  %v6357_v59 = vshll.u32 %v6266_v22, 16 }
 0x193   : > { %15447 = vmatmul.mubr.bf16.gmra.mrb[4].mxu1 %v16783_v30  ;;  %15179 = vmatpush3.bf16.msra.mxu0 %v16790_v18  ;;  %v18529_v18 = vld [vmem:[#allocation2 + $0x34] sm:$0xf]  ;;  %v6321_v30 = vrot.slane %v6319_v47, 4  ;;  %v3195_v12 = vrot.slane %v3193_v10, 4 }
 0x194   : > { %15463 = vmatpush3.bf16.msra.mxu1 %v16784_v14  ;;  %15450 = vmatprep.mubr.bf16.mxu1 %v16788_v8  ;;  %v3144_v14 = vsel %vm17255_vm7, %v3139_v3, %v3143_v58  ;;  %v3149_v60 = vrot.slane %v3148_v57, 4  ;;  %v16796_v8 = vld [vmem:[#allocation2 + $0xc0] sm:$0xff]   ;;  %v3165_v7 = vshll.u32 %v18529_v18, 16  ;;  %v3169_v5 = vshrl.u32 %v18529_v18, 16 }
 0x195   : > { %15464 = vmatprep.subr.bf16.mxu1 %v16786_v33  ;;  %15180 = vmatprep.subr.bf16.mxu0 %v16793_v29  ;;  %v6322_v15 = vor.u32 %v6321_v30, %v18521_v28  ;;  %v6333_v58 = vshll.u32 %v6263_v62, 16  ;;  %v18552_v57 = vld [vmem:[#allocation2 + $0x44] sm:$0x1]  ;;  %v3189_v62 = vshll.u32 %v18546_v43, 16 }
 0x196   : > { %15166 = vmatprep.mubr.bf16.mxu0 %v16795_v13  ;;  %v3154_v21 = vsel %vm17255_vm7, %v3149_v60, %v3153_v27  ;;  %v3167_v48 = vrot.slane %v3165_v7, 5  ;;  %v3171_v42 = vrot.slane %v3169_v5, 4  ;;  %v3092_v13 = vld [vmem:[#allocation2 + $0x3c] sm:$0xf] }
 0x197   : > { %15181 = vmatpush3.bf16.msra.mxu0 %v16793_v29  ;;  %v13580_v46 = vcombine.low %v3144_v14, %v3154_v21  ;;  %v18538_v29 = vld [vmem:[#allocation2 + $0x94] sm:$0xf]  ;;  %v6323_v2 = vrot.slane %v6322_v15, 4  ;;  %v3183_v11 = vshll.u32 %v3092_v13, 16  ;;  %v3191_v5 = vrot.slane %v3189_v62, 5  ;;  %v16809_v62 = vld [vmem:[#allocation4 + $0x218] sm:$0xff]  }
 0x198   : > { %15465 = vmatpush3.bf16.msra.mxu1 %v16786_v33  ;;  %15182 = vmatprep.subr.bf16.mxu0 %v16798_v34  ;;  %v18540_v33 = vld [vmem:[#allocation2 + $0x98] sm:$0x1]  ;;  %v3172_v27 = vor.u32 %v3171_v42, %v3167_v48  ;;  %v6339_v55 = vshll.u32 %v18538_v29, 16  ;;  %v6343_v3 = vshrl.u32 %v18538_v29, 16  ;;  %v3168_v14 = vsel %vm17255_vm7, %v3163_v45, %v3167_v48  ;;  %v18567_v15 = vld [vmem:[#allocation2 + $0xa4] sm:$0x1] }
 0x199   : > { %15466 = vmatprep.subr.bf16.mxu1 %v16792_v44  ;;  %v6349_v47 = vshll.u32 %v18540_v33, 16  ;;  %v3185_v7 = vrot.slane %v3183_v11, 5  ;;  %v6354_v42 = vshrl.u32 %v6266_v22, 16  ;;  %v18581_v22 = vld [vmem:[#allocation2 + $0x50] sm:$0x1] }
 0x19a   : > { %15167 = vmatmul.mubr.bf16.gmra.mrb[12].mxu0 %v16797_v56  ;;  %v6335_v56 = vrot.slane %v6333_v58, 5  ;;  %v3173_v17 = vrot.slane %v3172_v27, 4  ;;  %v6341_v28 = vrot.slane %v6339_v55, 5  ;;  %v6345_v41 = vrot.slane %v6343_v3, 4  ;;  %v16804_v58 = vld [vmem:[#allocation4 + $0x200] sm:$0xff]  }
 0x19b   : > { %15451 = vmatmul.mubr.bf16.gmra.mrb[8].mxu1 %v16791_v35  ;;  %15183 = vmatpush3.bf16.msra.mxu0 %v16798_v34  ;;  %v6328_v34 = vsel %vm17255_vm7, %v6323_v2, %v6327_v6  ;;  %v3180_v35 = vshrl.u32 %v3092_v13, 16  ;;  %v6351_v6 = vrot.slane %v6349_v47, 5  ;;  %v6363_v2 = vshll.u32 %v18560_v25, 16  ;;  %v18576_v55 = vld [vmem:[#allocation2 + $0x4c] sm:$0xf] }
 0x19c   : > { %15467 = vmatpush3.bf16.msra.mxu1 %v16792_v44  ;;  %15454 = vmatprep.mubr.bf16.mxu1 %v16796_v8  ;;  %v16799_v44 = vld [vmem:[#allocation2 + $0xcc] sm:$0xff]   ;;  %v18555_v54 = vcombine.low %v6318_v0, %v6328_v34  ;;  %v6336_v60 = vor.u32 %v6335_v56, %v6332_v32  ;;  %v3178_v30 = vsel %vm17255_vm7, %v3173_v17, %v3177_v16  ;;  %v16807_v0 = vld [vmem:[#allocation4 + $0x210] sm:$0xff]   ;;  %v6356_v27 = vrot.slane %v6354_v42, 4  ;;  %v6269_v11 = vld [vmem:[#allocation2 + $0xa8] sm:$0xf] }
 0x19d   : > { %15468 = vmatprep.subr.bf16.mxu1 %v16794_v20  ;;  %15184 = vmatprep.subr.bf16.mxu0 %v16801_v19  ;;  %v13581_v8 = vcombine.low %v3168_v14, %v3178_v30  ;;  %v6346_v21 = vor.u32 %v6345_v41, %v6341_v28  ;;  %v3182_v39 = vrot.slane %v3180_v35, 4  ;;  %v6359_v16 = vrot.slane %v6357_v59, 5  ;;  %v16806_v41 = vld [vmem:[#allocation4 + $0x208] sm:$0xff]  }
 0x19e   : > { %15186 = vmatprep.mubr.bf16.mxu0 %v18519_v51  ;;  %v16805_v51 = vld [vmem:[#allocation4 + $0x208] sm:$0xff]   ;;  %v6367_v32 = vshrl.u32 %v18560_v25, 16  ;;  %v3196_v34 = vor.u32 %v3195_v12, %v3191_v5  ;;  %v6365_v45 = vrot.slane %v6363_v2, 5  ;;  %v3204_v17 = vshrl.u32 %v3095_v37, 16  ;;  %v16811_v12 = vld [vmem:[#allocation4 + $0x220] sm:$0xff]  }
 0x19f   : > { %15185 = vmatpush3.bf16.msra.mxu0 %v16801_v19  ;;  %v6337_v19 = vrot.slane %v6336_v60, 4  ;;  %v6347_v48 = vrot.slane %v6346_v21, 4  ;;  %v6360_v56 = vor.u32 %v6359_v16, %v6356_v27  ;;  %v3207_v14 = vshll.u32 %v3095_v37, 16 }
 0x1a0   : > { %15469 = vmatpush3.bf16.msra.mxu1 %v16794_v20  ;;  %15202 = vmatprep.subr.bf16.mxu0 %v16803_v9  ;;  %v3199_v20 = vshll.u32 %v18552_v57, 16  ;;  %v6369_v3 = vrot.slane %v6367_v32, 4  ;;  %v3197_v47 = vrot.slane %v3196_v34, 4  ;;  %v3213_v60 = vshll.u32 %v18576_v55, 16 }
 0x1a1   : > { %15470 = vmatprep.subr.bf16.mxu1 %v16800_v24  ;;  %v6342_v63 = vsel %vm17255_vm7, %v6337_v19, %v6341_v28  ;;  %v6361_v35 = vrot.slane %v6360_v56, 4  ;;  %v3217_v21 = vshrl.u32 %v18576_v55, 16  ;;  %v6378_v59 = vshrl.u32 %v6269_v11, 16 }
 0x1a2   : > { %15187 = vmatmul.mubr.bf16.vlgmr.msra.gmra.mrb[0].mxu0 %v13580_v46  ;;  %v3186_v46 = vor.u32 %v3185_v7, %v3182_v39  ;;  %v3201_v13 = vrot.slane %v3199_v20, 5  ;;  %v3215_v19 = vrot.slane %v3213_v60, 5  ;;  %v18587_v39 = vld [vmem:[#allocation2 + $0xac] sm:$0xf]  ;;  %v3223_v20 = vshll.u32 %v18581_v22, 16 }
 0x1a3   : > { %15455 = vmatmul.mubr.bf16.gmra.mrb[12].mxu1 %v16799_v44  ;;  %15203 = vmatpush3.bf16.msra.mxu0 %v16803_v9  ;;  %v6352_v9 = vsel %vm17255_vm7, %v6347_v48, %v6351_v6  ;;  %v6373_v44 = vshll.u32 %v18567_v15, 16  ;;  %v3206_v6 = vrot.slane %v3204_v17, 4  ;;  %v3219_v42 = vrot.slane %v3217_v21, 4  ;;  %v6272_v17 = vld [vmem:[#allocation2 + $0xb4] sm:$0xf] }
 0x1a4   : > { %15471 = vmatpush3.bf16.msra.mxu1 %v16800_v24  ;;  %15474 = vmatprep.mubr.bf16.mxu1 %v18525_v31  ;;  %v13767_v31 = vcombine.low %v6342_v63, %v6352_v9  ;;  %v3187_v24 = vrot.slane %v3186_v46, 4  ;;  %v18593_v63 = vld [vmem:[#allocation2 + $0xb0] sm:$0x1]  ;;  %v6381_v46 = vshll.u32 %v6269_v11, 16  ;;  %v3225_v2 = vrot.slane %v3223_v20, 5 }
 0x1a5   : > { %15472 = vmatprep.subr.bf16.mxu1 %v16802_v26  ;;  %15204 = vmatprep.subr.bf16.mxu0 %v16805_v51  ;;  %v6375_v30 = vrot.slane %v6373_v44, 5  ;;  %v6391_v37 = vshrl.u32 %v18587_v39, 16  ;;  %v3098_v9 = vld [vmem:[#allocation2 + $0x54] sm:$0xf]  ;;  %v3220_v16 = vor.u32 %v3219_v42, %v3215_v19  ;;  %v6380_v32 = vrot.slane %v6378_v59, 4 }
 0x1a6   : > { %15190 = vmatprep.mubr.bf16.mxu0 %v13581_v8  ;;  %v3192_v28 = vsel %vm17255_vm7, %v3187_v24, %v3191_v5  ;;  %v3209_v8 = vrot.slane %v3207_v14, 5  ;;  %v6366_v5 = vsel %vm17255_vm7, %v6361_v35, %v6365_v45  ;;  %v16810_v24 = vld [vmem:[#allocation4 + $0x218] sm:$0xff]   ;;  %v6383_v34 = vrot.slane %v6381_v46, 5  ;;  %v18602_v44 = vld [vmem:[#allocation2 + $0x5c] sm:$0x1]  ;;  %v16812_v46 = vld [vmem:[#allocation4 + $0x220] sm:$0xff]  }
 0x1a7   : > { %15205 = vmatpush3.bf16.msra.mxu0 %v16805_v51  ;;  %v6370_v51 = vor.u32 %v6369_v3, %v6365_v45  ;;  %v6393_v56 = vrot.slane %v6391_v37, 4  ;;  %v6397_v3 = vshll.u32 %v18593_v63, 16  ;;  %v3228_v14 = vshrl.u32 %v3098_v9, 16  ;;  %v18606_v35 = vld [vmem:[#allocation2 + $0xb8] sm:$0xf] }
 0x1a8   : > { %15473 = vmatpush3.bf16.msra.mxu1 %v16802_v26  ;;  %15206 = vmatprep.subr.bf16.mxu0 %v16807_v0  ;;  %v3202_v26 = vsel %vm17255_vm7, %v3197_v47, %v3201_v13  ;;  %v3210_v48 = vor.u32 %v3209_v8, %v3206_v6  ;;  %v16808_v13 = vld [vmem:[#allocation4 + $0x210] sm:$0xff]   ;;  %v3221_v47 = vrot.slane %v3220_v16, 4  ;;  %v3231_v60 = vshll.u32 %v3098_v9, 16  ;;  %v18617_v37 = vld [vmem:[#allocation2 + $0xbc] sm:$0x1] }
 0x1a9   : > { %15490 = vmatprep.subr.bf16.mxu1 %v16804_v58  ;;  %v13582_v7 = vcombine.low %v3192_v28, %v3202_v26  ;;  %v6371_v10 = vrot.slane %v6370_v51, 4  ;;  %v16813_v51 = vld [vmem:[#allocation4 + $0x228] sm:$0xff]   ;;  %v6399_v11 = vrot.slane %v6397_v3, 5  ;;  %v3247_v42 = vshll.u32 %v18602_v44, 16  ;;  %v3101_v9 = vld [vmem:[#allocation2 + $0x60] sm:$0xf] }
 0x1aa   : > { %v3233_v8 = vrot.slane %v3231_v60, 5  ;;  %v6402_v59 = vshrl.u32 %v6272_v17, 16  ;;  %v18626_v60 = vld [vmem:[#allocation2 + $0x68] sm:$0x1] }
 0x1ab   : > { %15475 = vmatmul.mubr.bf16.vlgmr.msra.gmra.mrb[0].mxu1 %v18555_v54  ;;  %15207 = vmatpush3.bf16.msra.mxu0 %v16807_v0  ;;  %v6376_v54 = vsel %vm17255_vm7, %v6371_v10, %v6375_v30  ;;  %v6387_v0 = vshll.u32 %v18587_v39, 16  ;;  %v6384_v30 = vor.u32 %v6383_v34, %v6380_v32  ;;  %v3249_v32 = vrot.slane %v3247_v42, 5  ;;  %v18620_v34 = vld [vmem:[#allocation2 + $0x64] sm:$0xf] }
 0x1ac   : > { %15491 = vmatpush3.bf16.msra.mxu1 %v16804_v58  ;;  %15478 = vmatprep.mubr.bf16.mxu1 %v13767_v31  ;;  %v13768_v27 = vcombine.low %v6366_v5, %v6376_v54  ;;  %v3211_v58 = vrot.slane %v3210_v48, 4  ;;  %v18599_v31 = vld [vmem:[#allocation2 + $0x58] sm:$0xf]  ;;  %v16815_v54 = vld [vmem:[#allocation4 + $0x230] sm:$0xff]  }
 0x1ad   : > { %15492 = vmatprep.subr.bf16.mxu1 %v16806_v41  ;;  %15191 = vmatmul.mubr.bf16.gmra.mrb[4].mxu0 %v13582_v7  ;;  %v6389_v45 = vrot.slane %v6387_v0, 5  ;;  %v3237_v26 = vshll.u32 %v18599_v31, 16  ;;  %v6385_v7 = vrot.slane %v6384_v30, 4  ;;  %v3252_v30 = vshrl.u32 %v3101_v9, 16 }
 0x1ae   : > { %15208 = vmatprep.subr.bf16.mxu0 %v16809_v62  ;;  %v3216_v28 = vsel %vm17255_vm7, %v3211_v58, %v3215_v19  ;;  %v3241_v19 = vshrl.u32 %v18599_v31, 16 }
 0x1af   : > { %15209 = vmatpush3.bf16.msra.mxu0 %v16809_v62  ;;  %v6394_v6 = vor.u32 %v6393_v56, %v6389_v45  ;;  %v3226_v62 = vsel %vm17255_vm7, %v3221_v47, %v3225_v2  ;;  %v3239_v10 = vrot.slane %v3237_v26, 5  ;;  %v6390_v2 = vsel %vm17255_vm7, %v6385_v7, %v6389_v45 }
 0x1b0   : > { %15493 = vmatpush3.bf16.msra.mxu1 %v16806_v41  ;;  %15210 = vmatprep.subr.bf16.mxu0 %v16811_v12  ;;  %v3230_v41 = vrot.slane %v3228_v14, 4  ;;  %v13583_v21 = vcombine.low %v3216_v28, %v3226_v62  ;;  %v3243_v48 = vrot.slane %v3241_v19, 4  ;;  %v6404_v56 = vrot.slane %v6402_v59, 4  ;;  %v16814_v62 = vld [vmem:[#allocation4 + $0x228] sm:$0xff]   ;;  %v16816_v59 = vld [vmem:[#allocation4 + $0x230] sm:$0xff]  }
 0x1b1   : > { %15494 = vmatprep.subr.bf16.mxu1 %v16808_v13  ;;  %v6395_v5 = vrot.slane %v6394_v6, 4  ;;  %v6415_v45 = vshrl.u32 %v18606_v35, 16  ;;  %v6421_v14 = vshll.u32 %v18617_v37, 16  ;;  %v16817_v6 = vld [vmem:[#allocation4 + $0x238] sm:$0xff]   ;;  %v3265_v7 = vshrl.u32 %v18620_v34, 16 }
 0x1b2   : > { %v3234_v20 = vor.u32 %v3233_v8, %v3230_v41  ;;  %15194 = vmatprep.mubr.bf16.mxu0 %v13583_v21  ;;  %v3244_v16 = vor.u32 %v3243_v48, %v3239_v10  ;;  %v3255_v41 = vshll.u32 %v3101_v9, 16  ;;  %v3261_v8 = vshll.u32 %v18620_v34, 16 }
 0x1b3   : > { %15479 = vmatmul.mubr.bf16.gmra.mrb[4].mxu1 %v13768_v27  ;;  %15211 = vmatpush3.bf16.msra.mxu0 %v16811_v12  ;;  %v6400_v0 = vsel %vm17255_vm7, %v6395_v5, %v6399_v11  ;;  %v6405_v12 = vshll.u32 %v6272_v17, 16  ;;  %v6417_v26 = vrot.slane %v6415_v45, 4  ;;  %v6423_v19 = vrot.slane %v6421_v14, 5  ;;  %v18632_v5 = vld [vmem:[#allocation2 + $0xc4] sm:$0xf] }
 0x1b4   : > { %15495 = vmatpush3.bf16.msra.mxu1 %v16808_v13  ;;  %15212 = vmatprep.subr.bf16.mxu0 %v16813_v51  ;;  %v6411_v13 = vshll.u32 %v18606_v35, 16  ;;  %v13769_v27 = vcombine.low %v6390_v2, %v6400_v0  ;;  %v3235_v58 = vrot.slane %v3234_v20, 4  ;;  %v3245_v47 = vrot.slane %v3244_v16, 4 }
 0x1b5   : > { %15496 = vmatprep.subr.bf16.mxu1 %v16810_v24  ;;  %v6407_v3 = vrot.slane %v6405_v12, 5  ;;  %v3254_v21 = vrot.slane %v3252_v30, 4  ;;  %v3257_v42 = vrot.slane %v3255_v41, 5  ;;  %v3263_v2 = vrot.slane %v3261_v8, 5 }
 0x1b6   : > { %v6413_v28 = vrot.slane %v6411_v13, 5  ;;  %15482 = vmatprep.mubr.bf16.mxu1 %v13769_v27  ;;  %v3240_v17 = vsel %vm17255_vm7, %v3235_v58, %v3239_v10  ;;  %v3267_v0 = vrot.slane %v3265_v7, 4  ;;  %v3271_v12 = vshll.u32 %v18626_v60, 16  ;;  %v18635_v13 = vld [vmem:[#allocation2 + $0xc8] sm:$0x1] }
 0x1b7   : > { %15213 = vmatpush3.bf16.msra.mxu0 %v16813_v51  ;;  %v6408_v11 = vor.u32 %v6407_v3, %v6404_v56  ;;  %v6275_v51 = vld [vmem:[#allocation2 + $0xc0] sm:$0xf]  ;;  %v3258_v16 = vor.u32 %v3257_v42, %v3254_v21  ;;  %v3104_v56 = vld [vmem:[#allocation2 + $0x6c] sm:$0xf]  ;;  %v18639_v3 = vld [vmem:[#allocation2 + $0x70] sm:$0xf] }
 0x1b8   : > { %15497 = vmatpush3.bf16.msra.mxu1 %v16810_v24  ;;  %15214 = vmatprep.subr.bf16.mxu0 %v16815_v54  ;;  %v3250_v24 = vsel %vm17255_vm7, %v3245_v47, %v3249_v32  ;;  %v6418_v48 = vor.u32 %v6417_v26, %v6413_v28  ;;  %v6426_v9 = vshrl.u32 %v6275_v51, 16  ;;  %v6429_v32 = vshll.u32 %v6275_v51, 16  ;;  %v16818_v21 = vld [vmem:[#allocation4 + $0x238] sm:$0xff]  }
 0x1b9   : > { %15498 = vmatprep.subr.bf16.mxu1 %v16812_v46  ;;  %v13584_v10 = vcombine.low %v3240_v17, %v3250_v24  ;;  %v6409_v20 = vrot.slane %v6408_v11, 4  ;;  %v6435_v17 = vshll.u32 %v18632_v5, 16  ;;  %v3259_v14 = vrot.slane %v3258_v16, 4  ;;  %v6278_v24 = vld [vmem:[#allocation2 + $0xcc] sm:$0xf] }
 0x1ba   : > { %v6419_v58 = vrot.slane %v6418_v48, 4  ;;  %v6428_v45 = vrot.slane %v6426_v9, 4  ;;  %v6431_v30 = vrot.slane %v6429_v32, 5  ;;  %v6439_v11 = vshrl.u32 %v18632_v5, 16 }
 0x1bb   : > { %15215 = vmatpush3.bf16.msra.mxu0 %v16815_v54  ;;  %v6414_v27 = vsel %vm17255_vm7, %v6409_v20, %v6413_v28  ;;  %v3273_v54 = vrot.slane %v3271_v12, 5  ;;  %v18645_v28 = vld [vmem:[#allocation2 + $0x74] sm:$0x1]  ;;  %v6437_v8 = vrot.slane %v6435_v17, 5  ;;  %v6445_v51 = vshll.u32 %v18635_v13, 16 }
 0x1bc   : > { %15499 = vmatpush3.bf16.msra.mxu1 %v16812_v46  ;;  %15216 = vmatprep.subr.bf16.mxu0 %v16817_v6  ;;  %v3268_v46 = vor.u32 %v3267_v0, %v3263_v2  ;;  %v6424_v47 = vsel %vm17255_vm7, %v6419_v58, %v6423_v19  ;;  %v3264_v7 = vsel %vm17255_vm7, %v3259_v14, %v3263_v2  ;;  %v6441_v19 = vrot.slane %v6439_v11, 4  ;;  %v18653_v58 = vld [vmem:[#allocation2 + $0xd0] sm:$0xf] }
 0x1bd   : > { %15195 = vmatmul.mubr.bf16.gmra.mrb[8].mxu0 %v13584_v10  ;;  %15500 = vmatprep.subr.bf16.mxu1 %v16814_v62  ;;  %v13770_v26 = vcombine.low %v6414_v27, %v6424_v47  ;;  %v6432_v10 = vor.u32 %v6431_v30, %v6428_v45  ;;  %v3276_v20 = vshrl.u32 %v3104_v56, 16  ;;  %v3279_v42 = vshll.u32 %v3104_v56, 16  ;;  %v18659_v45 = vld [vmem:[#allocation2 + $0xd4] sm:$0x1] }
 0x1be   : > { %v3269_v41 = vrot.slane %v3268_v46, 4  ;;  %v6442_v9 = vor.u32 %v6441_v19, %v6437_v8  ;;  %v3289_v32 = vshrl.u32 %v18639_v3, 16  ;;  %v3295_v46 = vshll.u32 %v18645_v28, 16 }
 0x1bf   : > { %15217 = vmatpush3.bf16.msra.mxu0 %v16817_v6  ;;  %15483 = vmatmul.mubr.bf16.gmra.mrb[8].mxu1 %v13770_v26  ;;  %v6447_v6 = vrot.slane %v6445_v51, 5  ;;  %v6433_v12 = vrot.slane %v6432_v10, 4  ;;  %v3278_v27 = vrot.slane %v3276_v20, 4  ;;  %v3281_v16 = vrot.slane %v3279_v42, 5 }
 0x1c0   : > { %15501 = vmatpush3.bf16.msra.mxu1 %v16814_v62  ;;  %v3274_v48 = vsel %vm17255_vm7, %v3269_v41, %v3273_v54  ;;  %v3285_v62 = vshll.u32 %v18639_v3, 16  ;;  %v6443_v56 = vrot.slane %v6442_v9, 4  ;;  %v6450_v17 = vshrl.u32 %v6278_v24, 16  ;;  %v3509_v41 = vld [vmem:[#allocation2 + $0x18] sm:$0xe] }
 0x1c1   : > { %15502 = vmatprep.subr.bf16.mxu1 %v16816_v59  ;;  %v13585_v0 = vcombine.low %v3264_v7, %v3274_v48  ;;  %v6438_v54 = vsel %vm17255_vm7, %v6433_v12, %v6437_v8  ;;  %v6453_v47 = vshll.u32 %v6278_v24, 16  ;;  %v3282_v14 = vor.u32 %v3281_v16, %v3278_v27  ;;  %v6682_v24 = vld [vmem:[#allocation2 + $0x78] sm:$0xe] }
 0x1c2   : > { %v3287_v2 = vrot.slane %v3285_v62, 5  ;;  %v3291_v30 = vrot.slane %v3289_v32, 4  ;;  %v3297_v11 = vrot.slane %v3295_v46, 5  ;;  %v6459_v26 = vshll.u32 %v18653_v58, 16 }
 0x1c3   : > { %15198 = vmatprep.mubr.bf16.mxu0 %v13585_v0  ;;  %v6448_v51 = vsel %vm17255_vm7, %v6443_v56, %v6447_v6  ;;  %v6455_v7 = vrot.slane %v6453_v47, 5  ;;  %v6463_v10 = vshrl.u32 %v18653_v58, 16  ;;  %v3283_v19 = vrot.slane %v3282_v14, 4 }
 0x1c4   : > { %15503 = vmatpush3.bf16.msra.mxu1 %v16816_v59  ;;  %v6452_v59 = vrot.slane %v6450_v17, 4  ;;  %v13771_v8 = vcombine.low %v6438_v54, %v6448_v51  ;;  %v3292_v20 = vor.u32 %v3291_v30, %v3287_v2  ;;  %v6461_v48 = vrot.slane %v6459_v26, 5 }
 0x1c5   : > { %15504 = vmatprep.subr.bf16.mxu1 %v16818_v21  ;;  %v6465_v62 = vrot.slane %v6463_v10, 4  ;;  %v6469_v0 = vshll.u32 %v18659_v45, 16  ;;  %v13595_v12 = vrot.slane %v3509_v41, 9  ;;  %v3288_v9 = vsel %vm17255_vm7, %v3283_v19, %v3287_v2  ;;  %v6683_v41 = vld [vmem:[#allocation2 + $0x84] sm:$0xe] }
 0x1c6   : > { %v6456_v42 = vor.u32 %v6455_v7, %v6452_v59  ;;  %15486 = vmatprep.mubr.bf16.mxu1 %v13771_v8  ;;  %v3293_v6 = vrot.slane %v3292_v20, 4  ;;  %v3543_v27 = vrot.slane %v18478_v38, 5  ;;  %v3546_v16 = vrot.slane %v18480_v36, 5  ;;  %v3511_v20 = vld [vmem:[#allocation2 + $0x30] sm:$0xe] }
 0x1c7   : > { %v6466_v46 = vor.u32 %v6465_v62, %v6461_v48  ;;  %v6471_v54 = vrot.slane %v6469_v0, 5  ;;  %v13781_v56 = vrot.slane %v6682_v24, 9  ;;  %v6716_v30 = vrot.slane %v18485_v49, 5 }
 0x1c8   : > { %15505 = vmatpush3.bf16.msra.mxu1 %v16818_v21  ;;  %v6457_v32 = vrot.slane %v6456_v42, 4  ;;  %v3510_v21 = vld [vmem:[#allocation2 + $0x24] sm:$0xe]  ;;  %v3298_v17 = vsel %vm17255_vm7, %v3293_v6, %v3297_v11  ;;  %v3544_v47 = vsel %vm17724_vm13, %v13595_v12, %v3543_v27  ;;  %v3545_v14 = vrot.slane %v3543_v27, 4 }
 0x1c9   : > { %v13586_v2 = vcombine.low %v3288_v9, %v3298_v17  ;;  %v6467_v26 = vrot.slane %v6466_v46, 4  ;;  %v6719_v36 = vrot.slane %v18487_v50, 5  ;;  %v6717_v11 = vsel %vm17724_vm13, %v13781_v56, %v6716_v30  ;;  %v6684_v50 = vld [vmem:[#allocation2 + $0x90] sm:$0xe]  ;;  %v6685_v46 = vld [vmem:[#allocation2 + $0x9c] sm:$0xe] }
 0x1ca   : > { %v6462_v38 = vsel %vm17255_vm7, %v6457_v32, %v6461_v48  ;;  %v3547_v51 = vsel %vm17724_vm13, %v3545_v14, %v3546_v16  ;;  %v6718_v59 = vrot.slane %v6716_v30, 4  ;;  %v13596_v7 = vrot.slane %v3510_v21, 9  ;;  %v3513_v30 = vld [vmem:[#allocation2 + $0x48] sm:$0xe] }
 0x1cb   : > { %15199 = vmatmul.mubr.bf16.gmra.mrb[12].mxu0 %v13586_v2  ;;  %v6472_v49 = vsel %vm17255_vm7, %v6467_v26, %v6471_v54  ;;  %v13603_v10 = vcombine.low %v3544_v47, %v3547_v51  ;;  %v3550_v8 = vrot.slane %v18495_v1, 5  ;;  %v3553_v19 = vrot.slane %v18499_v23, 5  ;;  %v3512_v1 = vld [vmem:[#allocation2 + $0x3c] sm:$0xe] }
 0x1cc   : > { %v13772_v48 = vcombine.low %v6462_v38, %v6472_v49  ;;  %v6720_v24 = vsel %vm17724_vm13, %v6718_v59, %v6719_v36  ;;  %v13782_v42 = vrot.slane %v6683_v41, 9  ;;  %v6723_v62 = vrot.slane %v18502_v61, 5 }
 0x1cd   : > { %15218 = vmatprep.mubr.bf16.mxu0 %v13603_v10  ;;  %v13789_v0 = vcombine.low %v6717_v11, %v6720_v24  ;;  %v3551_v12 = vsel %vm17724_vm13, %v13596_v7, %v3550_v8  ;;  %v3552_v9 = vrot.slane %v3550_v8, 4  ;;  %v6726_v6 = vrot.slane %v18509_v40, 5  ;;  %v6687_v24 = vld [vmem:[#allocation2 + $0xb4] sm:$0xe] }
 0x1ce   : > { %15487 = vmatmul.mubr.bf16.gmra.mrb[12].mxu1 %v13772_v48  ;;  %v6724_v23 = vsel %vm17724_vm13, %v13782_v42, %v6723_v62  ;;  %v6725_v27 = vrot.slane %v6723_v62, 4  ;;  %v13597_v16 = vrot.slane %v3511_v20, 9  ;;  %v3557_v32 = vrot.slane %v18529_v18, 5  ;;  %v3514_v20 = vld [vmem:[#allocation2 + $0x54] sm:$0xe] }
 0x1cf   : > { %15506 = vmatprep.mubr.bf16.mxu1 %v13789_v0  ;;  %v3554_v61 = vsel %vm17724_vm13, %v3552_v9, %v3553_v19  ;;  %v3560_v54 = vrot.slane %v18531_v53, 5  ;;  %v13783_v56 = vrot.slane %v6684_v50, 9  ;;  %v6730_v21 = vrot.slane %v18538_v29, 5  ;;  %v6686_v53 = vld [vmem:[#allocation2 + $0xa8] sm:$0xe] }
 0x1d0   : > { %v13604_v40 = vcombine.low %v3551_v12, %v3554_v61  ;;  %v6727_v17 = vsel %vm17724_vm13, %v6725_v27, %v6726_v6  ;;  %v3558_v47 = vsel %vm17724_vm13, %v13597_v16, %v3557_v32  ;;  %v3559_v14 = vrot.slane %v3557_v32, 4  ;;  %v6688_v16 = vld [vmem:[#allocation2 + $0xc0] sm:$0xe] }
 0x1d1   : > { %v13790_v18 = vcombine.low %v6724_v23, %v6727_v17  ;;  %v6731_v2 = vsel %vm17724_vm13, %v13783_v56, %v6730_v21  ;;  %v6732_v38 = vrot.slane %v6730_v21, 4  ;;  %v6733_v26 = vrot.slane %v18540_v33, 5 }
 0x1d2   : > { %v3561_v29 = vsel %vm17724_vm13, %v3559_v14, %v3560_v54  ;;  %v13598_v36 = vrot.slane %v3512_v1, 9  ;;  %v3564_v41 = vrot.slane %v18546_v43, 5  ;;  %v3567_v51 = vrot.slane %v18552_v57, 5 }
 0x1d3   : > { %15219 = vmatmul.mubr.bf16.vlgmr.msra.gmra.mrb[0].mxu0 %v13604_v40  ;;  %v13605_v11 = vcombine.low %v3558_v47, %v3561_v29  ;;  %v6734_v59 = vsel %vm17724_vm13, %v6732_v38, %v6733_v26  ;;  %v13784_v7 = vrot.slane %v6685_v46, 9  ;;  %v6737_v49 = vrot.slane %v18560_v25, 5 }
 0x1d4   : > { %v13791_v10 = vcombine.low %v6731_v2, %v6734_v59  ;;  %v3565_v33 = vsel %vm17724_vm13, %v13598_v36, %v3564_v41  ;;  %v3566_v8 = vrot.slane %v3564_v41, 4  ;;  %v6740_v19 = vrot.slane %v18567_v15, 5  ;;  %v6689_v2 = vld [vmem:[#allocation2 + $0xcc] sm:$0xe] }
 0x1d5   : > { %15222 = vmatprep.mubr.bf16.mxu0 %v13605_v11  ;;  %v6738_v43 = vsel %vm17724_vm13, %v13784_v7, %v6737_v49  ;;  %v6739_v57 = vrot.slane %v6737_v49, 4  ;;  %v13599_v50 = vrot.slane %v3513_v30, 9  ;;  %v3571_v48 = vrot.slane %v18576_v55, 5  ;;  %v3515_v55 = vld [vmem:[#allocation2 + $0x60] sm:$0xe] }
 0x1d6   : > { %15507 = vmatmul.mubr.bf16.vlgmr.msra.gmra.mrb[0].mxu1 %v13790_v18  ;;  %v3568_v25 = vsel %vm17724_vm13, %v3566_v8, %v3567_v51  ;;  %v3574_v42 = vrot.slane %v18581_v22, 5  ;;  %v13785_v62 = vrot.slane %v6686_v53, 9  ;;  %v6744_v0 = vrot.slane %v18587_v39, 5  ;;  %v3516_v30 = vld [vmem:[#allocation2 + $0x6c] sm:$0xe] }
 0x1d7   : > { %15510 = vmatprep.mubr.bf16.mxu1 %v13791_v10  ;;  %v13606_v15 = vcombine.low %v3565_v33, %v3568_v25  ;;  %v6741_v12 = vsel %vm17724_vm13, %v6739_v57, %v6740_v19  ;;  %v3572_v9 = vsel %vm17724_vm13, %v13599_v50, %v3571_v48  ;;  %v3573_v6 = vrot.slane %v3571_v48, 4  ;;  %v328_v51 = vld [vmem:[#allocation3 + $0x18] sm:$0x1] }
 0x1d8   : > { %v13792_v1 = vcombine.low %v6738_v43, %v6741_v12  ;;  %v6745_v23 = vsel %vm17724_vm13, %v13785_v62, %v6744_v0  ;;  %v6746_v27 = vrot.slane %v6744_v0, 4  ;;  %v6747_v22 = vrot.slane %v18593_v63, 5  ;;  %v352_v0 = vld [vmem:[#allocation3 + $0x78] sm:$0x1]  ;;  %v325_v12 = vld [vmem:[#allocation3 + $0xc] sm:$0x1] }
 0x1d9   : > { %v3575_v39 = vsel %vm17724_vm13, %v3573_v6, %v3574_v42  ;;  %v13600_v32 = vrot.slane %v3514_v20, 9  ;;  %v3578_v46 = vrot.slane %v18599_v31, 5  ;;  %v3581_v61 = vrot.slane %v18602_v44, 5 }
 0x1da   : > { %v13607_v54 = vcombine.low %v3572_v9, %v3575_v39  ;;  %v6748_v56 = vsel %vm17724_vm13, %v6746_v27, %v6747_v22  ;;  %v13786_v21 = vrot.slane %v6687_v24, 9  ;;  %v6751_v40 = vrot.slane %v18606_v35, 5  ;;  %v349_v9 = vld [vmem:[#allocation3 + $0x6c] sm:$0x1]  ;;  %v402_v27 = vld [vmem:[#allocation3 + $0x80] sm:$0x1] }
 0x1db   : > { %15223 = vmatmul.mubr.bf16.gmra.mrb[4].mxu0 %v13606_v15  ;;  %v13793_v17 = vcombine.low %v6745_v23, %v6748_v56  ;;  %v3579_v63 = vsel %vm17724_vm13, %v13600_v32, %v3578_v46  ;;  %v3580_v47 = vrot.slane %v3578_v46, 4  ;;  %v6754_v14 = vrot.slane %v18617_v37, 5  ;;  %v378_v23 = vld [vmem:[#allocation3 + $0x20] sm:$0x1]  ;;  %v375_v39 = vld [vmem:[#allocation3 + $0x14] sm:$0x1] }
 0x1dc   : > { %15226 = vmatprep.mubr.bf16.mxu0 %v13607_v54  ;;  %v6753_v31 = vrot.slane %v6751_v40, 4  ;;  %v13601_v44 = vrot.slane %v3515_v55, 9  ;;  %v3585_v18 = vrot.slane %v18620_v34, 5  ;;  %v3588_v35 = vrot.slane %v18626_v60, 5  ;;  %v399_v46 = vld [vmem:[#allocation3 + $0x74] sm:$0x1] }
 0x1dd   : > { %v3582_v38 = vsel %vm17724_vm13, %v3580_v47, %v3581_v61  ;;  %v13787_v26 = vrot.slane %v6688_v16, 9  ;;  %v6758_v53 = vrot.slane %v18632_v5, 5  ;;  %v6752_v37 = vsel %vm17724_vm13, %v13786_v21, %v6751_v40  ;;  %v16819_v61 = vld [vmem:[#allocation6 + $0x40] sm:$0xff]   ;;  %v334_v56 = vld [vmem:[#allocation3 + $0x30] sm:$0x1] }
 0x1de   : > { %15511 = vmatmul.mubr.bf16.gmra.mrb[4].mxu1 %v13792_v1  ;;  %v13608_v29 = vcombine.low %v3579_v63, %v3582_v38  ;;  %v3586_v36 = vsel %vm17724_vm13, %v13601_v44, %v3585_v18  ;;  %v3587_v41 = vrot.slane %v3585_v18, 4  ;;  %v6755_v34 = vsel %vm17724_vm13, %v6753_v31, %v6754_v14  ;;  %15522 = vmatprep.subr.bf16.mxu0 %v16819_v61  ;;  %v358_v21 = vld [vmem:[#allocation3 + $0x90] sm:$0x1]  ;;  %v331_v63 = vld [vmem:[#allocation3 + $0x24] sm:$0x1] }
 0x1df   : > { %15514 = vmatprep.mubr.bf16.mxu1 %v13793_v17  ;;  %v6759_v60 = vsel %vm17724_vm13, %v13787_v26, %v6758_v53  ;;  %v6760_v11 = vrot.slane %v6758_v53, 4  ;;  %v6761_v5 = vrot.slane %v18635_v13, 5  ;;  %v13602_v49 = vrot.slane %v3516_v30, 9  ;;  %15523 = vmatpush3.bf16.msra.mxu0 %v16819_v61  ;;  %v355_v47 = vld [vmem:[#allocation3 + $0x84] sm:$0x1]  ;;  %v16821_v26 = vld [vmem:[#allocation6 + $0x50] sm:$0xff]  }
 0x1e0   : > { %v3589_v7 = vsel %vm17724_vm13, %v3587_v41, %v3588_v35  ;;  %v3592_v10 = vrot.slane %v18639_v3, 5  ;;  %v3595_v33 = vrot.slane %v18645_v28, 5  ;;  %v13788_v20 = vrot.slane %v6689_v2, 9  ;;  %v16820_v31 = vld [vmem:[#allocation6 + $0x48] sm:$0xff]   ;;  %v384_v44 = vld [vmem:[#allocation3 + $0x38] sm:$0x1] }
 0x1e1   : > { %v13609_v8 = vcombine.low %v3586_v36, %v3589_v7  ;;  %v6762_v19 = vsel %vm17724_vm13, %v6760_v11, %v6761_v5  ;;  %v6765_v13 = vrot.slane %v18653_v58, 5  ;;  %v13794_v43 = vcombine.low %v6752_v37, %v6755_v34  ;;  %15524 = vmatprep.subr.bf16.mxu0 %v16820_v31  ;;  %v408_v18 = vld [vmem:[#allocation3 + $0x98] sm:$0x1]  ;;  %v381_v35 = vld [vmem:[#allocation3 + $0x2c] sm:$0x1]  ;;  %v16822_v5 = vld [vmem:[#allocation6 + $0x58] sm:$0xff]  }
 0x1e2   : > { %v3594_v57 = vrot.slane %v3592_v10, 4  ;;  %v6768_v50 = vrot.slane %v18659_v45, 5  ;;  %v13795_v48 = vcombine.low %v6759_v60, %v6762_v19  ;;  %v329_v25 = vsel %vm18756_vm15, 0, %v328_v51  ;;  %v340_v36 = vld [vmem:[#allocation3 + $0x48] sm:$0x1] }
 0x1e3   : > { %15227 = vmatmul.mubr.bf16.gmra.mrb[8].mxu0 %v13608_v29  ;;  %v6767_v24 = vrot.slane %v6765_v13, 4  ;;  %v3593_v3 = vsel %vm17724_vm13, %v13602_v49, %v3592_v10  ;;  %330 = vst [vmem:[#allocation3 + $0x18] sm:$0x1] %v329_v25  ;;  %v6766_v45 = vsel %vm17724_vm13, %v13788_v20, %v6765_v13  ;;  %v353_v15 = vsel %vm18756_vm15, 0, %v352_v0  ;;  %v405_v29 = vld [vmem:[#allocation3 + $0x8c] sm:$0x1] }
 0x1e4   : > { %15230 = vmatprep.mubr.bf16.mxu0 %v13609_v8  ;;  %v3596_v28 = vsel %vm17724_vm13, %v3594_v57, %v3595_v33  ;;  %354 = vst [vmem:[#allocation3 + $0x78] sm:$0x1] %v353_v15  ;;  %v326_v6 = vsel %vm18756_vm15, 0, %v325_v12  ;;  %v350_v55 = vsel %vm18756_vm15, 0, %v349_v9  ;;  %v379_v22 = vsel %vm18786_vm0, 0, %v378_v23  ;;  %15525 = vmatpush3.bf16.msra.mxu0 %v16820_v31  ;;  %v16823_v8 = vld [vmem:[#allocation6 + $0x60] sm:$0xff]  }
 0x1e5   : > { %v13610_v58 = vcombine.low %v3593_v3, %v3596_v28  ;;  %v6769_v42 = vsel %vm17724_vm13, %v6767_v24, %v6768_v50  ;;  %327 = vst [vmem:[#allocation3 + $0xc] sm:$0x1] %v326_v6  ;;  %351 = vst [vmem:[#allocation3 + $0x6c] sm:$0x1] %v350_v55  ;;  %v403_v16 = vsel %vm18786_vm0, 0, %v402_v27  ;;  %v376_v32 = vsel %vm18786_vm0, 0, %v375_v39  ;;  %15526 = vmatprep.subr.bf16.mxu0 %v16821_v26 }
 0x1e6   : > { %15515 = vmatmul.mubr.bf16.gmra.mrb[8].mxu1 %v13794_v43  ;;  %v13796_v62 = vcombine.low %v6766_v45, %v6769_v42  ;;  %380 = vst [vmem:[#allocation3 + $0x20] sm:$0x1] %v379_v22  ;;  %404 = vst [vmem:[#allocation3 + $0x80] sm:$0x1] %v403_v16  ;;  %v400_v54 = vsel %vm18786_vm0, 0, %v399_v46  ;;  %v335_v40 = vsel %vm18756_vm15, 0, %v334_v56 }
 0x1e7   : > { %15518 = vmatprep.mubr.bf16.mxu1 %v13795_v48  ;;  %377 = vst [vmem:[#allocation3 + $0x14] sm:$0x1] %v376_v32  ;;  %401 = vst [vmem:[#allocation3 + $0x74] sm:$0x1] %v400_v54  ;;  %v359_v17 = vsel %vm18756_vm15, 0, %v358_v21  ;;  %v332_v14 = vsel %vm18756_vm15, 0, %v331_v63 }
 0x1e8   : > { %336 = vst [vmem:[#allocation3 + $0x30] sm:$0x1] %v335_v40  ;;  %360 = vst [vmem:[#allocation3 + $0x90] sm:$0x1] %v359_v17  ;;  %v356_v30 = vsel %vm18756_vm15, 0, %v355_v47  ;;  %v385_v2 = vsel %vm18786_vm0, 0, %v384_v44  ;;  %15527 = vmatpush3.bf16.msra.mxu0 %v16821_v26 }
 0x1e9   : > { %333 = vst [vmem:[#allocation3 + $0x24] sm:$0x1] %v332_v14  ;;  %357 = vst [vmem:[#allocation3 + $0x84] sm:$0x1] %v356_v30  ;;  %v409_v38 = vsel %vm18786_vm0, 0, %v408_v18  ;;  %v382_v53 = vsel %vm18786_vm0, 0, %v381_v35  ;;  %15528 = vmatprep.subr.bf16.mxu0 %v16822_v5 }
 0x1ea   : > { %386 = vst [vmem:[#allocation3 + $0x38] sm:$0x1] %v385_v2  ;;  %410 = vst [vmem:[#allocation3 + $0x98] sm:$0x1] %v409_v38  ;;  %v406_v37 = vsel %vm18786_vm0, 0, %v405_v29  ;;  %v341_v51 = vsel %vm18756_vm15, 0, %v340_v36 }
 0x1eb   : > { %15231 = vmatmul.mubr.bf16.gmra.mrb[12].mxu0 %v13610_v58  ;;  %383 = vst [vmem:[#allocation3 + $0x2c] sm:$0x1] %v382_v53  ;;  %407 = vst [vmem:[#allocation3 + $0x8c] sm:$0x1] %v406_v37  ;;  %v364_v41 = vld [vmem:[#allocation3 + $0xa8] sm:$0x1] }
 0x1ec   : > { %v365_v34 = vsel %vm18756_vm15, 0, %v364_v41  ;;  %v337_v60 = vld [vmem:[#allocation3 + $0x3c] sm:$0x1]  ;;  %342 = vst [vmem:[#allocation3 + $0x48] sm:$0x1] %v341_v51  ;;  %15529 = vmatpush3.bf16.msra.mxu0 %v16822_v5  ;;  %v16824_v45 = vld [vmem:[#allocation6 + $0x68] sm:$0xff]  }
 0x1ed   : > { %366 = vst [vmem:[#allocation3 + $0xa8] sm:$0x1] %v365_v34  ;;  %v338_v11 = vsel %vm18756_vm15, 0, %v337_v60  ;;  %v361_v7 = vld [vmem:[#allocation3 + $0x9c] sm:$0x1]  ;;  %15530 = vmatprep.subr.bf16.mxu0 %v16823_v8  ;;  %v16825_v54 = vld [vmem:[#allocation6 + $0x70] sm:$0xff]  }
 0x1ee   : > { %15519 = vmatmul.mubr.bf16.gmra.mrb[12].mxu1 %v13796_v62  ;;  %339 = vst [vmem:[#allocation3 + $0x3c] sm:$0x1] %v338_v11  ;;  %v362_v49 = vsel %vm18756_vm15, 0, %v361_v7  ;;  %v390_v10 = vld [vmem:[#allocation3 + $0x50] sm:$0x1]  ;;  %v16826_v56 = vld [vmem:[#allocation6 + $0x40] sm:$0xff]  }
 0x1ef   : > { %363 = vst [vmem:[#allocation3 + $0x9c] sm:$0x1] %v362_v49  ;;  %v391_v33 = vsel %vm18786_vm0, 0, %v390_v10  ;;  %v414_v19 = vld [vmem:[#allocation3 + $0xb0] sm:$0x1]  ;;  %15810 = vmatprep.subr.bf16.mxu1 %v16826_v56  ;;  %v16828_v18 = vld [vmem:[#allocation6 + $0x48] sm:$0xff]  }
 0x1f0   : > { %392 = vst [vmem:[#allocation3 + $0x50] sm:$0x1] %v391_v33  ;;  %v415_v20 = vsel %vm18786_vm0, 0, %v414_v19  ;;  %v387_v13 = vld [vmem:[#allocation3 + $0x44] sm:$0x1]  ;;  %15531 = vmatpush3.bf16.msra.mxu0 %v16823_v8  ;;  %15811 = vmatpush3.bf16.msra.mxu1 %v16826_v56  ;;  %v16827_v44 = vld [vmem:[#allocation6 + $0x78] sm:$0xff]  }
 0x1f1   : > { %v411_v43 = vld [vmem:[#allocation3 + $0xa4] sm:$0x1]  ;;  %416 = vst [vmem:[#allocation3 + $0xb0] sm:$0x1] %v415_v20  ;;  %v388_v57 = vsel %vm18786_vm0, 0, %v387_v13  ;;  %15532 = vmatprep.subr.bf16.mxu0 %v16824_v45  ;;  %15812 = vmatprep.subr.bf16.mxu1 %v16828_v18  ;;  %v16829_v29 = vld [vmem:[#allocation6] sm:$0xff]  }
 0x1f2   : > { %v412_v50 = vsel %vm18786_vm0, 0, %v411_v43  ;;  %389 = vst [vmem:[#allocation3 + $0x44] sm:$0x1] %v388_v57  ;;  %v346_v48 = vld [vmem:[#allocation3 + $0x60] sm:$0x1]  ;;  %v16830_v37 = vld [vmem:[#allocation6 + $0x50] sm:$0xff]  }
 0x1f3   : > { %413 = vst [vmem:[#allocation3 + $0xa4] sm:$0x1] %v412_v50  ;;  %v370_v24 = vld [vmem:[#allocation3 + $0xc0] sm:$0x1]  ;;  %v347_v25 = vsel %vm18756_vm15, 0, %v346_v48  ;;  %v16832_v36 = vld [vmem:[#allocation6 + $0x58] sm:$0xff]  }
 0x1f4   : > { %v371_v3 = vsel %vm18756_vm15, 0, %v370_v24  ;;  %348 = vst [vmem:[#allocation3 + $0x60] sm:$0x1] %v347_v25  ;;  %v343_v28 = vld [vmem:[#allocation3 + $0x54] sm:$0x1]  ;;  %15533 = vmatpush3.bf16.msra.mxu0 %v16824_v45  ;;  %15813 = vmatpush3.bf16.msra.mxu1 %v16828_v18  ;;  %v16834_v41 = vld [vmem:[#allocation6 + $0x60] sm:$0xff]  }
 0x1f5   : > { %372 = vst [vmem:[#allocation3 + $0xc0] sm:$0x1] %v371_v3  ;;  %v344_v58 = vsel %vm18756_vm15, 0, %v343_v28  ;;  %v367_v42 = vld [vmem:[#allocation3 + $0xb4] sm:$0x1]  ;;  %15534 = vmatprep.subr.bf16.mxu0 %v16825_v54  ;;  %15814 = vmatprep.subr.bf16.mxu1 %v16830_v37  ;;  %v16836_v51 = vld [vmem:[#allocation6 + $0x68] sm:$0xff]  }
 0x1f6   : > { %345 = vst [vmem:[#allocation3 + $0x54] sm:$0x1] %v344_v58  ;;  %v368_v62 = vsel %vm18756_vm15, 0, %v367_v42  ;;  %v396_v0 = vld [vmem:[#allocation3 + $0x68] sm:$0x1]  ;;  %v16840_v60 = vld [vmem:[#allocation6 + $0x78] sm:$0xff]  }
 0x1f7   : > { %369 = vst [vmem:[#allocation3 + $0xb4] sm:$0x1] %v368_v62  ;;  %v420_v15 = vld [vmem:[#allocation3 + $0xc8] sm:$0x1]  ;;  %v397_v12 = vsel %vm18786_vm0, 0, %v396_v0  ;;  %v16842_v45 = vld [vmem:[#allocation6] sm:$0xff]  }
 0x1f8   : > { %v421_v9 = vsel %vm18786_vm0, 0, %v420_v15  ;;  %398 = vst [vmem:[#allocation3 + $0x68] sm:$0x1] %v397_v12  ;;  %v7295_v6 = vld [vmem:[#allocation3] sm:$0xf]  ;;  %15535 = vmatpush3.bf16.msra.mxu0 %v16825_v54  ;;  %15815 = vmatpush3.bf16.msra.mxu1 %v16830_v37  ;;  %v16838_v34 = vld [vmem:[#allocation6 + $0x70] sm:$0xff]  }
 0x1f9   : > { %422 = vst [vmem:[#allocation3 + $0xc8] sm:$0x1] %v421_v9  ;;  %v7296_v55 = vld [vmem:[#allocation3 + $0x4] sm:$0xf]  ;;  %v393_v23 = vld [vmem:[#allocation3 + $0x5c] sm:$0x1]  ;;  %15536 = vmatprep.subr.bf16.mxu0 %v16827_v44  ;;  %15816 = vmatprep.subr.bf16.mxu1 %v16832_v36 }
 0x1fa   : > { %v7336_v27 = vshrl.u32 %v7295_v6, 16  ;;  %v7339_v22 = vshll.u32 %v7295_v6, 16  ;;  %v7345_v16 = vshll.u32 %v7296_v55, 16  ;;  %v7349_v39 = vshrl.u32 %v7296_v55, 16  ;;  %v417_v46 = vld [vmem:[#allocation3 + $0xbc] sm:$0x1] }
 0x1fb   : > { %v394_v32 = vsel %vm18786_vm0, 0, %v393_v23  ;;  %v418_v61 = vsel %vm18786_vm0, 0, %v417_v46  ;;  %v7327_v63 = vld [vmem:[#allocation3 + $0x8] sm:$0x1] }
 0x1fc   : > { %395 = vst [vmem:[#allocation3 + $0x5c] sm:$0x1] %v394_v32  ;;  %v7338_v21 = vrot.slane %v7336_v27, 4  ;;  %v7341_v40 = vrot.slane %v7339_v22, 5  ;;  %v7347_v17 = vrot.slane %v7345_v16, 5  ;;  %v7351_v47 = vrot.slane %v7349_v39, 4  ;;  %15537 = vmatpush3.bf16.msra.mxu0 %v16827_v44  ;;  %15817 = vmatpush3.bf16.msra.mxu1 %v16832_v36 }
 0x1fd   : > { %419 = vst [vmem:[#allocation3 + $0xbc] sm:$0x1] %v418_v61  ;;  %v7355_v30 = vshll.u32 %v7327_v63, 16  ;;  %15554 = vmatprep.subr.bf16.mxu0 %v16829_v29  ;;  %15818 = vmatprep.subr.bf16.mxu1 %v16834_v41  ;;  %v18853_v11 = vld [vmem:[%s20740_s3] ss:$0 sm:$0xff] }
 0x1fe   : > { %v7342_v14 = vor.u32 %v7341_v40, %v7338_v21  ;;  %v7352_v31 = vor.u32 %v7351_v47, %v7347_v17  ;;  %v18858_v5 = vld [vmem:[%s20741_s4] ss:$0 sm:$0xff] }
 0x1ff   : > { %v7357_v1 = vrot.slane %v7355_v30, 5 }
 0x200   : > { %v7343_v2 = vrot.slane %v7342_v14, 4  ;;  %v7353_v38 = vrot.slane %v7352_v31, 4  ;;  %15819 = vmatpush3.bf16.msra.mxu1 %v16834_v41 }
 0x201   : > { %15820 = vmatprep.subr.bf16.mxu1 %v16836_v51 }
 0x202   : > { %v7348_v35 = vsel %vm17255_vm7, %v7343_v2, %v7347_v17  ;;  %v7358_v26 = vsel %vm17255_vm7, %v7353_v38, %v7357_v1 }
 0x203   : > { %v13821_v53 = vcombine.low %v7348_v35, %v7358_v26  ;;  %v4086_v35 = vld [vmem:[#allocation3 + $0x18] sm:$0xf] }
 0x204   : > { %15821 = vmatpush3.bf16.msra.mxu1 %v16836_v51 }
 0x205   : > { %15538 = vmatprep.mubr.bf16.mxu0 %v13821_v53  ;;  %15822 = vmatprep.subr.bf16.mxu1 %v16838_v34 }
 0x208   : > { %15823 = vmatpush3.bf16.msra.mxu1 %v16838_v34  ;;  %v4079_v34 = vld [vmem:[#allocation3 + $0xc] sm:$0xf] }
 0x209   : > { %15824 = vmatprep.subr.bf16.mxu1 %v16840_v60 }
 0x20c   : > { %15825 = vmatpush3.bf16.msra.mxu1 %v16840_v60 }
 0x20d   : > { %15842 = vmatprep.subr.bf16.mxu1 %v16842_v45  ;;  %v4090_v45 = vld [vmem:[#allocation3 + $0x20] sm:$0x1] }
 0x2a6   : > { %v15220_v7 = vpop.f32.mrb[0].mxu0 }
 0x2a7   : > { %v3815_v49 = vmul.f32 %v15220_v7, %v18853_v11  ;;  %v3728_v10 = vpop.f32.mrb[1].mxu0 }
 0x2a8   : > { %v3813_v33 = vmul.f32 %v18853_v11, %v3728_v10  ;;  %v15221_v8 = vpop.f32.mrb[2].mxu0 }
 0x2a9   : > { %v3837_v19 = vadd.f32 %v18858_v5, %v3815_v49  ;;  %v15508_v20 = vpop.f32.mrb[0].mxu1  ;;  %v3816_v13 = vmul.f32 %v15221_v8, %v18853_v11  ;;  %v3731_v43 = vpop.f32.mrb[3].mxu0 }
 0x2aa   : > { %v6981_v57 = vmul.f32 %v15508_v20, %v18853_v11  ;;  %v3835_v50 = vadd.f32 %v18858_v5, %v3813_v33  ;;  %v6900_v48 = vpop.f32.mrb[1].mxu1  ;;  %v3814_v24 = vmul.f32 %v18853_v11, %v3731_v43  ;;  %v7244_v43 = vld [vmem:[#allocation3 + $0x78] sm:$0xf] }
 0x2ab   : > { %v3853_v25 = vmax.f32 %v3837_v19, 0.0  ;;  %v6979_v3 = vmul.f32 %v18853_v11, %v6900_v48  ;;  %v3838_v28 = vadd.f32 %v18858_v5, %v3816_v13  ;;  %v15509_v58 = vpop.f32.mrb[2].mxu1 }
 0x2ac   : > { %v6997_v42 = vadd.f32 %v18858_v5, %v6981_v57  ;;  %v3851_v62 = vmax.f32 %v3835_v50, 0.0  ;;  %v6982_v0 = vmul.f32 %v15509_v58, %v18853_v11  ;;  %v18872_v15 = vadd.f32 %v18858_v5, %v3814_v24  ;;  %v6903_v12 = vpop.f32.mrb[3].mxu1 }
 0x2ad   : > { %v14229_v9 = vpack.c.bf16 %v3853_v25, %v3853_v25  ;;  %v6995_v6 = vadd.f32 %v18858_v5, %v6979_v3  ;;  %v3854_v55 = vmax.f32 %v3838_v28, 0.0  ;;  %v18876_v23 = vmul.f32 %v18853_v11, %v6903_v12  ;;  %v7237_v28 = vld [vmem:[#allocation3 + $0x6c] sm:$0xf] }
 0x2ae   : > { %v7013_v27 = vmax.f32 %v6997_v42, 0.0  ;;  %v14227_v22 = vpack.c.bf16 %v3851_v62, %v3851_v62  ;;  %v6998_v16 = vadd.f32 %v18858_v5, %v6982_v0  ;;  %v3852_v39 = vmax.f32 %v18872_v15, 0.0  ;;  %v18880_v32 = vpop.f32.mrb[4].mxu0 }
 0x2af   : > { %v3933_v46 = vshrl.u32 %v14229_v9, 16  ;;  %v3936_v61 = vshll.u32 %v14229_v9, 16  ;;  %v7011_v54 = vmax.f32 %v6995_v6, 0.0  ;;  %v14230_v56 = vpack.c.bf16 %v3854_v55, %v3854_v55  ;;  %v18882_v21 = vpop.f32.mrb[5].mxu0 }
 0x2b0   : > { %v14245_v40 = vpack.c.bf16 %v7013_v27, %v7013_v27  ;;  %v3916_v17 = vshrl.u32 %v14227_v22, 16  ;;  %v3919_v63 = vshll.u32 %v14227_v22, 16  ;;  %v7014_v47 = vmax.f32 %v6998_v16, 0.0  ;;  %v18884_v14 = vpop.f32.mrb[6].mxu0  ;;  %v7248_v22 = vld [vmem:[#allocation3 + $0x80] sm:$0x1] }
 0x2b1   : > { %v3935_v30 = vrot.slane %v3933_v46, 7  ;;  %v14243_v31 = vpack.c.bf16 %v7011_v54, %v7011_v54  ;;  %v3941_v44 = vshrl.u32 %v14230_v56, 16  ;;  %v3944_v18 = vshll.u32 %v14230_v56, 16  ;;  %v18886_v2 = vpop.f32.mrb[4].mxu1  ;;  %v18888_v1 = vpop.f32.mrb[7].mxu0 }
 0x2b2   : > { %v7093_v26 = vshrl.u32 %v14245_v40, 16  ;;  %v7096_v53 = vshll.u32 %v14245_v40, 16  ;;  %v18896_v29 = vrot.slane %v3916_v17, 7  ;;  %v14246_v37 = vpack.c.bf16 %v7014_v47, %v7014_v47  ;;  %v6916_v36 = vpop.f32.mrb[5].mxu1 }
 0x2b3   : > { %v3938_v41 = vor.u32 %v3936_v61, %v3935_v30  ;;  %v3939_v51 = vrot.slane %v3935_v30, 4  ;;  %v7076_v60 = vshrl.u32 %v14243_v31, 16  ;;  %v7079_v7 = vshll.u32 %v14243_v31, 16  ;;  %v15513_v49 = vpop.f32.mrb[6].mxu1 }
 0x2b4   : > { %v7095_v10 = vrot.slane %v7093_v26, 7  ;;  %v3921_v33 = vor.u32 %v3919_v63, %v18896_v29  ;;  %v3922_v8 = vrot.slane %v18896_v29, 4  ;;  %v3943_v19 = vrot.slane %v3941_v44, 7  ;;  %v18900_v20 = vpop.f32.mrb[7].mxu1 }
 0x2b5   : > { %v4087_v13 = vsel %vm18892_vm3, %v3938_v41, %v4086_v35  ;;  %v18904_v57 = vrot.slane %v7076_v60, 7  ;;  %v7101_v50 = vshrl.u32 %v14246_v37, 16  ;;  %v7104_v48 = vshll.u32 %v14246_v37, 16 }
 0x2b6   : > { %4088 = vst [vmem:[#allocation3 + $0x18] sm:$0xf] %v4087_v13  ;;  %v7098_v24 = vor.u32 %v7096_v53, %v7095_v10  ;;  %v7099_v25 = vrot.slane %v7095_v10, 4  ;;  %v4080_v3 = vsel %vm18892_vm3, %v3921_v33, %v4079_v34  ;;  %v3946_v58 = vor.u32 %v3944_v18, %v3943_v19  ;;  %v18908_v42 = vpop.f32.mrb[8].mxu0 }
 0x2b7   : > { %4081 = vst [vmem:[#allocation3 + $0xc] sm:$0xf] %v4080_v3  ;;  %v7081_v62 = vor.u32 %v7079_v7, %v18904_v57  ;;  %v7082_v0 = vrot.slane %v18904_v57, 4  ;;  %v3948_v15 = vrot.slane %v3943_v19, 4  ;;  %v7103_v12 = vrot.slane %v7101_v50, 7  ;;  %v18912_v9 = vpop.f32.mrb[9].mxu0 }
 0x2b8   : > { %v7245_v6 = vsel %vm18892_vm3, %v7098_v24, %v7244_v43  ;;  %v3947_v27 = vsel %vm17269_vm9, %v3939_v51, %v3946_v58  ;;  %v14228_v16 = vpack.c.bf16 %v3852_v39, %v3852_v39  ;;  %v6996_v46 = vadd.f32 %v18858_v5, %v18876_v23  ;;  %v18920_v61 = vpop.f32.mrb[10].mxu0  ;;  %v4083_v7 = vld [vmem:[#allocation3 + $0x14] sm:$0x1] }
 0x2b9   : > { %7246 = vst [vmem:[#allocation3 + $0x78] sm:$0xf] %v7245_v6  ;;  %v7238_v54 = vsel %vm18892_vm3, %v7081_v62, %v7237_v28  ;;  %4089 = vst [vmem:[#allocation3 + $0x1c] sm:$0xf] %v3947_v27  ;;  %v4091_v56 = vsel %vm18756_vm15, %v3948_v15, %v4090_v45  ;;  %v7106_v40 = vor.u32 %v7104_v48, %v7103_v12  ;;  %v7108_v17 = vrot.slane %v7103_v12, 4  ;;  %v18926_v63 = vpop.f32.mrb[8].mxu1 }
 0x2ba   : > { %v18928_v47 = vpop.f32.mrb[11].mxu0  ;;  %7239 = vst [vmem:[#allocation3 + $0x6c] sm:$0xf] %v7238_v54  ;;  %4092 = vst [vmem:[#allocation3 + $0x20] sm:$0x1] %v4091_v56  ;;  %v3924_v39 = vshrl.u32 %v14228_v16, 16  ;;  %v3819_v31 = vmul.f32 %v18880_v32, %v18853_v11  ;;  %v6985_v26 = vmul.f32 %v18886_v2, %v18853_v11  ;;  %v3817_v53 = vmul.f32 %v18853_v11, %v18882_v21 }
 0x2bb   : > { %v3927_v23 = vshll.u32 %v14228_v16, 16  ;;  %v7012_v30 = vmax.f32 %v6996_v46, 0.0  ;;  %v18932_v44 = vpop.f32.mrb[9].mxu1  ;;  %v7107_v18 = vsel %vm17269_vm9, %v7099_v25, %v7106_v40  ;;  %v7249_v35 = vsel %vm18756_vm15, %v7108_v17, %v7248_v22  ;;  %v7241_v15 = vld [vmem:[#allocation3 + $0x74] sm:$0x1] }
 0x2bc   : > { %v18942_v37 = vpop.f32.mrb[10].mxu1  ;;  %7247 = vst [vmem:[#allocation3 + $0x7c] sm:$0xf] %v7107_v18  ;;  %7250 = vst [vmem:[#allocation3 + $0x80] sm:$0x1] %v7249_v35  ;;  %v3926_v41 = vrot.slane %v3924_v39, 7  ;;  %v3841_v51 = vadd.f32 %v18858_v5, %v3819_v31  ;;  %v6983_v34 = vmul.f32 %v18853_v11, %v6916_v36  ;;  %v7001_v10 = vadd.f32 %v18858_v5, %v6985_v26 }
 0x2bd   : > { %v14244_v32 = vpack.c.bf16 %v7012_v30, %v7012_v30  ;;  %v18946_v60 = vpop.f32.mrb[11].mxu1  ;;  %v3839_v2 = vadd.f32 %v18858_v5, %v3817_v53  ;;  %v3820_v21 = vmul.f32 %v18884_v14, %v18853_v11  ;;  %v6986_v33 = vmul.f32 %v15513_v49, %v18853_v11 }
 0x2be   : > { %v3929_v19 = vor.u32 %v3927_v23, %v3926_v41  ;;  %v3931_v13 = vrot.slane %v3926_v41, 4  ;;  %v18953_v48 = vpop.f32.mrb[12].mxu0  ;;  %v3857_v24 = vmax.f32 %v3841_v51, 0.0  ;;  %v7017_v36 = vmax.f32 %v7001_v10, 0.0  ;;  %v4100_v51 = vld [vmem:[#allocation3 + $0x30] sm:$0xf] }
 0x2bf   : > { %v7084_v43 = vshrl.u32 %v14244_v32, 16  ;;  %v7087_v50 = vshll.u32 %v14244_v32, 16  ;;  %v3855_v25 = vmax.f32 %v3839_v2, 0.0  ;;  %v6999_v3 = vadd.f32 %v18858_v5, %v6983_v34  ;;  %v18956_v28 = vpop.f32.mrb[13].mxu0  ;;  %v7258_v2 = vld [vmem:[#allocation3 + $0x90] sm:$0xf] }
 0x2c0   : > { %v3930_v14 = vsel %vm17269_vm9, %v3922_v8, %v3929_v19  ;;  %v4084_v49 = vsel %vm18756_vm15, %v3931_v13, %v4083_v7  ;;  %v3842_v45 = vadd.f32 %v18858_v5, %v3820_v21  ;;  %v18965_v62 = vpop.f32.mrb[14].mxu0  ;;  %v14233_v12 = vpack.c.bf16 %v3857_v24, %v3857_v24  ;;  %v4093_v21 = vld [vmem:[#allocation3 + $0x24] sm:$0xf] }
 0x2c1   : > { %v7086_v58 = vrot.slane %v7084_v43, 7  ;;  %4082 = vst [vmem:[#allocation3 + $0x10] sm:$0xf] %v3930_v14  ;;  %4085 = vst [vmem:[#allocation3 + $0x14] sm:$0x1] %v4084_v49  ;;  %v14249_v6 = vpack.c.bf16 %v7017_v36, %v7017_v36  ;;  %v14231_v27 = vpack.c.bf16 %v3855_v25, %v3855_v25  ;;  %v7015_v22 = vmax.f32 %v6999_v3, 0.0 }
 0x2c2   : > { %v18967_v16 = vpop.f32.mrb[12].mxu1  ;;  %v18969_v29 = vpop.f32.mrb[15].mxu0  ;;  %v3858_v54 = vmax.f32 %v3842_v45, 0.0  ;;  %v7002_v56 = vadd.f32 %v18858_v5, %v6986_v33  ;;  %v3967_v17 = vshrl.u32 %v14233_v12, 16  ;;  %v3970_v39 = vshll.u32 %v14233_v12, 16 }
 0x2c3   : > { %v7089_v8 = vor.u32 %v7087_v50, %v7086_v58  ;;  %v7091_v46 = vrot.slane %v7086_v58, 4  ;;  %v18972_v40 = vpop.f32.mrb[13].mxu1  ;;  %v7127_v23 = vshrl.u32 %v14249_v6, 16  ;;  %v7130_v30 = vshll.u32 %v14249_v6, 16  ;;  %v7251_v58 = vld [vmem:[#allocation3 + $0x84] sm:$0xf] }
 0x2c4   : > { %v18974_v31 = vpop.f32.mrb[14].mxu1  ;;  %v3950_v26 = vshrl.u32 %v14231_v27, 16  ;;  %v3953_v53 = vshll.u32 %v14231_v27, 16  ;;  %v3969_v32 = vrot.slane %v3967_v17, 7  ;;  %v14247_v7 = vpack.c.bf16 %v7015_v22, %v7015_v22 }
 0x2c5   : > { %v7090_v18 = vsel %vm17269_vm9, %v7082_v0, %v7089_v8  ;;  %v7242_v35 = vsel %vm18756_vm15, %v7091_v46, %v7241_v15  ;;  %v18982_v41 = vpop.f32.mrb[15].mxu1  ;;  %v18984_v34 = vrot.slane %v7127_v23, 7  ;;  %v14234_v10 = vpack.c.bf16 %v3858_v54, %v3858_v54 }
 0x2c6   : > { %7240 = vst [vmem:[#allocation3 + $0x70] sm:$0xf] %v7090_v18  ;;  %7243 = vst [vmem:[#allocation3 + $0x74] sm:$0x1] %v7242_v35  ;;  %v18986_v57 = vrot.slane %v3950_v26, 7  ;;  %v7018_v0 = vmax.f32 %v7002_v56, 0.0  ;;  %v3818_v33 = vmul.f32 %v18853_v11, %v18888_v1  ;;  %v6984_v19 = vmul.f32 %v18853_v11, %v18900_v20 }
 0x2c7   : > { %v3972_v13 = vor.u32 %v3970_v39, %v3969_v32  ;;  %v3973_v43 = vrot.slane %v3969_v32, 4  ;;  %v7132_v50 = vor.u32 %v7130_v30, %v18984_v34  ;;  %v7133_v24 = vrot.slane %v18984_v34, 4  ;;  %v4104_v39 = vld [vmem:[#allocation3 + $0x38] sm:$0x1] }
 0x2c8   : > { %v3955_v36 = vor.u32 %v3953_v53, %v18986_v57  ;;  %v3956_v25 = vrot.slane %v18986_v57, 4  ;;  %v7110_v3 = vshrl.u32 %v14247_v7, 16  ;;  %v7113_v14 = vshll.u32 %v14247_v7, 16  ;;  %v7262_v34 = vld [vmem:[#allocation3 + $0x98] sm:$0x1] }
 0x2c9   : > { %v4101_v49 = vsel %vm18892_vm3, %v3972_v13, %v4100_v51  ;;  %v7259_v1 = vsel %vm18892_vm3, %v7132_v50, %v7258_v2  ;;  %v3975_v20 = vshrl.u32 %v14234_v10, 16  ;;  %v3978_v45 = vshll.u32 %v14234_v10, 16 }
 0x2ca   : > { %4102 = vst [vmem:[#allocation3 + $0x30] sm:$0xf] %v4101_v49  ;;  %7260 = vst [vmem:[#allocation3 + $0x90] sm:$0xf] %v7259_v1  ;;  %v4094_v15 = vsel %vm18892_vm3, %v3955_v36, %v4093_v21  ;;  %v19002_v12 = vrot.slane %v7110_v3, 7  ;;  %v14250_v6 = vpack.c.bf16 %v7018_v0, %v7018_v0  ;;  %v3840_v27 = vadd.f32 %v18858_v5, %v3818_v33 }
 0x2cb   : > { %4095 = vst [vmem:[#allocation3 + $0x24] sm:$0xf] %v4094_v15  ;;  %v3977_v22 = vrot.slane %v3975_v20, 7  ;;  %v7000_v8 = vadd.f32 %v18858_v5, %v6984_v19  ;;  %v3823_v46 = vmul.f32 %v18908_v42, %v18853_v11  ;;  %v6989_v54 = vmul.f32 %v18926_v63, %v18853_v11 }
 0x2cc   : > { %v7115_v56 = vor.u32 %v7113_v14, %v19002_v12  ;;  %v7116_v17 = vrot.slane %v19002_v12, 4  ;;  %v7135_v23 = vshrl.u32 %v14250_v6, 16  ;;  %v7138_v30 = vshll.u32 %v14250_v6, 16 }
 0x2cd   : > { %v3980_v18 = vor.u32 %v3978_v45, %v3977_v22  ;;  %v3982_v35 = vrot.slane %v3977_v22, 4  ;;  %v3856_v26 = vmax.f32 %v3840_v27, 0.0  ;;  %v7016_v53 = vmax.f32 %v7000_v8, 0.0  ;;  %v4097_v45 = vld [vmem:[#allocation3 + $0x2c] sm:$0x1] }
 0x2ce   : > { %v7252_v32 = vsel %vm18892_vm3, %v7115_v56, %v7251_v58  ;;  %v7137_v51 = vrot.slane %v7135_v23, 7  ;;  %v3845_v42 = vadd.f32 %v18858_v5, %v3823_v46  ;;  %v7005_v63 = vadd.f32 %v18858_v5, %v6989_v54  ;;  %v7255_v27 = vld [vmem:[#allocation3 + $0x8c] sm:$0x1] }
 0x2cf   : > { %7253 = vst [vmem:[#allocation3 + $0x84] sm:$0xf] %v7252_v32  ;;  %v3981_v7 = vsel %vm17269_vm9, %v3973_v43, %v3980_v18  ;;  %v4105_v10 = vsel %vm18756_vm15, %v3982_v35, %v4104_v39  ;;  %v14232_v2 = vpack.c.bf16 %v3856_v26, %v3856_v26  ;;  %v14248_v21 = vpack.c.bf16 %v7016_v53, %v7016_v53 }
 0x2d0   : > { %4103 = vst [vmem:[#allocation3 + $0x34] sm:$0xf] %v3981_v7  ;;  %4106 = vst [vmem:[#allocation3 + $0x38] sm:$0x1] %v4105_v10  ;;  %v7140_v0 = vor.u32 %v7138_v30, %v7137_v51  ;;  %v7142_v33 = vrot.slane %v7137_v51, 4  ;;  %v3861_v19 = vmax.f32 %v3845_v42, 0.0  ;;  %v3821_v12 = vmul.f32 %v18853_v11, %v18912_v9 }
 0x2d1   : > { %v7021_v13 = vmax.f32 %v7005_v63, 0.0  ;;  %v3958_v50 = vshrl.u32 %v14232_v2, 16  ;;  %v3961_v36 = vshll.u32 %v14232_v2, 16  ;;  %v7118_v3 = vshrl.u32 %v14248_v21, 16  ;;  %v4114_v51 = vld [vmem:[#allocation3 + $0x48] sm:$0xf] }
 0x2d2   : > { %v7121_v14 = vshll.u32 %v14248_v21, 16  ;;  %v7141_v49 = vsel %vm17269_vm9, %v7133_v24, %v7140_v0  ;;  %v7263_v43 = vsel %vm18756_vm15, %v7142_v33, %v7262_v34  ;;  %v14237_v1 = vpack.c.bf16 %v3861_v19, %v3861_v19  ;;  %v7272_v34 = vld [vmem:[#allocation3 + $0xa8] sm:$0xf]  ;;  %v19187_v55 = vld [vmem:[#allocation3 + $0x30] sm:$0xf] }
 0x2d3   : > { %v14253_v58 = vpack.c.bf16 %v7021_v13, %v7021_v13  ;;  %7261 = vst [vmem:[#allocation3 + $0x94] sm:$0xf] %v7141_v49  ;;  %7264 = vst [vmem:[#allocation3 + $0x98] sm:$0x1] %v7263_v43  ;;  %v3960_v20 = vrot.slane %v3958_v50, 7  ;;  %v7120_v15 = vrot.slane %v7118_v3, 7  ;;  %v6987_v6 = vmul.f32 %v18853_v11, %v18932_v44 }
 0x2d4   : > { %v4001_v22 = vshrl.u32 %v14237_v1, 16  ;;  %v4004_v8 = vshll.u32 %v14237_v1, 16  ;;  %v3843_v35 = vadd.f32 %v18858_v5, %v3821_v12  ;;  %v6990_v2 = vmul.f32 %v18942_v37, %v18853_v11 }
 0x2d5   : > { %v7161_v24 = vshrl.u32 %v14253_v58, 16  ;;  %v7164_v46 = vshll.u32 %v14253_v58, 16  ;;  %v3963_v54 = vor.u32 %v3961_v36, %v3960_v20  ;;  %v3965_v56 = vrot.slane %v3960_v20, 4 }
 0x2d6   : > { %v7123_v39 = vor.u32 %v7121_v14, %v7120_v15  ;;  %v7125_v23 = vrot.slane %v7120_v15, 4  ;;  %v19028_v30 = vrot.slane %v4001_v22, 7  ;;  %v7003_v9 = vadd.f32 %v18858_v5, %v6987_v6 }
 0x2d7   : > { %v19030_v18 = vrot.slane %v7161_v24, 7  ;;  %v3964_v44 = vsel %vm17269_vm9, %v3956_v25, %v3963_v54  ;;  %v4098_v26 = vsel %vm18756_vm15, %v3965_v56, %v4097_v45  ;;  %v3859_v7 = vmax.f32 %v3843_v35, 0.0 }
 0x2d8   : > { %v7124_v53 = vsel %vm17269_vm9, %v7116_v17, %v7123_v39  ;;  %v7256_v32 = vsel %vm18756_vm15, %v7125_v23, %v7255_v27  ;;  %4096 = vst [vmem:[#allocation3 + $0x28] sm:$0xf] %v3964_v44  ;;  %4099 = vst [vmem:[#allocation3 + $0x2c] sm:$0x1] %v4098_v26  ;;  %v4006_v57 = vor.u32 %v4004_v8, %v19028_v30  ;;  %v4007_v42 = vrot.slane %v19028_v30, 4 }
 0x2d9   : > { %7254 = vst [vmem:[#allocation3 + $0x88] sm:$0xf] %v7124_v53  ;;  %7257 = vst [vmem:[#allocation3 + $0x8c] sm:$0x1] %v7256_v32  ;;  %v7166_v25 = vor.u32 %v7164_v46, %v19030_v18  ;;  %v7167_v63 = vrot.slane %v19030_v18, 4  ;;  %v7019_v10 = vmax.f32 %v7003_v9, 0.0  ;;  %v3824_v17 = vmul.f32 %v18920_v61, %v18853_v11 }
 0x2da   : > { %v4115_v21 = vsel %vm18892_vm3, %v4006_v57, %v4114_v51  ;;  %v3822_v33 = vmul.f32 %v18853_v11, %v18928_v47  ;;  %v6988_v19 = vmul.f32 %v18853_v11, %v18946_v60  ;;  %v14235_v13 = vpack.c.bf16 %v3859_v7, %v3859_v7  ;;  %v4107_v8 = vld [vmem:[#allocation3 + $0x3c] sm:$0xf]  ;;  %v4118_v7 = vld [vmem:[#allocation3 + $0x50] sm:$0x1] }
 0x2db   : > { %v7273_v0 = vsel %vm18892_vm3, %v7166_v25, %v7272_v34  ;;  %4116 = vst [vmem:[#allocation3 + $0x48] sm:$0xf] %v4115_v21  ;;  %v14251_v50 = vpack.c.bf16 %v7019_v10, %v7019_v10  ;;  %v3846_v61 = vadd.f32 %v18858_v5, %v3824_v17  ;;  %v7006_v37 = vadd.f32 %v18858_v5, %v6990_v2  ;;  %v7276_v21 = vld [vmem:[#allocation3 + $0xb0] sm:$0x1] }
 0x2dc   : > { %7274 = vst [vmem:[#allocation3 + $0xa8] sm:$0xf] %v7273_v0  ;;  %v3844_v36 = vadd.f32 %v18858_v5, %v3822_v33  ;;  %v7004_v3 = vadd.f32 %v18858_v5, %v6988_v19  ;;  %v3827_v14 = vmul.f32 %v18953_v48, %v18853_v11  ;;  %v6993_v47 = vmul.f32 %v18967_v16, %v18853_v11  ;;  %v7265_v48 = vld [vmem:[#allocation3 + $0x9c] sm:$0xf] }
 0x2dd   : > { %v3984_v49 = vshrl.u32 %v14235_v13, 16  ;;  %v3987_v60 = vshll.u32 %v14235_v13, 16  ;;  %v7144_v43 = vshrl.u32 %v14251_v50, 16  ;;  %v7147_v1 = vshll.u32 %v14251_v50, 16 }
 0x2de   : > { %v3862_v58 = vmax.f32 %v3846_v61, 0.0  ;;  %v7022_v20 = vmax.f32 %v7006_v37, 0.0  ;;  %v3860_v45 = vmax.f32 %v3844_v36, 0.0  ;;  %v7020_v15 = vmax.f32 %v7004_v3, 0.0  ;;  %v4111_v3 = vld [vmem:[#allocation3 + $0x44] sm:$0x1] }
 0x2df   : > { %v3986_v12 = vrot.slane %v3984_v49, 7  ;;  %v19068_v6 = vrot.slane %v7144_v43, 7  ;;  %v3849_v27 = vadd.f32 %v18858_v5, %v3827_v14  ;;  %v7009_v22 = vadd.f32 %v18858_v5, %v6993_v47 }
 0x2e0   : > { %v14238_v24 = vpack.c.bf16 %v3862_v58, %v3862_v58  ;;  %v14254_v46 = vpack.c.bf16 %v7022_v20, %v7022_v20  ;;  %v14236_v16 = vpack.c.bf16 %v3860_v45, %v3860_v45  ;;  %v14252_v54 = vpack.c.bf16 %v7020_v15, %v7020_v15  ;;  %v7269_v20 = vld [vmem:[#allocation3 + $0xa4] sm:$0x1] }
 0x2e1   : > { %v3989_v56 = vor.u32 %v3987_v60, %v3986_v12  ;;  %v3990_v39 = vrot.slane %v3986_v12, 4  ;;  %v7149_v23 = vor.u32 %v7147_v1, %v19068_v6  ;;  %v7150_v35 = vrot.slane %v19068_v6, 4 }
 0x2e2   : > { %v4009_v9 = vshrl.u32 %v14238_v24, 16  ;;  %v4012_v44 = vshll.u32 %v14238_v24, 16  ;;  %v7169_v26 = vshrl.u32 %v14254_v46, 16  ;;  %v7172_v53 = vshll.u32 %v14254_v46, 16 }
 0x2e3   : > { %v4108_v32 = vsel %vm18892_vm3, %v3989_v56, %v4107_v8  ;;  %v7266_v51 = vsel %vm18892_vm3, %v7149_v23, %v7265_v48  ;;  %v3992_v34 = vshrl.u32 %v14236_v16, 16  ;;  %v3995_v57 = vshll.u32 %v14236_v16, 16  ;;  %v4128_v56 = vld [vmem:[#allocation3 + $0x60] sm:$0xf] }
 0x2e4   : > { %4109 = vst [vmem:[#allocation3 + $0x3c] sm:$0xf] %v4108_v32  ;;  %7267 = vst [vmem:[#allocation3 + $0x9c] sm:$0xf] %v7266_v51  ;;  %v4011_v25 = vrot.slane %v4009_v9, 7  ;;  %v7171_v10 = vrot.slane %v7169_v26, 7  ;;  %v3825_v13 = vmul.f32 %v18853_v11, %v18956_v28  ;;  %v6991_v8 = vmul.f32 %v18853_v11, %v18972_v40 }
 0x2e5   : > { %v7152_v17 = vshrl.u32 %v14252_v54, 16  ;;  %v7155_v2 = vshll.u32 %v14252_v54, 16  ;;  %v3994_v0 = vrot.slane %v3992_v34, 7  ;;  %v3865_v33 = vmax.f32 %v3849_v27, 0.0 }
 0x2e6   : > { %v7025_v19 = vmax.f32 %v7009_v22, 0.0  ;;  %v4014_v50 = vor.u32 %v4012_v44, %v4011_v25  ;;  %v4016_v61 = vrot.slane %v4011_v25, 4  ;;  %v7174_v37 = vor.u32 %v7172_v53, %v7171_v10  ;;  %v7286_v53 = vld [vmem:[#allocation3 + $0xc0] sm:$0xf] }
 0x2e7   : > { %v7176_v36 = vrot.slane %v7171_v10, 4  ;;  %v3997_v14 = vor.u32 %v3995_v57, %v3994_v0  ;;  %v3999_v47 = vrot.slane %v3994_v0, 4  ;;  %v7154_v49 = vrot.slane %v7152_v17, 7 }
 0x2e8   : > { %v14241_v60 = vpack.c.bf16 %v3865_v33, %v3865_v33  ;;  %v4015_v43 = vsel %vm17269_vm9, %v4007_v42, %v4014_v50  ;;  %v4119_v1 = vsel %vm18756_vm15, %v4016_v61, %v4118_v7  ;;  %v7175_v28 = vsel %vm17269_vm9, %v7167_v63, %v7174_v37  ;;  %v19127_v50 = vld [vmem:[#allocation3 + $0xc] sm:$0xf]  ;;  %v4121_v61 = vld [vmem:[#allocation3 + $0x54] sm:$0xf] }
 0x2e9   : > { %v7277_v58 = vsel %vm18756_vm15, %v7176_v36, %v7276_v21  ;;  %4117 = vst [vmem:[#allocation3 + $0x4c] sm:$0xf] %v4015_v43  ;;  %4120 = vst [vmem:[#allocation3 + $0x50] sm:$0x1] %v4119_v1  ;;  %v3998_v30 = vsel %vm17269_vm9, %v3990_v39, %v3997_v14  ;;  %v4112_v42 = vsel %vm18756_vm15, %v3999_v47, %v4111_v3  ;;  %v7159_v15 = vrot.slane %v7154_v49, 4 }
 0x2ea   : > { %7275 = vst [vmem:[#allocation3 + $0xac] sm:$0xf] %v7175_v28  ;;  %7278 = vst [vmem:[#allocation3 + $0xb0] sm:$0x1] %v7277_v58  ;;  %v7157_v45 = vor.u32 %v7155_v2, %v7154_v49  ;;  %v4035_v18 = vshrl.u32 %v14241_v60, 16  ;;  %v4038_v63 = vshll.u32 %v14241_v60, 16  ;;  %v14257_v12 = vpack.c.bf16 %v7025_v19, %v7025_v19 }
 0x2eb   : > { %4110 = vst [vmem:[#allocation3 + $0x40] sm:$0xf] %v3998_v30  ;;  %4113 = vst [vmem:[#allocation3 + $0x44] sm:$0x1] %v4112_v42  ;;  %v3847_v6 = vadd.f32 %v18858_v5, %v3825_v13  ;;  %v7270_v22 = vsel %vm18756_vm15, %v7159_v15, %v7269_v20  ;;  %v3828_v48 = vmul.f32 %v18965_v62, %v18853_v11  ;;  %v7279_v28 = vld [vmem:[#allocation3 + $0xb4] sm:$0xf] }
 0x2ec   : > { %v7158_v27 = vsel %vm17269_vm9, %v7150_v35, %v7157_v45  ;;  %7271 = vst [vmem:[#allocation3 + $0xa4] sm:$0x1] %v7270_v22  ;;  %v19105_v24 = vrot.slane %v4035_v18, 7  ;;  %v7195_v46 = vshrl.u32 %v14257_v12, 16  ;;  %v7198_v16 = vshll.u32 %v14257_v12, 16 }
 0x2ed   : > { %7268 = vst [vmem:[#allocation3 + $0xa0] sm:$0xf] %v7158_v27  ;;  %v3863_v54 = vmax.f32 %v3847_v6, 0.0  ;;  %v7007_v39 = vadd.f32 %v18858_v5, %v6991_v8  ;;  %v3850_v23 = vadd.f32 %v18858_v5, %v3828_v48  ;;  %v6994_v35 = vmul.f32 %v18974_v31, %v18853_v11  ;;  %v4132_v30 = vld [vmem:[#allocation3 + $0x68] sm:$0x1] }
 0x2ee   : > { %v3826_v40 = vmul.f32 %v18853_v11, %v18969_v29  ;;  %v4040_v62 = vor.u32 %v4038_v63, %v19105_v24  ;;  %v4041_v9 = vrot.slane %v19105_v24, 4  ;;  %v19115_v44 = vrot.slane %v7195_v46, 7  ;;  %v7290_v27 = vld [vmem:[#allocation3 + $0xc8] sm:$0x1]  ;;  %v4125_v22 = vld [vmem:[#allocation3 + $0x5c] sm:$0x1] }
 0x2ef   : > { %v14239_v26 = vpack.c.bf16 %v3863_v54, %v3863_v54  ;;  %v7023_v32 = vmax.f32 %v7007_v39, 0.0  ;;  %v3866_v51 = vmax.f32 %v3850_v23, 0.0  ;;  %v7010_v34 = vadd.f32 %v18858_v5, %v6994_v35  ;;  %v19137_v46 = vld [vmem:[#allocation3 + $0x10] sm:$0xf]  ;;  %v19145_v23 = vld [vmem:[#allocation3 + $0x18] sm:$0xf] }
 0x2f0   : > { %v3848_v57 = vadd.f32 %v18858_v5, %v3826_v40  ;;  %v4129_v31 = vsel %vm18892_vm3, %v4040_v62, %v4128_v56  ;;  %v7200_v25 = vor.u32 %v7198_v16, %v19115_v44  ;;  %v7201_v29 = vrot.slane %v19115_v44, 4 }
 0x2f1   : > { %v4018_v7 = vshrl.u32 %v14239_v26, 16  ;;  %4130 = vst [vmem:[#allocation3 + $0x60] sm:$0xf] %v4129_v31  ;;  %v4021_v10 = vshll.u32 %v14239_v26, 16  ;;  %v14255_v17 = vpack.c.bf16 %v7023_v32, %v7023_v32  ;;  %v14242_v2 = vpack.c.bf16 %v3866_v51, %v3866_v51  ;;  %v19147_v26 = vld [vmem:[#allocation3 + $0x14] sm:$0x1] }
 0x2f2   : > { %v7026_v21 = vmax.f32 %v7010_v34, 0.0  ;;  %v7287_v0 = vsel %vm18892_vm3, %v7200_v25, %v7286_v53  ;;  %v3864_v19 = vmax.f32 %v3848_v57, 0.0  ;;  %v6992_v13 = vmul.f32 %v18853_v11, %v18982_v41  ;;  %v19160_v25 = vld [vmem:[#allocation3 + $0x1c] sm:$0xf] }
 0x2f3   : > { %v4020_v33 = vrot.slane %v4018_v7, 7  ;;  %7288 = vst [vmem:[#allocation3 + $0xc0] sm:$0xf] %v7287_v0  ;;  %v7178_v37 = vshrl.u32 %v14255_v17, 16  ;;  %v7181_v36 = vshll.u32 %v14255_v17, 16  ;;  %v4043_v3 = vshrl.u32 %v14242_v2, 16 }
 0x2f4   : > { %v4046_v14 = vshll.u32 %v14242_v2, 16  ;;  %v14258_v60 = vpack.c.bf16 %v7026_v21, %v7026_v21  ;;  %v14240_v43 = vpack.c.bf16 %v3864_v19, %v3864_v19  ;;  %v7008_v20 = vadd.f32 %v18858_v5, %v6992_v13 }
 0x2f5   : > { %v4023_v47 = vor.u32 %v4021_v10, %v4020_v33  ;;  %v4024_v49 = vrot.slane %v4020_v33, 4  ;;  %v19129_v1 = vrot.slane %v7178_v37, 7  ;;  %v4045_v58 = vrot.slane %v4043_v3, 7  ;;  %v19163_v33 = vld [vmem:[#allocation3 + $0x20] sm:$0x1] }
 0x2f6   : > { %v7360_v11 = vshrl.u32 %v19127_v50, 16  ;;  %v7203_v42 = vshrl.u32 %v14258_v60, 16  ;;  %v7206_v45 = vshll.u32 %v14258_v60, 16  ;;  %v4026_v15 = vshrl.u32 %v14240_v43, 16 }
 0x2f7   : > { %v4122_v41 = vsel %vm18892_vm3, %v4023_v47, %v4121_v61  ;;  %v7183_v18 = vor.u32 %v7181_v36, %v19129_v1  ;;  %v7184_v63 = vrot.slane %v19129_v1, 4  ;;  %v4048_v12 = vor.u32 %v4046_v14, %v4045_v58  ;;  %v19169_v14 = vld [vmem:[#allocation3 + $0x24] sm:$0xf] }
 0x2f8   : > { %4123 = vst [vmem:[#allocation3 + $0x54] sm:$0xf] %v4122_v41  ;;  %v4050_v6 = vrot.slane %v4045_v58, 4  ;;  %v7205_v8 = vrot.slane %v7203_v42, 7  ;;  %v4028_v5 = vrot.slane %v4026_v15, 7  ;;  %v4029_v48 = vshll.u32 %v14240_v43, 16 }
 0x2f9   : > { %v7024_v24 = vmax.f32 %v7008_v20, 0.0  ;;  %v7280_v16 = vsel %vm18892_vm3, %v7183_v18, %v7279_v28  ;;  %v4049_v54 = vsel %vm17269_vm9, %v4041_v9, %v4048_v12  ;;  %v7362_v39 = vrot.slane %v7360_v11, 4  ;;  %v19172_v15 = vld [vmem:[#allocation3 + $0x28] sm:$0xf] }
 0x2fa   : > { %v4133_v56 = vsel %vm18756_vm15, %v4050_v6, %v4132_v30  ;;  %7281 = vst [vmem:[#allocation3 + $0xb4] sm:$0xf] %v7280_v16  ;;  %4131 = vst [vmem:[#allocation3 + $0x64] sm:$0xf] %v4049_v54  ;;  %v7208_v35 = vor.u32 %v7206_v45, %v7205_v8  ;;  %v7210_v40 = vrot.slane %v7205_v8, 4  ;;  %v4031_v62 = vor.u32 %v4029_v48, %v4028_v5 }
 0x2fb   : > { %4134 = vst [vmem:[#allocation3 + $0x68] sm:$0x1] %v4133_v56  ;;  %v4033_v44 = vrot.slane %v4028_v5, 4  ;;  %v14256_v38 = vpack.c.bf16 %v7024_v24, %v7024_v24  ;;  %v7363_v53 = vshll.u32 %v19127_v50, 16  ;;  %v7369_v9 = vshll.u32 %v19137_v46, 16  ;;  %v16831_v24 = vld [vmem:[#allocation6 + $0x8] sm:$0xff]  }
 0x2fc   : > { %v7373_v32 = vshrl.u32 %v19137_v46, 16  ;;  %v7209_v51 = vsel %vm17269_vm9, %v7201_v29, %v7208_v35  ;;  %v7291_v34 = vsel %vm18756_vm15, %v7210_v40, %v7290_v27  ;;  %v4032_v57 = vsel %vm17269_vm9, %v4024_v49, %v4031_v62  ;;  %v7283_v29 = vld [vmem:[#allocation3 + $0xbc] sm:$0x1]  ;;  %v19182_v27 = vld [vmem:[#allocation3 + $0x2c] sm:$0x1] }
 0x2fd   : > { %v4126_v31 = vsel %vm18756_vm15, %v4033_v44, %v4125_v22  ;;  %7289 = vst [vmem:[#allocation3 + $0xc4] sm:$0xf] %v7209_v51  ;;  %7292 = vst [vmem:[#allocation3 + $0xc8] sm:$0x1] %v7291_v34  ;;  %v7186_v7 = vshrl.u32 %v14256_v38, 16  ;;  %v7189_v10 = vshll.u32 %v14256_v38, 16 }
 0x2fe   : > { %4124 = vst [vmem:[#allocation3 + $0x58] sm:$0xf] %v4032_v57  ;;  %4127 = vst [vmem:[#allocation3 + $0x5c] sm:$0x1] %v4126_v31  ;;  %v7365_v17 = vrot.slane %v7363_v53, 5  ;;  %v7371_v2 = vrot.slane %v7369_v9, 5 }
 0x2ff   : > { %v7375_v21 = vrot.slane %v7373_v32, 4  ;;  %v7379_v0 = vshll.u32 %v19147_v26, 16  ;;  %v7384_v19 = vshrl.u32 %v19145_v23, 16  ;;  %v7387_v13 = vshll.u32 %v19145_v23, 16  ;;  %v19199_v38 = vld [vmem:[#allocation3 + $0x3c] sm:$0xf] }
 0x300   : > { %v7188_v61 = vrot.slane %v7186_v7, 7  ;;  %v7366_v37 = vor.u32 %v7365_v17, %v7362_v39  ;;  %v7393_v36 = vshll.u32 %v19160_v25, 16  ;;  %v7397_v3 = vshrl.u32 %v19160_v25, 16  ;;  %v19193_v39 = vld [vmem:[#allocation3 + $0x38] sm:$0x1] }
 0x301   : > { %v7376_v47 = vor.u32 %v7375_v21, %v7371_v2  ;;  %v7381_v49 = vrot.slane %v7379_v0, 5  ;;  %v7386_v60 = vrot.slane %v7384_v19, 4  ;;  %v7389_v43 = vrot.slane %v7387_v13, 5  ;;  %v17035_v57 = vld [vmem:[#allocation6] sm:$0xff]   ;;  %v19206_v19 = vld [vmem:[#allocation3 + $0x40] sm:$0xf] }
 0x302   : > { %v7191_v28 = vor.u32 %v7189_v10, %v7188_v61  ;;  %v7193_v58 = vrot.slane %v7188_v61, 4  ;;  %v7367_v20 = vrot.slane %v7366_v37, 4  ;;  %v7395_v11 = vrot.slane %v7393_v36, 5 }
 0x303   : > { %v7377_v41 = vrot.slane %v7376_v47, 4  ;;  %v7390_v30 = vor.u32 %v7389_v43, %v7386_v60  ;;  %v7399_v42 = vrot.slane %v7397_v3, 4  ;;  %v7403_v45 = vshll.u32 %v19163_v33, 16  ;;  %v19212_v43 = vld [vmem:[#allocation3 + $0x48] sm:$0xf] }
 0x304   : > { %v7192_v18 = vsel %vm17269_vm9, %v7184_v63, %v7191_v28  ;;  %v7284_v12 = vsel %vm18756_vm15, %v7193_v58, %v7283_v29  ;;  %v7372_v6 = vsel %vm17255_vm7, %v7367_v20, %v7371_v2  ;;  %v7408_v22 = vshrl.u32 %v19169_v14, 16  ;;  %v19189_v63 = vld [vmem:[#allocation3 + $0x34] sm:$0xf]  ;;  %v16833_v29 = vld [vmem:[#allocation6 + $0x10] sm:$0xff]  }
 0x305   : > { %7282 = vst [vmem:[#allocation3 + $0xb8] sm:$0xf] %v7192_v18  ;;  %7285 = vst [vmem:[#allocation3 + $0xbc] sm:$0x1] %v7284_v12  ;;  %v7382_v8 = vsel %vm17255_vm7, %v7377_v41, %v7381_v49  ;;  %v7391_v5 = vrot.slane %v7390_v30, 4  ;;  %v7400_v1 = vor.u32 %v7399_v42, %v7395_v11  ;;  %v7405_v48 = vrot.slane %v7403_v45, 5 }
 0x306   : > { %v13822_v59 = vcombine.low %v7372_v6, %v7382_v8  ;;  %v7410_v16 = vrot.slane %v7408_v22, 4  ;;  %v7411_v54 = vshll.u32 %v19169_v14, 16  ;;  %v7417_v56 = vshll.u32 %v19172_v15, 16  ;;  %v16835_v45 = vld [vmem:[#allocation6 + $0x18] sm:$0xff]  }
 0x307   : > { %v7396_v35 = vsel %vm17255_vm7, %v7391_v5, %v7395_v11  ;;  %v7401_v40 = vrot.slane %v7400_v1, 4  ;;  %v7421_v62 = vshrl.u32 %v19172_v15, 16  ;;  %v7427_v44 = vshll.u32 %v19182_v27, 16  ;;  %v19214_v11 = vld [vmem:[#allocation3 + $0x44] sm:$0x1] }
 0x308   : > { %15539 = vmatmul.mubr.bf16.vlgmr.msra.gmra.mrb[16].mxu0 %v13822_v59  ;;  %v7413_v53 = vrot.slane %v7411_v54, 5  ;;  %v7419_v9 = vrot.slane %v7417_v56, 5  ;;  %v7432_v32 = vshrl.u32 %v19187_v55, 16  ;;  %v7435_v51 = vshll.u32 %v19187_v55, 16  ;;  %v19222_v1 = vld [vmem:[#allocation3 + $0x4c] sm:$0xf] }
 0x309   : > { %v7406_v34 = vsel %vm17255_vm7, %v7401_v40, %v7405_v48  ;;  %15555 = vmatpush3.bf16.msra.mxu0 %v17035_v57  ;;  %v7423_v31 = vrot.slane %v7421_v62, 4  ;;  %v7429_v7 = vrot.slane %v7427_v44, 5  ;;  %v7441_v10 = vshll.u32 %v19189_v63, 16  ;;  %v16837_v54 = vld [vmem:[#allocation6 + $0x20] sm:$0xff]   ;;  %v19227_v40 = vld [vmem:[#allocation3 + $0x50] sm:$0x1] }
 0x30a   : > { %v13823_v17 = vcombine.low %v7396_v35, %v7406_v34  ;;  %15556 = vmatprep.subr.bf16.mxu0 %v16831_v24  ;;  %v7414_v2 = vor.u32 %v7413_v53, %v7410_v16  ;;  %v7434_v21 = vrot.slane %v7432_v32, 4  ;;  %v7437_v0 = vrot.slane %v7435_v51, 5  ;;  %v19233_v34 = vld [vmem:[#allocation3 + $0x60] sm:$0xf] }
 0x30b   : > { %v7424_v13 = vor.u32 %v7423_v31, %v7419_v9  ;;  %v7443_v61 = vrot.slane %v7441_v10, 5  ;;  %v7445_v37 = vshrl.u32 %v19189_v63, 16  ;;  %v7451_v36 = vshll.u32 %v19193_v39, 16 }
 0x30c   : > { %15542 = vmatprep.mubr.bf16.mxu0 %v13823_v17  ;;  %v7415_v3 = vrot.slane %v7414_v2, 4  ;;  %v7438_v47 = vor.u32 %v7437_v0, %v7434_v21  ;;  %v7456_v49 = vshrl.u32 %v19199_v38, 16  ;;  %v7459_v60 = vshll.u32 %v19199_v38, 16  ;;  %v19237_v17 = vld [vmem:[#allocation3 + $0x64] sm:$0xf] }
 0x30d   : > { %15557 = vmatpush3.bf16.msra.mxu0 %v16831_v24  ;;  %v7425_v28 = vrot.slane %v7424_v13, 4  ;;  %v7447_v58 = vrot.slane %v7445_v37, 4  ;;  %v7453_v20 = vrot.slane %v7451_v36, 5  ;;  %v7465_v41 = vshll.u32 %v19206_v19, 16 }
 0x30e   : > { %v7420_v30 = vsel %vm17255_vm7, %v7415_v3, %v7419_v9  ;;  %15558 = vmatprep.subr.bf16.mxu0 %v16833_v29  ;;  %v7439_v42 = vrot.slane %v7438_v47, 4  ;;  %v7458_v18 = vrot.slane %v7456_v49, 4  ;;  %v7461_v12 = vrot.slane %v7459_v60, 5  ;;  %v19243_v3 = vld [vmem:[#allocation3 + $0x54] sm:$0xf]  ;;  %v16839_v49 = vld [vmem:[#allocation6 + $0x28] sm:$0xff]  }
 0x30f   : > { %v7430_v6 = vsel %vm17255_vm7, %v7425_v28, %v7429_v7  ;;  %v7448_v22 = vor.u32 %v7447_v58, %v7443_v61  ;;  %v7467_v8 = vrot.slane %v7465_v41, 5  ;;  %v7469_v5 = vshrl.u32 %v19206_v19, 16  ;;  %v19245_v60 = vld [vmem:[#allocation3 + $0x68] sm:$0x1] }
 0x310   : > { %v13824_v48 = vcombine.low %v7420_v30, %v7430_v6  ;;  %v7444_v59 = vsel %vm17255_vm7, %v7439_v42, %v7443_v61  ;;  %v7462_v24 = vor.u32 %v7461_v12, %v7458_v18  ;;  %v7475_v16 = vshll.u32 %v19214_v11, 16  ;;  %v19252_v18 = vld [vmem:[#allocation3 + $0x58] sm:$0xf] }
 0x311   : > { %v7449_v56 = vrot.slane %v7448_v22, 4  ;;  %15559 = vmatpush3.bf16.msra.mxu0 %v16833_v29  ;;  %v7471_v35 = vrot.slane %v7469_v5, 4  ;;  %v7480_v62 = vshrl.u32 %v19212_v43, 16  ;;  %v7483_v44 = vshll.u32 %v19212_v43, 16 }
 0x312   : > { %15543 = vmatmul.mubr.bf16.gmra.mrb[20].mxu0 %v13824_v48  ;;  %15560 = vmatprep.subr.bf16.mxu0 %v16835_v45  ;;  %v7463_v53 = vrot.slane %v7462_v24, 4  ;;  %v7477_v9 = vrot.slane %v7475_v16, 5  ;;  %v7489_v32 = vshll.u32 %v19222_v1, 16  ;;  %v7493_v51 = vshrl.u32 %v19222_v1, 16 }
 0x313   : > { %v7454_v57 = vsel %vm17255_vm7, %v7449_v56, %v7453_v20  ;;  %v7472_v31 = vor.u32 %v7471_v35, %v7467_v8  ;;  %v7482_v7 = vrot.slane %v7480_v62, 4  ;;  %v7485_v10 = vrot.slane %v7483_v44, 5  ;;  %v16841_v44 = vld [vmem:[#allocation6 + $0x30] sm:$0xff]  }
 0x314   : > { %v13825_v2 = vcombine.low %v7444_v59, %v7454_v57  ;;  %v7468_v29 = vsel %vm17255_vm7, %v7463_v53, %v7467_v8  ;;  %v7491_v21 = vrot.slane %v7489_v32, 5  ;;  %v7495_v0 = vrot.slane %v7493_v51, 4  ;;  %v19262_v53 = vld [vmem:[#allocation3 + $0x6c] sm:$0xf]  ;;  %v19264_v32 = vld [vmem:[#allocation3 + $0x5c] sm:$0x1] }
 0x315   : > { %15561 = vmatpush3.bf16.msra.mxu0 %v16835_v45  ;;  %v7473_v13 = vrot.slane %v7472_v31, 4  ;;  %v7486_v61 = vor.u32 %v7485_v10, %v7482_v7  ;;  %v7499_v37 = vshll.u32 %v19227_v40, 16  ;;  %v10374_v36 = vshrl.u32 %v19233_v34, 16  ;;  %v19266_v57 = vld [vmem:[#allocation3 + $0x70] sm:$0xf] }
 0x316   : > { %15546 = vmatprep.mubr.bf16.mxu0 %v13825_v2  ;;  %15562 = vmatprep.subr.bf16.mxu0 %v16837_v54  ;;  %v7496_v47 = vor.u32 %v7495_v0, %v7491_v21  ;;  %v10377_v28 = vshll.u32 %v19233_v34, 16  ;;  %v10383_v58 = vshll.u32 %v19237_v17, 16  ;;  %v10387_v20 = vshrl.u32 %v19237_v17, 16 }
 0x317   : > { %v7478_v41 = vsel %vm17255_vm7, %v7473_v13, %v7477_v9  ;;  %v7487_v30 = vrot.slane %v7486_v61, 4  ;;  %v7501_v42 = vrot.slane %v7499_v37, 5  ;;  %v10376_v45 = vrot.slane %v10374_v36, 4  ;;  %v19271_v61 = vld [vmem:[#allocation3 + $0x78] sm:$0xf] }
 0x318   : > { %v13826_v12 = vcombine.low %v7468_v29, %v7478_v41  ;;  %v7497_v6 = vrot.slane %v7496_v47, 4  ;;  %v10379_v22 = vrot.slane %v10377_v28, 5  ;;  %v10385_v8 = vrot.slane %v10383_v58, 5  ;;  %v19274_v28 = vld [vmem:[#allocation3 + $0x74] sm:$0x1] }
 0x319   : > { %v7492_v5 = vsel %vm17255_vm7, %v7487_v30, %v7491_v21  ;;  %15563 = vmatpush3.bf16.msra.mxu0 %v16837_v54  ;;  %v10389_v48 = vrot.slane %v10387_v20, 4  ;;  %v10393_v59 = vshll.u32 %v19245_v60, 16  ;;  %v7504_v24 = vshrl.u32 %v19243_v3, 16  ;;  %v16843_v20 = vld [vmem:[#allocation6 + $0x38] sm:$0xff]  }
 0x31a   : > { %15547 = vmatmul.mubr.bf16.gmra.mrb[24].mxu0 %v13826_v12  ;;  %v7502_v16 = vsel %vm17255_vm7, %v7497_v6, %v7501_v42  ;;  %15564 = vmatprep.subr.bf16.mxu0 %v16839_v49  ;;  %v10380_v56 = vor.u32 %v10379_v22, %v10376_v45  ;;  %v7507_v35 = vshll.u32 %v19243_v3, 16  ;;  %v7513_v62 = vshll.u32 %v19252_v18, 16  ;;  %v19281_v45 = vld [vmem:[#allocation3 + $0x7c] sm:$0xf] }
 0x31b   : > { %v13827_v9 = vcombine.low %v7492_v5, %v7502_v16  ;;  %v10390_v54 = vor.u32 %v10389_v48, %v10385_v8  ;;  %v7506_v51 = vrot.slane %v7504_v24, 4  ;;  %v7517_v2 = vshrl.u32 %v19252_v18, 16 }
 0x31c   : > { %v10381_v31 = vrot.slane %v10380_v56, 4  ;;  %v7509_v7 = vrot.slane %v7507_v35, 5  ;;  %v7515_v10 = vrot.slane %v7513_v62, 5  ;;  %v10395_v21 = vrot.slane %v10393_v59, 5  ;;  %v19288_v62 = vld [vmem:[#allocation3 + $0x80] sm:$0x1] }
 0x31d   : > { %15550 = vmatprep.mubr.bf16.mxu0 %v13827_v9  ;;  %15565 = vmatpush3.bf16.msra.mxu0 %v16839_v49  ;;  %v10391_v29 = vrot.slane %v10390_v54, 4  ;;  %v10398_v0 = vshrl.u32 %v19262_v53, 16  ;;  %v10401_v13 = vshll.u32 %v19262_v53, 16  ;;  %v7519_v36 = vrot.slane %v7517_v2, 4 }
 0x31e   : > { %v7510_v37 = vor.u32 %v7509_v7, %v7506_v51  ;;  %v7523_v47 = vshll.u32 %v19264_v32, 16  ;;  %15566 = vmatprep.subr.bf16.mxu0 %v16841_v44  ;;  %v10407_v58 = vshll.u32 %v19266_v57, 16  ;;  %v10386_v49 = vsel %vm17255_vm7, %v10381_v31, %v10385_v8  ;;  %v19286_v8 = vld [vmem:[#allocation6 + $0x80] sm:$0xff]  }
 0x31f   : > { %v10396_v41 = vsel %vm17255_vm7, %v10391_v29, %v10395_v21  ;;  %v10400_v30 = vrot.slane %v10398_v0, 4  ;;  %v10403_v42 = vrot.slane %v10401_v13, 5  ;;  %v7520_v22 = vor.u32 %v7519_v36, %v7515_v10  ;;  %v19297_v13 = vld [vmem:[#allocation3 + $0x84] sm:$0xf] }
 0x320   : > { %v14007_v12 = vcombine.low %v10386_v49, %v10396_v41  ;;  %v7511_v6 = vrot.slane %v7510_v37, 4  ;;  %v10409_v5 = vrot.slane %v10407_v58, 5  ;;  %v10411_v59 = vshrl.u32 %v19266_v57, 16  ;;  %v19300_v49 = vld [vmem:[#allocation3 + $0x88] sm:$0xf] }
 0x321   : > { %v10404_v48 = vor.u32 %v10403_v42, %v10400_v30  ;;  %v10417_v24 = vshll.u32 %v19274_v28, 16  ;;  %15567 = vmatpush3.bf16.msra.mxu0 %v16841_v44  ;;  %v10422_v16 = vshrl.u32 %v19271_v61, 16  ;;  %v7521_v56 = vrot.slane %v7520_v22, 4  ;;  %v17036_v42 = vld [vmem:[#allocation3] sm:$0xf] }
 0x322   : > { %15826 = vmatprep.mubr.bf16.mxu1 %v14007_v12  ;;  %v7525_v35 = vrot.slane %v7523_v47, 5  ;;  %v10425_v9 = vshll.u32 %v19271_v61, 16  ;;  %v10431_v54 = vshll.u32 %v19281_v45, 16  ;;  %15568 = vmatprep.subr.bf16.mxu0 %v16843_v20  ;;  %v7516_v51 = vsel %vm17255_vm7, %v7511_v6, %v7515_v10  ;;  %v19304_v12 = vld [vmem:[#allocation3 + $0x4] sm:$0xf] }
 0x323   : > { %v10405_v31 = vrot.slane %v10404_v48, 4  ;;  %v10413_v7 = vrot.slane %v10411_v59, 4  ;;  %v10424_v44 = vrot.slane %v10422_v16, 4  ;;  %v10435_v0 = vshrl.u32 %v19281_v45, 16 }
 0x324   : > { %v7526_v2 = vsel %vm17255_vm7, %v7521_v56, %v7525_v35  ;;  %v10427_v29 = vrot.slane %v10425_v9, 5  ;;  %v10433_v21 = vrot.slane %v10431_v54, 5  ;;  %v10419_v47 = vrot.slane %v10417_v24, 5  ;;  %v19316_v9 = vld [vmem:[#allocation3 + $0x90] sm:$0xf] }
 0x325   : > { %v13828_v37 = vcombine.low %v7516_v51, %v7526_v2  ;;  %v10414_v36 = vor.u32 %v10413_v7, %v10409_v5  ;;  %v10441_v58 = vshll.u32 %v19288_v62, 16  ;;  %15569 = vmatpush3.bf16.msra.mxu0 %v16843_v20  ;;  %v10410_v10 = vsel %vm17255_vm7, %v10405_v31, %v10409_v5  ;;  %v19310_v20 = vld [vmem:[#allocation3 + $0x8c] sm:$0x1]  ;;  %v19320_v7 = vld [vmem:[#allocation3 + $0x94] sm:$0xf] }
 0x326   : > { %v10428_v41 = vor.u32 %v10427_v29, %v10424_v44  ;;  %v10437_v30 = vrot.slane %v10435_v0, 4  ;;  %v13837_v6 = vcombine.low %v17036_v42, %v19304_v12  ;;  %15586 = vmatprep.subr.bf16.mxu0 %v19286_v8  ;;  %v13838_v48 = vcombine.low %v19127_v50, %v19137_v46  ;;  %v16844_v29 = vld [vmem:[#allocation6 + $0x8] sm:$0xff]  }
 0x327   : > { %15551 = vmatmul.mubr.bf16.gmra.mrb[28].mxu0 %v13828_v37  ;;  %v10415_v22 = vrot.slane %v10414_v36, 4  ;;  %v10446_v59 = vshrl.u32 %v19297_v13, 16  ;;  %v10449_v5 = vshll.u32 %v19297_v13, 16  ;;  %v10455_v56 = vshll.u32 %v19300_v49, 16 }
 0x328   : > { %v10429_v24 = vrot.slane %v10428_v41, 4  ;;  %v10438_v16 = vor.u32 %v10437_v30, %v10433_v21  ;;  %15570 = vmatprep.mubr.bf16.mxu0 %v13837_v6  ;;  %v10459_v35 = vshrl.u32 %v19300_v49, 16  ;;  %v10443_v51 = vrot.slane %v10441_v58, 5 }
 0x329   : > { %v10420_v54 = vsel %vm17255_vm7, %v10415_v22, %v10419_v47  ;;  %v10448_v50 = vrot.slane %v10446_v59, 4  ;;  %v10451_v31 = vrot.slane %v10449_v5, 5  ;;  %v10457_v0 = vrot.slane %v10455_v56, 5  ;;  %v19327_v47 = vld [vmem:[#allocation3 + $0x98] sm:$0x1]  ;;  %v16850_v56 = vld [vmem:[#allocation6 + $0x88] sm:$0xff]  }
 0x32a   : > { %v14008_v44 = vcombine.low %v10410_v10, %v10420_v54  ;;  %v10439_v2 = vrot.slane %v10438_v16, 4  ;;  %v10465_v37 = vshll.u32 %v19310_v20, 16  ;;  %v10434_v36 = vsel %vm17255_vm7, %v10429_v24, %v10433_v21  ;;  %20885 = vst [vmem:[#allocation24_spill] sm:$0xff] %v19327_v47  ;;  %v17038_v5 = vld [vmem:[#allocation6] sm:$0xff]   ;;  %v16848_v16 = vld [vmem:[#allocation6 + $0x10] sm:$0xff]  }
 0x32b   : > { %v10452_v41 = vor.u32 %v10451_v31, %v10448_v50  ;;  %v10461_v30 = vrot.slane %v10459_v35, 4  ;;  %v13839_v42 = vcombine.low %v19145_v23, %v19160_v25  ;;  %v10470_v10 = vshrl.u32 %v19316_v9, 16  ;;  %v19335_v35 = vld [vmem:[#allocation3 + $0x9c] sm:$0xf] }
 0x32c   : > { %15827 = vmatmul.mubr.bf16.vlgmr.msra.gmra.mrb[16].mxu1 %v14008_v44  ;;  %v10444_v58 = vsel %vm17255_vm7, %v10439_v2, %v10443_v51  ;;  %v10473_v6 = vshll.u32 %v19316_v9, 16  ;;  %v10479_v22 = vshll.u32 %v19320_v7, 16  ;;  %v10483_v23 = vshrl.u32 %v19320_v7, 16  ;;  %20886 = vst [vmem:[#allocation25_spill] sm:$0xff] %v19335_v35  ;;  %v19338_v44 = vld [vmem:[#allocation3 + $0xa0] sm:$0xf] }
 0x32d   : > { %v14009_v59 = vcombine.low %v10434_v36, %v10444_v58  ;;  %15843 = vmatpush3.bf16.msra.mxu1 %v17038_v5  ;;  %v10453_v21 = vrot.slane %v10452_v41, 4  ;;  %v10462_v24 = vor.u32 %v10461_v30, %v10457_v0  ;;  %v10472_v54 = vrot.slane %v10470_v10, 4  ;;  %v19343_v10 = vld [vmem:[#allocation3 + $0xa4] sm:$0x1] }
 0x32e   : > { %15844 = vmatprep.subr.bf16.mxu1 %v16844_v29  ;;  %v10475_v51 = vrot.slane %v10473_v6, 5  ;;  %v10481_v50 = vrot.slane %v10479_v22, 5  ;;  %v10489_v31 = vshll.u32 %v19327_v47, 16  ;;  %v10467_v41 = vrot.slane %v10465_v37, 5  ;;  %20887 = vst [vmem:[#allocation19_spill] sm:$0xff] %v19343_v10 }
 0x32f   : > { %15830 = vmatprep.mubr.bf16.mxu1 %v14009_v59  ;;  %15571 = vmatmul.mubr.bf16.vlgmr.msra.gmra.mrb[16].mxu0 %v13838_v48  ;;  %v10458_v2 = vsel %vm17255_vm7, %v10453_v21, %v10457_v0  ;;  %v10463_v36 = vrot.slane %v10462_v24, 4  ;;  %v10485_v30 = vrot.slane %v10483_v23, 4  ;;  %v10494_v6 = vshrl.u32 %v19335_v35, 16  ;;  %v16853_v0 = vld [vmem:[#allocation6 + $0x90] sm:$0xff]   ;;  %v16851_v23 = vld [vmem:[#allocation6 + $0x18] sm:$0xff]  }
 0x330   : > { %15574 = vmatprep.mubr.bf16.mxu0 %v13839_v42  ;;  %15587 = vmatpush3.bf16.msra.mxu0 %v19286_v8  ;;  %v10476_v58 = vor.u32 %v10475_v51, %v10472_v54  ;;  %v10491_v5 = vrot.slane %v10489_v31, 5  ;;  %v10497_v22 = vshll.u32 %v19335_v35, 16  ;;  %v10503_v37 = vshll.u32 %v19338_v44, 16  ;;  %v19351_v8 = vld [vmem:[#allocation3 + $0xa8] sm:$0xf] }
 0x331   : > { %15845 = vmatpush3.bf16.msra.mxu1 %v16844_v29  ;;  %v10468_v48 = vsel %vm17255_vm7, %v10463_v36, %v10467_v41  ;;  %v10486_v59 = vor.u32 %v10485_v30, %v10481_v50  ;;  %15588 = vmatprep.subr.bf16.mxu0 %v16850_v56  ;;  %v10507_v42 = vshrl.u32 %v19338_v44, 16  ;;  %20888 = vst [vmem:[#allocation17_spill] sm:$0xff] %v19351_v8  ;;  %v10496_v54 = vrot.slane %v10494_v6, 4  ;;  %v19353_v31 = vld [vmem:[#allocation3 + $0xac] sm:$0xf] }
 0x332   : > { %v14010_v21 = vcombine.low %v10458_v2, %v10468_v48  ;;  %15846 = vmatprep.subr.bf16.mxu1 %v16848_v16  ;;  %v10477_v24 = vrot.slane %v10476_v58, 4  ;;  %v10499_v51 = vrot.slane %v10497_v22, 5  ;;  %20889 = vst [vmem:[#allocation21_spill] sm:$0xff] %v19353_v31  ;;  %v10505_v35 = vrot.slane %v10503_v37, 5  ;;  %v19356_v30 = vld [vmem:[#allocation3 + $0xb0] sm:$0x1] }
 0x333   : > { %v10487_v29 = vrot.slane %v10486_v59, 4  ;;  %v10509_v36 = vrot.slane %v10507_v42, 4  ;;  %v10513_v41 = vshll.u32 %v19343_v10, 16  ;;  %20890 = vst [vmem:[#allocation23_spill] sm:$0xff] %v19356_v30  ;;  %v13840_v2 = vcombine.low %v19169_v14, %v19172_v15  ;;  %v19363_v22 = vld [vmem:[#allocation3 + $0xb4] sm:$0xf] }
 0x334   : > { %15831 = vmatmul.mubr.bf16.gmra.mrb[20].mxu1 %v14010_v21  ;;  %v10482_v47 = vsel %vm17255_vm7, %v10477_v24, %v10481_v50  ;;  %15589 = vmatpush3.bf16.msra.mxu0 %v16850_v56  ;;  %v10500_v58 = vor.u32 %v10499_v51, %v10496_v54  ;;  %v10518_v6 = vshrl.u32 %v19351_v8, 16  ;;  %v16854_v37 = vld [vmem:[#allocation6 + $0x20] sm:$0xff]   ;;  %v13841_v42 = vcombine.low %v19187_v55, %v19189_v63  ;;  %v16856_v54 = vld [vmem:[#allocation6 + $0x98] sm:$0xff]  }
 0x335   : > { %v10492_v48 = vsel %vm17255_vm7, %v10487_v29, %v10491_v5  ;;  %15847 = vmatpush3.bf16.msra.mxu1 %v16848_v16  ;;  %15590 = vmatprep.subr.bf16.mxu0 %v16853_v0  ;;  %v10510_v59 = vor.u32 %v10509_v36, %v10505_v35  ;;  %v10521_v56 = vshll.u32 %v19351_v8, 16  ;;  %v10527_v24 = vshll.u32 %v19353_v31, 16  ;;  %v19372_v29 = vld [vmem:[#allocation3 + $0xb8] sm:$0xf] }
 0x336   : > { %v14011_v50 = vcombine.low %v10482_v47, %v10492_v48  ;;  %15848 = vmatprep.subr.bf16.mxu1 %v16851_v23  ;;  %v10501_v14 = vrot.slane %v10500_v58, 4  ;;  %v10520_v21 = vrot.slane %v10518_v6, 4  ;;  %v10515_v10 = vrot.slane %v10513_v41, 5  ;;  %v19375_v47 = vld [vmem:[#allocation3 + $0xbc] sm:$0x1] }
 0x337   : > { %15575 = vmatmul.mubr.bf16.gmra.mrb[20].mxu0 %v13840_v2  ;;  %v10511_v51 = vrot.slane %v10510_v59, 4  ;;  %v10523_v5 = vrot.slane %v10521_v56, 5  ;;  %v10531_v16 = vshrl.u32 %v19353_v31, 16  ;;  %v10529_v55 = vrot.slane %v10527_v24, 5  ;;  %v16857_v59 = vld [vmem:[#allocation6 + $0x28] sm:$0xff]  }
 0x338   : > { %15834 = vmatprep.mubr.bf16.mxu1 %v14011_v50  ;;  %15578 = vmatprep.mubr.bf16.mxu0 %v13841_v42  ;;  %v10537_v36 = vshll.u32 %v19356_v30, 16  ;;  %v10542_v58 = vshrl.u32 %v19363_v22, 16  ;;  %v10506_v2 = vsel %vm17255_vm7, %v10501_v14, %v10505_v35  ;;  %v7914_v56 = vld [vmem:[#allocation3] sm:$0xe]  ;;  %v16859_v50 = vld [vmem:[#allocation6 + $0xa0] sm:$0xff]   ;;  %v10545_v30 = vshll.u32 %v19363_v22, 16 }
 0x339   : > { %15849 = vmatpush3.bf16.msra.mxu1 %v16851_v23  ;;  %v10516_v41 = vsel %vm17255_vm7, %v10511_v51, %v10515_v10  ;;  %15591 = vmatpush3.bf16.msra.mxu0 %v16853_v0  ;;  %v10524_v6 = vor.u32 %v10523_v5, %v10520_v21  ;;  %v10533_v48 = vrot.slane %v10531_v16, 4  ;;  %v10551_v23 = vshll.u32 %v19372_v29, 16 }
 0x33a   : > { %v14012_v42 = vcombine.low %v10506_v2, %v10516_v41  ;;  %15850 = vmatprep.subr.bf16.mxu1 %v16854_v37  ;;  %15592 = vmatprep.subr.bf16.mxu0 %v16856_v54  ;;  %v10544_v24 = vrot.slane %v10542_v58, 4  ;;  %v10555_v35 = vshrl.u32 %v19372_v29, 16  ;;  %v10561_v10 = vshll.u32 %v19375_v47, 16  ;;  %v16860_v2 = vld [vmem:[#allocation6 + $0x30] sm:$0xff]  }
 0x33b   : > { %v10525_v8 = vrot.slane %v10524_v6, 4  ;;  %v10534_v31 = vor.u32 %v10533_v48, %v10529_v55  ;;  %v10547_v0 = vrot.slane %v10545_v30, 5  ;;  %v10553_v14 = vrot.slane %v10551_v23, 5 }
 0x33c   : > { %15835 = vmatmul.mubr.bf16.gmra.mrb[24].mxu1 %v14012_v42  ;;  %v10539_v51 = vrot.slane %v10537_v36, 5  ;;  %v13842_v5 = vcombine.low %v19199_v38, %v19206_v19  ;;  %v10557_v16 = vrot.slane %v10555_v35, 4  ;;  %v13843_v41 = vcombine.low %v19212_v43, %v19222_v1 }
 0x33d   : > { %v10535_v21 = vrot.slane %v10534_v31, 4  ;;  %15851 = vmatpush3.bf16.msra.mxu1 %v16854_v37  ;;  %15593 = vmatpush3.bf16.msra.mxu0 %v16856_v54  ;;  %v10548_v58 = vor.u32 %v10547_v0, %v10544_v24  ;;  %v13853_v6 = vrot.slane %v7914_v56, 9  ;;  %v10530_v30 = vsel %vm17255_vm7, %v10525_v8, %v10529_v55  ;;  %v16863_v54 = vld [vmem:[#allocation6 + $0xa8] sm:$0xff]   ;;  %v17039_v24 = vld [vmem:[#allocation3 + $0x8] sm:$0x1] }
 0x33e   : > { %15852 = vmatprep.subr.bf16.mxu1 %v16857_v59  ;;  %15594 = vmatprep.subr.bf16.mxu0 %v16859_v50  ;;  %v10558_v37 = vor.u32 %v10557_v16, %v10553_v14  ;;  %v7940_v38 = vrot.slane %v19304_v12, 5  ;;  %v10563_v42 = vrot.slane %v10561_v10, 5  ;;  %v7943_v23 = vrot.slane %v17039_v24, 5  ;;  %v16864_v10 = vld [vmem:[#allocation6 + $0x38] sm:$0xff]   ;;  %v7915_v0 = vld [vmem:[#allocation3 + $0xc] sm:$0xe] }
 0x33f   : > { %v10540_v31 = vsel %vm17255_vm7, %v10535_v21, %v10539_v51  ;;  %15579 = vmatmul.mubr.bf16.gmra.mrb[24].mxu0 %v13842_v5  ;;  %v10549_v48 = vrot.slane %v10548_v58, 4  ;;  %v7947_v56 = vrot.slane %v19137_v46, 5  ;;  %v14023_v12 = vcombine.low %v19233_v34, %v19237_v17  ;;  %v16866_v16 = vld [vmem:[#allocation6 + $0xb0] sm:$0xff]   ;;  %v7919_v24 = vld [vmem:[#allocation3 + $0x3c] sm:$0xe] }
 0x340   : > { %v14013_v36 = vcombine.low %v10530_v30, %v10540_v31  ;;  %15582 = vmatprep.mubr.bf16.mxu0 %v13843_v41  ;;  %v10559_v43 = vrot.slane %v10558_v37, 4  ;;  %v7941_v8 = vsel %vm17724_vm13, %v13853_v6, %v7940_v38  ;;  %v7942_v55 = vrot.slane %v7940_v38, 4  ;;  %v7917_v41 = vld [vmem:[#allocation3 + $0x24] sm:$0xe]  ;;  %v19412_v6 = vld [vmem:[#allocation6 + $0x80] sm:$0xff]  }
 0x341   : > { %15853 = vmatpush3.bf16.msra.mxu1 %v16857_v59  ;;  %15595 = vmatpush3.bf16.msra.mxu0 %v16859_v50  ;;  %v10554_v35 = vsel %vm17255_vm7, %v10549_v48, %v10553_v14  ;;  %v13844_v59 = vcombine.low %v19243_v3, %v19252_v18  ;;  %v7916_v50 = vld [vmem:[#allocation3 + $0x18] sm:$0xe]  ;;  %v7949_v51 = vrot.slane %v7947_v56, 4  ;;  %v7950_v14 = vrot.slane %v19147_v26, 5  ;;  %v7918_v38 = vld [vmem:[#allocation3 + $0x30] sm:$0xe] }
 0x342   : > { %15838 = vmatprep.mubr.bf16.mxu1 %v14013_v36  ;;  %15854 = vmatprep.subr.bf16.mxu1 %v16860_v2  ;;  %v10564_v21 = vsel %vm17255_vm7, %v10559_v43, %v10563_v42  ;;  %v7944_v46 = vsel %vm17724_vm13, %v7942_v55, %v7943_v23  ;;  %v14024_v34 = vcombine.low %v19262_v53, %v19266_v57  ;;  %v7954_v3 = vrot.slane %v19160_v25, 5  ;;  %v16870_v53 = vld [vmem:[#allocation6 + $0xb8] sm:$0xff]  }
 0x343   : > { %15596 = vmatprep.subr.bf16.mxu0 %v16863_v54  ;;  %v14014_v5 = vcombine.low %v10554_v35, %v10564_v21  ;;  %v13861_v58 = vcombine.low %v7941_v8, %v7944_v46  ;;  %v14025_v30 = vcombine.low %v19271_v61, %v19281_v45  ;;  %v13854_v31 = vrot.slane %v7915_v0, 9  ;;  %v16871_v21 = vld [vmem:[#allocation6 + $0x88] sm:$0xff]  }
 0x344   : > { %v19418_v26 = vsel %vm17724_vm13, %v7949_v51, %v7950_v14  ;;  %v7961_v37 = vrot.slane %v19172_v15, 5  ;;  %v14026_v25 = vcombine.low %v19297_v13, %v19300_v49  ;;  %v7957_v36 = vrot.slane %v19163_v33, 5 }
 0x345   : > { %15855 = vmatpush3.bf16.msra.mxu1 %v16860_v2  ;;  %15597 = vmatpush3.bf16.msra.mxu0 %v16863_v54  ;;  %v13855_v2 = vrot.slane %v7916_v50, 9  ;;  %v7956_v54 = vrot.slane %v7954_v3, 4  ;;  %v7948_v61 = vsel %vm17724_vm13, %v13854_v31, %v7947_v56  ;;  %v13856_v48 = vrot.slane %v7917_v41, 9  ;;  %v7921_v41 = vld [vmem:[#allocation3 + $0x54] sm:$0xe] }
 0x346   : > { %15839 = vmatmul.mubr.bf16.gmra.mrb[28].mxu1 %v14014_v5  ;;  %15856 = vmatprep.subr.bf16.mxu1 %v16864_v10  ;;  %v7963_v42 = vrot.slane %v7961_v37, 4  ;;  %v7964_v15 = vrot.slane %v19182_v27, 5  ;;  %v13862_v23 = vcombine.low %v7948_v61, %v19418_v26  ;;  %v7968_v8 = vrot.slane %v19189_v63, 5  ;;  %v10951_v5 = vld [vmem:[#allocation3 + $0x60] sm:$0xe] }
 0x347   : > { %15858 = vmatprep.mubr.bf16.mxu1 %v14023_v12  ;;  %15583 = vmatmul.mubr.bf16.gmra.mrb[28].mxu0 %v13844_v59  ;;  %v7955_v43 = vsel %vm17724_vm13, %v13855_v2, %v7954_v3  ;;  %v7958_v33 = vsel %vm17724_vm13, %v7956_v54, %v7957_v36  ;;  %v19435_v55 = vsel %vm17724_vm13, %v13856_v48, %v7961_v37  ;;  %v13857_v56 = vrot.slane %v7918_v38, 9  ;;  %v7920_v12 = vld [vmem:[#allocation3 + $0x48] sm:$0xe]  ;;  %v16872_v59 = vld [vmem:[#allocation6 + $0xc0] sm:$0xff]   ;;  %v16876_v38 = vld [vmem:[#allocation6 + $0xc8] sm:$0xff]  }
 0x348   : > { %15598 = vmatprep.subr.bf16.mxu0 %v16866_v16  ;;  %15602 = vmatprep.mubr.bf16.mxu0 %v13861_v58  ;;  %v19439_v27 = vsel %vm17724_vm13, %v7963_v42, %v7964_v15  ;;  %v7975_v35 = vrot.slane %v19206_v19, 5  ;;  %v7971_v0 = vrot.slane %v19193_v39, 5  ;;  %v13858_v50 = vrot.slane %v7919_v24, 9  ;;  %v10952_v36 = vld [vmem:[#allocation3 + $0x6c] sm:$0xe] }
 0x349   : > { %15857 = vmatpush3.bf16.msra.mxu1 %v16864_v10  ;;  %15599 = vmatpush3.bf16.msra.mxu0 %v16866_v16  ;;  %v13864_v63 = vcombine.low %v19435_v55, %v19439_v27  ;;  %v7970_v10 = vrot.slane %v7968_v8, 4  ;;  %v13863_v46 = vcombine.low %v7955_v43, %v7958_v33  ;;  %v19448_v51 = vsel %vm17724_vm13, %v13857_v56, %v7968_v8  ;;  %v16874_v48 = vld [vmem:[#allocation6 + $0x90] sm:$0xff]   ;;  %v10953_v15 = vld [vmem:[#allocation3 + $0x78] sm:$0xe] }
 0x34a   : > { %15874 = vmatprep.subr.bf16.mxu1 %v19412_v6  ;;  %15600 = vmatprep.subr.bf16.mxu0 %v16870_v53  ;;  %v7977_v14 = vrot.slane %v7975_v35, 4  ;;  %v7978_v19 = vrot.slane %v19214_v11, 5  ;;  %v19457_v58 = vsel %vm17724_vm13, %v13858_v50, %v7975_v35  ;;  %v13859_v39 = vrot.slane %v7920_v12, 9  ;;  %v16878_v8 = vld [vmem:[#allocation6 + $0xd0] sm:$0xff]   ;;  %v10954_v35 = vld [vmem:[#allocation3 + $0x84] sm:$0xe] }
 0x34b   : > { %v19453_v16 = vsel %vm17724_vm13, %v7970_v10, %v7971_v0  ;;  %v7982_v3 = vrot.slane %v19222_v1, 5  ;;  %v7985_v26 = vrot.slane %v19227_v40, 5  ;;  %v10977_v37 = vrot.slane %v19237_v17, 5  ;;  %v16877_v12 = vld [vmem:[#allocation6 + $0x98] sm:$0xff]  }
 0x34c   : > { %v13865_v31 = vcombine.low %v19448_v51, %v19453_v16  ;;  %v19464_v11 = vsel %vm17724_vm13, %v7977_v14, %v7978_v19  ;;  %v14039_v54 = vrot.slane %v10951_v5, 9  ;;  %v13860_v17 = vrot.slane %v7921_v41, 9  ;;  %v10955_v50 = vld [vmem:[#allocation3 + $0x90] sm:$0xe]  ;;  %v10958_v51 = vld [vmem:[#allocation3 + $0xb4] sm:$0xe] }
 0x34d   : > { %15601 = vmatpush3.bf16.msra.mxu0 %v16870_v53  ;;  %v13866_v2 = vcombine.low %v19457_v58, %v19464_v11  ;;  %v7984_v1 = vrot.slane %v7982_v3, 4  ;;  %v10980_v53 = vrot.slane %v19245_v60, 5  ;;  %v19474_v61 = vsel %vm17724_vm13, %v13859_v39, %v7982_v3  ;;  %v16882_v3 = vld [vmem:[#allocation6 + $0xd8] sm:$0xff]  }
 0x34e   : > { %15859 = vmatmul.mubr.bf16.vlgmr.msra.gmra.mrb[16].mxu1 %v14024_v34  ;;  %15618 = vmatprep.subr.bf16.mxu0 %v16872_v59  ;;  %v10979_v40 = vrot.slane %v10977_v37, 4  ;;  %v7989_v34 = vrot.slane %v19252_v18, 5  ;;  %v19483_v60 = vsel %vm17724_vm13, %v14039_v54, %v10977_v37  ;;  %v14040_v43 = vrot.slane %v10952_v36, 9  ;;  %v20891_v36 = vld [vmem:[#allocation24_spill] sm:$0xff]  ;;  %v16888_v58 = vld [vmem:[#allocation6 + $0xb8] sm:$0xff]  }
 0x34f   : > { %15862 = vmatprep.mubr.bf16.mxu1 %v14025_v30  ;;  %15875 = vmatpush3.bf16.msra.mxu1 %v19412_v6  ;;  %v19479_v42 = vsel %vm17724_vm13, %v7984_v1, %v7985_v26  ;;  %v7992_v6 = vrot.slane %v19264_v32, 5  ;;  %v10984_v30 = vrot.slane %v19266_v57, 5  ;;  %v14027_v33 = vcombine.low %v19316_v9, %v19320_v7  ;;  %v10956_v1 = vld [vmem:[#allocation3 + $0x9c] sm:$0xe] }
 0x350   : > { %15876 = vmatprep.subr.bf16.mxu1 %v16871_v21  ;;  %15603 = vmatmul.mubr.bf16.vlgmr.msra.gmra.mrb[16].mxu0 %v13862_v23  ;;  %v13867_v18 = vcombine.low %v19474_v61, %v19479_v42  ;;  %v19491_v24 = vsel %vm17724_vm13, %v10979_v40, %v10980_v53  ;;  %v7991_v23 = vrot.slane %v7989_v34, 4  ;;  %v10987_v56 = vrot.slane %v19274_v28, 5  ;;  %v16892_v42 = vld [vmem:[#allocation6 + $0xf8] sm:$0xff]  }
 0x351   : > { %15606 = vmatprep.mubr.bf16.mxu0 %v13863_v46  ;;  %15619 = vmatpush3.bf16.msra.mxu0 %v16872_v59  ;;  %v14047_v32 = vcombine.low %v19483_v60, %v19491_v24  ;;  %v10986_v57 = vrot.slane %v10984_v30, 4  ;;  %v19500_v59 = vsel %vm17724_vm13, %v13860_v17, %v7989_v34  ;;  %v19508_v9 = vsel %vm17724_vm13, %v14040_v43, %v10984_v30  ;;  %v20893_v43 = vld [vmem:[#allocation25_spill] sm:$0xff]  ;;  %v16895_v60 = vld [vmem:[#allocation6 + $0x100] sm:$0xff]  }
 0x352   : > { %15620 = vmatprep.subr.bf16.mxu0 %v16876_v38  ;;  %v19504_v10 = vsel %vm17724_vm13, %v7991_v23, %v7992_v6  ;;  %v10991_v0 = vrot.slane %v19281_v45, 5  ;;  %v14041_v46 = vrot.slane %v10953_v15, 9  ;;  %v10998_v14 = vrot.slane %v19300_v49, 5 }
 0x353   : > { %15877 = vmatpush3.bf16.msra.mxu1 %v16871_v21  ;;  %v13868_v28 = vcombine.low %v19500_v59, %v19504_v10  ;;  %v19515_v21 = vsel %vm17724_vm13, %v10986_v57, %v10987_v56  ;;  %v10994_v39 = vrot.slane %v19288_v62, 5  ;;  %v14042_v45 = vrot.slane %v10954_v35, 9  ;;  %v16880_v62 = vld [vmem:[#allocation6 + $0xa0] sm:$0xff]   ;;  %v20894_v56 = vld [vmem:[#allocation21_spill] sm:$0xff]  ;;  %v16893_v59 = vld [vmem:[#allocation6 + $0xc8] sm:$0xff]  }
 0x354   : > { %15878 = vmatprep.subr.bf16.mxu1 %v16874_v48  ;;  %v14048_v19 = vcombine.low %v19508_v9, %v19515_v21  ;;  %v10993_v5 = vrot.slane %v10991_v0, 4  ;;  %v19526_v41 = vsel %vm17724_vm13, %v14041_v46, %v10991_v0  ;;  %v11000_v26 = vrot.slane %v10998_v14, 4  ;;  %v20895_v35 = vld [vmem:[#allocation17_spill] sm:$0xff]  ;;  %v16896_v21 = vld [vmem:[#allocation6 + $0xd0] sm:$0xff]  }
 0x355   : > { %15621 = vmatpush3.bf16.msra.mxu0 %v16876_v38  ;;  %v11001_v37 = vrot.slane %v19310_v20, 5  ;;  %v11005_v38 = vrot.slane %v19320_v7, 5  ;;  %v19536_v13 = vsel %vm17724_vm13, %v14042_v45, %v10998_v14  ;;  %v14043_v49 = vrot.slane %v10955_v50, 9  ;;  %v16887_v14 = vld [vmem:[#allocation6 + $0xe8] sm:$0xff]   ;;  %v8446_v45 = vld [vmem:[#allocation3 + $0xc] sm:$0xf] }
 0x356   : > { %15863 = vmatmul.mubr.bf16.gmra.mrb[20].mxu1 %v14026_v25  ;;  %15622 = vmatprep.subr.bf16.mxu0 %v16878_v8  ;;  %v19532_v54 = vsel %vm17724_vm13, %v10993_v5, %v10994_v39  ;;  %v11012_v25 = vrot.slane %v19338_v44, 5  ;;  %v11008_v40 = vrot.slane %v20891_v36, 5  ;;  %v14044_v55 = vrot.slane %v10956_v1, 9  ;;  %v16886_v39 = vld [vmem:[#allocation6 + $0xb0] sm:$0xff]   ;;  %v19630_v9 = vld [vmem:[#allocation3 + $0x34] sm:$0xf] }
 0x357   : > { %15866 = vmatprep.mubr.bf16.mxu1 %v14027_v33  ;;  %15879 = vmatpush3.bf16.msra.mxu1 %v16874_v48  ;;  %v14049_v20 = vcombine.low %v19526_v41, %v19532_v54  ;;  %v19546_v7 = vsel %vm17724_vm13, %v11000_v26, %v11001_v37  ;;  %v11007_v53 = vrot.slane %v11005_v38, 4  ;;  %v16884_v48 = vld [vmem:[#allocation6 + $0xe0] sm:$0xff]   ;;  %v19557_v6 = vsel %vm17724_vm13, %v14043_v49, %v11005_v38  ;;  %v19597_v26 = vld [vmem:[#allocation3 + $0x10] sm:$0xf] }
 0x358   : > { %15880 = vmatprep.subr.bf16.mxu1 %v16877_v12  ;;  %15607 = vmatmul.mubr.bf16.gmra.mrb[20].mxu0 %v13864_v63  ;;  %v14050_v17 = vcombine.low %v19536_v13, %v19546_v7  ;;  %v11014_v27 = vrot.slane %v11012_v25, 4  ;;  %v20892_v63 = vld [vmem:[#allocation19_spill] sm:$0xff]  ;;  %v11026_v23 = vrot.slane %v19372_v29, 5  ;;  %v14028_v33 = vcombine.low %v20893_v43, %v19338_v44  ;;  %v16891_v1 = vld [vmem:[#allocation3 + $0xc] sm:$0xff]   ;;  %v16894_v43 = vld [vmem:[#allocation3 + $0x18] sm:$0xff]  }
 0x359   : > { %15610 = vmatprep.mubr.bf16.mxu0 %v13865_v31  ;;  %15623 = vmatpush3.bf16.msra.mxu0 %v16878_v8  ;;  %v11015_v34 = vrot.slane %v20892_v63, 5  ;;  %v19561_v30 = vsel %vm17724_vm13, %v11007_v53, %v11008_v40  ;;  %v19567_v31 = vsel %vm17724_vm13, %v14044_v55, %v11012_v25  ;;  %v16883_v8 = vld [vmem:[#allocation6 + $0xa8] sm:$0xff]   ;;  %v14046_v0 = vrot.slane %v10958_v51, 9  ;;  %v19611_v53 = vld [vmem:[#allocation3 + $0x1c] sm:$0xf] }
 0x35a   : > { %15624 = vmatprep.subr.bf16.mxu0 %v16882_v3  ;;  %v14051_v16 = vcombine.low %v19557_v6, %v19561_v30  ;;  %v11028_v50 = vrot.slane %v11026_v23, 4  ;;  %v11029_v46 = vrot.slane %v19375_v47, 5  ;;  %v14030_v37 = vcombine.low %v19363_v22, %v19372_v29  ;;  %v16890_v22 = vld [vmem:[#allocation6 + $0xc0] sm:$0xff]   ;;  %v19613_v40 = vld [vmem:[#allocation3 + $0x28] sm:$0xf] }
 0x35b   : > { %15881 = vmatpush3.bf16.msra.mxu1 %v16877_v12  ;;  %v19571_v15 = vsel %vm17724_vm13, %v11014_v27, %v11015_v34  ;;  %v14029_v12 = vcombine.low %v20895_v35, %v20894_v56  ;;  %v19583_v44 = vsel %vm17724_vm13, %v14046_v0, %v11026_v23  ;;  %v8471_v11 = vshrl.u32 %v8446_v45, 16  ;;  %v10957_v63 = vld [vmem:[#allocation3 + $0xa8] sm:$0xe] }
 0x35c   : > { %15882 = vmatprep.subr.bf16.mxu1 %v16880_v62  ;;  %v14052_v57 = vcombine.low %v19567_v31, %v19571_v15  ;;  %v19587_v5 = vsel %vm17724_vm13, %v11028_v50, %v11029_v46  ;;  %v8480_v38 = vshll.u32 %v19597_v26, 16  ;;  %v8484_v61 = vshrl.u32 %v19597_v26, 16  ;;  %v16897_v0 = vld [vmem:[#allocation3 + $0x24] sm:$0xff]   ;;  %v8455_v46 = vld [vmem:[#allocation3 + $0x30] sm:$0xf] }
 0x35d   : > { %15625 = vmatpush3.bf16.msra.mxu0 %v16882_v3  ;;  %v14054_v47 = vcombine.low %v19583_v44, %v19587_v5  ;;  %v16889_v3 = vld [vmem:[#allocation6 + $0xf0] sm:$0xff]   ;;  %v8473_v29 = vrot.slane %v8471_v11, 4  ;;  %v11019_v10 = vrot.slane %v20894_v56, 5  ;;  %v8504_v27 = vshll.u32 %v19611_v53, 16  ;;  %v19635_v11 = vld [vmem:[#allocation3 + $0x20] sm:$0x1] }
 0x35e   : > { %15867 = vmatmul.mubr.bf16.gmra.mrb[24].mxu1 %v14028_v33  ;;  %15626 = vmatprep.subr.bf16.mxu0 %v16884_v48  ;;  %v19609_v49 = vrot.slane %v8480_v38, 5  ;;  %v8486_v25 = vrot.slane %v8484_v61, 4  ;;  %v8508_v51 = vshrl.u32 %v19611_v53, 16  ;;  %v16898_v33 = vld [vmem:[#allocation6 + $0x108] sm:$0xff]   ;;  %v8528_v35 = vshll.u32 %v19613_v40, 16 }
 0x35f   : > { %15870 = vmatprep.mubr.bf16.mxu1 %v14029_v12  ;;  %15883 = vmatpush3.bf16.msra.mxu1 %v16880_v62  ;;  %v8532_v12 = vshrl.u32 %v19613_v40, 16  ;;  %v19633_v41 = vrot.slane %v8504_v27, 5 }
 0x360   : > { %15884 = vmatprep.subr.bf16.mxu1 %v16883_v8  ;;  %15611 = vmatmul.mubr.bf16.gmra.mrb[24].mxu0 %v13866_v2  ;;  %v8474_v2 = vshll.u32 %v8446_v45, 16  ;;  %v8487_v34 = vor.u32 %v8486_v25, %v19609_v49  ;;  %v8510_v54 = vrot.slane %v8508_v51, 4  ;;  %v19637_v61 = vrot.slane %v8528_v35, 5  ;;  %v16899_v25 = vld [vmem:[#allocation6 + $0xd8] sm:$0xff]   ;;  %v16902_v35 = vld [vmem:[#allocation6 + $0xe0] sm:$0xff]  }
 0x361   : > { %15614 = vmatprep.mubr.bf16.mxu0 %v13867_v18  ;;  %15627 = vmatpush3.bf16.msra.mxu0 %v16884_v48  ;;  %v8449_v18 = vld [vmem:[#allocation3 + $0x18] sm:$0xf] }
 0x362   : > { %15628 = vmatprep.subr.bf16.mxu0 %v16887_v14  ;;  %v8476_v62 = vrot.slane %v8474_v2, 5  ;;  %v8495_v36 = vshrl.u32 %v8449_v18, 16  ;;  %v8498_v24 = vshll.u32 %v8449_v18, 16  ;;  %v8511_v27 = vor.u32 %v8510_v54, %v19633_v41  ;;  %v8464_v54 = vld [vmem:[#allocation3 + $0x54] sm:$0xf] }
 0x363   : > { %15885 = vmatpush3.bf16.msra.mxu1 %v16883_v8 }
 0x364   : > { %15886 = vmatprep.subr.bf16.mxu1 %v16886_v39  ;;  %v8477_v55 = vor.u32 %v8476_v62, %v8473_v29  ;;  %v8497_v48 = vrot.slane %v8495_v36, 4  ;;  %v8500_v8 = vrot.slane %v8498_v24, 5  ;;  %v8546_v29 = vshll.u32 %v8455_v46, 16 }
 0x365   : > { %15629 = vmatpush3.bf16.msra.mxu0 %v16887_v14  ;;  %v11021_v14 = vrot.slane %v11019_v10, 4  ;;  %v8552_v62 = vshll.u32 %v19630_v9, 16  ;;  %v8556_v24 = vshrl.u32 %v19630_v9, 16 }
 0x366   : > { %15871 = vmatmul.mubr.bf16.gmra.mrb[28].mxu1 %v14030_v37  ;;  %15630 = vmatprep.subr.bf16.mxu0 %v16889_v3  ;;  %v8488_v37 = vrot.slane %v8487_v34, 4  ;;  %v8501_v2 = vor.u32 %v8500_v8, %v8497_v48  ;;  %v16900_v34 = vld [vmem:[#allocation3 + $0x30] sm:$0xff]   ;;  %v16903_v8 = vld [vmem:[#allocation3 + $0x3c] sm:$0xff]   ;;  %v8548_v7 = vrot.slane %v8546_v29, 5 }
 0x367   : > { %15887 = vmatpush3.bf16.msra.mxu1 %v16886_v39  ;;  %15890 = vmatprep.mubr.bf16.mxu1 %v14047_v32  ;;  %v8452_v32 = vld [vmem:[#allocation3 + $0x24] sm:$0xf]  ;;  %v16904_v48 = vld [vmem:[#allocation6 + $0x118] sm:$0xff]  }
 0x368   : > { %15888 = vmatprep.subr.bf16.mxu1 %v16888_v58  ;;  %15615 = vmatmul.mubr.bf16.gmra.mrb[28].mxu0 %v13868_v28  ;;  %v19616_v28 = vld [vmem:[#allocation3 + $0x14] sm:$0x1]  ;;  %v8519_v23 = vshrl.u32 %v8452_v32, 16  ;;  %v8522_v56 = vshll.u32 %v8452_v32, 16  ;;  %v20896_v39 = vld [vmem:[#allocation23_spill] sm:$0xff]  ;;  %v19663_v51 = vrot.slane %v8501_v2, 4 }
 0x369   : > { %15631 = vmatpush3.bf16.msra.mxu0 %v16889_v3  ;;  %15634 = vmatprep.mubr.bf16.mxu0 %v16891_v1  ;;  %v8490_v50 = vshll.u32 %v19616_v28, 16  ;;  %v11022_v45 = vrot.slane %v20896_v39, 5  ;;  %v8478_v3 = vrot.slane %v8477_v55, 4  ;;  %v19639_v1 = vld [vmem:[#allocation3 + $0x2c] sm:$0x1] }
 0x36a   : > { %15632 = vmatprep.subr.bf16.mxu0 %v16892_v42  ;;  %v8524_v38 = vrot.slane %v8522_v56, 5  ;;  %v8458_v32 = vld [vmem:[#allocation3 + $0x3c] sm:$0xf]  ;;  %v8507_v39 = vsel %vm17255_vm7, %v19663_v51, %v19633_v41 }
 0x36b   : > { %15889 = vmatpush3.bf16.msra.mxu1 %v16888_v58  ;;  %v16901_v58 = vld [vmem:[#allocation6 + $0x110] sm:$0xff]   ;;  %v8492_v18 = vrot.slane %v8490_v50, 5  ;;  %v8567_v56 = vshrl.u32 %v8458_v32, 16 }
 0x36c   : > { %15906 = vmatprep.subr.bf16.mxu1 %v16890_v22 }
 0x36d   : > { %15633 = vmatpush3.bf16.msra.mxu0 %v16892_v42  ;;  %v8534_v42 = vrot.slane %v8532_v12, 4  ;;  %v8493_v55 = vsel %vm17255_vm7, %v8488_v37, %v8492_v18  ;;  %v8558_v12 = vrot.slane %v8556_v24, 4  ;;  %v16905_v18 = vld [vmem:[#allocation6 + $0xe8] sm:$0xff]  }
 0x36e   : > { %15891 = vmatmul.mubr.bf16.vlgmr.msra.gmra.mrb[16].mxu1 %v14048_v19  ;;  %15650 = vmatprep.subr.bf16.mxu0 %v16895_v60  ;;  %v14045_v19 = vrot.slane %v10957_v63, 9  ;;  %v19658_v63 = vld [vmem:[#allocation3 + $0x40] sm:$0xf] }
 0x36f   : > { %15894 = vmatprep.mubr.bf16.mxu1 %v14049_v20  ;;  %15907 = vmatpush3.bf16.msra.mxu1 %v16890_v22  ;;  %v8521_v20 = vrot.slane %v8519_v23, 4  ;;  %v8543_v22 = vshrl.u32 %v8455_v46, 16  ;;  %v8576_v50 = vshll.u32 %v19658_v63, 16  ;;  %v8580_v46 = vshrl.u32 %v19658_v63, 16 }
 0x370   : > { %15908 = vmatprep.subr.bf16.mxu1 %v16893_v59  ;;  %15635 = vmatmul.mubr.bf16.vlgmr.msra.gmra.mrb[16].mxu0 %v16894_v43  ;;  %v19644_v36 = vsel %vm17724_vm13, %v14045_v19, %v11019_v10  ;;  %v8514_v10 = vshll.u32 %v19635_v11, 16  ;;  %v8538_v43 = vshll.u32 %v19639_v1, 16  ;;  %v19682_v19 = vld [vmem:[#allocation3 + $0x4c] sm:$0xf] }
 0x371   : > { %15638 = vmatprep.mubr.bf16.mxu0 %v16897_v0  ;;  %15651 = vmatpush3.bf16.msra.mxu0 %v16895_v60  ;;  %v19648_v60 = vsel %vm17724_vm13, %v11021_v14, %v11022_v45  ;;  %v8525_v23 = vor.u32 %v8524_v38, %v8521_v20  ;;  %v8545_v13 = vrot.slane %v8543_v22, 4  ;;  %v8570_v0 = vshll.u32 %v8458_v32, 16  ;;  %v16907_v14 = vld [vmem:[#allocation6 + $0x120] sm:$0xff]  }
 0x372   : > { %15652 = vmatprep.subr.bf16.mxu0 %v16898_v33  ;;  %v14053_v6 = vcombine.low %v19644_v36, %v19648_v60  ;;  %v19688_v45 = vrot.slane %v8511_v27, 4  ;;  %v19692_v37 = vrot.slane %v8538_v43, 5  ;;  %v19697_v38 = vrot.slane %v8567_v56, 4 }
 0x373   : > { %15909 = vmatpush3.bf16.msra.mxu1 %v16893_v59  ;;  %v8483_v59 = vsel %vm17255_vm7, %v8478_v3, %v19609_v49  ;;  %v8535_v49 = vor.u32 %v8534_v42, %v19637_v61  ;;  %v19690_v3 = vrot.slane %v8525_v23, 4  ;;  %v19699_v42 = vld [vmem:[#allocation3 + $0x58] sm:$0xf]  ;;  %v8572_v29 = vrot.slane %v8570_v0, 5 }
 0x374   : > { %15910 = vmatprep.subr.bf16.mxu1 %v16896_v21  ;;  %v19678_v30 = vcombine.low %v8483_v59, %v8493_v55  ;;  %v8582_v36 = vrot.slane %v8580_v46, 4  ;;  %v8600_v24 = vshll.u32 %v19682_v19, 16  ;;  %v8604_v32 = vshrl.u32 %v19682_v19, 16  ;;  %v16906_v59 = vld [vmem:[#allocation3 + $0x48] sm:$0xff]   ;;  %v16911_v55 = vld [vmem:[#allocation6 + $0x128] sm:$0xff]  }
 0x375   : > { %15653 = vmatpush3.bf16.msra.mxu0 %v16898_v33  ;;  %v19667_v33 = vld [vmem:[#allocation3 + $0x38] sm:$0x1]  ;;  %v19694_v20 = vrot.slane %v8535_v49, 4  ;;  %v8615_v27 = vshrl.u32 %v8464_v54, 16  ;;  %v8628_v23 = vshrl.u32 %v19699_v42, 16  ;;  %v8531_v31 = vsel %vm17255_vm7, %v19690_v3, %v19637_v61 }
 0x376   : > { %15895 = vmatmul.mubr.bf16.gmra.mrb[20].mxu1 %v14050_v17  ;;  %15654 = vmatprep.subr.bf16.mxu0 %v16901_v58  ;;  %v19672_v17 = vrot.slane %v8552_v62, 5  ;;  %v8562_v2 = vshll.u32 %v19667_v33, 16  ;;  %v19702_v62 = vrot.slane %v8576_v50, 5  ;;  %v16909_v49 = vld [vmem:[#allocation3 + $0x54] sm:$0xff]   ;;  %v19733_v61 = vld [vmem:[#allocation3 + $0x44] sm:$0x1] }
 0x377   : > { %15898 = vmatprep.mubr.bf16.mxu1 %v14051_v16  ;;  %15911 = vmatpush3.bf16.msra.mxu1 %v16896_v21  ;;  %v19680_v16 = vrot.slane %v8514_v10, 5  ;;  %v8461_v21 = vld [vmem:[#allocation3 + $0x48] sm:$0xf]  ;;  %v8618_v10 = vshll.u32 %v8464_v54, 16  ;;  %v8541_v15 = vsel %vm17255_vm7, %v19694_v20, %v19692_v37  ;;  %v19737_v46 = vrot.slane %v8600_v24, 5 }
 0x378   : > { %15912 = vmatprep.subr.bf16.mxu1 %v16899_v25  ;;  %15639 = vmatmul.mubr.bf16.gmra.mrb[20].mxu0 %v16900_v34  ;;  %v8559_v22 = vor.u32 %v8558_v12, %v19672_v17  ;;  %v8591_v60 = vshrl.u32 %v8461_v21, 16  ;;  %v8624_v34 = vshll.u32 %v19699_v42, 16  ;;  %v8583_v56 = vor.u32 %v8582_v36, %v19702_v62  ;;  %v19731_v12 = vld [vmem:[#allocation3 + $0x70] sm:$0xf] }
 0x379   : > { %15642 = vmatprep.mubr.bf16.mxu0 %v16903_v8  ;;  %15655 = vmatpush3.bf16.msra.mxu0 %v16901_v58  ;;  %v8549_v58 = vor.u32 %v8548_v7, %v8545_v13  ;;  %v8517_v43 = vsel %vm17255_vm7, %v19688_v45, %v19680_v16  ;;  %v8573_v7 = vor.u32 %v8572_v29, %v19697_v38  ;;  %v16914_v16 = vld [vmem:[#allocation6 + $0x130] sm:$0xff]   ;;  %v19741_v45 = vrot.slane %v8618_v10, 5  ;;  %v19745_v54 = vld [vmem:[#allocation3 + $0x50] sm:$0x1] }
 0x37a   : > { %15656 = vmatprep.subr.bf16.mxu0 %v16904_v48  ;;  %v19727_v13 = vrot.slane %v8559_v22, 4  ;;  %v19735_v0 = vrot.slane %v8591_v60, 4  ;;  %v19743_v3 = vrot.slane %v8624_v34, 5  ;;  %v8630_v37 = vrot.slane %v8628_v23, 4  ;;  %v16910_v38 = vld [vmem:[#allocation3 + $0x6c] sm:$0xff]  }
 0x37b   : > { %15913 = vmatpush3.bf16.msra.mxu1 %v16899_v25  ;;  %v8594_v25 = vshll.u32 %v8461_v21, 16  ;;  %v19725_v8 = vrot.slane %v8549_v58, 4  ;;  %v19739_v21 = vrot.slane %v8615_v27, 4  ;;  %v11515_v58 = vshll.u32 %v19731_v12, 16  ;;  %v16912_v22 = vld [vmem:[#allocation6 + $0xf8] sm:$0xff]  }
 0x37c   : > { %15914 = vmatprep.subr.bf16.mxu1 %v16902_v35  ;;  %v19754_v29 = vcombine.low %v8507_v39, %v8517_v43  ;;  %v19756_v36 = vcombine.low %v8531_v31, %v8541_v15  ;;  %v8586_v60 = vshll.u32 %v19733_v61, 16  ;;  %v19767_v24 = vrot.slane %v8573_v7, 4  ;;  %v19772_v39 = vld [vmem:[#allocation3 + $0x5c] sm:$0x1]  ;;  %v19782_v23 = vld [vmem:[#allocation3 + $0x64] sm:$0xf] }
 0x37d   : > { %15657 = vmatpush3.bf16.msra.mxu0 %v16904_v48  ;;  %v16908_v48 = vld [vmem:[#allocation6 + $0xf0] sm:$0xff]   ;;  %v8596_v50 = vrot.slane %v8594_v25, 5  ;;  %v19769_v41 = vrot.slane %v8583_v56, 4  ;;  %v8610_v27 = vshll.u32 %v19745_v54, 16  ;;  %v8621_v10 = vor.u32 %v19741_v45, %v19739_v21  ;;  %v19794_v7 = vld [vmem:[#allocation3 + $0x74] sm:$0x1] }
 0x37e   : > { %15899 = vmatmul.mubr.bf16.gmra.mrb[24].mxu1 %v14052_v57  ;;  %15658 = vmatprep.subr.bf16.mxu0 %v16907_v14  ;;  %v19723_v57 = vrot.slane %v8562_v2, 5  ;;  %v11519_v2 = vshrl.u32 %v19731_v12, 16  ;;  %v8631_v34 = vor.u32 %v8630_v37, %v19743_v3  ;;  %v19784_v44 = vrot.slane %v11515_v58, 5  ;;  %v11484_v21 = vld [vmem:[#allocation3 + $0x78] sm:$0xf]  ;;  %v16917_v37 = vld [vmem:[#allocation3 + $0x84] sm:$0xff]  }
 0x37f   : > { %15902 = vmatprep.mubr.bf16.mxu1 %v14053_v6  ;;  %15915 = vmatpush3.bf16.msra.mxu1 %v16902_v35  ;;  %v11481_v35 = vld [vmem:[#allocation3 + $0x6c] sm:$0xf]  ;;  %v8606_v6 = vrot.slane %v8604_v32, 4  ;;  %v8597_v51 = vor.u32 %v8596_v50, %v19735_v0  ;;  %v8467_v32 = vld [vmem:[#allocation3 + $0x60] sm:$0xf]  ;;  %v8588_v31 = vrot.slane %v8586_v60, 5 }
 0x380   : > { %15916 = vmatprep.subr.bf16.mxu1 %v16905_v18  ;;  %15643 = vmatmul.mubr.bf16.gmra.mrb[24].mxu0 %v16906_v59  ;;  %v11509_v20 = vshll.u32 %v11481_v35, 16  ;;  %v8565_v25 = vsel %vm17255_vm7, %v19727_v13, %v19723_v57  ;;  %v16918_v59 = vld [vmem:[#allocation6 + $0x138] sm:$0xff]   ;;  %v11521_v5 = vrot.slane %v11519_v2, 4  ;;  %v8634_v15 = vshll.u32 %v19772_v39, 16  ;;  %v16920_v0 = vld [vmem:[#allocation6 + $0x140] sm:$0xff]  }
 0x381   : > { %15646 = vmatprep.mubr.bf16.mxu0 %v16909_v49  ;;  %15659 = vmatpush3.bf16.msra.mxu0 %v16907_v14  ;;  %v11506_v14 = vshrl.u32 %v11481_v35, 16  ;;  %v8639_v57 = vshrl.u32 %v8467_v32, 16  ;;  %v8648_v56 = vshll.u32 %v19782_v23, 16  ;;  %v8652_v35 = vshrl.u32 %v19782_v23, 16  ;;  %v16915_v45 = vld [vmem:[#allocation3 + $0x78] sm:$0xff]  }
 0x382   : > { %15660 = vmatprep.subr.bf16.mxu0 %v16911_v55  ;;  %v11511_v43 = vrot.slane %v11509_v20, 5  ;;  %v8589_v50 = vsel %vm17255_vm7, %v19769_v41, %v8588_v31  ;;  %v8632_v20 = vrot.slane %v8631_v34, 4  ;;  %v11522_v2 = vor.u32 %v11521_v5, %v19784_v44  ;;  %v19803_v60 = vld [vmem:[#allocation3 + $0x68] sm:$0x1]  ;;  %v11487_v31 = vld [vmem:[#allocation3 + $0x84] sm:$0xf] }
 0x383   : > { %15917 = vmatpush3.bf16.msra.mxu1 %v16905_v18  ;;  %v8555_v18 = vsel %vm17255_vm7, %v19725_v8, %v19672_v17  ;;  %v16913_v17 = vld [vmem:[#allocation3 + $0x60] sm:$0xff]   ;;  %v11508_v49 = vrot.slane %v11506_v14, 4  ;;  %v8642_v8 = vshll.u32 %v8467_v32, 16  ;;  %v8622_v14 = vrot.slane %v8621_v10, 4 }
 0x384   : > { %15918 = vmatprep.subr.bf16.mxu1 %v16908_v48  ;;  %v19788_v13 = vcombine.low %v8555_v18, %v8565_v25  ;;  %v11525_v18 = vshll.u32 %v19794_v7, 16  ;;  %v8641_v25 = vrot.slane %v8639_v57, 4  ;;  %v19805_v41 = vrot.slane %v8648_v56, 5 }
 0x385   : > { %15661 = vmatpush3.bf16.msra.mxu0 %v16911_v55  ;;  %v8607_v55 = vor.u32 %v8606_v6, %v19737_v46  ;;  %v11512_v58 = vor.u32 %v11511_v43, %v11508_v49  ;;  %v11530_v32 = vshrl.u32 %v11484_v21, 16  ;;  %v11523_v5 = vrot.slane %v11522_v2, 4  ;;  %v8872_v2 = vld [vmem:[#allocation3 + $0xc] sm:$0xe] }
 0x386   : > { %15903 = vmatmul.mubr.bf16.gmra.mrb[28].mxu1 %v14054_v47  ;;  %15662 = vmatprep.subr.bf16.mxu0 %v16914_v16  ;;  %v16916_v47 = vld [vmem:[#allocation6 + $0x100] sm:$0xff]  }
 0x387   : > { %15919 = vmatpush3.bf16.msra.mxu1 %v16908_v48  ;;  %15922 = vmatprep.mubr.bf16.mxu1 %v16910_v38  ;;  %v8579_v48 = vsel %vm17255_vm7, %v19767_v24, %v19702_v62  ;;  %v8608_v6 = vrot.slane %v8607_v55, 4  ;;  %v16919_v62 = vld [vmem:[#allocation6 + $0x108] sm:$0xff]   ;;  %v8636_v38 = vrot.slane %v8634_v15, 5  ;;  %v8644_v24 = vrot.slane %v8642_v8, 5  ;;  %v19821_v15 = vld [vmem:[#allocation3 + $0x88] sm:$0xf] }
 0x388   : > { %15920 = vmatprep.subr.bf16.mxu1 %v16912_v22  ;;  %15647 = vmatmul.mubr.bf16.gmra.mrb[28].mxu0 %v16913_v17  ;;  %v11533_v17 = vshll.u32 %v11484_v21, 16  ;;  %v16924_v55 = vld [vmem:[#allocation6 + $0x148] sm:$0xff]   ;;  %v11513_v43 = vrot.slane %v11512_v58, 4  ;;  %v8658_v8 = vshll.u32 %v19803_v60, 16  ;;  %v11563_v21 = vshll.u32 %v19821_v15, 16 }
 0x389   : > { %15663 = vmatpush3.bf16.msra.mxu0 %v16914_v16  ;;  %15666 = vmatprep.mubr.bf16.mxu0 %v19678_v30  ;;  %v8598_v30 = vrot.slane %v8597_v51, 4  ;;  %v8612_v16 = vrot.slane %v8610_v27, 5  ;;  %v19807_v51 = vld [vmem:[#allocation3 + $0x7c] sm:$0xf]  ;;  %v19809_v27 = vcombine.low %v8579_v48, %v8589_v50  ;;  %v8637_v49 = vsel %vm17255_vm7, %v8632_v20, %v8636_v38 }
 0x38a   : > { %15664 = vmatprep.subr.bf16.mxu0 %v16918_v59  ;;  %v8645_v57 = vor.u32 %v8644_v24, %v8641_v25  ;;  %v11543_v48 = vshrl.u32 %v19807_v51, 16  ;;  %v11532_v50 = vrot.slane %v11530_v32, 4  ;;  %v11518_v20 = vsel %vm17255_vm7, %v11513_v43, %v19784_v44  ;;  %v19844_v24 = vld [vmem:[#allocation3 + $0x8c] sm:$0x1]  ;;  %v16923_v32 = vld [vmem:[#allocation3 + $0x9c] sm:$0xff]  }
 0x38b   : > { %15921 = vmatpush3.bf16.msra.mxu1 %v16912_v22  ;;  %v8654_v22 = vrot.slane %v8652_v35, 4  ;;  %v8603_v10 = vsel %vm17255_vm7, %v8598_v30, %v19737_v46  ;;  %v8613_v34 = vsel %vm17255_vm7, %v8608_v6, %v8612_v16  ;;  %v16922_v46 = vld [vmem:[#allocation6 + $0x110] sm:$0xff]   ;;  %v19829_v35 = vld [vmem:[#allocation3 + $0x80] sm:$0x1]  ;;  %v11535_v30 = vrot.slane %v11533_v17, 5 }
 0x38c   : > { %15938 = vmatprep.subr.bf16.mxu1 %v16916_v47  ;;  %v11554_v6 = vshrl.u32 %v11487_v31, 16  ;;  %v11557_v16 = vshll.u32 %v11487_v31, 16  ;;  %v8646_v38 = vrot.slane %v8645_v57, 4  ;;  %v11549_v44 = vshll.u32 %v19829_v35, 16 }
 0x38d   : > { %15665 = vmatpush3.bf16.msra.mxu0 %v16918_v59  ;;  %v8627_v59 = vsel %vm17255_vm7, %v8622_v14, %v19743_v3  ;;  %v11527_v3 = vrot.slane %v11525_v18, 5  ;;  %v8655_v56 = vor.u32 %v8654_v22, %v19805_v41  ;;  %v16925_v14 = vld [vmem:[#allocation6 + $0x118] sm:$0xff]   ;;  %v8660_v18 = vrot.slane %v8658_v8, 5 }
 0x38e   : > { %15923 = vmatmul.mubr.bf16.vlgmr.msra.gmra.mrb[16].mxu1 %v16915_v45  ;;  %15682 = vmatprep.subr.bf16.mxu0 %v16920_v0  ;;  %v11567_v45 = vshrl.u32 %v19821_v15, 16  ;;  %v19846_v22 = vld [vmem:[#allocation3 + $0x94] sm:$0xf]  ;;  %v11556_v43 = vrot.slane %v11554_v6, 4  ;;  %v19850_v31 = vrot.slane %v11563_v21, 5  ;;  %v16932_v21 = vld [vmem:[#allocation6 + $0x160] sm:$0xff]  }
 0x38f   : > { %15926 = vmatprep.mubr.bf16.mxu1 %v16917_v37  ;;  %15939 = vmatpush3.bf16.msra.mxu1 %v16916_v47  ;;  %v11539_v47 = vshll.u32 %v19807_v51, 16  ;;  %v16921_v37 = vld [vmem:[#allocation3 + $0x90] sm:$0xff]   ;;  %v11528_v58 = vsel %vm17255_vm7, %v11523_v5, %v11527_v3  ;;  %v8656_v17 = vrot.slane %v8655_v56, 4  ;;  %v11559_v5 = vrot.slane %v11557_v16, 5 }
 0x390   : > { %15940 = vmatprep.subr.bf16.mxu1 %v16919_v62  ;;  %15667 = vmatmul.mubr.bf16.vlgmr.msra.gmra.mrb[16].mxu0 %v19754_v29  ;;  %v16926_v29 = vld [vmem:[#allocation6 + $0x150] sm:$0xff]   ;;  %v11569_v57 = vrot.slane %v11567_v45, 4  ;;  %v19852_v8 = vcombine.low %v11518_v20, %v11528_v58  ;;  %v8651_v3 = vsel %vm17255_vm7, %v8646_v38, %v19805_v41  ;;  %v19867_v45 = vrot.slane %v11549_v44, 5  ;;  %v8873_v20 = vld [vmem:[#allocation3 + $0x18] sm:$0xe] }
 0x391   : > { %15670 = vmatprep.mubr.bf16.mxu0 %v19756_v36  ;;  %15683 = vmatpush3.bf16.msra.mxu0 %v16920_v0  ;;  %v19833_v36 = vcombine.low %v8603_v10, %v8613_v34  ;;  %v19835_v0 = vcombine.low %v8627_v59, %v8637_v49  ;;  %v19842_v25 = vrot.slane %v11539_v47, 5  ;;  %v11536_v10 = vor.u32 %v11535_v30, %v11532_v50  ;;  %v11490_v59 = vld [vmem:[#allocation3 + $0x90] sm:$0xf]  ;;  %v19876_v38 = vld [vmem:[#allocation3 + $0x98] sm:$0x1] }
 0x392   : > { %15684 = vmatprep.subr.bf16.mxu0 %v16924_v55  ;;  %v8906_v34 = vrot.slane %v19597_v26, 5  ;;  %v16930_v49 = vld [vmem:[#allocation6 + $0x158] sm:$0xff]   ;;  %v11587_v47 = vshll.u32 %v19846_v22, 16  ;;  %v16928_v26 = vld [vmem:[#allocation6 + $0x120] sm:$0xff]   ;;  %v11578_v50 = vshrl.u32 %v11490_v59, 16  ;;  %v11581_v30 = vshll.u32 %v11490_v59, 16 }
 0x393   : > { %15941 = vmatpush3.bf16.msra.mxu1 %v16919_v62  ;;  %v11545_v62 = vrot.slane %v11543_v48, 4  ;;  %v11591_v48 = vshrl.u32 %v19846_v22, 16  ;;  %v19864_v6 = vrot.slane %v11536_v10, 4  ;;  %v11560_v41 = vor.u32 %v11559_v5, %v11556_v43  ;;  %v11493_v44 = vld [vmem:[#allocation3 + $0x9c] sm:$0xf]  ;;  %v16929_v59 = vld [vmem:[#allocation3 + $0xb4] sm:$0xff]  }
 0x394   : > { %15942 = vmatprep.subr.bf16.mxu1 %v16922_v46  ;;  %v8908_v16 = vrot.slane %v8906_v34, 4  ;;  %v8913_v58 = vrot.slane %v19611_v53, 5  ;;  %v11580_v53 = vrot.slane %v11578_v50, 4  ;;  %v13910_v5 = vrot.slane %v8873_v20, 9  ;;  %v11496_v20 = vld [vmem:[#allocation3 + $0xa8] sm:$0xf] }
 0x395   : > { %15685 = vmatpush3.bf16.msra.mxu0 %v16924_v55  ;;  %v13909_v55 = vrot.slane %v8872_v2, 9  ;;  %v11546_v56 = vor.u32 %v11545_v62, %v19842_v25  ;;  %v8909_v2 = vrot.slane %v19616_v28, 5  ;;  %v11593_v62 = vrot.slane %v11591_v48, 4 }
 0x396   : > { %15927 = vmatmul.mubr.bf16.gmra.mrb[20].mxu1 %v16921_v37  ;;  %15686 = vmatprep.subr.bf16.mxu0 %v16926_v29  ;;  %v11570_v37 = vor.u32 %v11569_v57, %v19850_v31  ;;  %v11542_v28 = vsel %vm17255_vm7, %v19864_v6, %v19842_v25  ;;  %v19892_v57 = vld [vmem:[#allocation3 + $0xa0] sm:$0xf]  ;;  %v11602_v50 = vshrl.u32 %v11493_v44, 16  ;;  %v8916_v6 = vrot.slane %v19635_v11, 5  ;;  %v16937_v11 = vld [vmem:[#allocation6 + $0x170] sm:$0xff]  }
 0x397   : > { %15930 = vmatprep.mubr.bf16.mxu1 %v16923_v32  ;;  %15943 = vmatpush3.bf16.msra.mxu1 %v16922_v46  ;;  %v8661_v46 = vsel %vm17255_vm7, %v8656_v17, %v8660_v18  ;;  %v19878_v18 = vrot.slane %v11587_v47, 5  ;;  %v16931_v32 = vld [vmem:[#allocation6 + $0x128] sm:$0xff]   ;;  %v19882_v10 = vrot.slane %v11546_v56, 4  ;;  %v11561_v47 = vrot.slane %v11560_v41, 4 }
 0x398   : > { %15944 = vmatprep.subr.bf16.mxu1 %v16925_v14  ;;  %15671 = vmatmul.mubr.bf16.gmra.mrb[20].mxu0 %v19788_v13  ;;  %v11573_v13 = vshll.u32 %v19844_v24, 16  ;;  %v19880_v17 = vcombine.low %v8651_v3, %v8661_v46  ;;  %v11571_v48 = vrot.slane %v11570_v37, 4  ;;  %v8915_v3 = vrot.slane %v8913_v58, 4  ;;  %v16934_v46 = vld [vmem:[#allocation6 + $0x130] sm:$0xff]  }
 0x399   : > { %15674 = vmatprep.mubr.bf16.mxu0 %v19809_v27  ;;  %15687 = vmatpush3.bf16.msra.mxu0 %v16926_v29  ;;  %v16927_v27 = vld [vmem:[#allocation3 + $0xa8] sm:$0xff]   ;;  %v19873_v29 = vsel %vm17724_vm13, %v13909_v55, %v8906_v34  ;;  %v19890_v34 = vsel %vm17724_vm13, %v8908_v16, %v8909_v2  ;;  %v16935_v55 = vld [vmem:[#allocation6 + $0x168] sm:$0xff]   ;;  %v11594_v25 = vor.u32 %v11593_v62, %v19878_v18  ;;  %v8920_v56 = vrot.slane %v19613_v40, 5 }
 0x39a   : > { %15688 = vmatprep.subr.bf16.mxu0 %v16930_v49  ;;  %v11575_v43 = vrot.slane %v11573_v13, 5  ;;  %v11611_v13 = vshll.u32 %v19892_v57, 16  ;;  %v11615_v41 = vshrl.u32 %v19892_v57, 16  ;;  %v11552_v40 = vsel %vm17255_vm7, %v19882_v10, %v19867_v45 }
 0x39b   : > { %15945 = vmatpush3.bf16.msra.mxu1 %v16925_v14  ;;  %v11583_v14 = vrot.slane %v11581_v30, 5  ;;  %v11605_v30 = vshll.u32 %v11493_v44, 16  ;;  %v11566_v37 = vsel %vm17255_vm7, %v11561_v47, %v19850_v31  ;;  %v8922_v2 = vrot.slane %v8920_v56, 4  ;;  %v16936_v31 = vld [vmem:[#allocation6 + $0x138] sm:$0xff]  }
 0x39c   : > { %15946 = vmatprep.subr.bf16.mxu1 %v16928_v26  ;;  %v11604_v62 = vrot.slane %v11602_v50, 4  ;;  %v8923_v44 = vrot.slane %v19639_v1, 5  ;;  %v11629_v47 = vshll.u32 %v11496_v20, 16 }
 0x39d   : > { %15689 = vmatpush3.bf16.msra.mxu0 %v16930_v49  ;;  %v11597_v49 = vshll.u32 %v19876_v38, 16  ;;  %v11584_v16 = vor.u32 %v11583_v14, %v11580_v53  ;;  %v11607_v10 = vrot.slane %v11605_v30, 5  ;;  %v16933_v53 = vld [vmem:[#allocation3 + $0xc0] sm:$0xff]  }
 0x39e   : > { %15931 = vmatmul.mubr.bf16.gmra.mrb[24].mxu1 %v16927_v27  ;;  %15690 = vmatprep.subr.bf16.mxu0 %v16932_v21  ;;  %v19921_v27 = vld [vmem:[#allocation3 + $0xac] sm:$0xf]  ;;  %v19937_v30 = vsel %vm17724_vm13, %v8922_v2, %v8923_v44  ;;  %v16940_v44 = vld [vmem:[#allocation6 + $0x148] sm:$0xff]  }
 0x39f   : > { %15934 = vmatprep.mubr.bf16.mxu1 %v16929_v59  ;;  %15947 = vmatpush3.bf16.msra.mxu1 %v16928_v26  ;;  %v13917_v26 = vcombine.low %v19873_v29, %v19890_v34  ;;  %v11599_v45 = vrot.slane %v11597_v49, 5  ;;  %v8874_v29 = vld [vmem:[#allocation3 + $0x24] sm:$0xe]  ;;  %v11585_v14 = vrot.slane %v11584_v16, 4  ;;  %v19924_v59 = vrot.slane %v11611_v13, 5  ;;  %v16938_v13 = vld [vmem:[#allocation6 + $0x140] sm:$0xff]  }
 0x3a0   : > { %15948 = vmatprep.subr.bf16.mxu1 %v16931_v32  ;;  %15675 = vmatmul.mubr.bf16.gmra.mrb[24].mxu0 %v19833_v36  ;;  %v19910_v36 = vsel %vm17724_vm13, %v13910_v5, %v8913_v58  ;;  %v11595_v58 = vrot.slane %v11594_v25, 4  ;;  %v11617_v34 = vrot.slane %v11615_v41, 4  ;;  %v11626_v5 = vshrl.u32 %v11496_v20, 16  ;;  %v16939_v25 = vld [vmem:[#allocation6 + $0x178] sm:$0xff]  }
 0x3a1   : > { %15678 = vmatprep.mubr.bf16.mxu0 %v19835_v0  ;;  %15691 = vmatpush3.bf16.msra.mxu0 %v16932_v21  ;;  %v11576_v0 = vsel %vm17255_vm7, %v11571_v48, %v11575_v43  ;;  %v19919_v21 = vsel %vm17724_vm13, %v8915_v3, %v8916_v6  ;;  %v19926_v43 = vld [vmem:[#allocation3 + $0xa4] sm:$0x1]  ;;  %v11639_v48 = vshrl.u32 %v19921_v27, 16  ;;  %v14080_v3 = vcombine.low %v11542_v28, %v11552_v40  ;;  %v19940_v28 = vld [vmem:[#allocation3 + $0xb8] sm:$0xf] }
 0x3a2   : > { %15692 = vmatprep.subr.bf16.mxu0 %v16935_v55  ;;  %v14081_v49 = vcombine.low %v11566_v37, %v11576_v0  ;;  %v13918_v1 = vcombine.low %v19910_v36, %v19919_v21  ;;  %v13911_v50 = vrot.slane %v8874_v29, 9  ;;  %v11608_v6 = vor.u32 %v11607_v10, %v11604_v62  ;;  %v8875_v37 = vld [vmem:[#allocation3 + $0x30] sm:$0xe]  ;;  %v11499_v20 = vld [vmem:[#allocation3 + $0xb4] sm:$0xf]  ;;  %v16945_v36 = vld [vmem:[#allocation6 + $0x190] sm:$0xff]  }
 0x3a3   : > { %15949 = vmatpush3.bf16.msra.mxu1 %v16931_v32  ;;  %v11635_v32 = vshll.u32 %v19921_v27, 16  ;;  %v8927_v16 = vrot.slane %v19630_v9, 5  ;;  %v11618_v41 = vor.u32 %v11617_v34, %v19924_v59  ;;  %v11621_v40 = vshll.u32 %v19926_v43, 16 }
 0x3a4   : > { %15950 = vmatprep.subr.bf16.mxu1 %v16934_v46  ;;  %v11628_v9 = vrot.slane %v11626_v5, 4  ;;  %v11631_v0 = vrot.slane %v11629_v47, 5  ;;  %v11659_v2 = vshll.u32 %v19940_v28, 16  ;;  %v11663_v62 = vshrl.u32 %v19940_v28, 16 }
 0x3a5   : > { %15693 = vmatpush3.bf16.msra.mxu0 %v16935_v55  ;;  %v11600_v55 = vsel %vm17255_vm7, %v11595_v58, %v11599_v45  ;;  %v19950_v45 = vrot.slane %v11635_v32, 5  ;;  %v16941_v58 = vld [vmem:[#allocation6 + $0x180] sm:$0xff]   ;;  %v8929_v10 = vrot.slane %v8927_v16, 4  ;;  %v11623_v34 = vrot.slane %v11621_v40, 5 }
 0x3a6   : > { %15935 = vmatmul.mubr.bf16.gmra.mrb[28].mxu1 %v16933_v53  ;;  %15694 = vmatprep.subr.bf16.mxu0 %v16937_v11  ;;  %v8934_v53 = vrot.slane %v19658_v63, 5  ;;  %v8930_v5 = vrot.slane %v19667_v33, 5  ;;  %v11650_v47 = vshrl.u32 %v11499_v20, 16  ;;  %v11653_v32 = vshll.u32 %v11499_v20, 16  ;;  %v16947_v63 = vld [vmem:[#allocation6 + $0x198] sm:$0xff]  }
 0x3a7   : > { %15951 = vmatpush3.bf16.msra.mxu1 %v16934_v46  ;;  %15954 = vmatprep.mubr.bf16.mxu1 %v19852_v8  ;;  %v11590_v8 = vsel %vm17255_vm7, %v11585_v14, %v19878_v18  ;;  %v8921_v46 = vsel %vm17724_vm13, %v13911_v50, %v8920_v56  ;;  %v19955_v56 = vld [vmem:[#allocation3 + $0xb0] sm:$0x1]  ;;  %v19962_v14 = vld [vmem:[#allocation3 + $0xc4] sm:$0xf]  ;;  %v11632_v50 = vor.u32 %v11631_v0, %v11628_v9 }
 0x3a8   : > { %15952 = vmatprep.subr.bf16.mxu1 %v16936_v31  ;;  %15679 = vmatmul.mubr.bf16.gmra.mrb[28].mxu0 %v19880_v17  ;;  %v11641_v17 = vrot.slane %v11639_v48, 4  ;;  %v19952_v29 = vcombine.low %v11590_v8, %v11600_v55  ;;  %v13919_v18 = vcombine.low %v8921_v46, %v19937_v30  ;;  %v11619_v48 = vrot.slane %v11618_v41, 4  ;;  %v11502_v30 = vld [vmem:[#allocation3 + $0xc0] sm:$0xf]  ;;  %v8876_v41 = vld [vmem:[#allocation3 + $0x3c] sm:$0xe] }
 0x3a9   : > { %15695 = vmatpush3.bf16.msra.mxu0 %v16937_v11  ;;  %15698 = vmatprep.mubr.bf16.mxu0 %v13917_v26  ;;  %v19959_v26 = vrot.slane %v11608_v6, 4  ;;  %v13912_v11 = vrot.slane %v8875_v37, 9  ;;  %v16943_v6 = vld [vmem:[#allocation6 + $0x188] sm:$0xff]   ;;  %v19970_v8 = vrot.slane %v11659_v2, 5  ;;  %v11665_v46 = vrot.slane %v11663_v62, 4 }
 0x3aa   : > { %15696 = vmatprep.subr.bf16.mxu0 %v16939_v25  ;;  %v11642_v55 = vor.u32 %v11641_v17, %v19950_v45  ;;  %v11683_v33 = vshll.u32 %v19962_v14, 16  ;;  %v11687_v40 = vshrl.u32 %v19962_v14, 16  ;;  %v8936_v37 = vrot.slane %v8934_v53, 4  ;;  %v19989_v62 = vld [vmem:[#allocation3 + $0xbc] sm:$0x1] }
 0x3ab   : > { %15953 = vmatpush3.bf16.msra.mxu1 %v16936_v31  ;;  %v19967_v31 = vsel %vm17724_vm13, %v13912_v11, %v8927_v16  ;;  %v8931_v16 = vsel %vm17724_vm13, %v8929_v10, %v8930_v5  ;;  %v11655_v9 = vrot.slane %v11653_v32, 5  ;;  %v11674_v0 = vshrl.u32 %v11502_v30, 16  ;;  %v16944_v5 = vld [vmem:[#allocation6 + $0x158] sm:$0xff]  }
 0x3ac   : > { %15970 = vmatprep.subr.bf16.mxu1 %v16938_v13  ;;  %v11677_v17 = vshll.u32 %v11502_v30, 16  ;;  %v11633_v20 = vrot.slane %v11632_v50, 4  ;;  %v8937_v2 = vrot.slane %v19733_v61, 5  ;;  %v11643_v21 = vrot.slane %v11642_v55, 4 }
 0x3ad   : > { %15697 = vmatpush3.bf16.msra.mxu0 %v16939_v25  ;;  %v11614_v25 = vsel %vm17255_vm7, %v19959_v26, %v19924_v59  ;;  %v11624_v59 = vsel %vm17255_vm7, %v11619_v48, %v11623_v34  ;;  %v8941_v26 = vrot.slane %v19682_v19, 5  ;;  %v19993_v11 = vrot.slane %v11683_v33, 5  ;;  %v20006_v33 = vld [vmem:[#allocation3 + $0xc8] sm:$0x1] }
 0x3ae   : > { %15955 = vmatmul.mubr.bf16.vlgmr.msra.gmra.mrb[16].mxu1 %v14080_v3  ;;  %15714 = vmatprep.subr.bf16.mxu0 %v16941_v58  ;;  %v11645_v3 = vshll.u32 %v19955_v56, 16  ;;  %v11689_v10 = vrot.slane %v11687_v40, 4  ;;  %v8938_v34 = vsel %vm17724_vm13, %v8936_v37, %v8937_v2  ;;  %v8948_v61 = vrot.slane %v19699_v42, 5  ;;  %v16949_v2 = vld [vmem:[#allocation6 + $0x1a0] sm:$0xff]  }
 0x3af   : > { %15958 = vmatprep.mubr.bf16.mxu1 %v14081_v49  ;;  %15971 = vmatpush3.bf16.msra.mxu1 %v16938_v13  ;;  %v16942_v49 = vld [vmem:[#allocation6 + $0x150] sm:$0xff]   ;;  %v11652_v13 = vrot.slane %v11650_v47, 4  ;;  %v11669_v32 = vshll.u32 %v19989_v62, 16  ;;  %v11676_v48 = vrot.slane %v11674_v0, 4  ;;  %v11679_v50 = vrot.slane %v11677_v17, 5 }
 0x3b0   : > { %15972 = vmatprep.subr.bf16.mxu1 %v16940_v44  ;;  %15699 = vmatmul.mubr.bf16.vlgmr.msra.gmra.mrb[16].mxu0 %v13918_v1  ;;  %v11666_v1 = vor.u32 %v11665_v46, %v19970_v8  ;;  %v14083_v55 = vcombine.low %v11614_v25, %v11624_v59  ;;  %v13920_v30 = vcombine.low %v19967_v31, %v8931_v16  ;;  %v8943_v46 = vrot.slane %v8941_v26, 4  ;;  %v8877_v25 = vld [vmem:[#allocation3 + $0x48] sm:$0xe] }
 0x3b1   : > { %15702 = vmatprep.mubr.bf16.mxu0 %v13919_v18  ;;  %15715 = vmatpush3.bf16.msra.mxu0 %v16941_v58  ;;  %v11647_v58 = vrot.slane %v11645_v3, 5  ;;  %v13913_v18 = vrot.slane %v8876_v41, 9  ;;  %v11656_v47 = vor.u32 %v11655_v9, %v11652_v13  ;;  %v11638_v40 = vsel %vm17255_vm7, %v11633_v20, %v19950_v45  ;;  %v8878_v41 = vld [vmem:[#allocation3 + $0x54] sm:$0xe]  ;;  %v16946_v45 = vld [vmem:[#allocation6 + $0x160] sm:$0xff]  }
 0x3b2   : > { %15716 = vmatprep.subr.bf16.mxu0 %v16943_v6  ;;  %v8944_v3 = vrot.slane %v19745_v54, 5  ;;  %v11940_v37 = vrot.slane %v19731_v12, 5  ;;  %v11671_v9 = vrot.slane %v11669_v32, 5  ;;  %v11680_v0 = vor.u32 %v11679_v50, %v11676_v48  ;;  %v16948_v32 = vld [vmem:[#allocation6 + $0x168] sm:$0xff]  }
 0x3b3   : > { %15973 = vmatpush3.bf16.msra.mxu1 %v16940_v44  ;;  %v8935_v44 = vsel %vm17724_vm13, %v13913_v18, %v8934_v53  ;;  %v11648_v31 = vsel %vm17255_vm7, %v11643_v21, %v11647_v58  ;;  %v11690_v53 = vor.u32 %v11689_v10, %v19993_v11  ;;  %v11657_v13 = vrot.slane %v11656_v47, 4 }
 0x3b4   : > { %15974 = vmatprep.subr.bf16.mxu1 %v16942_v49  ;;  %v13921_v16 = vcombine.low %v8935_v44, %v8938_v34  ;;  %v11693_v17 = vshll.u32 %v20006_v33, 16  ;;  %v14084_v59 = vcombine.low %v11638_v40, %v11648_v31  ;;  %v8945_v54 = vsel %vm17724_vm13, %v8943_v46, %v8944_v3  ;;  %v8879_v46 = vld [vmem:[#allocation3 + $0x60] sm:$0xe]  ;;  %v11907_v31 = vld [vmem:[#allocation3 + $0x78] sm:$0xe] }
 0x3b5   : > { %15717 = vmatpush3.bf16.msra.mxu0 %v16943_v6  ;;  %v11667_v6 = vrot.slane %v11666_v1, 4  ;;  %v8951_v20 = vrot.slane %v19772_v39, 5  ;;  %v11691_v21 = vrot.slane %v11690_v53, 4  ;;  %v13915_v1 = vrot.slane %v8878_v41, 9 }
 0x3b6   : > { %15959 = vmatmul.mubr.bf16.gmra.mrb[20].mxu1 %v19952_v29  ;;  %15718 = vmatprep.subr.bf16.mxu0 %v16945_v36  ;;  %v8950_v29 = vrot.slane %v8948_v61, 4  ;;  %v8955_v10 = vrot.slane %v19782_v23, 5  ;;  %v11942_v18 = vrot.slane %v11940_v37, 4  ;;  %v11947_v34 = vrot.slane %v19807_v51, 5 }
 0x3b7   : > { %15962 = vmatprep.mubr.bf16.mxu1 %v14083_v55  ;;  %15975 = vmatpush3.bf16.msra.mxu1 %v16942_v49  ;;  %v13914_v49 = vrot.slane %v8877_v25, 9  ;;  %v11672_v12 = vsel %vm17255_vm7, %v11667_v6, %v11671_v9  ;;  %v11954_v47 = vrot.slane %v19821_v15, 5  ;;  %v11662_v39 = vsel %vm17255_vm7, %v11657_v13, %v19970_v8  ;;  %v16950_v25 = vld [vmem:[#allocation6 + $0x170] sm:$0xff]   ;;  %v11909_v13 = vld [vmem:[#allocation3 + $0x90] sm:$0xe] }
 0x3b8   : > { %15976 = vmatprep.subr.bf16.mxu1 %v16944_v5  ;;  %15703 = vmatmul.mubr.bf16.gmra.mrb[20].mxu0 %v13920_v30  ;;  %v8952_v58 = vsel %vm17724_vm13, %v8950_v29, %v8951_v20  ;;  %v11695_v48 = vrot.slane %v11693_v17, 5  ;;  %v14085_v50 = vcombine.low %v11662_v39, %v11672_v12  ;;  %v8949_v51 = vsel %vm17724_vm13, %v13915_v1, %v8948_v61  ;;  %v9414_v39 = vld [vmem:[#allocation3 + $0x18] sm:$0xf] }
 0x3b9   : > { %15706 = vmatprep.mubr.bf16.mxu0 %v13921_v16  ;;  %15719 = vmatpush3.bf16.msra.mxu0 %v16945_v36  ;;  %v11906_v36 = vld [vmem:[#allocation3 + $0x6c] sm:$0xe]  ;;  %v8942_v23 = vsel %vm17724_vm13, %v13914_v49, %v8941_v26  ;;  %v11943_v30 = vrot.slane %v19794_v7, 5  ;;  %v13923_v8 = vcombine.low %v8949_v51, %v8952_v58  ;;  %v16951_v26 = vld [vmem:[#allocation6 + $0x1a8] sm:$0xff]   ;;  %v8957_v40 = vrot.slane %v8955_v10, 4  ;;  %v16952_v49 = vld [vmem:[#allocation6 + $0x178] sm:$0xff]  }
 0x3ba   : > { %15720 = vmatprep.subr.bf16.mxu0 %v16947_v63  ;;  %v13922_v55 = vcombine.low %v8942_v23, %v8945_v54  ;;  %v11696_v19 = vsel %vm17255_vm7, %v11691_v21, %v11695_v48  ;;  %v14095_v44 = vrot.slane %v11906_v36, 9  ;;  %v11949_v6 = vrot.slane %v11947_v34, 4  ;;  %v11908_v16 = vld [vmem:[#allocation3 + $0x84] sm:$0xe]  ;;  %v20074_v21 = vld [vmem:[#allocation3 + $0x1c] sm:$0xf] }
 0x3bb   : > { %15977 = vmatpush3.bf16.msra.mxu1 %v16944_v5  ;;  %v11681_v5 = vrot.slane %v11680_v0, 4  ;;  %v11944_v42 = vsel %vm17724_vm13, %v11942_v18, %v11943_v30  ;;  %v11956_v7 = vrot.slane %v11954_v47, 4  ;;  %v11961_v61 = vrot.slane %v19846_v22, 5  ;;  %v16955_v58 = vld [vmem:[#allocation3 + $0x18] sm:$0xff]   ;;  %v16956_v23 = vld [vmem:[#allocation6 + $0x1b8] sm:$0xff]  }
 0x3bc   : > { %15978 = vmatprep.subr.bf16.mxu1 %v16946_v45  ;;  %v8958_v53 = vrot.slane %v19803_v60, 5  ;;  %v11968_v3 = vrot.slane %v19892_v57, 5  ;;  %v11941_v41 = vsel %vm17724_vm13, %v14095_v44, %v11940_v37  ;;  %v13916_v29 = vrot.slane %v8879_v46, 9  ;;  %v11910_v57 = vld [vmem:[#allocation3 + $0x9c] sm:$0xe] }
 0x3bd   : > { %15721 = vmatpush3.bf16.msra.mxu0 %v16947_v63  ;;  %v11686_v63 = vsel %vm17255_vm7, %v11681_v5, %v19993_v11  ;;  %v11950_v22 = vrot.slane %v19829_v35, 5  ;;  %v14103_v0 = vcombine.low %v11941_v41, %v11944_v42  ;;  %v16953_v11 = vld [vmem:[#allocation6 + $0x1b0] sm:$0xff]   ;;  %v14096_v17 = vrot.slane %v11907_v31, 9  ;;  %v9417_v48 = vld [vmem:[#allocation3 + $0x24] sm:$0xf] }
 0x3be   : > { %15963 = vmatmul.mubr.bf16.gmra.mrb[24].mxu1 %v14084_v59  ;;  %15722 = vmatprep.subr.bf16.mxu0 %v16949_v2  ;;  %v14086_v9 = vcombine.low %v11686_v63, %v11696_v19  ;;  %v8959_v60 = vsel %vm17724_vm13, %v8957_v40, %v8958_v53  ;;  %v14097_v37 = vrot.slane %v11908_v16, 9  ;;  %v8956_v54 = vsel %vm17724_vm13, %v13916_v29, %v8955_v10  ;;  %v11911_v5 = vld [vmem:[#allocation3 + $0xa8] sm:$0xe]  ;;  %v20119_v29 = vld [vmem:[#allocation3 + $0x34] sm:$0xf] }
 0x3bf   : > { %15966 = vmatprep.mubr.bf16.mxu1 %v14085_v50  ;;  %15979 = vmatpush3.bf16.msra.mxu1 %v16946_v45  ;;  %v11957_v45 = vrot.slane %v19844_v24, 5  ;;  %v20062_v59 = vsel %vm17724_vm13, %v11949_v6, %v11950_v22  ;;  %v11963_v24 = vrot.slane %v11961_v61, 4  ;;  %v20072_v20 = vsel %vm17724_vm13, %v14096_v17, %v11947_v34  ;;  %v20102_v19 = vld [vmem:[#allocation3 + $0x28] sm:$0xf]  ;;  %v16957_v22 = vld [vmem:[#allocation6 + $0x188] sm:$0xff]  }
 0x3c0   : > { %15980 = vmatprep.subr.bf16.mxu1 %v16948_v32  ;;  %15707 = vmatmul.mubr.bf16.gmra.mrb[24].mxu0 %v13922_v55  ;;  %v14098_v12 = vrot.slane %v11909_v13, 9  ;;  %v13924_v1 = vcombine.low %v8956_v54, %v8959_v60  ;;  %v20080_v36 = vsel %vm17724_vm13, %v14097_v37, %v11954_v47  ;;  %v11964_v18 = vrot.slane %v19876_v38, 5  ;;  %v11912_v55 = vld [vmem:[#allocation3 + $0xb4] sm:$0xe]  ;;  %v16958_v37 = vld [vmem:[#allocation3 + $0x24] sm:$0xff]  }
 0x3c1   : > { %15710 = vmatprep.mubr.bf16.mxu0 %v13923_v8  ;;  %15723 = vmatpush3.bf16.msra.mxu0 %v16949_v2  ;;  %v20066_v35 = vsel %vm17724_vm13, %v11956_v7, %v11957_v45  ;;  %v11970_v2 = vrot.slane %v11968_v3, 4  ;;  %v14099_v10 = vrot.slane %v11910_v57, 9  ;;  %v14104_v34 = vcombine.low %v20072_v20, %v20062_v59  ;;  %v16959_v7 = vld [vmem:[#allocation6 + $0x1c0] sm:$0xff]  }
 0x3c2   : > { %15724 = vmatprep.subr.bf16.mxu0 %v16951_v26  ;;  %v20089_v15 = vsel %vm17724_vm13, %v14098_v12, %v11961_v61  ;;  %v11971_v47 = vrot.slane %v19926_v43, 5  ;;  %v20094_v38 = vsel %vm17724_vm13, %v11963_v24, %v11964_v18  ;;  %v9448_v51 = vshll.u32 %v20074_v21, 16  ;;  %v16954_v43 = vld [vmem:[#allocation6 + $0x180] sm:$0xff]   ;;  %v16961_v12 = vld [vmem:[#allocation3 + $0x30] sm:$0xff]   ;;  %v20144_v18 = vld [vmem:[#allocation3 + $0x2c] sm:$0x1] }
 0x3c3   : > { %15981 = vmatpush3.bf16.msra.mxu1 %v16948_v32  ;;  %v14105_v32 = vcombine.low %v20080_v36, %v20066_v35  ;;  %v20098_v50 = vsel %vm17724_vm13, %v14099_v10, %v11968_v3  ;;  %v9452_v30 = vshrl.u32 %v20074_v21, 16  ;;  %v11975_v44 = vrot.slane %v19921_v27, 5  ;;  %v9420_v27 = vld [vmem:[#allocation3 + $0x30] sm:$0xf]  ;;  %v16962_v35 = vld [vmem:[#allocation6 + $0x1c8] sm:$0xff]   ;;  %v16960_v10 = vld [vmem:[#allocation6 + $0x190] sm:$0xff]  }
 0x3c4   : > { %15982 = vmatprep.subr.bf16.mxu1 %v16950_v25  ;;  %v20106_v8 = vsel %vm17724_vm13, %v11970_v2, %v11971_v47  ;;  %v9442_v46 = vshll.u32 %v9414_v39, 16  ;;  %v14100_v40 = vrot.slane %v11911_v5, 9  ;;  %v11978_v42 = vrot.slane %v19955_v56, 5  ;;  %v9423_v47 = vld [vmem:[#allocation3 + $0x3c] sm:$0xf] }
 0x3c5   : > { %15725 = vmatpush3.bf16.msra.mxu0 %v16951_v26  ;;  %v9439_v26 = vshrl.u32 %v9414_v39, 16  ;;  %v9463_v31 = vshrl.u32 %v9417_v48, 16  ;;  %v9466_v6 = vshll.u32 %v9417_v48, 16  ;;  %v14106_v61 = vcombine.low %v20089_v15, %v20094_v38 }
 0x3c6   : > { %15967 = vmatmul.mubr.bf16.gmra.mrb[28].mxu1 %v14086_v9  ;;  %15726 = vmatprep.subr.bf16.mxu0 %v16953_v11  ;;  %v14101_v63 = vrot.slane %v11912_v55, 9  ;;  %v9476_v53 = vshrl.u32 %v20102_v19, 16  ;;  %v14107_v16 = vcombine.low %v20098_v50, %v20106_v8  ;;  %v11982_v3 = vrot.slane %v19940_v28, 5  ;;  %v20122_v9 = vld [vmem:[#allocation3 + $0x20] sm:$0x1] }
 0x3c7   : > { %15983 = vmatpush3.bf16.msra.mxu1 %v16950_v25  ;;  %15986 = vmatprep.mubr.bf16.mxu1 %v14103_v0  ;;  %v9472_v25 = vshll.u32 %v20102_v19, 16  ;;  %v20117_v56 = vrot.slane %v9448_v51, 5  ;;  %v9454_v41 = vrot.slane %v9452_v30, 4  ;;  %v11977_v45 = vrot.slane %v11975_v44, 4  ;;  %v20154_v51 = vld [vmem:[#allocation3 + $0x40] sm:$0xf] }
 0x3c8   : > { %15984 = vmatprep.subr.bf16.mxu1 %v16952_v49  ;;  %15711 = vmatmul.mubr.bf16.gmra.mrb[28].mxu0 %v13924_v1  ;;  %v11989_v13 = vrot.slane %v19962_v14, 5  ;;  %v9441_v0 = vrot.slane %v9439_v26, 4  ;;  %v9444_v60 = vrot.slane %v9442_v46, 5  ;;  %v20126_v17 = vrot.slane %v9463_v31, 4  ;;  %v16965_v30 = vld [vmem:[#allocation6 + $0x1d0] sm:$0xff]  }
 0x3c9   : > { %15727 = vmatpush3.bf16.msra.mxu0 %v16953_v11  ;;  %15730 = vmatprep.mubr.bf16.mxu0 %v16955_v58  ;;  %v20124_v11 = vld [vmem:[#allocation3 + $0xc0] sm:$0xe]  ;;  %v20128_v28 = vrot.slane %v9466_v6, 5  ;;  %v9487_v57 = vshrl.u32 %v9420_v27, 16  ;;  %v9490_v59 = vshll.u32 %v9420_v27, 16  ;;  %v20130_v24 = vrot.slane %v9472_v25, 5 }
 0x3ca   : > { %15728 = vmatprep.subr.bf16.mxu0 %v16956_v23  ;;  %v9496_v54 = vshll.u32 %v20119_v29, 16  ;;  %v9500_v20 = vshrl.u32 %v20119_v29, 16  ;;  %v20136_v2 = vsel %vm17724_vm13, %v14100_v40, %v11975_v44  ;;  %v20140_v1 = vsel %vm17724_vm13, %v14101_v63, %v11982_v3 }
 0x3cb   : > { %15985 = vmatpush3.bf16.msra.mxu1 %v16952_v49  ;;  %v9478_v49 = vrot.slane %v9476_v53, 4  ;;  %v11985_v58 = vrot.slane %v19989_v62, 5  ;;  %v9455_v36 = vor.u32 %v9454_v41, %v20117_v56  ;;  %v20148_v39 = vsel %vm17724_vm13, %v11977_v45, %v11978_v42  ;;  %v20165_v53 = vld [vmem:[#allocation3 + $0x38] sm:$0x1] }
 0x3cc   : > { %16002 = vmatprep.subr.bf16.mxu1 %v16954_v43  ;;  %v9445_v62 = vor.u32 %v9444_v60, %v9441_v0  ;;  %v9458_v5 = vshll.u32 %v20122_v9, 16  ;;  %v9489_v48 = vrot.slane %v9487_v57, 4  ;;  %v9492_v55 = vrot.slane %v9490_v59, 5  ;;  %v16964_v0 = vld [vmem:[#allocation3 + $0x3c] sm:$0xff]   ;;  %v16968_v60 = vld [vmem:[#allocation6 + $0x1d8] sm:$0xff]   ;;  %v16967_v59 = vld [vmem:[#allocation3 + $0x48] sm:$0xff]  }
 0x3cd   : > { %15729 = vmatpush3.bf16.msra.mxu0 %v16956_v23  ;;  %v11991_v23 = vrot.slane %v11989_v13, 4  ;;  %v9479_v44 = vor.u32 %v9478_v49, %v20130_v24  ;;  %v20159_v26 = vrot.slane %v9496_v54, 5  ;;  %v9502_v46 = vrot.slane %v9500_v20, 4  ;;  %v16966_v49 = vld [vmem:[#allocation6 + $0x1a0] sm:$0xff]   ;;  %v9426_v20 = vld [vmem:[#allocation3 + $0x48] sm:$0xf] }
 0x3ce   : > { %15987 = vmatmul.mubr.bf16.vlgmr.msra.gmra.mrb[16].mxu1 %v14104_v34  ;;  %15746 = vmatprep.subr.bf16.mxu0 %v16959_v7  ;;  %v11984_v34 = vrot.slane %v11982_v3, 4  ;;  %v11992_v40 = vrot.slane %v20006_v33, 5  ;;  %v9456_v42 = vrot.slane %v9455_v36, 4  ;;  %v9511_v31 = vshrl.u32 %v9423_v47, 16 }
 0x3cf   : > { %15990 = vmatprep.mubr.bf16.mxu1 %v14105_v32  ;;  %16003 = vmatpush3.bf16.msra.mxu1 %v16954_v43  ;;  %v14102_v32 = vrot.slane %v20124_v11, 9  ;;  %v9469_v43 = vor.u32 %v20128_v28, %v20126_v17  ;;  %v9514_v6 = vshll.u32 %v9423_v47, 16  ;;  %v14108_v63 = vcombine.low %v20136_v2, %v20148_v39  ;;  %v20215_v47 = vld [vmem:[#allocation3 + $0x58] sm:$0xf] }
 0x3d0   : > { %16004 = vmatprep.subr.bf16.mxu1 %v16957_v22  ;;  %15731 = vmatmul.mubr.bf16.vlgmr.msra.gmra.mrb[16].mxu0 %v16958_v37  ;;  %v9482_v25 = vshll.u32 %v20144_v18, 16  ;;  %v9520_v27 = vshll.u32 %v20154_v51, 16  ;;  %v9524_v3 = vshrl.u32 %v20154_v51, 16  ;;  %v20171_v33 = vsel %vm17724_vm13, %v11984_v34, %v11985_v58 }
 0x3d1   : > { %15734 = vmatprep.mubr.bf16.mxu0 %v16961_v12  ;;  %15747 = vmatpush3.bf16.msra.mxu0 %v16959_v7  ;;  %v16963_v7 = vld [vmem:[#allocation6 + $0x198] sm:$0xff]   ;;  %v9446_v41 = vrot.slane %v9445_v62, 4  ;;  %v9493_v45 = vor.u32 %v9492_v55, %v9489_v48  ;;  %v20178_v11 = vsel %vm17724_vm13, %v11991_v23, %v11992_v40  ;;  %v9470_v17 = vrot.slane %v9469_v43, 4 }
 0x3d2   : > { %15748 = vmatprep.subr.bf16.mxu0 %v16962_v35  ;;  %v9480_v28 = vrot.slane %v9479_v44, 4  ;;  %v9503_v57 = vor.u32 %v9502_v46, %v20159_v26  ;;  %v9506_v38 = vshll.u32 %v20165_v53, 16  ;;  %v9513_v37 = vrot.slane %v9511_v31, 4  ;;  %v9429_v55 = vld [vmem:[#allocation3 + $0x54] sm:$0xf] }
 0x3d3   : > { %16005 = vmatpush3.bf16.msra.mxu1 %v16957_v22  ;;  %v9460_v22 = vrot.slane %v9458_v5, 5  ;;  %v20193_v50 = vsel %vm17724_vm13, %v14102_v32, %v11989_v13  ;;  %v9484_v8 = vrot.slane %v9482_v25, 5  ;;  %v9526_v54 = vrot.slane %v9524_v3, 4  ;;  %v20206_v13 = vld [vmem:[#allocation3 + $0x4c] sm:$0xf]  ;;  %v16970_v31 = vld [vmem:[#allocation3 + $0x54] sm:$0xff]  }
 0x3d4   : > { %16006 = vmatprep.subr.bf16.mxu1 %v16960_v10  ;;  %v14109_v12 = vcombine.low %v20140_v1, %v20171_v33  ;;  %v14110_v58 = vcombine.low %v20193_v50, %v20178_v11  ;;  %v9451_v14 = vsel %vm17255_vm7, %v9446_v41, %v20117_v56  ;;  %v20204_v36 = vrot.slane %v9493_v45, 4  ;;  %v9432_v3 = vld [vmem:[#allocation3 + $0x60] sm:$0xf] }
 0x3d5   : > { %15749 = vmatpush3.bf16.msra.mxu0 %v16962_v35  ;;  %v9461_v15 = vsel %vm17255_vm7, %v9456_v42, %v9460_v22  ;;  %v9516_v35 = vrot.slane %v9514_v6, 5  ;;  %v9485_v32 = vsel %vm17255_vm7, %v9480_v28, %v9484_v8  ;;  %v20212_v23 = vrot.slane %v9503_v57, 4  ;;  %v20225_v42 = vld [vmem:[#allocation3 + $0x64] sm:$0xf]  ;;  %v16972_v28 = vld [vmem:[#allocation6 + $0x1b0] sm:$0xff]  }
 0x3d6   : > { %15991 = vmatmul.mubr.bf16.gmra.mrb[20].mxu1 %v14106_v61  ;;  %15750 = vmatprep.subr.bf16.mxu0 %v16965_v30  ;;  %v20187_v61 = vld [vmem:[#allocation3 + $0x44] sm:$0x1]  ;;  %v20208_v34 = vcombine.low %v9451_v14, %v9461_v15  ;;  %v9475_v56 = vsel %vm17255_vm7, %v9470_v17, %v20130_v24  ;;  %v20220_v62 = vrot.slane %v9506_v38, 5  ;;  %v9535_v48 = vshrl.u32 %v9426_v20, 16 }
 0x3d7   : > { %15994 = vmatprep.mubr.bf16.mxu1 %v14107_v16  ;;  %16007 = vmatpush3.bf16.msra.mxu1 %v16960_v10  ;;  %v20195_v16 = vrot.slane %v9520_v27, 5  ;;  %v16971_v10 = vld [vmem:[#allocation6 + $0x1e0] sm:$0xff]   ;;  %v9530_v1 = vshll.u32 %v20187_v61, 16  ;;  %v9517_v5 = vor.u32 %v9516_v35, %v9513_v37  ;;  %v9538_v44 = vshll.u32 %v9426_v20, 16  ;;  %v16973_v6 = vld [vmem:[#allocation3 + $0x60] sm:$0xff]   ;;  %v16978_v20 = vld [vmem:[#allocation6 + $0x1f0] sm:$0xff]  }
 0x3d8   : > { %16008 = vmatprep.subr.bf16.mxu1 %v16963_v7  ;;  %15735 = vmatmul.mubr.bf16.gmra.mrb[20].mxu0 %v16964_v0  ;;  %v9544_v46 = vshll.u32 %v20206_v13, 16  ;;  %v9548_v40 = vshrl.u32 %v20206_v13, 16  ;;  %v20227_v24 = vcombine.low %v9475_v56, %v9485_v32  ;;  %v9568_v25 = vshll.u32 %v20215_v47, 16  ;;  %v16975_v33 = vld [vmem:[#allocation6 + $0x1e8] sm:$0xff]   ;;  %v12446_v0 = vld [vmem:[#allocation3 + $0x78] sm:$0xf] }
 0x3d9   : > { %15738 = vmatprep.mubr.bf16.mxu0 %v16967_v59  ;;  %15751 = vmatpush3.bf16.msra.mxu0 %v16965_v30  ;;  %v16969_v30 = vld [vmem:[#allocation6 + $0x1a8] sm:$0xff]   ;;  %v9527_v43 = vor.u32 %v9526_v54, %v20195_v16  ;;  %v9572_v27 = vshrl.u32 %v20215_v47, 16  ;;  %v9509_v41 = vsel %vm17255_vm7, %v20212_v23, %v20220_v62  ;;  %v20242_v22 = vrot.slane %v9530_v1, 5  ;;  %v20254_v37 = vld [vmem:[#allocation3 + $0x50] sm:$0x1] }
 0x3da   : > { %15752 = vmatprep.subr.bf16.mxu0 %v16968_v60  ;;  %v9559_v45 = vshrl.u32 %v9429_v55, 16  ;;  %v9537_v17 = vrot.slane %v9535_v48, 4  ;;  %v9592_v2 = vshll.u32 %v20225_v42, 16  ;;  %v9596_v39 = vshrl.u32 %v20225_v42, 16  ;;  %v20258_v23 = vld [vmem:[#allocation3 + $0x5c] sm:$0x1] }
 0x3db   : > { %16009 = vmatpush3.bf16.msra.mxu1 %v16963_v7  ;;  %v9499_v7 = vsel %vm17255_vm7, %v20204_v36, %v20159_v26  ;;  %v9562_v26 = vshll.u32 %v9429_v55, 16  ;;  %v20250_v57 = vrot.slane %v9527_v43, 4  ;;  %v9540_v59 = vrot.slane %v9538_v44, 5 }
 0x3dc   : > { %16010 = vmatprep.subr.bf16.mxu1 %v16966_v49  ;;  %v20252_v15 = vrot.slane %v9544_v46, 5  ;;  %v9550_v38 = vrot.slane %v9548_v40, 4  ;;  %v20256_v35 = vrot.slane %v9568_v25, 5  ;;  %v9583_v8 = vshrl.u32 %v9432_v3, 16  ;;  %v16974_v46 = vld [vmem:[#allocation3 + $0x78] sm:$0xff]  }
 0x3dd   : > { %15753 = vmatpush3.bf16.msra.mxu0 %v16968_v60  ;;  %v20244_v60 = vrot.slane %v9517_v5, 4  ;;  %v9586_v54 = vshll.u32 %v9432_v3, 16  ;;  %v9564_v14 = vrot.slane %v9562_v26, 5  ;;  %v12471_v36 = vshrl.u32 %v12446_v0, 16  ;;  %v16976_v5 = vld [vmem:[#allocation6 + $0x1b8] sm:$0xff]  }
 0x3de   : > { %15995 = vmatmul.mubr.bf16.gmra.mrb[24].mxu1 %v14108_v63  ;;  %15754 = vmatprep.subr.bf16.mxu0 %v16971_v10  ;;  %v20248_v63 = vld [vmem:[#allocation3 + $0x7c] sm:$0xf]  ;;  %v12474_v32 = vshll.u32 %v12446_v0, 16  ;;  %v20260_v1 = vrot.slane %v9592_v2, 5  ;;  %v9598_v56 = vrot.slane %v9596_v39, 4  ;;  %v20264_v48 = vcombine.low %v9499_v7, %v9509_v41  ;;  %v16982_v7 = vld [vmem:[#allocation6 + $0x1f8] sm:$0xff]  }
 0x3df   : > { %15998 = vmatprep.mubr.bf16.mxu1 %v14109_v12  ;;  %16011 = vmatpush3.bf16.msra.mxu1 %v16966_v49  ;;  %v9574_v49 = vrot.slane %v9572_v27, 4  ;;  %v9561_v12 = vrot.slane %v9559_v45, 4  ;;  %v12484_v62 = vshrl.u32 %v20248_v63, 16  ;;  %v9541_v55 = vor.u32 %v9540_v59, %v9537_v17  ;;  %v20273_v27 = vld [vmem:[#allocation3 + $0x70] sm:$0xf] }
 0x3e0   : > { %16012 = vmatprep.subr.bf16.mxu1 %v16969_v30  ;;  %15739 = vmatmul.mubr.bf16.gmra.mrb[24].mxu0 %v16970_v31  ;;  %v9551_v43 = vor.u32 %v9550_v38, %v20252_v15  ;;  %v9554_v44 = vshll.u32 %v20254_v37, 16  ;;  %v9523_v40 = vsel %vm17255_vm7, %v20244_v60, %v20195_v16  ;;  %v9588_v25 = vrot.slane %v9586_v54, 5  ;;  %v20283_v16 = vld [vmem:[#allocation3 + $0x68] sm:$0x1]  ;;  %v16980_v60 = vld [vmem:[#allocation6 + $0x1c0] sm:$0xff]  }
 0x3e1   : > { %15742 = vmatprep.mubr.bf16.mxu0 %v16973_v6  ;;  %15755 = vmatpush3.bf16.msra.mxu0 %v16971_v10  ;;  %v12480_v10 = vshll.u32 %v20248_v63, 16  ;;  %v9575_v31 = vor.u32 %v9574_v49, %v20256_v35  ;;  %v9585_v6 = vrot.slane %v9583_v8, 4  ;;  %v9533_v3 = vsel %vm17255_vm7, %v20250_v57, %v20242_v22  ;;  %v16984_v49 = vld [vmem:[#allocation6 + $0x200] sm:$0xff]   ;;  %v20294_v54 = vld [vmem:[#allocation3 + $0x80] sm:$0x1] }
 0x3e2   : > { %15756 = vmatprep.subr.bf16.mxu0 %v16975_v33  ;;  %v12473_v41 = vrot.slane %v12471_v36, 4  ;;  %v12476_v45 = vrot.slane %v12474_v32, 5  ;;  %v9565_v26 = vor.u32 %v9564_v14, %v9561_v12  ;;  %v9599_v0 = vor.u32 %v9598_v56, %v20260_v1 }
 0x3e3   : > { %16013 = vmatpush3.bf16.msra.mxu1 %v16969_v30  ;;  %v16977_v30 = vld [vmem:[#allocation3 + $0x6c] sm:$0xff]   ;;  %v20286_v11 = vrot.slane %v12480_v10, 5  ;;  %v12486_v50 = vrot.slane %v12484_v62, 4  ;;  %v9542_v17 = vrot.slane %v9541_v55, 4  ;;  %v9552_v22 = vrot.slane %v9551_v43, 4  ;;  %v16979_v62 = vld [vmem:[#allocation3 + $0x84] sm:$0xff]  }
 0x3e4   : > { %16014 = vmatprep.subr.bf16.mxu1 %v16972_v28  ;;  %v9616_v2 = vshll.u32 %v20273_v27, 16  ;;  %v9620_v39 = vshrl.u32 %v20273_v27, 16  ;;  %v9576_v57 = vrot.slane %v9575_v31, 4  ;;  %v9589_v59 = vor.u32 %v9588_v25, %v9585_v6  ;;  %v20297_v10 = vld [vmem:[#allocation3 + $0x74] sm:$0x1]  ;;  %v16983_v55 = vld [vmem:[#allocation6 + $0x1c8] sm:$0xff]  }
 0x3e5   : > { %15757 = vmatpush3.bf16.msra.mxu0 %v16975_v33  ;;  %v9578_v33 = vshll.u32 %v20258_v23, 16  ;;  %v9602_v38 = vshll.u32 %v20283_v16, 16  ;;  %v20292_v8 = vcombine.low %v9523_v40, %v9533_v3  ;;  %v12477_v12 = vor.u32 %v12476_v45, %v12473_v41  ;;  %v16981_v40 = vld [vmem:[#allocation3 + $0x90] sm:$0xff]  }
 0x3e6   : > { %15999 = vmatmul.mubr.bf16.gmra.mrb[28].mxu1 %v14110_v58  ;;  %15758 = vmatprep.subr.bf16.mxu0 %v16978_v20  ;;  %v9435_v58 = vld [vmem:[#allocation3 + $0x6c] sm:$0xf]  ;;  %v9566_v32 = vrot.slane %v9565_v26, 4  ;;  %v9547_v43 = vsel %vm17255_vm7, %v9542_v17, %v20252_v15  ;;  %v9590_v6 = vrot.slane %v9589_v59, 4  ;;  %v12490_v3 = vshll.u32 %v20294_v54, 16  ;;  %v16988_v15 = vld [vmem:[#allocation6 + $0x208] sm:$0xff]  }
 0x3e7   : > { %16015 = vmatpush3.bf16.msra.mxu1 %v16972_v28  ;;  %16018 = vmatprep.mubr.bf16.mxu1 %v16974_v46  ;;  %v9556_v28 = vrot.slane %v9554_v44, 5  ;;  %v9607_v14 = vshrl.u32 %v9435_v58, 16  ;;  %v9610_v36 = vshll.u32 %v9435_v58, 16  ;;  %v9580_v56 = vrot.slane %v9578_v33, 5  ;;  %v20309_v33 = vld [vmem:[#allocation3 + $0x88] sm:$0xf] }
 0x3e8   : > { %16016 = vmatprep.subr.bf16.mxu1 %v16976_v5  ;;  %15743 = vmatmul.mubr.bf16.gmra.mrb[28].mxu0 %v16977_v30  ;;  %v20304_v46 = vrot.slane %v9616_v2, 5  ;;  %v12449_v30 = vld [vmem:[#allocation3 + $0x84] sm:$0xf]  ;;  %v9604_v25 = vrot.slane %v9602_v38, 5  ;;  %v12478_v41 = vrot.slane %v12477_v12, 4  ;;  %v12492_v38 = vrot.slane %v12490_v3, 5 }
 0x3e9   : > { %15759 = vmatpush3.bf16.msra.mxu0 %v16978_v20  ;;  %15762 = vmatprep.mubr.bf16.mxu0 %v20208_v34  ;;  %v9600_v20 = vrot.slane %v9599_v0, 4  ;;  %v12487_v34 = vor.u32 %v12486_v50, %v20286_v11  ;;  %v9557_v44 = vsel %vm17255_vm7, %v9552_v22, %v9556_v28  ;;  %v9581_v31 = vsel %vm17255_vm7, %v9576_v57, %v9580_v56  ;;  %v16986_v22 = vld [vmem:[#allocation6 + $0x1d0] sm:$0xff]   ;;  %v20321_v57 = vld [vmem:[#allocation3 + $0x94] sm:$0xf]  ;;  %v12452_v56 = vld [vmem:[#allocation3 + $0x90] sm:$0xf] }
 0x3ea   : > { %15760 = vmatprep.subr.bf16.mxu0 %v16982_v7  ;;  %v9609_v45 = vrot.slane %v9607_v14, 4  ;;  %v9612_v26 = vrot.slane %v9610_v36, 5  ;;  %v9626_v0 = vshll.u32 %v20297_v10, 16  ;;  %v12495_v17 = vshrl.u32 %v12449_v30, 16  ;;  %v20329_v12 = vld [vmem:[#allocation3 + $0x8c] sm:$0x1] }
 0x3eb   : > { %16017 = vmatpush3.bf16.msra.mxu1 %v16976_v5  ;;  %v9622_v5 = vrot.slane %v9620_v39, 4  ;;  %v9605_v50 = vsel %vm17255_vm7, %v9600_v20, %v9604_v25  ;;  %v12488_v58 = vrot.slane %v12487_v34, 4  ;;  %v12498_v39 = vshll.u32 %v12449_v30, 16  ;;  %v16990_v14 = vld [vmem:[#allocation6 + $0x210] sm:$0xff]   ;;  %v20338_v20 = vld [vmem:[#allocation3 + $0xa0] sm:$0xf] }
 0x3ec   : > { %16034 = vmatprep.subr.bf16.mxu1 %v16980_v60  ;;  %v12504_v28 = vshll.u32 %v20309_v33, 16  ;;  %v12497_v34 = vrot.slane %v12495_v17, 4  ;;  %v16989_v30 = vld [vmem:[#allocation6 + $0x1d8] sm:$0xff]   ;;  %v16987_v25 = vld [vmem:[#allocation3 + $0xa8] sm:$0xff]   ;;  %v12522_v3 = vshll.u32 %v12452_v56, 16 }
 0x3ed   : > { %15761 = vmatpush3.bf16.msra.mxu0 %v16982_v7  ;;  %v9571_v7 = vsel %vm17255_vm7, %v9566_v32, %v20256_v35  ;;  %v9623_v2 = vor.u32 %v9622_v5, %v20304_v46  ;;  %v13953_v35 = vcombine.low %v9547_v43, %v9557_v44  ;;  %v12483_v32 = vsel %vm17255_vm7, %v12478_v41, %v20286_v11  ;;  %v12455_v44 = vld [vmem:[#allocation3 + $0x9c] sm:$0xf]  ;;  %v9840_v17 = vld [vmem:[#allocation3 + $0x18] sm:$0xe] }
 0x3ee   : > { %16019 = vmatmul.mubr.bf16.vlgmr.msra.gmra.mrb[16].mxu1 %v16979_v62  ;;  %15778 = vmatprep.subr.bf16.mxu0 %v16984_v49  ;;  %v20324_v59 = vcombine.low %v9571_v7, %v9581_v31  ;;  %v12528_v62 = vshll.u32 %v20321_v57, 16  ;;  %v12532_v43 = vshrl.u32 %v20321_v57, 16  ;;  %v16985_v5 = vld [vmem:[#allocation3 + $0x9c] sm:$0xff]   ;;  %v20344_v31 = vrot.slane %v12504_v28, 5 }
 0x3ef   : > { %16022 = vmatprep.mubr.bf16.mxu1 %v16981_v40  ;;  %16035 = vmatpush3.bf16.msra.mxu1 %v16980_v60  ;;  %v12508_v60 = vshrl.u32 %v20309_v33, 16  ;;  %v9624_v11 = vrot.slane %v9623_v2, 4  ;;  %v12500_v40 = vrot.slane %v12498_v39, 5  ;;  %v12552_v41 = vshll.u32 %v20338_v20, 16 }
 0x3f0   : > { %16036 = vmatprep.subr.bf16.mxu1 %v16983_v55  ;;  %15763 = vmatmul.mubr.bf16.vlgmr.msra.gmra.mrb[16].mxu0 %v20227_v24  ;;  %v9595_v24 = vsel %vm17255_vm7, %v9590_v6, %v20260_v1  ;;  %v12493_v1 = vsel %vm17255_vm7, %v12488_v58, %v12492_v38  ;;  %v9874_v58 = vrot.slane %v20074_v21, 5  ;;  %v12534_v2 = vrot.slane %v12532_v43, 4 }
 0x3f1   : > { %15766 = vmatprep.mubr.bf16.mxu0 %v20264_v48  ;;  %15779 = vmatpush3.bf16.msra.mxu0 %v16984_v49  ;;  %v20331_v36 = vcombine.low %v9595_v24, %v9605_v50  ;;  %v9613_v48 = vor.u32 %v9612_v26, %v9609_v45  ;;  %v20336_v49 = vrot.slane %v9626_v0, 5  ;;  %v12510_v6 = vrot.slane %v12508_v60, 4  ;;  %v16994_v26 = vld [vmem:[#allocation6 + $0x218] sm:$0xff]   ;;  %v16992_v60 = vld [vmem:[#allocation6 + $0x1e0] sm:$0xff]  }
 0x3f2   : > { %15780 = vmatprep.subr.bf16.mxu0 %v16988_v15  ;;  %v12556_v45 = vshrl.u32 %v20338_v20, 16  ;;  %v20348_v0 = vcombine.low %v12483_v32, %v12493_v1  ;;  %v12514_v50 = vshll.u32 %v20329_v12, 16  ;;  %v12543_v39 = vshrl.u32 %v12455_v44, 16  ;;  %v16996_v1 = vld [vmem:[#allocation6 + $0x220] sm:$0xff]  }
 0x3f3   : > { %16037 = vmatpush3.bf16.msra.mxu1 %v16983_v55  ;;  %v12519_v55 = vshrl.u32 %v12452_v56, 16  ;;  %v9614_v7 = vrot.slane %v9613_v48, 4  ;;  %v12546_v28 = vshll.u32 %v12455_v44, 16  ;;  %v9629_v24 = vsel %vm17255_vm7, %v9624_v11, %v20336_v49  ;;  %v20364_v44 = vld [vmem:[#allocation3 + $0x98] sm:$0x1] }
 0x3f4   : > { %16038 = vmatprep.subr.bf16.mxu1 %v16986_v22  ;;  %v12501_v38 = vor.u32 %v12500_v40, %v12497_v34  ;;  %v12511_v32 = vor.u32 %v12510_v6, %v20344_v31  ;;  %v20359_v48 = vrot.slane %v12552_v41, 5  ;;  %v12558_v56 = vrot.slane %v12556_v45, 4  ;;  %v12458_v11 = vld [vmem:[#allocation3 + $0xa8] sm:$0xf]  ;;  %v16991_v40 = vld [vmem:[#allocation3 + $0xb4] sm:$0xff]   ;;  %v16995_v6 = vld [vmem:[#allocation6 + $0x1e8] sm:$0xff]  }
 0x3f5   : > { %15781 = vmatpush3.bf16.msra.mxu0 %v16988_v15  ;;  %v20352_v15 = vrot.slane %v12528_v62, 5  ;;  %v12521_v21 = vrot.slane %v12519_v55, 4  ;;  %v13965_v62 = vrot.slane %v9840_v17, 9  ;;  %v9876_v43 = vrot.slane %v9874_v58, 4  ;;  %v16993_v41 = vld [vmem:[#allocation3 + $0xc0] sm:$0xff]  }
 0x3f6   : > { %16023 = vmatmul.mubr.bf16.gmra.mrb[20].mxu1 %v16985_v5  ;;  %15782 = vmatprep.subr.bf16.mxu0 %v16990_v14  ;;  %v9881_v49 = vrot.slane %v20102_v19, 5  ;;  %v12545_v34 = vrot.slane %v12543_v39, 4  ;;  %v12548_v5 = vrot.slane %v12546_v28, 5  ;;  %v12512_v45 = vrot.slane %v12511_v32, 4  ;;  %v16999_v39 = vld [vmem:[#allocation6 + $0x228] sm:$0xff]  }
 0x3f7   : > { %16026 = vmatprep.mubr.bf16.mxu1 %v16987_v25  ;;  %16039 = vmatpush3.bf16.msra.mxu1 %v16986_v22  ;;  %v12524_v22 = vrot.slane %v12522_v3, 5  ;;  %v20374_v55 = vsel %vm17724_vm13, %v13965_v62, %v9874_v58  ;;  %v9877_v3 = vrot.slane %v20122_v9, 5  ;;  %v12559_v17 = vor.u32 %v12558_v56, %v20359_v48  ;;  %v16998_v56 = vld [vmem:[#allocation6 + $0x1f0] sm:$0xff]   ;;  %v20428_v19 = vld [vmem:[#allocation3 + $0xb8] sm:$0xf] }
 0x3f8   : > { %16040 = vmatprep.subr.bf16.mxu1 %v16989_v30  ;;  %15767 = vmatmul.mubr.bf16.gmra.mrb[20].mxu0 %v20292_v8  ;;  %v9619_v8 = vsel %vm17255_vm7, %v9614_v7, %v20304_v46  ;;  %v12502_v46 = vrot.slane %v12501_v38, 4  ;;  %v9883_v9 = vrot.slane %v9881_v49, 4  ;;  %v12567_v28 = vshrl.u32 %v12458_v11, 16  ;;  %v9841_v38 = vld [vmem:[#allocation3 + $0x24] sm:$0xe] }
 0x3f9   : > { %15770 = vmatprep.mubr.bf16.mxu0 %v13953_v35  ;;  %15783 = vmatpush3.bf16.msra.mxu0 %v16990_v14  ;;  %v20367_v35 = vrot.slane %v12514_v50, 5  ;;  %v12535_v14 = vor.u32 %v12534_v2, %v20352_v15  ;;  %v20370_v25 = vcombine.low %v9619_v8, %v9629_v24  ;;  %v12525_v7 = vor.u32 %v12524_v22, %v12521_v21  ;;  %v20381_v2 = vld [vmem:[#allocation3 + $0xac] sm:$0xf] }
 0x3fa   : > { %15784 = vmatprep.subr.bf16.mxu0 %v16994_v26  ;;  %v12538_v50 = vshll.u32 %v20364_v44, 16  ;;  %v20385_v58 = vsel %vm17724_vm13, %v9876_v43, %v9877_v3  ;;  %v12549_v32 = vor.u32 %v12548_v5, %v12545_v34  ;;  %v9888_v22 = vrot.slane %v20119_v29, 5  ;;  %v16997_v5 = vld [vmem:[#allocation3 + $0xcc] sm:$0xff]  }
 0x3fb   : > { %16041 = vmatpush3.bf16.msra.mxu1 %v16989_v30  ;;  %v20377_v30 = vld [vmem:[#allocation3 + $0xa4] sm:$0x1]  ;;  %v12536_v24 = vrot.slane %v12535_v14, 4  ;;  %v12507_v8 = vsel %vm17255_vm7, %v12502_v46, %v20344_v31  ;;  %v9884_v62 = vrot.slane %v20144_v18, 5  ;;  %v12576_v43 = vshll.u32 %v20381_v2, 16 }
 0x3fc   : > { %16042 = vmatprep.subr.bf16.mxu1 %v16992_v60  ;;  %v12562_v21 = vshll.u32 %v20377_v30, 16  ;;  %v12517_v29 = vsel %vm17255_vm7, %v12512_v45, %v20367_v35  ;;  %v12526_v14 = vrot.slane %v12525_v7, 4  ;;  %v12560_v34 = vrot.slane %v12559_v17, 4  ;;  %v9842_v35 = vld [vmem:[#allocation3 + $0x30] sm:$0xe] }
 0x3fd   : > { %15785 = vmatpush3.bf16.msra.mxu0 %v16994_v26  ;;  %v12570_v26 = vshll.u32 %v12458_v11, 16  ;;  %v17001_v11 = vld [vmem:[#allocation6 + $0x230] sm:$0xff]   ;;  %v13966_v31 = vrot.slane %v9841_v38, 9  ;;  %v20404_v18 = vsel %vm17724_vm13, %v9883_v9, %v9884_v62  ;;  %v17000_v45 = vld [vmem:[#allocation6 + $0x1f8] sm:$0xff]   ;;  %v14136_v7 = vcombine.low %v12507_v8, %v12517_v29  ;;  %v9843_v29 = vld [vmem:[#allocation3 + $0x3c] sm:$0xe] }
 0x3fe   : > { %16027 = vmatmul.mubr.bf16.gmra.mrb[24].mxu1 %v16991_v40  ;;  %15786 = vmatprep.subr.bf16.mxu0 %v16996_v1  ;;  %v12569_v40 = vrot.slane %v12567_v28, 4  ;;  %v12564_v3 = vrot.slane %v12562_v21, 5  ;;  %v20410_v17 = vld [vmem:[#allocation3 + $0xb0] sm:$0x1]  ;;  %v20412_v9 = vrot.slane %v12576_v43, 5  ;;  %v9895_v62 = vrot.slane %v20154_v51, 5 }
 0x3ff   : > { %16030 = vmatprep.mubr.bf16.mxu1 %v16993_v41  ;;  %16043 = vmatpush3.bf16.msra.mxu1 %v16992_v60  ;;  %v12580_v60 = vshrl.u32 %v20381_v2, 16  ;;  %v12572_v46 = vrot.slane %v12570_v26, 5  ;;  %v9890_v41 = vrot.slane %v9888_v22, 4  ;;  %v20421_v26 = vsel %vm17724_vm13, %v13966_v31, %v9881_v49  ;;  %v17003_v38 = vld [vmem:[#allocation6 + $0x238] sm:$0xff]   ;;  %v20438_v43 = vld [vmem:[#allocation3 + $0xc4] sm:$0xf] }
 0x400   : > { %16044 = vmatprep.subr.bf16.mxu1 %v16995_v6  ;;  %15771 = vmatmul.mubr.bf16.gmra.mrb[24].mxu0 %v20324_v59  ;;  %v12540_v59 = vrot.slane %v12538_v50, 5  ;;  %v13973_v50 = vcombine.low %v20374_v55, %v20385_v58  ;;  %v9891_v55 = vrot.slane %v20165_v53, 5  ;;  %v12461_v21 = vld [vmem:[#allocation3 + $0xb4] sm:$0xf]  ;;  %v12586_v8 = vshll.u32 %v20410_v17, 16 }
 0x401   : > { %15774 = vmatprep.mubr.bf16.mxu0 %v20331_v36  ;;  %15787 = vmatpush3.bf16.msra.mxu0 %v16996_v1  ;;  %v12550_v1 = vrot.slane %v12549_v32, 4  ;;  %v12582_v28 = vrot.slane %v12580_v60, 4  ;;  %v13967_v32 = vrot.slane %v9842_v35, 9  ;;  %v17002_v60 = vld [vmem:[#allocation6 + $0x200] sm:$0xff]   ;;  %v12600_v51 = vshll.u32 %v20428_v19, 16 }
 0x402   : > { %15788 = vmatprep.subr.bf16.mxu0 %v16999_v39  ;;  %v12541_v36 = vsel %vm17255_vm7, %v12536_v24, %v12540_v59  ;;  %v12565_v24 = vsel %vm17255_vm7, %v12560_v34, %v12564_v3  ;;  %v9892_v53 = vsel %vm17724_vm13, %v9890_v41, %v9891_v55  ;;  %v12594_v59 = vshll.u32 %v12461_v21, 16  ;;  %v12467_v3 = vld [vmem:[#allocation3 + $0xcc] sm:$0xf] }
 0x403   : > { %16045 = vmatpush3.bf16.msra.mxu1 %v16995_v6  ;;  %v12531_v6 = vsel %vm17255_vm7, %v12526_v14, %v20352_v15  ;;  %v12573_v15 = vor.u32 %v12572_v46, %v12569_v40  ;;  %v12555_v49 = vsel %vm17255_vm7, %v12550_v1, %v20359_v48  ;;  %v12583_v48 = vor.u32 %v12582_v28, %v20412_v9 }
 0x404   : > { %16046 = vmatprep.subr.bf16.mxu1 %v16998_v56  ;;  %v14137_v58 = vcombine.low %v12531_v6, %v12541_v36  ;;  %v12591_v14 = vshrl.u32 %v12461_v21, 16  ;;  %v12604_v34 = vshrl.u32 %v20428_v19, 16  ;;  %v12624_v40 = vshll.u32 %v20438_v43, 16  ;;  %v20454_v6 = vld [vmem:[#allocation3 + $0xd0] sm:$0xf] }
 0x405   : > { %15789 = vmatpush3.bf16.msra.mxu0 %v16999_v39  ;;  %v13974_v39 = vcombine.low %v20421_v26, %v20404_v18  ;;  %v20448_v18 = vrot.slane %v12573_v15, 4  ;;  %v12588_v46 = vrot.slane %v12586_v8, 5  ;;  %v9897_v36 = vrot.slane %v9895_v62, 4 }
 0x406   : > { %16031 = vmatmul.mubr.bf16.gmra.mrb[28].mxu1 %v16997_v5  ;;  %15790 = vmatprep.subr.bf16.mxu0 %v17001_v11  ;;  %v12464_v5 = vld [vmem:[#allocation3 + $0xc0] sm:$0xf]  ;;  %v9898_v1 = vrot.slane %v20187_v61, 5  ;;  %v12584_v35 = vrot.slane %v12583_v48, 4  ;;  %v9902_v41 = vrot.slane %v20206_v13, 5  ;;  %v12593_v26 = vrot.slane %v12591_v14, 4 }
 0x407   : > { %16047 = vmatpush3.bf16.msra.mxu1 %v16998_v56  ;;  %16050 = vmatprep.mubr.bf16.mxu1 %v20348_v0  ;;  %v20441_v56 = vcombine.low %v12555_v49, %v12565_v24  ;;  %v9889_v0 = vsel %vm17724_vm13, %v13967_v32, %v9888_v22  ;;  %v12628_v22 = vshrl.u32 %v20438_v43, 16  ;;  %v12618_v28 = vshll.u32 %v12464_v5, 16  ;;  %v20464_v13 = vld [vmem:[#allocation3 + $0xbc] sm:$0x1] }
 0x408   : > { %16048 = vmatprep.subr.bf16.mxu1 %v17000_v45  ;;  %15775 = vmatmul.mubr.bf16.gmra.mrb[28].mxu0 %v20370_v25  ;;  %v17004_v25 = vld [vmem:[#allocation6 + $0x208] sm:$0xff]   ;;  %v13975_v31 = vcombine.low %v9889_v0, %v9892_v53  ;;  %v12596_v24 = vrot.slane %v12594_v59, 5  ;;  %v20456_v55 = vrot.slane %v12600_v51, 5  ;;  %v12579_v61 = vsel %vm17255_vm7, %v20448_v18, %v20412_v9  ;;  %v17005_v9 = vld [vmem:[#allocation6 + $0x210] sm:$0xff]  }
 0x409   : > { %15791 = vmatpush3.bf16.msra.mxu0 %v17001_v11  ;;  %15794 = vmatprep.mubr.bf16.mxu0 %v13973_v50  ;;  %v13968_v11 = vrot.slane %v9843_v29, 9  ;;  %v12615_v50 = vshrl.u32 %v12464_v5, 16  ;;  %v20466_v15 = vrot.slane %v12624_v40, 5  ;;  %v12630_v21 = vrot.slane %v12628_v22, 4  ;;  %v20476_v51 = vld [vmem:[#allocation3 + $0xc8] sm:$0x1] }
 0x40a   : > { %15792 = vmatprep.subr.bf16.mxu0 %v17003_v38  ;;  %v12639_v49 = vshrl.u32 %v12467_v3, 16  ;;  %v12642_v53 = vshll.u32 %v12467_v3, 16  ;;  %v12652_v8 = vshrl.u32 %v20454_v6, 16  ;;  %v9904_v0 = vrot.slane %v9902_v41, 4 }
 0x40b   : > { %16049 = vmatpush3.bf16.msra.mxu1 %v17000_v45  ;;  %v12606_v45 = vrot.slane %v12604_v34, 4  ;;  %v9896_v32 = vsel %vm17724_vm13, %v13968_v11, %v9895_v62  ;;  %v9899_v62 = vsel %vm17724_vm13, %v9897_v36, %v9898_v1  ;;  %v12617_v48 = vrot.slane %v12615_v50, 4  ;;  %v17006_v11 = vld [vmem:[#allocation6 + $0x218] sm:$0xff]  }
 0x40c   : > { %16066 = vmatprep.subr.bf16.mxu1 %v17002_v60  ;;  %v12620_v29 = vrot.slane %v12618_v28, 5  ;;  %v12610_v59 = vshll.u32 %v20464_v13, 16  ;;  %v12631_v5 = vor.u32 %v12630_v21, %v20466_v15  ;;  %v9909_v18 = vrot.slane %v20215_v47, 5  ;;  %v9845_v21 = vld [vmem:[#allocation3 + $0x54] sm:$0xe] }
 0x40d   : > { %15793 = vmatpush3.bf16.msra.mxu0 %v17003_v38  ;;  %v9844_v38 = vld [vmem:[#allocation3 + $0x48] sm:$0xe]  ;;  %v12607_v14 = vor.u32 %v12606_v45, %v20456_v55  ;;  %v12641_v40 = vrot.slane %v12639_v49, 4  ;;  %v12634_v3 = vshll.u32 %v20476_v51, 16  ;;  %v13976_v47 = vcombine.low %v9896_v32, %v9899_v62 }
 0x40e   : > { %16051 = vmatmul.mubr.bf16.vlgmr.msra.gmra.mrb[16].mxu1 %v14136_v7  ;;  %v12648_v7 = vshll.u32 %v20454_v6, 16  ;;  %v13969_v34 = vrot.slane %v9844_v38, 9  ;;  %v12621_v1 = vor.u32 %v12620_v29, %v12617_v48  ;;  %v12632_v45 = vrot.slane %v12631_v5, 4  ;;  %v9846_v48 = vld [vmem:[#allocation3 + $0x60] sm:$0xe] }
 0x40f   : > { %16054 = vmatprep.mubr.bf16.mxu1 %v14137_v58  ;;  %16067 = vmatpush3.bf16.msra.mxu1 %v17002_v60  ;;  %v12589_v58 = vsel %vm17255_vm7, %v12584_v35, %v12588_v46  ;;  %v12597_v60 = vor.u32 %v12596_v24, %v12593_v26  ;;  %v12654_v46 = vrot.slane %v12652_v8, 4  ;;  %v20486_v35 = vld [vmem:[#allocation3 + $0xd4] sm:$0x1]  ;;  %v12608_v28 = vrot.slane %v12607_v14, 4 }
 0x410   : > { %16068 = vmatprep.subr.bf16.mxu1 %v17004_v25  ;;  %15795 = vmatmul.mubr.bf16.vlgmr.msra.gmra.mrb[16].mxu0 %v13974_v39  ;;  %v9905_v39 = vrot.slane %v20254_v37, 5  ;;  %v20481_v22 = vrot.slane %v12648_v7, 5  ;;  %v9916_v37 = vrot.slane %v20225_v42, 5  ;;  %v14139_v50 = vcombine.low %v12579_v61, %v12589_v58  ;;  %v17007_v61 = vld [vmem:[#allocation6 + $0x220] sm:$0xff]  }
 0x411   : > { %15798 = vmatprep.mubr.bf16.mxu0 %v13975_v31  ;;  %v12644_v31 = vrot.slane %v12642_v53, 5  ;;  %v12612_v26 = vrot.slane %v12610_v59, 5  ;;  %v9903_v24 = vsel %vm17724_vm13, %v13969_v34, %v9902_v41  ;;  %v9911_v38 = vrot.slane %v9909_v18, 4 }
 0x412   : > { %v9906_v36 = vsel %vm17724_vm13, %v9904_v0, %v9905_v39  ;;  %v12655_v7 = vor.u32 %v12654_v46, %v20481_v22  ;;  %v12658_v42 = vshll.u32 %v20486_v35, 16  ;;  %v12622_v32 = vrot.slane %v12621_v1, 4 }
 0x413   : > { %16069 = vmatpush3.bf16.msra.mxu1 %v17004_v25  ;;  %v12598_v25 = vrot.slane %v12597_v60, 4  ;;  %v13977_v49 = vcombine.low %v9903_v24, %v9906_v36  ;;  %v12645_v53 = vor.u32 %v12644_v31, %v12641_v40  ;;  %v9912_v8 = vrot.slane %v20258_v23, 5  ;;  %v17008_v40 = vld [vmem:[#allocation6 + $0x228] sm:$0xff]  }
 0x414   : > { %16070 = vmatprep.subr.bf16.mxu1 %v17005_v9  ;;  %v9918_v62 = vrot.slane %v9916_v37, 4  ;;  %v13970_v0 = vrot.slane %v9845_v21, 9  ;;  %v9919_v60 = vrot.slane %v20283_v16, 5  ;;  %v12905_v23 = vrot.slane %v20248_v63, 5 }
 0x415   : > { %v12603_v41 = vsel %vm17255_vm7, %v12598_v25, %v20456_v55  ;;  %v9913_v58 = vsel %vm17724_vm13, %v9911_v38, %v9912_v8  ;;  %v12646_v14 = vrot.slane %v12645_v53, 4  ;;  %v12656_v59 = vrot.slane %v12655_v7, 4 }
 0x416   : > { %16055 = vmatmul.mubr.bf16.gmra.mrb[20].mxu1 %v20441_v56  ;;  %v12636_v56 = vrot.slane %v12634_v3, 5  ;;  %v12660_v55 = vrot.slane %v12658_v42, 5  ;;  %v9923_v34 = vrot.slane %v20273_v27, 5  ;;  %v12627_v5 = vsel %vm17255_vm7, %v12622_v32, %v20466_v15  ;;  %v12872_v42 = vld [vmem:[#allocation3 + $0x84] sm:$0xe] }
 0x417   : > { %16058 = vmatprep.mubr.bf16.mxu1 %v14139_v50  ;;  %16071 = vmatpush3.bf16.msra.mxu1 %v17005_v9  ;;  %v12613_v9 = vsel %vm17255_vm7, %v12608_v28, %v12612_v26  ;;  %v13971_v31 = vrot.slane %v9846_v48, 9  ;;  %v9920_v46 = vsel %vm17724_vm13, %v9918_v62, %v9919_v60  ;;  %v9910_v63 = vsel %vm17724_vm13, %v13970_v0, %v9909_v18  ;;  %v12871_v50 = vld [vmem:[#allocation3 + $0x78] sm:$0xe]  ;;  %v17009_v18 = vld [vmem:[#allocation6 + $0x230] sm:$0xff]   ;;  %v12873_v32 = vld [vmem:[#allocation3 + $0x90] sm:$0xe] }
 0x418   : > { %16072 = vmatprep.subr.bf16.mxu1 %v17006_v11  ;;  %15799 = vmatmul.mubr.bf16.gmra.mrb[20].mxu0 %v13976_v47  ;;  %v12637_v29 = vsel %vm17255_vm7, %v12632_v45, %v12636_v56  ;;  %v14140_v39 = vcombine.low %v12603_v41, %v12613_v9  ;;  %v12907_v36 = vrot.slane %v12905_v23, 4  ;;  %v12651_v15 = vsel %vm17255_vm7, %v12646_v14, %v20481_v22  ;;  %v9847_v28 = vld [vmem:[#allocation3 + $0x6c] sm:$0xe] }
 0x419   : > { %15802 = vmatprep.mubr.bf16.mxu0 %v13977_v49  ;;  %v14141_v16 = vcombine.low %v12627_v5, %v12637_v29  ;;  %v9917_v27 = vsel %vm17724_vm13, %v13971_v31, %v9916_v37  ;;  %v12661_v1 = vsel %vm17255_vm7, %v12656_v59, %v12660_v55  ;;  %v9925_v47 = vrot.slane %v9923_v34, 4  ;;  %v17010_v49 = vld [vmem:[#allocation6 + $0x238] sm:$0xff]   ;;  %v12875_v59 = vld [vmem:[#allocation3 + $0xa8] sm:$0xe] }
 0x41a   : > { %v13979_v3 = vcombine.low %v9917_v27, %v9920_v46  ;;  %v12908_v25 = vrot.slane %v20294_v54, 5  ;;  %v9926_v37 = vrot.slane %v20297_v10, 5  ;;  %v12912_v26 = vrot.slane %v20309_v33, 5 }
 0x41b   : > { %16073 = vmatpush3.bf16.msra.mxu1 %v17006_v11  ;;  %v13978_v11 = vcombine.low %v9910_v63, %v9913_v58  ;;  %v14142_v24 = vcombine.low %v12651_v15, %v12661_v1  ;;  %v14151_v45 = vrot.slane %v12871_v50, 9  ;;  %v12919_v22 = vrot.slane %v20321_v57, 5  ;;  %v12878_v1 = vld [vmem:[#allocation3 + $0xcc] sm:$0xe] }
 0x41c   : > { %16074 = vmatprep.subr.bf16.mxu1 %v17007_v61  ;;  %v12909_v4 = vsel %vm17724_vm13, %v12907_v36, %v12908_v25  ;;  %v13972_v21 = vrot.slane %v9847_v28, 9  ;;  %v9927_v38 = vsel %vm17724_vm13, %v9925_v47, %v9926_v37  ;;  %v12914_v53 = vrot.slane %v12912_v26, 4  ;;  %v12877_v36 = vld [vmem:[#allocation3 + $0xc0] sm:$0xe] }
 0x41d   : > { %v12906_v54 = vsel %vm17724_vm13, %v14151_v45, %v12905_v23  ;;  %v12915_v57 = vrot.slane %v20329_v12, 5  ;;  %v12922_v56 = vrot.slane %v20364_v44, 5  ;;  %v14152_v8 = vrot.slane %v12872_v42, 9  ;;  %v12874_v23 = vld [vmem:[#allocation3 + $0x9c] sm:$0xe] }
 0x41e   : > { %16059 = vmatmul.mubr.bf16.gmra.mrb[24].mxu1 %v14140_v39  ;;  %v14159_v10 = vcombine.low %v12906_v54, %v12909_v4  ;;  %v9924_v33 = vsel %vm17724_vm13, %v13972_v21, %v9923_v34  ;;  %v12926_v41 = vrot.slane %v20338_v20, 5  ;;  %v14153_v9 = vrot.slane %v12873_v32, 9  ;;  %v14292_v21 = vld [vmem:[%s17249_s13] sm:$0xff]  }
 0x41f   : > { %16062 = vmatprep.mubr.bf16.mxu1 %v14141_v16  ;;  %16075 = vmatpush3.bf16.msra.mxu1 %v17007_v61  ;;  %v13980_v7 = vcombine.low %v9924_v33, %v9927_v38  ;;  %v12921_v61 = vrot.slane %v12919_v22, 4  ;;  %v12916_v62 = vsel %vm17724_vm13, %v12914_v53, %v12915_v57  ;;  %v12933_v48 = vrot.slane %v20381_v2, 5  ;;  %v20583_v38 = vld [vmem:[%s20743_s6] ss:$0 sm:$0xff] }
 0x420   : > { %16076 = vmatprep.subr.bf16.mxu1 %v17008_v40  ;;  %15803 = vmatmul.mubr.bf16.gmra.mrb[24].mxu0 %v13978_v11  ;;  %v12913_v12 = vsel %vm17724_vm13, %v14152_v8, %v12912_v26  ;;  %v12920_v44 = vsel %vm17724_vm13, %v14153_v9, %v12919_v22  ;;  %v12928_v60 = vrot.slane %v12926_v41, 4  ;;  %v12929_v20 = vrot.slane %v20377_v30, 5  ;;  %v12876_v11 = vld [vmem:[#allocation3 + $0xb4] sm:$0xe]  ;;  %v20576_v22 = vld [vmem:[%s20742_s5] ss:$0 sm:$0xff] }
 0x421   : > { %15806 = vmatprep.mubr.bf16.mxu0 %v13979_v3  ;;  %v12923_v0 = vsel %vm17724_vm13, %v12921_v61, %v12922_v56  ;;  %v14160_v29 = vcombine.low %v12913_v12, %v12916_v62  ;;  %v12935_v14 = vrot.slane %v12933_v48, 4  ;;  %v12936_v55 = vrot.slane %v20410_v17, 5  ;;  %v14357_v12 = vld [vmem:[%s17249_s13 + $0x18] sm:$0xff]  }
 0x422   : > { %v14161_v58 = vcombine.low %v12920_v44, %v12923_v0  ;;  %v14154_v2 = vrot.slane %v12874_v23, 9  ;;  %v12930_v34 = vsel %vm17724_vm13, %v12928_v60, %v12929_v20  ;;  %v12940_v39 = vrot.slane %v20428_v19, 5 }
 0x423   : > { %16077 = vmatpush3.bf16.msra.mxu1 %v17008_v40  ;;  %v14155_v5 = vrot.slane %v12875_v59, 9  ;;  %v12937_v40 = vsel %vm17724_vm13, %v12935_v14, %v12936_v55  ;;  %v12947_v31 = vrot.slane %v20438_v43, 5  ;;  %v12943_v19 = vrot.slane %v20464_v13, 5 }
 0x424   : > { %16078 = vmatprep.subr.bf16.mxu1 %v17009_v18  ;;  %v12927_v46 = vsel %vm17724_vm13, %v14154_v2, %v12926_v41  ;;  %v12942_v63 = vrot.slane %v12940_v39, 4  ;;  %v12954_v15 = vrot.slane %v20454_v6, 5  ;;  %v12950_v43 = vrot.slane %v20476_v51, 5 }
 0x425   : > { %v14162_v16 = vcombine.low %v12927_v46, %v12930_v34  ;;  %v12934_v30 = vsel %vm17724_vm13, %v14155_v5, %v12933_v48  ;;  %v12949_v27 = vrot.slane %v12947_v31, 4  ;;  %v14156_v3 = vrot.slane %v12876_v11, 9 }
 0x426   : > { %16063 = vmatmul.mubr.bf16.gmra.mrb[28].mxu1 %v14142_v24  ;;  %v14163_v17 = vcombine.low %v12934_v30, %v12937_v40  ;;  %v12944_v50 = vsel %vm17724_vm13, %v12942_v63, %v12943_v19  ;;  %v14157_v47 = vrot.slane %v12877_v36, 9  ;;  %v14158_v13 = vrot.slane %v12878_v1, 9 }
 0x427   : > { %16079 = vmatpush3.bf16.msra.mxu1 %v17009_v18  ;;  %16082 = vmatprep.mubr.bf16.mxu1 %v14159_v10  ;;  %v12951_v18 = vsel %vm17724_vm13, %v12949_v27, %v12950_v43  ;;  %v12941_v25 = vsel %vm17724_vm13, %v14156_v3, %v12940_v39  ;;  %v12956_v28 = vrot.slane %v12954_v15, 4  ;;  %v12957_v6 = vrot.slane %v20486_v35, 5  ;;  %v14355_v35 = vld [vmem:[%s17249_s13 + $0x8] sm:$0xff]  }
 0x428   : > { %16080 = vmatprep.subr.bf16.mxu1 %v17010_v49  ;;  %15807 = vmatmul.mubr.bf16.gmra.mrb[28].mxu0 %v13980_v7  ;;  %v14164_v37 = vcombine.low %v12941_v25, %v12944_v50  ;;  %v12948_v51 = vsel %vm17724_vm13, %v14157_v47, %v12947_v31  ;;  %v12955_v24 = vsel %vm17724_vm13, %v14158_v13, %v12954_v15  ;;  %v14297_v10 = vunpack.c.l.bf16 %v14355_v35  ;;  %v14359_v47 = vld [vmem:[%s17249_s13 + $0x28] sm:$0xff]   ;;  %v14358_v13 = vld [vmem:[%s17249_s13 + $0x20] sm:$0xff]  }
 0x429   : > { %v14165_v26 = vcombine.low %v12948_v51, %v12951_v18  ;;  %v12958_v45 = vsel %vm17724_vm13, %v12956_v28, %v12957_v6  ;;  %v14293_v53 = vunpack.c.l.bf16 %v14292_v21  ;;  %v14298_v57 = vunpack.c.h.bf16 %v14355_v35 }
 0x42a   : > { %v14166_v4 = vcombine.low %v12955_v24, %v12958_v45  ;;  %v14294_v62 = vunpack.c.h.bf16 %v14292_v21  ;;  %v14305_v2 = vunpack.c.l.bf16 %v14357_v12  ;;  %v14306_v63 = vunpack.c.h.bf16 %v14357_v12 }
 0x42b   : > { %16081 = vmatpush3.bf16.msra.mxu1 %v17010_v49  ;;  %v14313_v45 = vunpack.c.l.bf16 %v14359_v47 }
 0x42e   : > { %16083 = vmatmul.mubr.bf16.vlgmr.msra.gmra.mrb[16].mxu1 %v14160_v29 }
 0x42f   : > { %16086 = vmatprep.mubr.bf16.mxu1 %v14161_v58  ;;  %v14356_v58 = vld [vmem:[%s17249_s13 + $0x10] sm:$0xff]  }
 0x430   : > { %v14301_v31 = vunpack.c.l.bf16 %v14356_v58  ;;  %v14302_v15 = vunpack.c.h.bf16 %v14356_v58 }
 0x436   : > { %16087 = vmatmul.mubr.bf16.gmra.mrb[20].mxu1 %v14162_v16 }
 0x437   : > { %16090 = vmatprep.mubr.bf16.mxu1 %v14163_v17 }
 0x43e   : > { %16091 = vmatmul.mubr.bf16.gmra.mrb[24].mxu1 %v14164_v37 }
 0x43f   : > { %16094 = vmatprep.mubr.bf16.mxu1 %v14165_v26 }
 0x446   : > { %16095 = vmatmul.mubr.bf16.gmra.mrb[28].mxu1 %v14166_v4 }
 0x4e3   : > { %v15796_v54 = vpop.f32.mrb[16].mxu0 }
 0x4e4   : > { %v10146_v49 = vmul.f32 %v15796_v54, %v20576_v22  ;;  %v10059_v52 = vpop.f32.mrb[17].mxu0 }
 0x4e5   : > { %v10144_v33 = vmul.f32 %v20576_v22, %v10059_v52  ;;  %v15797_v7 = vpop.f32.mrb[18].mxu0 }
 0x4e6   : > { %v10168_v42 = vadd.f32 %v20583_v38, %v10146_v49  ;;  %v10147_v61 = vmul.f32 %v15797_v7, %v20576_v22  ;;  %v10062_v32 = vpop.f32.mrb[19].mxu0  ;;  %v14309_v49 = vunpack.c.l.bf16 %v14358_v13  ;;  %v14314_v7 = vunpack.c.h.bf16 %v14359_v47 }
 0x4e7   : > { %v10166_v56 = vadd.f32 %v20583_v38, %v10144_v33  ;;  %v10145_v8 = vmul.f32 %v20576_v22, %v10062_v32 }
 0x4e8   : > { %v10219_v41 = vadd.f32 %v14297_v10, %v10168_v42  ;;  %v10169_v9 = vadd.f32 %v20583_v38, %v10147_v61 }
 0x4e9   : > { %v10217_v0 = vadd.f32 %v14293_v53, %v10166_v56  ;;  %v10167_v48 = vadd.f32 %v20583_v38, %v10145_v8  ;;  %v14310_v56 = vunpack.c.h.bf16 %v14358_v13 }
 0x4ea   : > { %v10235_v29 = vmax.f32 %v10219_v41, 0.0  ;;  %v10220_v44 = vadd.f32 %v14298_v57, %v10169_v9 }
 0x4eb   : > { %v10233_v60 = vmax.f32 %v10217_v0, 0.0  ;;  %v10218_v23 = vadd.f32 %v14294_v62, %v10167_v48  ;;  %v15800_v14 = vpop.f32.mrb[20].mxu0  ;;  %v14361_v0 = vld [vmem:[%s17249_s13 + $0x38] sm:$0xff]  }
 0x4ec   : > { %v14261_v20 = vpack.c.bf16 %v10235_v29, %v10235_v29  ;;  %v10236_v59 = vmax.f32 %v10220_v44, 0.0  ;;  %v10150_v55 = vmul.f32 %v15800_v14, %v20576_v22  ;;  %v10075_v34 = vpop.f32.mrb[21].mxu0  ;;  %v14360_v29 = vld [vmem:[%s17249_s13 + $0x30] sm:$0xff]  }
 0x4ed   : > { %v14259_v39 = vpack.c.bf16 %v10233_v60, %v10233_v60  ;;  %v10234_v5 = vmax.f32 %v10218_v23, 0.0  ;;  %v10148_v40 = vmul.f32 %v20576_v22, %v10075_v34  ;;  %v15801_v46 = vpop.f32.mrb[22].mxu0 }
 0x4ee   : > { %10317 = vst.msk [vmem:[%s20600_s26 + $0x8] sm:$0xf] %vm832_vm5, %v14261_v20  ;;  %v14262_v16 = vpack.c.bf16 %v10236_v59, %v10236_v59  ;;  %v10172_v30 = vadd.f32 %v20583_v38, %v10150_v55  ;;  %v10151_v17 = vmul.f32 %v15801_v46, %v20576_v22  ;;  %v10078_v11 = vpop.f32.mrb[23].mxu0  ;;  %v14321_v59 = vunpack.c.l.bf16 %v14361_v0 }
 0x4ef   : > { %10315 = vst.msk [vmem:[%s20600_s26] sm:$0xf] %vm832_vm5, %v14259_v39  ;;  %v14260_v27 = vpack.c.bf16 %v10234_v5, %v10234_v5  ;;  %v10170_v19 = vadd.f32 %v20583_v38, %v10148_v40  ;;  %v10149_v36 = vmul.f32 %v20576_v22, %v10078_v11  ;;  %v14317_v5 = vunpack.c.l.bf16 %v14360_v29 }
 0x4f0   : > { %10318 = vst.msk [vmem:[%s20600_s26 + $0xc] sm:$0xf] %vm832_vm5, %v14262_v16  ;;  %v10223_v43 = vadd.f32 %v14305_v2, %v10172_v30  ;;  %v10173_v1 = vadd.f32 %v20583_v38, %v10151_v17  ;;  %v14363_v16 = vld [vmem:[%s17249_s13 + $0x48] sm:$0xff]   ;;  %v14362_v30 = vld [vmem:[%s17249_s13 + $0x40] sm:$0xff]  }
 0x4f1   : > { %10316 = vst.msk [vmem:[%s20600_s26 + $0x4] sm:$0xf] %vm832_vm5, %v14260_v27  ;;  %v10221_v3 = vadd.f32 %v14301_v31, %v10170_v19  ;;  %v10171_v50 = vadd.f32 %v20583_v38, %v10149_v36 }
 0x4f2   : > { %v10239_v18 = vmax.f32 %v10223_v43, 0.0  ;;  %v10224_v25 = vadd.f32 %v14306_v63, %v10173_v1  ;;  %v14322_v63 = vunpack.c.h.bf16 %v14361_v0 }
 0x4f3   : > { %v10237_v28 = vmax.f32 %v10221_v3, 0.0  ;;  %v10222_v6 = vadd.f32 %v14302_v15, %v10171_v50  ;;  %v15804_v37 = vpop.f32.mrb[24].mxu0  ;;  %v14318_v15 = vunpack.c.h.bf16 %v14360_v29  ;;  %v14329_v50 = vunpack.c.l.bf16 %v14363_v16 }
 0x4f4   : > { %v14265_v51 = vpack.c.bf16 %v10239_v18, %v10239_v18  ;;  %v10240_v26 = vmax.f32 %v10224_v25, 0.0  ;;  %v10154_v24 = vmul.f32 %v15804_v37, %v20576_v22  ;;  %v10091_v4 = vpop.f32.mrb[25].mxu0  ;;  %v14325_v18 = vunpack.c.l.bf16 %v14362_v30 }
 0x4f5   : > { %v14263_v35 = vpack.c.bf16 %v10237_v28, %v10237_v28  ;;  %v10238_v21 = vmax.f32 %v10222_v6, 0.0  ;;  %v10152_v54 = vmul.f32 %v20576_v22, %v10091_v4  ;;  %v15805_v10 = vpop.f32.mrb[26].mxu0 }
 0x4f6   : > { %10321 = vst.msk [vmem:[%s20600_s26 + $0x18] sm:$0xf] %vm832_vm5, %v14265_v51  ;;  %v14266_v52 = vpack.c.bf16 %v10240_v26, %v10240_v26  ;;  %v10176_v33 = vadd.f32 %v20583_v38, %v10154_v24  ;;  %v10155_v53 = vmul.f32 %v15805_v10, %v20576_v22  ;;  %v10094_v42 = vpop.f32.mrb[27].mxu0  ;;  %v14330_v51 = vunpack.c.h.bf16 %v14363_v16 }
 0x4f7   : > { %10319 = vst.msk [vmem:[%s20600_s26 + $0x10] sm:$0xf] %vm832_vm5, %v14263_v35  ;;  %v14264_v61 = vpack.c.bf16 %v10238_v21, %v10238_v21  ;;  %v10174_v57 = vadd.f32 %v20583_v38, %v10152_v54  ;;  %v10153_v32 = vmul.f32 %v20576_v22, %v10094_v42  ;;  %v14326_v35 = vunpack.c.h.bf16 %v14362_v30 }
 0x4f8   : > { %10322 = vst.msk [vmem:[%s20600_s26 + $0x1c] sm:$0xf] %vm832_vm5, %v14266_v52  ;;  %v10227_v8 = vadd.f32 %v14313_v45, %v10176_v33  ;;  %v10177_v62 = vadd.f32 %v20583_v38, %v10155_v53 }
 0x4f9   : > { %10320 = vst.msk [vmem:[%s20600_s26 + $0x14] sm:$0xf] %vm832_vm5, %v14264_v61  ;;  %v10225_v41 = vadd.f32 %v14309_v49, %v10174_v57  ;;  %v10175_v9 = vadd.f32 %v20583_v38, %v10153_v32 }
 0x4fa   : > { %v10243_v48 = vmax.f32 %v10227_v8, 0.0  ;;  %v10228_v12 = vadd.f32 %v14314_v7, %v10177_v62 }
 0x4fb   : > { %v10241_v44 = vmax.f32 %v10225_v41, 0.0  ;;  %v10226_v58 = vadd.f32 %v14310_v56, %v10175_v9  ;;  %v15808_v60 = vpop.f32.mrb[28].mxu0  ;;  %v14365_v41 = vld [vmem:[%s17249_s13 + $0x58] sm:$0xff]  }
 0x4fc   : > { %v14269_v23 = vpack.c.bf16 %v10243_v48, %v10243_v48  ;;  %v10244_v14 = vmax.f32 %v10228_v12, 0.0  ;;  %v10158_v20 = vmul.f32 %v15808_v60, %v20576_v22  ;;  %v10107_v55 = vpop.f32.mrb[29].mxu0  ;;  %v14364_v48 = vld [vmem:[%s17249_s13 + $0x50] sm:$0xff]  }
 0x4fd   : > { %v14267_v2 = vpack.c.bf16 %v10241_v44, %v10241_v44  ;;  %v10242_v34 = vmax.f32 %v10226_v58, 0.0  ;;  %v10156_v39 = vmul.f32 %v20576_v22, %v10107_v55  ;;  %v15809_v40 = vpop.f32.mrb[30].mxu0 }
 0x4fe   : > { %10325 = vst.msk [vmem:[%s20600_s26 + $0x28] sm:$0xf] %vm832_vm5, %v14269_v23  ;;  %v14270_v31 = vpack.c.bf16 %v10244_v14, %v10244_v14  ;;  %v10180_v46 = vadd.f32 %v20583_v38, %v10158_v20  ;;  %v10159_v17 = vmul.f32 %v15809_v40, %v20576_v22  ;;  %v10110_v11 = vpop.f32.mrb[31].mxu0  ;;  %v14337_v14 = vunpack.c.l.bf16 %v14365_v41 }
 0x4ff   : > { %10323 = vst.msk [vmem:[%s20600_s26 + $0x20] sm:$0xf] %vm832_vm5, %v14267_v2  ;;  %v14268_v27 = vpack.c.bf16 %v10242_v34, %v10242_v34  ;;  %v10178_v19 = vadd.f32 %v20583_v38, %v10156_v39  ;;  %v10157_v36 = vmul.f32 %v20576_v22, %v10110_v11  ;;  %v14333_v34 = vunpack.c.l.bf16 %v14364_v48 }
 0x500   : > { %10326 = vst.msk [vmem:[%s20600_s26 + $0x2c] sm:$0xf] %vm832_vm5, %v14270_v31  ;;  %v10231_v43 = vadd.f32 %v14321_v59, %v10180_v46  ;;  %v10181_v1 = vadd.f32 %v20583_v38, %v10159_v17  ;;  %v14338_v46 = vunpack.c.h.bf16 %v14365_v41  ;;  %v14334_v11 = vunpack.c.h.bf16 %v14364_v48 }
 0x501   : > { %10324 = vst.msk [vmem:[%s20600_s26 + $0x24] sm:$0xf] %vm832_vm5, %v14268_v27  ;;  %v16084_v3 = vpop.f32.mrb[16].mxu1  ;;  %v10229_v47 = vadd.f32 %v14317_v5, %v10178_v19  ;;  %v10179_v25 = vadd.f32 %v20583_v38, %v10157_v36 }
 0x502   : > { %v10247_v13 = vmax.f32 %v10231_v43, 0.0  ;;  %v13170_v28 = vmul.f32 %v16084_v3, %v20576_v22  ;;  %v13089_v6 = vpop.f32.mrb[17].mxu1  ;;  %v10232_v37 = vadd.f32 %v14322_v63, %v10181_v1  ;;  %v14367_v43 = vld [vmem:[%s17249_s13 + $0x68] sm:$0xff]  }
 0x503   : > { %v10245_v26 = vmax.f32 %v10229_v47, 0.0  ;;  %v13168_v24 = vmul.f32 %v20576_v22, %v13089_v6  ;;  %v16085_v45 = vpop.f32.mrb[18].mxu1  ;;  %v10230_v4 = vadd.f32 %v14318_v15, %v10179_v25 }
 0x504   : > { %v14273_v21 = vpack.c.bf16 %v10247_v13, %v10247_v13  ;;  %v13186_v54 = vadd.f32 %v20583_v38, %v13170_v28  ;;  %v10248_v49 = vmax.f32 %v10232_v37, 0.0  ;;  %v13171_v10 = vmul.f32 %v16085_v45, %v20576_v22  ;;  %v13092_v52 = vpop.f32.mrb[19].mxu1 }
 0x505   : > { %v14271_v33 = vpack.c.bf16 %v10245_v26, %v10245_v26  ;;  %v13184_v53 = vadd.f32 %v20583_v38, %v13168_v24  ;;  %v10246_v7 = vmax.f32 %v10230_v4, 0.0  ;;  %v13169_v42 = vmul.f32 %v20576_v22, %v13092_v52 }
 0x506   : > { %10329 = vst.msk [vmem:[%s20600_s26 + $0x38] sm:$0xf] %vm832_vm5, %v14273_v21  ;;  %v13237_v61 = vadd.f32 %v14329_v50, %v13186_v54  ;;  %v14274_v57 = vpack.c.bf16 %v10248_v49, %v10248_v49  ;;  %v13187_v32 = vadd.f32 %v20583_v38, %v13171_v10  ;;  %v14366_v50 = vld [vmem:[%s17249_s13 + $0x60] sm:$0xff]   ;;  %v14345_v37 = vunpack.c.l.bf16 %v14367_v43 }
 0x507   : > { %10327 = vst.msk [vmem:[%s20600_s26 + $0x30] sm:$0xf] %vm832_vm5, %v14271_v33  ;;  %v13235_v56 = vadd.f32 %v14325_v18, %v13184_v53  ;;  %v14272_v8 = vpack.c.bf16 %v10246_v7, %v10246_v7  ;;  %v13185_v62 = vadd.f32 %v20583_v38, %v13169_v42  ;;  %v14341_v4 = vunpack.c.l.bf16 %v14366_v50 }
 0x508   : > { %v13253_v9 = vmax.f32 %v13237_v61, 0.0  ;;  %10330 = vst.msk [vmem:[%s20600_s26 + $0x3c] sm:$0xf] %vm832_vm5, %v14274_v57  ;;  %v13238_v0 = vadd.f32 %v14330_v51, %v13187_v32  ;;  %v14346_v10 = vunpack.c.h.bf16 %v14367_v43  ;;  %v14342_v42 = vunpack.c.h.bf16 %v14366_v50 }
 0x509   : > { %v13251_v12 = vmax.f32 %v13235_v56, 0.0  ;;  %10328 = vst.msk [vmem:[%s20600_s26 + $0x34] sm:$0xf] %vm832_vm5, %v14272_v8  ;;  %v13236_v29 = vadd.f32 %v14326_v35, %v13185_v62  ;;  %v16088_v44 = vpop.f32.mrb[20].mxu1  ;;  %v14369_v8 = vld [vmem:[%s17249_s13 + $0x78] sm:$0xff]  }
 0x50a   : > { %v14277_v58 = vpack.c.bf16 %v13253_v9, %v13253_v9  ;;  %v13254_v60 = vmax.f32 %v13238_v0, 0.0  ;;  %v13174_v23 = vmul.f32 %v16088_v44, %v20576_v22  ;;  %v13105_v20 = vpop.f32.mrb[21].mxu1  ;;  %v14368_v9 = vld [vmem:[%s17249_s13 + $0x70] sm:$0xff]  }
 0x50b   : > { %v14275_v59 = vpack.c.bf16 %v13251_v12, %v13251_v12  ;;  %v13252_v55 = vmax.f32 %v13236_v29, 0.0  ;;  %v13172_v2 = vmul.f32 %v20576_v22, %v13105_v20  ;;  %v16089_v39 = vpop.f32.mrb[22].mxu1 }
 0x50c   : > { %14209 = vst.msk [vmem:[%s20600_s26 + $0x48] sm:$0xf] %vm832_vm5, %v14277_v58  ;;  %v14278_v5 = vpack.c.bf16 %v13254_v60, %v13254_v60  ;;  %v13190_v40 = vadd.f32 %v20583_v38, %v13174_v23  ;;  %v13175_v31 = vmul.f32 %v16089_v39, %v20576_v22  ;;  %v13108_v16 = vpop.f32.mrb[23].mxu1  ;;  %v14353_v60 = vunpack.c.l.bf16 %v14369_v8 }
 0x50d   : > { %14207 = vst.msk [vmem:[%s20600_s26 + $0x40] sm:$0xf] %vm832_vm5, %v14275_v59  ;;  %v14276_v30 = vpack.c.bf16 %v13252_v55, %v13252_v55  ;;  %v13188_v17 = vadd.f32 %v20583_v38, %v13172_v2  ;;  %v13173_v63 = vmul.f32 %v20576_v22, %v13108_v16  ;;  %v14349_v55 = vunpack.c.l.bf16 %v14368_v9 }
 0x50e   : > { %14210 = vst.msk [vmem:[%s20600_s26 + $0x4c] sm:$0xf] %vm832_vm5, %v14278_v5  ;;  %v13241_v27 = vadd.f32 %v14337_v14, %v13190_v40  ;;  %v13191_v19 = vadd.f32 %v20583_v38, %v13175_v31  ;;  %v14354_v40 = vunpack.c.h.bf16 %v14369_v8 }
 0x50f   : > { %14208 = vst.msk [vmem:[%s20600_s26 + $0x44] sm:$0xf] %vm832_vm5, %v14276_v30  ;;  %v13239_v36 = vadd.f32 %v14333_v34, %v13188_v17  ;;  %v13189_v15 = vadd.f32 %v20583_v38, %v13173_v63  ;;  %v14350_v17 = vunpack.c.h.bf16 %v14368_v9 }
 0x510   : > { %v13257_v1 = vmax.f32 %v13241_v27, 0.0  ;;  %v13242_v3 = vadd.f32 %v14338_v46, %v13191_v19 }
 0x511   : > { %v13255_v47 = vmax.f32 %v13239_v36, 0.0  ;;  %v13240_v18 = vadd.f32 %v14334_v11, %v13189_v15  ;;  %v16092_v25 = vpop.f32.mrb[24].mxu1 }
 0x512   : > { %v14281_v13 = vpack.c.bf16 %v13257_v1, %v13257_v1  ;;  %v13258_v28 = vmax.f32 %v13242_v3, 0.0  ;;  %v13178_v6 = vmul.f32 %v16092_v25, %v20576_v22  ;;  %v13121_v51 = vpop.f32.mrb[25].mxu1 }
 0x513   : > { %v14279_v26 = vpack.c.bf16 %v13255_v47, %v13255_v47  ;;  %v13256_v24 = vmax.f32 %v13240_v18, 0.0  ;;  %v13176_v45 = vmul.f32 %v20576_v22, %v13121_v51  ;;  %v16093_v35 = vpop.f32.mrb[26].mxu1 }
 0x514   : > { %14213 = vst.msk [vmem:[%s20600_s26 + $0x58] sm:$0xf] %vm832_vm5, %v14281_v13  ;;  %v14282_v21 = vpack.c.bf16 %v13258_v28, %v13258_v28  ;;  %v13194_v54 = vadd.f32 %v20583_v38, %v13178_v6  ;;  %v13179_v49 = vmul.f32 %v16093_v35, %v20576_v22  ;;  %v13124_v52 = vpop.f32.mrb[27].mxu1 }
 0x515   : > { %14211 = vst.msk [vmem:[%s20600_s26 + $0x50] sm:$0xf] %vm832_vm5, %v14279_v26  ;;  %v14280_v33 = vpack.c.bf16 %v13256_v24, %v13256_v24  ;;  %v13192_v53 = vadd.f32 %v20583_v38, %v13176_v45  ;;  %v13177_v7 = vmul.f32 %v20576_v22, %v13124_v52 }
 0x516   : > { %14214 = vst.msk [vmem:[%s20600_s26 + $0x5c] sm:$0xf] %vm832_vm5, %v14282_v21  ;;  %v13245_v61 = vadd.f32 %v14345_v37, %v13194_v54  ;;  %v13195_v57 = vadd.f32 %v20583_v38, %v13179_v49 }
 0x517   : > { %14212 = vst.msk [vmem:[%s20600_s26 + $0x54] sm:$0xf] %vm832_vm5, %v14280_v33  ;;  %v13243_v32 = vadd.f32 %v14341_v4, %v13192_v53  ;;  %v13193_v56 = vadd.f32 %v20583_v38, %v13177_v7 }
 0x518   : > { %v13261_v62 = vmax.f32 %v13245_v61, 0.0  ;;  %v13246_v41 = vadd.f32 %v14346_v10, %v13195_v57 }
 0x519   : > { %v13259_v0 = vmax.f32 %v13243_v32, 0.0  ;;  %v13244_v48 = vadd.f32 %v14342_v42, %v13193_v56  ;;  %v16096_v12 = vpop.f32.mrb[28].mxu1 }
 0x51a   : > { %v14285_v29 = vpack.c.bf16 %v13261_v62, %v13261_v62  ;;  %v13262_v44 = vmax.f32 %v13246_v41, 0.0  ;;  %v13182_v58 = vmul.f32 %v16096_v12, %v20576_v22  ;;  %v13137_v23 = vpop.f32.mrb[29].mxu1 }
 0x51b   : > { %v14283_v14 = vpack.c.bf16 %v13259_v0, %v13259_v0  ;;  %v13260_v20 = vmax.f32 %v13244_v48, 0.0  ;;  %v13180_v59 = vmul.f32 %v20576_v22, %v13137_v23  ;;  %v16097_v2 = vpop.f32.mrb[30].mxu1 }
 0x51c   : > { %14217 = vst.msk [vmem:[%s20600_s26 + $0x68] sm:$0xf] %vm832_vm5, %v14285_v29  ;;  %v14286_v34 = vpack.c.bf16 %v13262_v44, %v13262_v44  ;;  %v13198_v39 = vadd.f32 %v20583_v38, %v13182_v58  ;;  %v13183_v5 = vmul.f32 %v16097_v2, %v20576_v22  ;;  %v13140_v31 = vpop.f32.mrb[31].mxu1 }
 0x51d   : > { %14215 = vst.msk [vmem:[%s20600_s26 + $0x60] sm:$0xf] %vm832_vm5, %v14283_v14  ;;  %v14284_v46 = vpack.c.bf16 %v13260_v20, %v13260_v20  ;;  %v13196_v16 = vadd.f32 %v20583_v38, %v13180_v59  ;;  %v13181_v30 = vmul.f32 %v20576_v22, %v13140_v31 }
 0x51e   : > { %14218 = vst.msk [vmem:[%s20600_s26 + $0x6c] sm:$0xf] %vm832_vm5, %v14286_v34  ;;  %v13249_v63 = vadd.f32 %v14353_v60, %v13198_v39  ;;  %v13199_v11 = vadd.f32 %v20583_v38, %v13183_v5 }
 0x51f   : > { %14216 = vst.msk [vmem:[%s20600_s26 + $0x64] sm:$0xf] %vm832_vm5, %v14284_v46  ;;  %v13247_v27 = vadd.f32 %v14349_v55, %v13196_v16  ;;  %v13197_v19 = vadd.f32 %v20583_v38, %v13181_v30 }
 0x520   : > { %v13265_v36 = vmax.f32 %v13249_v63, 0.0  ;;  %v13250_v15 = vadd.f32 %v14354_v40, %v13199_v11 }
 0x521   : > { %v13263_v43 = vmax.f32 %v13247_v27, 0.0  ;;  %v13248_v1 = vadd.f32 %v14350_v17, %v13197_v19 }
 0x522   : > { %v14289_v22 = vpack.c.bf16 %v13265_v36, %v13265_v36  ;;  %v13266_v3 = vmax.f32 %v13250_v15, 0.0 }
 0x523   : > { %v14287_v50 = vpack.c.bf16 %v13263_v43, %v13263_v43  ;;  %v13264_v47 = vmax.f32 %v13248_v1, 0.0 }
 0x524   : > { %14221 = vst.msk [vmem:[%s20600_s26 + $0x78] sm:$0xf] %vm832_vm5, %v14289_v22  ;;  %v14290_v18 = vpack.c.bf16 %v13266_v3, %v13266_v3 }
 0x525   : > { %14219 = vst.msk [vmem:[%s20600_s26 + $0x70] sm:$0xf] %vm832_vm5, %v14287_v50  ;;  %v14288_v25 = vpack.c.bf16 %v13264_v47, %v13264_v47 }
 0x526   : > { %14222 = vst.msk [vmem:[%s20600_s26 + $0x7c] sm:$0xf] %vm832_vm5, %v14290_v18 }
 0x527   : > { %14220 = vst.msk [vmem:[%s20600_s26 + $0x74] sm:$0xf] %vm832_vm5, %v14288_v25 }
 0x528 PF: > { %s19_s24 = sadd.s32 1, %s17110_s24  }
 0x529   : > { %p16_p9 = scmp.ge.s32.totalorder %s19_s24, 4  }
 0x52b   :  { %18 = sbr.rel (!%p16_p9) target bundleno = 2 (0x2), region = 122 }
 0x532   :  { %13370 = vsyncpa [#allocation5], 1 }
 0x533   :  { %13372 = vsyncpa [#allocation5 + $0x1], 1 }
 0x534   :  { %13373 = vsyncpa [#allocation7], 1 }

</bundles_post_ra>
